<compile_context>
chip_gen: v6e
topology: v6e:2x2x1
jax: 0.10.0
libtpu: 0.0.40
codegen_flags: <defaults>
</compile_context>

<pallas_src>
import functools

import jax
import jax.numpy as jnp
from jax.experimental import pallas as pl
from jax.experimental.pallas import tpu as pltpu


# Interior lives at (row 1, col _WPAD) inside the padded scratch so every interior
# *store* is sublane-aligned; the 3x3 tap *reads* may start at any offset for free.
_WPAD = 8


def _dcr_block_kernel(H, W, C,
                      alpha_ref,                      # (3,) f32 in SMEM (scalar prefetch)
                      x_ref,                          # (1, H, W, C)        compute dtype
                      w1_ref, b1_ref,                 # (3,3,C,C/2),   (1,C/2)
                      w2_ref, b2_ref,                 # (3,3,3C/2,C/2),(1,C/2)
                      w3_ref, b3_ref,                 # (3,3,2C,C),    (1,C)
                      o_ref,                          # (1, H, W, C)
                      pad_ref):                       # (H+2, W+_WPAD+1, 2C) scratch
    C2 = C // 2
    ctot = 2 * C
    HW = H * W
    dt = pad_ref.dtype

    # ---- zero ONLY the halo the 3x3 taps read (not the full scratch) -------------
    # Read footprint: rows [0, H+2), cols [_WPAD-1, _WPAD+W+1).  The interior
    # [1:H+1, _WPAD:_WPAD+W, :] is fully overwritten below every grid step.
    pad_ref[0:1, _WPAD - 1:_WPAD + W + 1, :] = jnp.zeros((1, W + 2, ctot), dt)
    pad_ref[H + 1:H + 2, _WPAD - 1:_WPAD + W + 1, :] = jnp.zeros((1, W + 2, ctot), dt)
    pad_ref[1:H + 1, _WPAD - 1:_WPAD, :] = jnp.zeros((H, 1, ctot), dt)
    pad_ref[1:H + 1, _WPAD + W:_WPAD + W + 1, :] = jnp.zeros((H, 1, ctot), dt)

    # ---- interior store of x into channels [0:C] (sublane-aligned store) ---------
    pad_ref[1:H + 1, _WPAD:_WPAD + W, 0:C] = x_ref[0]

    def conv_bias_prelu(cin, w_ref, b_ref, alpha, cout):
        """3x3 conv over scratch channels [0:cin] + folded-BN bias + PReLU.

        The channel concat of the original module is realized by the scratch layout
        [x | out1 | out2]; each tap is ONE dot with K = cin (no per-source splits,
        no weight slicing).  BN scale is pre-folded into w; bias seeds the acc.
        """
        acc = jnp.broadcast_to(b_ref[...].astype(jnp.float32), (HW, cout))
        for dy in range(3):
            for dx in range(3):
                col = _WPAD - 1 + dx
                # Slice the REF: the load itself is the (H, W, cin) tap window.
                win = pad_ref[dy:dy + H, col:col + W, 0:cin]
                acc = acc + jnp.dot(win.reshape(HW, cin), w_ref[dy, dx],
                                    preferred_element_type=jnp.float32)
        return jnp.where(acc > 0.0, acc, alpha * acc)      # PReLU (shared alpha)

    # Stage 1: conv_1(x)                      -> out1, stored at channels [C : C+C/2]
    out1 = conv_bias_prelu(C, w1_ref, b1_ref, alpha_ref[0], C2)
    pad_ref[1:H + 1, _WPAD:_WPAD + W, C:C + C2] = out1.reshape(H, W, C2).astype(dt)

    # Stage 2: conv_2(cat[x, out1])           -> out2, stored at channels [3C/2 : 2C]
    out2 = conv_bias_prelu(C + C2, w2_ref, b2_ref, alpha_ref[1], C2)
    pad_ref[1:H + 1, _WPAD:_WPAD + W, C + C2:ctot] = out2.reshape(H, W, C2).astype(dt)

    # Stage 3: conv_3(cat[x, out1, out2])
    out3 = conv_bias_prelu(ctot, w3_ref, b3_ref, alpha_ref[2], C)

    # Fused residual add (torch.add(out, residual)) -> single output store.
    res = x_ref[0].reshape(HW, C).astype(jnp.float32)
    o_ref[0] = (out3 + res).reshape(H, W, C).astype(o_ref.dtype)


def _fold_bn_into_conv(w, conv_bias, gamma, beta, running_mean, running_var, eps=1e-5):
    """Fold conv bias + BatchNorm2d (eval mode) into the conv weights + a bias."""
    scale = gamma / jnp.sqrt(running_var + eps)          # (cout,)
    w_folded = (w.astype(jnp.float32) * scale)           # HWIO: scale per out-channel
    b_folded = beta + (conv_bias - running_mean) * scale
    return w_folded, b_folded.reshape(1, -1).astype(jnp.float32)


@functools.partial(jax.jit, static_argnames=("compute_dtype",))
def dcr_block_forward(x_nhwc, params, compute_dtype=jnp.float32):
    """Forward pass of _DCR_block; x_nhwc: (N, H, W, C)."""
    N, H, W, C = x_nhwc.shape
    assert C % 2 == 0, "channel_in must be even (channel_in/2 conv widths)"
    C2 = C // 2
    wp = W + _WPAD + 1      # left pad 8 (aligned stores) + right pad 1 (read halo)

    w1, b1 = _fold_bn_into_conv(params["w1"], params["b1"], params["gamma1"],
                                params["beta1"], params["mean1"], params["var1"])
    w2, b2 = _fold_bn_into_conv(params["w2"], params["b2"], params["gamma2"],
                                params["beta2"], params["mean2"], params["var2"])
    w3, b3 = _fold_bn_into_conv(params["w3"], params["b3"], params["gamma3"],
                                params["beta3"], params["mean3"], params["var3"])

    x = x_nhwc.astype(compute_dtype)
    w1 = w1.astype(compute_dtype)
    w2 = w2.astype(compute_dtype)
    w3 = w3.astype(compute_dtype)
    alphas = jnp.stack([params["alpha1"], params["alpha2"],
                        params["alpha3"]]).astype(jnp.float32)     # (3,) -> SMEM

    kernel = functools.partial(_dcr_block_kernel, H, W, C)

    out = pl.pallas_call(
        kernel,
        out_shape=jax.ShapeDtypeStruct((N, H, W, C), compute_dtype),
        grid_spec=pltpu.PrefetchScalarGridSpec(
            num_scalar_prefetch=1,            # alphas -> SMEM, passed first
            grid=(N,),
            in_specs=[
                pl.BlockSpec((1, H, W, C), lambda n, a: (n, 0, 0, 0)),
                pl.BlockSpec((3, 3, C, C2), lambda n, a: (0, 0, 0, 0)),
                pl.BlockSpec((1, C2), lambda n, a: (0, 0)),
                pl.BlockSpec((3, 3, C + C2, C2), lambda n, a: (0, 0, 0, 0)),
                pl.BlockSpec((1, C2), lambda n, a: (0, 0)),
                pl.BlockSpec((3, 3, 2 * C, C), lambda n, a: (0, 0, 0, 0)),
                pl.BlockSpec((1, C), lambda n, a: (0, 0)),
            ],
            out_specs=pl.BlockSpec((1, H, W, C), lambda n, a: (n, 0, 0, 0)),
            scratch_shapes=[
                # merged padded activation scratch: channels = [x | out1 | out2]
                pltpu.VMEM((H + 2, wp, 2 * C), compute_dtype),
            ],
        ),
        compiler_params=pltpu.CompilerParams(
            dimension_semantics=("parallel",),
        ),
    )(alphas, x, w1, b1, w2, b2, w3, b3)
    return out


def make_params(channel_in, key):
    """Deterministic synthetic parameters matching _DCR_block(channel_in).__init__."""
    c_half = channel_in // 2
    ks = jax.random.split(key, 6)
    params = {}

    def conv_w(k, cin, cout):
        return jax.random.normal(k, (3, 3, cin, cout), jnp.float32) * 0.1  # HWIO

    params["w1"] = conv_w(ks[0], channel_in, c_half)
    params["b1"] = jax.random.normal(ks[1], (c_half,), jnp.float32) * 0.1
    params["w2"] = conv_w(ks[2], channel_in * 3 // 2, c_half)
    params["b2"] = jax.random.normal(ks[3], (c_half,), jnp.float32) * 0.1
    params["w3"] = conv_w(ks[4], channel_in * 2, channel_in)
    params["b3"] = jax.random.normal(ks[5], (channel_in,), jnp.float32) * 0.1

    # BatchNorm2d defaults: gamma=1, beta=0, running_mean=0, running_var=1.
    for i, c in [(1, c_half), (2, c_half), (3, channel_in)]:
        params[f"gamma{i}"] = jnp.ones((c,), jnp.float32)
        params[f"beta{i}"] = jnp.zeros((c,), jnp.float32)
        params[f"mean{i}"] = jnp.zeros((c,), jnp.float32)
        params[f"var{i}"] = jnp.ones((c,), jnp.float32)

    # nn.PReLU() default: single shared parameter initialized to 0.25.
    params["alpha1"] = jnp.float32(0.25)
    params["alpha2"] = jnp.float32(0.25)
    params["alpha3"] = jnp.float32(0.25)
    return params


def _reference_forward(x_nhwc, params):
    """Pure-JAX reference (lax conv) for correctness checking."""
    def conv_bn_prelu(x, w, cb, g, bt, m, v, a):
        y = jax.lax.conv_general_dilated(
            x, w, window_strides=(1, 1), padding=((1, 1), (1, 1)),
            dimension_numbers=("NHWC", "HWIO", "NHWC"))
        y = y + cb
        y = g * (y - m) / jnp.sqrt(v + 1e-5) + bt
        return jnp.where(y > 0, y, a * y)

    residual = x_nhwc
    out = conv_bn_prelu(x_nhwc, params["w1"], params["b1"], params["gamma1"],
                        params["beta1"], params["mean1"], params["var1"],
                        params["alpha1"])
    conc = jnp.concatenate([x_nhwc, out], axis=-1)
    out = conv_bn_prelu(conc, params["w2"], params["b2"], params["gamma2"],
                        params["beta2"], params["mean2"], params["var2"],
                        params["alpha2"])
    conc = jnp.concatenate([conc, out], axis=-1)
    out = conv_bn_prelu(conc, params["w3"], params["b3"], params["gamma3"],
                        params["beta3"], params["mean3"], params["var3"],
                        params["alpha3"])
    return out + residual


if __name__ == "__main__":
    # Small shapes consistent with the module: PyTorch NCHW (2, 4, 16, 16) -> NHWC here.
    N, C, H, W = 2, 4, 16, 16
    key = jax.random.PRNGKey(0)
    kx, kp = jax.random.split(key)

    x = jax.random.normal(kx, (N, H, W, C), jnp.float32)  # NHWC
    params = make_params(C, kp)
    ref = _reference_forward(x, params)

    # f32 path: exact check against the lax reference.
    out_f32 = jax.block_until_ready(dcr_block_forward(x, params,
                                                      compute_dtype=jnp.float32))
    assert out_f32.shape == (N, H, W, C), out_f32.shape
    assert jnp.allclose(out_f32, ref, atol=1e-4, rtol=1e-4), (
        float(jnp.max(jnp.abs(out_f32 - ref))))

    # bf16 path (v6e/v7x recommendation): f32 MXU accumulation, loose tolerance.
    out_bf16 = jax.block_until_ready(dcr_block_forward(x, params,
                                                       compute_dtype=jnp.bfloat16))
    assert out_bf16.dtype == jnp.bfloat16
    assert jnp.allclose(out_bf16.astype(jnp.float32), ref, atol=1.5e-1, rtol=1.5e-1), (
        float(jnp.max(jnp.abs(out_bf16.astype(jnp.float32) - ref))))

    print("KERNEL_OK")
</pallas_src>

<mosaic_0001>
module attributes {stable_mosaic.version = 11 : i64} {
  func.func @_dcr_block_kernel(%arg0: i32, %arg1: memref<3xf32, #tpu.memory_space<smem>>, %arg2: memref<1x16x16x4xf32, #tpu.memory_space<vmem>>, %arg3: memref<3x3x4x2xf32, #tpu.memory_space<vmem>>, %arg4: memref<1x2xf32, #tpu.memory_space<vmem>>, %arg5: memref<3x3x6x2xf32, #tpu.memory_space<vmem>>, %arg6: memref<1x2xf32, #tpu.memory_space<vmem>>, %arg7: memref<3x3x8x4xf32, #tpu.memory_space<vmem>>, %arg8: memref<1x4xf32, #tpu.memory_space<vmem>>, %arg9: memref<1x16x16x4xf32, #tpu.memory_space<vmem>>, %arg10: memref<18x25x8xf32, #tpu.memory_space<vmem>>) attributes {dimension_semantics = [#tpu.dimension_semantics<parallel>], iteration_bounds = array<i64: 2>, scalar_prefetch = 1 : i64, scratch_operands = 1 : i64, tpu.core_type = #tpu.core_type<tc>, window_params = [{transform_indices = @transform_0, window_bounds = array<i64: 1, 16, 16, 4>}, {pipeline_mode = #tpu.pipeline_mode<synchronous>, transform_indices = @transform_1, window_bounds = array<i64: 3, 3, 4, 2>}, {pipeline_mode = #tpu.pipeline_mode<synchronous>, transform_indices = @transform_2, window_bounds = array<i64: 1, 2>}, {pipeline_mode = #tpu.pipeline_mode<synchronous>, transform_indices = @transform_3, window_bounds = array<i64: 3, 3, 6, 2>}, {pipeline_mode = #tpu.pipeline_mode<synchronous>, transform_indices = @transform_4, window_bounds = array<i64: 1, 2>}, {pipeline_mode = #tpu.pipeline_mode<synchronous>, transform_indices = @transform_5, window_bounds = array<i64: 3, 3, 8, 4>}, {pipeline_mode = #tpu.pipeline_mode<synchronous>, transform_indices = @transform_6, window_bounds = array<i64: 1, 4>}, {transform_indices = @transform_7, window_bounds = array<i64: 1, 16, 16, 4>}]} {
    %cst = arith.constant 0.000000e+00 : f32
    %0 = vector.broadcast %cst : f32 to vector<1x18x8xf32>
    %c0 = arith.constant 0 : index
    %c7 = arith.constant 7 : index
    %c0_0 = arith.constant 0 : index
    %1 = vector.load %arg10[%c0, %c7, %c0_0] : memref<18x25x8xf32, #tpu.memory_space<vmem>>, vector<1x18x8xf32>
    tpu.vector_store %arg10[%c0, %c7, %c0_0], %0 {strides = array<i32>} : memref<18x25x8xf32, #tpu.memory_space<vmem>>, vector<1x18x8xf32>,
    %cst_1 = arith.constant 0.000000e+00 : f32
    %2 = vector.broadcast %cst_1 : f32 to vector<1x18x8xf32>
    %c17 = arith.constant 17 : index
    %c7_2 = arith.constant 7 : index
    %c0_3 = arith.constant 0 : index
    %3 = vector.load %arg10[%c17, %c7_2, %c0_3] : memref<18x25x8xf32, #tpu.memory_space<vmem>>, vector<1x18x8xf32>
    tpu.vector_store %arg10[%c17, %c7_2, %c0_3], %2 {strides = array<i32>} : memref<18x25x8xf32, #tpu.memory_space<vmem>>, vector<1x18x8xf32>,
    %cst_4 = arith.constant 0.000000e+00 : f32
    %4 = vector.broadcast %cst_4 : f32 to vector<16x1x8xf32>
    %c1 = arith.constant 1 : index
    %c7_5 = arith.constant 7 : index
    %c0_6 = arith.constant 0 : index
    %5 = vector.load %arg10[%c1, %c7_5, %c0_6] : memref<18x25x8xf32, #tpu.memory_space<vmem>>, vector<16x1x8xf32>
    tpu.vector_store %arg10[%c1, %c7_5, %c0_6], %4 {strides = array<i32>} : memref<18x25x8xf32, #tpu.memory_space<vmem>>, vector<16x1x8xf32>,
    %cst_7 = arith.constant 0.000000e+00 : f32
    %6 = vector.broadcast %cst_7 : f32 to vector<16x1x8xf32>
    %c1_8 = arith.constant 1 : index
    %c24 = arith.constant 24 : index
    %c0_9 = arith.constant 0 : index
    %7 = vector.load %arg10[%c1_8, %c24, %c0_9] : memref<18x25x8xf32, #tpu.memory_space<vmem>>, vector<16x1x8xf32>
    tpu.vector_store %arg10[%c1_8, %c24, %c0_9], %6 {strides = array<i32>} : memref<18x25x8xf32, #tpu.memory_space<vmem>>, vector<16x1x8xf32>,
    %c0_10 = arith.constant 0 : index
    %c0_11 = arith.constant 0 : index
    %c0_12 = arith.constant 0 : index
    %c0_13 = arith.constant 0 : index
    %8 = vector.load %arg2[%c0_10, %c0_11, %c0_12, %c0_13] : memref<1x16x16x4xf32, #tpu.memory_space<vmem>>, vector<1x16x16x4xf32>
    %9 = vector.shape_cast %8 : vector<1x16x16x4xf32> to vector<16x16x4xf32>
    %c1_14 = arith.constant 1 : index
    %c8 = arith.constant 8 : index
    %c0_15 = arith.constant 0 : index
    %10 = vector.load %arg10[%c1_14, %c8, %c0_15] : memref<18x25x8xf32, #tpu.memory_space<vmem>>, vector<16x16x4xf32>
    tpu.vector_store %arg10[%c1_14, %c8, %c0_15], %9 {strides = array<i32>} : memref<18x25x8xf32, #tpu.memory_space<vmem>>, vector<16x16x4xf32>,
    %c0_16 = arith.constant 0 : index
    %11 = memref.load %arg1[%c0_16] : memref<3xf32, #tpu.memory_space<smem>>
    %c0_17 = arith.constant 0 : index
    %c0_18 = arith.constant 0 : index
    %12 = vector.load %arg4[%c0_17, %c0_18] : memref<1x2xf32, #tpu.memory_space<vmem>>, vector<1x2xf32>
    %13 = vector.shape_cast %12 : vector<1x2xf32> to vector<1x2xf32>
    %14 = vector.broadcast %13 : vector<1x2xf32> to vector<256x2xf32>
    %c0_19 = arith.constant 0 : index
    %c7_20 = arith.constant 7 : index
    %c0_21 = arith.constant 0 : index
    %15 = vector.load %arg10[%c0_19, %c7_20, %c0_21] : memref<18x25x8xf32, #tpu.memory_space<vmem>>, vector<16x16x4xf32>
    %16 = vector.shape_cast %15 : vector<16x16x4xf32> to vector<256x4xf32>
    %c0_22 = arith.constant 0 : index
    %c0_23 = arith.constant 0 : index
    %c0_24 = arith.constant 0 : index
    %c0_25 = arith.constant 0 : index
    %17 = vector.load %arg3[%c0_22, %c0_23, %c0_24, %c0_25] : memref<3x3x4x2xf32, #tpu.memory_space<vmem>>, vector<1x1x4x2xf32>
    %18 = vector.shape_cast %17 : vector<1x1x4x2xf32> to vector<4x2xf32>
    %cst_26 = arith.constant dense<0.000000e+00> : vector<256x2xf32>
    %19 = tpu.matmul %16, %18, %cst_26 {dimension_numbers = #tpu.dot_dimension_numbers<[1], [0], [0], [1], [0, 0, 1, 1], [], []>} : vector<256x4xf32>, vector<4x2xf32>, vector<256x2xf32> -> vector<256x2xf32>
    %20 = arith.addf %14, %19 : vector<256x2xf32>
    %c0_27 = arith.constant 0 : index
    %c8_28 = arith.constant 8 : index
    %c0_29 = arith.constant 0 : index
    %21 = vector.load %arg10[%c0_27, %c8_28, %c0_29] : memref<18x25x8xf32, #tpu.memory_space<vmem>>, vector<16x16x4xf32>
    %22 = vector.shape_cast %21 : vector<16x16x4xf32> to vector<256x4xf32>
    %c0_30 = arith.constant 0 : index
    %c1_31 = arith.constant 1 : index
    %c0_32 = arith.constant 0 : index
    %c0_33 = arith.constant 0 : index
    %23 = vector.load %arg3[%c0_30, %c1_31, %c0_32, %c0_33] : memref<3x3x4x2xf32, #tpu.memory_space<vmem>>, vector<1x1x4x2xf32>
    %24 = vector.shape_cast %23 : vector<1x1x4x2xf32> to vector<4x2xf32>
    %cst_34 = arith.constant dense<0.000000e+00> : vector<256x2xf32>
    %25 = tpu.matmul %22, %24, %cst_34 {dimension_numbers = #tpu.dot_dimension_numbers<[1], [0], [0], [1], [0, 0, 1, 1], [], []>} : vector<256x4xf32>, vector<4x2xf32>, vector<256x2xf32> -> vector<256x2xf32>
    %26 = arith.addf %20, %25 : vector<256x2xf32>
    %c0_35 = arith.constant 0 : index
    %c9 = arith.constant 9 : index
    %c0_36 = arith.constant 0 : index
    %27 = vector.load %arg10[%c0_35, %c9, %c0_36] : memref<18x25x8xf32, #tpu.memory_space<vmem>>, vector<16x16x4xf32>
    %28 = vector.shape_cast %27 : vector<16x16x4xf32> to vector<256x4xf32>
    %c0_37 = arith.constant 0 : index
    %c2 = arith.constant 2 : index
    %c0_38 = arith.constant 0 : index
    %c0_39 = arith.constant 0 : index
    %29 = vector.load %arg3[%c0_37, %c2, %c0_38, %c0_39] : memref<3x3x4x2xf32, #tpu.memory_space<vmem>>, vector<1x1x4x2xf32>
    %30 = vector.shape_cast %29 : vector<1x1x4x2xf32> to vector<4x2xf32>
    %cst_40 = arith.constant dense<0.000000e+00> : vector<256x2xf32>
    %31 = tpu.matmul %28, %30, %cst_40 {dimension_numbers = #tpu.dot_dimension_numbers<[1], [0], [0], [1], [0, 0, 1, 1], [], []>} : vector<256x4xf32>, vector<4x2xf32>, vector<256x2xf32> -> vector<256x2xf32>
    %32 = arith.addf %26, %31 : vector<256x2xf32>
    %c1_41 = arith.constant 1 : index
    %c7_42 = arith.constant 7 : index
    %c0_43 = arith.constant 0 : index
    %33 = vector.load %arg10[%c1_41, %c7_42, %c0_43] : memref<18x25x8xf32, #tpu.memory_space<vmem>>, vector<16x16x4xf32>
    %34 = vector.shape_cast %33 : vector<16x16x4xf32> to vector<256x4xf32>
    %c1_44 = arith.constant 1 : index
    %c0_45 = arith.constant 0 : index
    %c0_46 = arith.constant 0 : index
    %c0_47 = arith.constant 0 : index
    %35 = vector.load %arg3[%c1_44, %c0_45, %c0_46, %c0_47] : memref<3x3x4x2xf32, #tpu.memory_space<vmem>>, vector<1x1x4x2xf32>
    %36 = vector.shape_cast %35 : vector<1x1x4x2xf32> to vector<4x2xf32>
    %cst_48 = arith.constant dense<0.000000e+00> : vector<256x2xf32>
    %37 = tpu.matmul %34, %36, %cst_48 {dimension_numbers = #tpu.dot_dimension_numbers<[1], [0], [0], [1], [0, 0, 1, 1], [], []>} : vector<256x4xf32>, vector<4x2xf32>, vector<256x2xf32> -> vector<256x2xf32>
    %38 = arith.addf %32, %37 : vector<256x2xf32>
    %c1_49 = arith.constant 1 : index
    %c8_50 = arith.constant 8 : index
    %c0_51 = arith.constant 0 : index
    %39 = vector.load %arg10[%c1_49, %c8_50, %c0_51] : memref<18x25x8xf32, #tpu.memory_space<vmem>>, vector<16x16x4xf32>
    %40 = vector.shape_cast %39 : vector<16x16x4xf32> to vector<256x4xf32>
    %c1_52 = arith.constant 1 : index
    %c1_53 = arith.constant 1 : index
    %c0_54 = arith.constant 0 : index
    %c0_55 = arith.constant 0 : index
    %41 = vector.load %arg3[%c1_52, %c1_53, %c0_54, %c0_55] : memref<3x3x4x2xf32, #tpu.memory_space<vmem>>, vector<1x1x4x2xf32>
    %42 = vector.shape_cast %41 : vector<1x1x4x2xf32> to vector<4x2xf32>
    %cst_56 = arith.constant dense<0.000000e+00> : vector<256x2xf32>
    %43 = tpu.matmul %40, %42, %cst_56 {dimension_numbers = #tpu.dot_dimension_numbers<[1], [0], [0], [1], [0, 0, 1, 1], [], []>} : vector<256x4xf32>, vector<4x2xf32>, vector<256x2xf32> -> vector<256x2xf32>
    %44 = arith.addf %38, %43 : vector<256x2xf32>
    %c1_57 = arith.constant 1 : index
    %c9_58 = arith.constant 9 : index
    %c0_59 = arith.constant 0 : index
    %45 = vector.load %arg10[%c1_57, %c9_58, %c0_59] : memref<18x25x8xf32, #tpu.memory_space<vmem>>, vector<16x16x4xf32>
    %46 = vector.shape_cast %45 : vector<16x16x4xf32> to vector<256x4xf32>
    %c1_60 = arith.constant 1 : index
    %c2_61 = arith.constant 2 : index
    %c0_62 = arith.constant 0 : index
    %c0_63 = arith.constant 0 : index
    %47 = vector.load %arg3[%c1_60, %c2_61, %c0_62, %c0_63] : memref<3x3x4x2xf32, #tpu.memory_space<vmem>>, vector<1x1x4x2xf32>
    %48 = vector.shape_cast %47 : vector<1x1x4x2xf32> to vector<4x2xf32>
    %cst_64 = arith.constant dense<0.000000e+00> : vector<256x2xf32>
    %49 = tpu.matmul %46, %48, %cst_64 {dimension_numbers = #tpu.dot_dimension_numbers<[1], [0], [0], [1], [0, 0, 1, 1], [], []>} : vector<256x4xf32>, vector<4x2xf32>, vector<256x2xf32> -> vector<256x2xf32>
    %50 = arith.addf %44, %49 : vector<256x2xf32>
    %c2_65 = arith.constant 2 : index
    %c7_66 = arith.constant 7 : index
    %c0_67 = arith.constant 0 : index
    %51 = vector.load %arg10[%c2_65, %c7_66, %c0_67] : memref<18x25x8xf32, #tpu.memory_space<vmem>>, vector<16x16x4xf32>
    %52 = vector.shape_cast %51 : vector<16x16x4xf32> to vector<256x4xf32>
    %c2_68 = arith.constant 2 : index
    %c0_69 = arith.constant 0 : index
    %c0_70 = arith.constant 0 : index
    %c0_71 = arith.constant 0 : index
    %53 = vector.load %arg3[%c2_68, %c0_69, %c0_70, %c0_71] : memref<3x3x4x2xf32, #tpu.memory_space<vmem>>, vector<1x1x4x2xf32>
    %54 = vector.shape_cast %53 : vector<1x1x4x2xf32> to vector<4x2xf32>
    %cst_72 = arith.constant dense<0.000000e+00> : vector<256x2xf32>
    %55 = tpu.matmul %52, %54, %cst_72 {dimension_numbers = #tpu.dot_dimension_numbers<[1], [0], [0], [1], [0, 0, 1, 1], [], []>} : vector<256x4xf32>, vector<4x2xf32>, vector<256x2xf32> -> vector<256x2xf32>
    %56 = arith.addf %50, %55 : vector<256x2xf32>
    %c2_73 = arith.constant 2 : index
    %c8_74 = arith.constant 8 : index
    %c0_75 = arith.constant 0 : index
    %57 = vector.load %arg10[%c2_73, %c8_74, %c0_75] : memref<18x25x8xf32, #tpu.memory_space<vmem>>, vector<16x16x4xf32>
    %58 = vector.shape_cast %57 : vector<16x16x4xf32> to vector<256x4xf32>
    %c2_76 = arith.constant 2 : index
    %c1_77 = arith.constant 1 : index
    %c0_78 = arith.constant 0 : index
    %c0_79 = arith.constant 0 : index
    %59 = vector.load %arg3[%c2_76, %c1_77, %c0_78, %c0_79] : memref<3x3x4x2xf32, #tpu.memory_space<vmem>>, vector<1x1x4x2xf32>
    %60 = vector.shape_cast %59 : vector<1x1x4x2xf32> to vector<4x2xf32>
    %cst_80 = arith.constant dense<0.000000e+00> : vector<256x2xf32>
    %61 = tpu.matmul %58, %60, %cst_80 {dimension_numbers = #tpu.dot_dimension_numbers<[1], [0], [0], [1], [0, 0, 1, 1], [], []>} : vector<256x4xf32>, vector<4x2xf32>, vector<256x2xf32> -> vector<256x2xf32>
    %62 = arith.addf %56, %61 : vector<256x2xf32>
    %c2_81 = arith.constant 2 : index
    %c9_82 = arith.constant 9 : index
    %c0_83 = arith.constant 0 : index
    %63 = vector.load %arg10[%c2_81, %c9_82, %c0_83] : memref<18x25x8xf32, #tpu.memory_space<vmem>>, vector<16x16x4xf32>
    %64 = vector.shape_cast %63 : vector<16x16x4xf32> to vector<256x4xf32>
    %c2_84 = arith.constant 2 : index
    %c2_85 = arith.constant 2 : index
    %c0_86 = arith.constant 0 : index
    %c0_87 = arith.constant 0 : index
    %65 = vector.load %arg3[%c2_84, %c2_85, %c0_86, %c0_87] : memref<3x3x4x2xf32, #tpu.memory_space<vmem>>, vector<1x1x4x2xf32>
    %66 = vector.shape_cast %65 : vector<1x1x4x2xf32> to vector<4x2xf32>
    %cst_88 = arith.constant dense<0.000000e+00> : vector<256x2xf32>
    %67 = tpu.matmul %64, %66, %cst_88 {dimension_numbers = #tpu.dot_dimension_numbers<[1], [0], [0], [1], [0, 0, 1, 1], [], []>} : vector<256x4xf32>, vector<4x2xf32>, vector<256x2xf32> -> vector<256x2xf32>
    %68 = arith.addf %62, %67 : vector<256x2xf32>
    %cst_89 = arith.constant 0.000000e+00 : f32
    %69 = vector.broadcast %cst_89 : f32 to vector<256x2xf32>
    %70 = arith.cmpf ogt, %68, %69 : vector<256x2xf32>
    %71 = vector.broadcast %11 : f32 to vector<256x2xf32>
    %72 = arith.mulf %71, %68 : vector<256x2xf32>
    %73 = arith.select %70, %68, %72 : vector<256x2xi1>, vector<256x2xf32>
    %74 = vector.shape_cast %73 : vector<256x2xf32> to vector<16x16x2xf32>
    %c1_90 = arith.constant 1 : index
    %c8_91 = arith.constant 8 : index
    %c4 = arith.constant 4 : index
    %75 = vector.load %arg10[%c1_90, %c8_91, %c4] : memref<18x25x8xf32, #tpu.memory_space<vmem>>, vector<16x16x2xf32>
    tpu.vector_store %arg10[%c1_90, %c8_91, %c4], %74 {strides = array<i32>} : memref<18x25x8xf32, #tpu.memory_space<vmem>>, vector<16x16x2xf32>,
    %c1_92 = arith.constant 1 : index
    %76 = memref.load %arg1[%c1_92] : memref<3xf32, #tpu.memory_space<smem>>
    %c0_93 = arith.constant 0 : index
    %c0_94 = arith.constant 0 : index
    %77 = vector.load %arg6[%c0_93, %c0_94] : memref<1x2xf32, #tpu.memory_space<vmem>>, vector<1x2xf32>
    %78 = vector.shape_cast %77 : vector<1x2xf32> to vector<1x2xf32>
    %79 = vector.broadcast %78 : vector<1x2xf32> to vector<256x2xf32>
    %c0_95 = arith.constant 0 : index
    %c7_96 = arith.constant 7 : index
    %c0_97 = arith.constant 0 : index
    %80 = vector.load %arg10[%c0_95, %c7_96, %c0_97] : memref<18x25x8xf32, #tpu.memory_space<vmem>>, vector<16x16x6xf32>
    %81 = vector.shape_cast %80 : vector<16x16x6xf32> to vector<256x6xf32>
    %c0_98 = arith.constant 0 : index
    %c0_99 = arith.constant 0 : index
    %c0_100 = arith.constant 0 : index
    %c0_101 = arith.constant 0 : index
    %82 = vector.load %arg5[%c0_98, %c0_99, %c0_100, %c0_101] : memref<3x3x6x2xf32, #tpu.memory_space<vmem>>, vector<1x1x6x2xf32>
    %83 = vector.shape_cast %82 : vector<1x1x6x2xf32> to vector<6x2xf32>
    %cst_102 = arith.constant dense<0.000000e+00> : vector<256x2xf32>
    %84 = tpu.matmul %81, %83, %cst_102 {dimension_numbers = #tpu.dot_dimension_numbers<[1], [0], [0], [1], [0, 0, 1, 1], [], []>} : vector<256x6xf32>, vector<6x2xf32>, vector<256x2xf32> -> vector<256x2xf32>
    %85 = arith.addf %79, %84 : vector<256x2xf32>
    %c0_103 = arith.constant 0 : index
    %c8_104 = arith.constant 8 : index
    %c0_105 = arith.constant 0 : index
    %86 = vector.load %arg10[%c0_103, %c8_104, %c0_105] : memref<18x25x8xf32, #tpu.memory_space<vmem>>, vector<16x16x6xf32>
    %87 = vector.shape_cast %86 : vector<16x16x6xf32> to vector<256x6xf32>
    %c0_106 = arith.constant 0 : index
    %c1_107 = arith.constant 1 : index
    %c0_108 = arith.constant 0 : index
    %c0_109 = arith.constant 0 : index
    %88 = vector.load %arg5[%c0_106, %c1_107, %c0_108, %c0_109] : memref<3x3x6x2xf32, #tpu.memory_space<vmem>>, vector<1x1x6x2xf32>
    %89 = vector.shape_cast %88 : vector<1x1x6x2xf32> to vector<6x2xf32>
    %cst_110 = arith.constant dense<0.000000e+00> : vector<256x2xf32>
    %90 = tpu.matmul %87, %89, %cst_110 {dimension_numbers = #tpu.dot_dimension_numbers<[1], [0], [0], [1], [0, 0, 1, 1], [], []>} : vector<256x6xf32>, vector<6x2xf32>, vector<256x2xf32> -> vector<256x2xf32>
    %91 = arith.addf %85, %90 : vector<256x2xf32>
    %c0_111 = arith.constant 0 : index
    %c9_112 = arith.constant 9 : index
    %c0_113 = arith.constant 0 : index
    %92 = vector.load %arg10[%c0_111, %c9_112, %c0_113] : memref<18x25x8xf32, #tpu.memory_space<vmem>>, vector<16x16x6xf32>
    %93 = vector.shape_cast %92 : vector<16x16x6xf32> to vector<256x6xf32>
    %c0_114 = arith.constant 0 : index
    %c2_115 = arith.constant 2 : index
    %c0_116 = arith.constant 0 : index
    %c0_117 = arith.constant 0 : index
    %94 = vector.load %arg5[%c0_114, %c2_115, %c0_116, %c0_117] : memref<3x3x6x2xf32, #tpu.memory_space<vmem>>, vector<1x1x6x2xf32>
    %95 = vector.shape_cast %94 : vector<1x1x6x2xf32> to vector<6x2xf32>
    %cst_118 = arith.constant dense<0.000000e+00> : vector<256x2xf32>
    %96 = tpu.matmul %93, %95, %cst_118 {dimension_numbers = #tpu.dot_dimension_numbers<[1], [0], [0], [1], [0, 0, 1, 1], [], []>} : vector<256x6xf32>, vector<6x2xf32>, vector<256x2xf32> -> vector<256x2xf32>
    %97 = arith.addf %91, %96 : vector<256x2xf32>
    %c1_119 = arith.constant 1 : index
    %c7_120 = arith.constant 7 : index
    %c0_121 = arith.constant 0 : index
    %98 = vector.load %arg10[%c1_119, %c7_120, %c0_121] : memref<18x25x8xf32, #tpu.memory_space<vmem>>, vector<16x16x6xf32>
    %99 = vector.shape_cast %98 : vector<16x16x6xf32> to vector<256x6xf32>
    %c1_122 = arith.constant 1 : index
    %c0_123 = arith.constant 0 : index
    %c0_124 = arith.constant 0 : index
    %c0_125 = arith.constant 0 : index
    %100 = vector.load %arg5[%c1_122, %c0_123, %c0_124, %c0_125] : memref<3x3x6x2xf32, #tpu.memory_space<vmem>>, vector<1x1x6x2xf32>
    %101 = vector.shape_cast %100 : vector<1x1x6x2xf32> to vector<6x2xf32>
    %cst_126 = arith.constant dense<0.000000e+00> : vector<256x2xf32>
    %102 = tpu.matmul %99, %101, %cst_126 {dimension_numbers = #tpu.dot_dimension_numbers<[1], [0], [0], [1], [0, 0, 1, 1], [], []>} : vector<256x6xf32>, vector<6x2xf32>, vector<256x2xf32> -> vector<256x2xf32>
    %103 = arith.addf %97, %102 : vector<256x2xf32>
    %c1_127 = arith.constant 1 : index
    %c8_128 = arith.constant 8 : index
    %c0_129 = arith.constant 0 : index
    %104 = vector.load %arg10[%c1_127, %c8_128, %c0_129] : memref<18x25x8xf32, #tpu.memory_space<vmem>>, vector<16x16x6xf32>
    %105 = vector.shape_cast %104 : vector<16x16x6xf32> to vector<256x6xf32>
    %c1_130 = arith.constant 1 : index
    %c1_131 = arith.constant 1 : index
    %c0_132 = arith.constant 0 : index
    %c0_133 = arith.constant 0 : index
    %106 = vector.load %arg5[%c1_130, %c1_131, %c0_132, %c0_133] : memref<3x3x6x2xf32, #tpu.memory_space<vmem>>, vector<1x1x6x2xf32>
    %107 = vector.shape_cast %106 : vector<1x1x6x2xf32> to vector<6x2xf32>
    %cst_134 = arith.constant dense<0.000000e+00> : vector<256x2xf32>
    %108 = tpu.matmul %105, %107, %cst_134 {dimension_numbers = #tpu.dot_dimension_numbers<[1], [0], [0], [1], [0, 0, 1, 1], [], []>} : vector<256x6xf32>, vector<6x2xf32>, vector<256x2xf32> -> vector<256x2xf32>
    %109 = arith.addf %103, %108 : vector<256x2xf32>
    %c1_135 = arith.constant 1 : index
    %c9_136 = arith.constant 9 : index
    %c0_137 = arith.constant 0 : index
    %110 = vector.load %arg10[%c1_135, %c9_136, %c0_137] : memref<18x25x8xf32, #tpu.memory_space<vmem>>, vector<16x16x6xf32>
    %111 = vector.shape_cast %110 : vector<16x16x6xf32> to vector<256x6xf32>
    %c1_138 = arith.constant 1 : index
    %c2_139 = arith.constant 2 : index
    %c0_140 = arith.constant 0 : index
    %c0_141 = arith.constant 0 : index
    %112 = vector.load %arg5[%c1_138, %c2_139, %c0_140, %c0_141] : memref<3x3x6x2xf32, #tpu.memory_space<vmem>>, vector<1x1x6x2xf32>
    %113 = vector.shape_cast %112 : vector<1x1x6x2xf32> to vector<6x2xf32>
    %cst_142 = arith.constant dense<0.000000e+00> : vector<256x2xf32>
    %114 = tpu.matmul %111, %113, %cst_142 {dimension_numbers = #tpu.dot_dimension_numbers<[1], [0], [0], [1], [0, 0, 1, 1], [], []>} : vector<256x6xf32>, vector<6x2xf32>, vector<256x2xf32> -> vector<256x2xf32>
    %115 = arith.addf %109, %114 : vector<256x2xf32>
    %c2_143 = arith.constant 2 : index
    %c7_144 = arith.constant 7 : index
    %c0_145 = arith.constant 0 : index
    %116 = vector.load %arg10[%c2_143, %c7_144, %c0_145] : memref<18x25x8xf32, #tpu.memory_space<vmem>>, vector<16x16x6xf32>
    %117 = vector.shape_cast %116 : vector<16x16x6xf32> to vector<256x6xf32>
    %c2_146 = arith.constant 2 : index
    %c0_147 = arith.constant 0 : index
    %c0_148 = arith.constant 0 : index
    %c0_149 = arith.constant 0 : index
    %118 = vector.load %arg5[%c2_146, %c0_147, %c0_148, %c0_149] : memref<3x3x6x2xf32, #tpu.memory_space<vmem>>, vector<1x1x6x2xf32>
    %119 = vector.shape_cast %118 : vector<1x1x6x2xf32> to vector<6x2xf32>
    %cst_150 = arith.constant dense<0.000000e+00> : vector<256x2xf32>
    %120 = tpu.matmul %117, %119, %cst_150 {dimension_numbers = #tpu.dot_dimension_numbers<[1], [0], [0], [1], [0, 0, 1, 1], [], []>} : vector<256x6xf32>, vector<6x2xf32>, vector<256x2xf32> -> vector<256x2xf32>
    %121 = arith.addf %115, %120 : vector<256x2xf32>
    %c2_151 = arith.constant 2 : index
    %c8_152 = arith.constant 8 : index
    %c0_153 = arith.constant 0 : index
    %122 = vector.load %arg10[%c2_151, %c8_152, %c0_153] : memref<18x25x8xf32, #tpu.memory_space<vmem>>, vector<16x16x6xf32>
    %123 = vector.shape_cast %122 : vector<16x16x6xf32> to vector<256x6xf32>
    %c2_154 = arith.constant 2 : index
    %c1_155 = arith.constant 1 : index
    %c0_156 = arith.constant 0 : index
    %c0_157 = arith.constant 0 : index
    %124 = vector.load %arg5[%c2_154, %c1_155, %c0_156, %c0_157] : memref<3x3x6x2xf32, #tpu.memory_space<vmem>>, vector<1x1x6x2xf32>
    %125 = vector.shape_cast %124 : vector<1x1x6x2xf32> to vector<6x2xf32>
    %cst_158 = arith.constant dense<0.000000e+00> : vector<256x2xf32>
    %126 = tpu.matmul %123, %125, %cst_158 {dimension_numbers = #tpu.dot_dimension_numbers<[1], [0], [0], [1], [0, 0, 1, 1], [], []>} : vector<256x6xf32>, vector<6x2xf32>, vector<256x2xf32> -> vector<256x2xf32>
    %127 = arith.addf %121, %126 : vector<256x2xf32>
    %c2_159 = arith.constant 2 : index
    %c9_160 = arith.constant 9 : index
    %c0_161 = arith.constant 0 : index
    %128 = vector.load %arg10[%c2_159, %c9_160, %c0_161] : memref<18x25x8xf32, #tpu.memory_space<vmem>>, vector<16x16x6xf32>
    %129 = vector.shape_cast %128 : vector<16x16x6xf32> to vector<256x6xf32>
    %c2_162 = arith.constant 2 : index
    %c2_163 = arith.constant 2 : index
    %c0_164 = arith.constant 0 : index
    %c0_165 = arith.constant 0 : index
    %130 = vector.load %arg5[%c2_162, %c2_163, %c0_164, %c0_165] : memref<3x3x6x2xf32, #tpu.memory_space<vmem>>, vector<1x1x6x2xf32>
    %131 = vector.shape_cast %130 : vector<1x1x6x2xf32> to vector<6x2xf32>
    %cst_166 = arith.constant dense<0.000000e+00> : vector<256x2xf32>
    %132 = tpu.matmul %129, %131, %cst_166 {dimension_numbers = #tpu.dot_dimension_numbers<[1], [0], [0], [1], [0, 0, 1, 1], [], []>} : vector<256x6xf32>, vector<6x2xf32>, vector<256x2xf32> -> vector<256x2xf32>
    %133 = arith.addf %127, %132 : vector<256x2xf32>
    %cst_167 = arith.constant 0.000000e+00 : f32
    %134 = vector.broadcast %cst_167 : f32 to vector<256x2xf32>
    %135 = arith.cmpf ogt, %133, %134 : vector<256x2xf32>
    %136 = vector.broadcast %76 : f32 to vector<256x2xf32>
    %137 = arith.mulf %136, %133 : vector<256x2xf32>
    %138 = arith.select %135, %133, %137 : vector<256x2xi1>, vector<256x2xf32>
    %139 = vector.shape_cast %138 : vector<256x2xf32> to vector<16x16x2xf32>
    %c1_168 = arith.constant 1 : index
    %c8_169 = arith.constant 8 : index
    %c6 = arith.constant 6 : index
    %140 = vector.load %arg10[%c1_168, %c8_169, %c6] : memref<18x25x8xf32, #tpu.memory_space<vmem>>, vector<16x16x2xf32>
    tpu.vector_store %arg10[%c1_168, %c8_169, %c6], %139 {strides = array<i32>} : memref<18x25x8xf32, #tpu.memory_space<vmem>>, vector<16x16x2xf32>,
    %c2_170 = arith.constant 2 : index
    %141 = memref.load %arg1[%c2_170] : memref<3xf32, #tpu.memory_space<smem>>
    %c0_171 = arith.constant 0 : index
    %c0_172 = arith.constant 0 : index
    %142 = vector.load %arg8[%c0_171, %c0_172] : memref<1x4xf32, #tpu.memory_space<vmem>>, vector<1x4xf32>
    %143 = vector.shape_cast %142 : vector<1x4xf32> to vector<1x4xf32>
    %144 = vector.broadcast %143 : vector<1x4xf32> to vector<256x4xf32>
    %c0_173 = arith.constant 0 : index
    %c7_174 = arith.constant 7 : index
    %c0_175 = arith.constant 0 : index
    %145 = vector.load %arg10[%c0_173, %c7_174, %c0_175] : memref<18x25x8xf32, #tpu.memory_space<vmem>>, vector<16x16x8xf32>
    %146 = vector.shape_cast %145 : vector<16x16x8xf32> to vector<256x8xf32>
    %c0_176 = arith.constant 0 : index
    %c0_177 = arith.constant 0 : index
    %c0_178 = arith.constant 0 : index
    %c0_179 = arith.constant 0 : index
    %147 = vector.load %arg7[%c0_176, %c0_177, %c0_178, %c0_179] : memref<3x3x8x4xf32, #tpu.memory_space<vmem>>, vector<1x1x8x4xf32>
    %148 = vector.shape_cast %147 : vector<1x1x8x4xf32> to vector<8x4xf32>
    %cst_180 = arith.constant dense<0.000000e+00> : vector<256x4xf32>
    %149 = tpu.matmul %146, %148, %cst_180 {dimension_numbers = #tpu.dot_dimension_numbers<[1], [0], [0], [1], [0, 0, 1, 1], [], []>} : vector<256x8xf32>, vector<8x4xf32>, vector<256x4xf32> -> vector<256x4xf32>
    %150 = arith.addf %144, %149 : vector<256x4xf32>
    %c0_181 = arith.constant 0 : index
    %c8_182 = arith.constant 8 : index
    %c0_183 = arith.constant 0 : index
    %151 = vector.load %arg10[%c0_181, %c8_182, %c0_183] : memref<18x25x8xf32, #tpu.memory_space<vmem>>, vector<16x16x8xf32>
    %152 = vector.shape_cast %151 : vector<16x16x8xf32> to vector<256x8xf32>
    %c0_184 = arith.constant 0 : index
    %c1_185 = arith.constant 1 : index
    %c0_186 = arith.constant 0 : index
    %c0_187 = arith.constant 0 : index
    %153 = vector.load %arg7[%c0_184, %c1_185, %c0_186, %c0_187] : memref<3x3x8x4xf32, #tpu.memory_space<vmem>>, vector<1x1x8x4xf32>
    %154 = vector.shape_cast %153 : vector<1x1x8x4xf32> to vector<8x4xf32>
    %cst_188 = arith.constant dense<0.000000e+00> : vector<256x4xf32>
    %155 = tpu.matmul %152, %154, %cst_188 {dimension_numbers = #tpu.dot_dimension_numbers<[1], [0], [0], [1], [0, 0, 1, 1], [], []>} : vector<256x8xf32>, vector<8x4xf32>, vector<256x4xf32> -> vector<256x4xf32>
    %156 = arith.addf %150, %155 : vector<256x4xf32>
    %c0_189 = arith.constant 0 : index
    %c9_190 = arith.constant 9 : index
    %c0_191 = arith.constant 0 : index
    %157 = vector.load %arg10[%c0_189, %c9_190, %c0_191] : memref<18x25x8xf32, #tpu.memory_space<vmem>>, vector<16x16x8xf32>
    %158 = vector.shape_cast %157 : vector<16x16x8xf32> to vector<256x8xf32>
    %c0_192 = arith.constant 0 : index
    %c2_193 = arith.constant 2 : index
    %c0_194 = arith.constant 0 : index
    %c0_195 = arith.constant 0 : index
    %159 = vector.load %arg7[%c0_192, %c2_193, %c0_194, %c0_195] : memref<3x3x8x4xf32, #tpu.memory_space<vmem>>, vector<1x1x8x4xf32>
    %160 = vector.shape_cast %159 : vector<1x1x8x4xf32> to vector<8x4xf32>
    %cst_196 = arith.constant dense<0.000000e+00> : vector<256x4xf32>
    %161 = tpu.matmul %158, %160, %cst_196 {dimension_numbers = #tpu.dot_dimension_numbers<[1], [0], [0], [1], [0, 0, 1, 1], [], []>} : vector<256x8xf32>, vector<8x4xf32>, vector<256x4xf32> -> vector<256x4xf32>
    %162 = arith.addf %156, %161 : vector<256x4xf32>
    %c1_197 = arith.constant 1 : index
    %c7_198 = arith.constant 7 : index
    %c0_199 = arith.constant 0 : index
    %163 = vector.load %arg10[%c1_197, %c7_198, %c0_199] : memref<18x25x8xf32, #tpu.memory_space<vmem>>, vector<16x16x8xf32>
    %164 = vector.shape_cast %163 : vector<16x16x8xf32> to vector<256x8xf32>
    %c1_200 = arith.constant 1 : index
    %c0_201 = arith.constant 0 : index
    %c0_202 = arith.constant 0 : index
    %c0_203 = arith.constant 0 : index
    %165 = vector.load %arg7[%c1_200, %c0_201, %c0_202, %c0_203] : memref<3x3x8x4xf32, #tpu.memory_space<vmem>>, vector<1x1x8x4xf32>
    %166 = vector.shape_cast %165 : vector<1x1x8x4xf32> to vector<8x4xf32>
    %cst_204 = arith.constant dense<0.000000e+00> : vector<256x4xf32>
    %167 = tpu.matmul %164, %166, %cst_204 {dimension_numbers = #tpu.dot_dimension_numbers<[1], [0], [0], [1], [0, 0, 1, 1], [], []>} : vector<256x8xf32>, vector<8x4xf32>, vector<256x4xf32> -> vector<256x4xf32>
    %168 = arith.addf %162, %167 : vector<256x4xf32>
    %c1_205 = arith.constant 1 : index
    %c8_206 = arith.constant 8 : index
    %c0_207 = arith.constant 0 : index
    %169 = vector.load %arg10[%c1_205, %c8_206, %c0_207] : memref<18x25x8xf32, #tpu.memory_space<vmem>>, vector<16x16x8xf32>
    %170 = vector.shape_cast %169 : vector<16x16x8xf32> to vector<256x8xf32>
    %c1_208 = arith.constant 1 : index
    %c1_209 = arith.constant 1 : index
    %c0_210 = arith.constant 0 : index
    %c0_211 = arith.constant 0 : index
    %171 = vector.load %arg7[%c1_208, %c1_209, %c0_210, %c0_211] : memref<3x3x8x4xf32, #tpu.memory_space<vmem>>, vector<1x1x8x4xf32>
    %172 = vector.shape_cast %171 : vector<1x1x8x4xf32> to vector<8x4xf32>
    %cst_212 = arith.constant dense<0.000000e+00> : vector<256x4xf32>
    %173 = tpu.matmul %170, %172, %cst_212 {dimension_numbers = #tpu.dot_dimension_numbers<[1], [0], [0], [1], [0, 0, 1, 1], [], []>} : vector<256x8xf32>, vector<8x4xf32>, vector<256x4xf32> -> vector<256x4xf32>
    %174 = arith.addf %168, %173 : vector<256x4xf32>
    %c1_213 = arith.constant 1 : index
    %c9_214 = arith.constant 9 : index
    %c0_215 = arith.constant 0 : index
    %175 = vector.load %arg10[%c1_213, %c9_214, %c0_215] : memref<18x25x8xf32, #tpu.memory_space<vmem>>, vector<16x16x8xf32>
    %176 = vector.shape_cast %175 : vector<16x16x8xf32> to vector<256x8xf32>
    %c1_216 = arith.constant 1 : index
    %c2_217 = arith.constant 2 : index
    %c0_218 = arith.constant 0 : index
    %c0_219 = arith.constant 0 : index
    %177 = vector.load %arg7[%c1_216, %c2_217, %c0_218, %c0_219] : memref<3x3x8x4xf32, #tpu.memory_space<vmem>>, vector<1x1x8x4xf32>
    %178 = vector.shape_cast %177 : vector<1x1x8x4xf32> to vector<8x4xf32>
    %cst_220 = arith.constant dense<0.000000e+00> : vector<256x4xf32>
    %179 = tpu.matmul %176, %178, %cst_220 {dimension_numbers = #tpu.dot_dimension_numbers<[1], [0], [0], [1], [0, 0, 1, 1], [], []>} : vector<256x8xf32>, vector<8x4xf32>, vector<256x4xf32> -> vector<256x4xf32>
    %180 = arith.addf %174, %179 : vector<256x4xf32>
    %c2_221 = arith.constant 2 : index
    %c7_222 = arith.constant 7 : index
    %c0_223 = arith.constant 0 : index
    %181 = vector.load %arg10[%c2_221, %c7_222, %c0_223] : memref<18x25x8xf32, #tpu.memory_space<vmem>>, vector<16x16x8xf32>
    %182 = vector.shape_cast %181 : vector<16x16x8xf32> to vector<256x8xf32>
    %c2_224 = arith.constant 2 : index
    %c0_225 = arith.constant 0 : index
    %c0_226 = arith.constant 0 : index
    %c0_227 = arith.constant 0 : index
    %183 = vector.load %arg7[%c2_224, %c0_225, %c0_226, %c0_227] : memref<3x3x8x4xf32, #tpu.memory_space<vmem>>, vector<1x1x8x4xf32>
    %184 = vector.shape_cast %183 : vector<1x1x8x4xf32> to vector<8x4xf32>
    %cst_228 = arith.constant dense<0.000000e+00> : vector<256x4xf32>
    %185 = tpu.matmul %182, %184, %cst_228 {dimension_numbers = #tpu.dot_dimension_numbers<[1], [0], [0], [1], [0, 0, 1, 1], [], []>} : vector<256x8xf32>, vector<8x4xf32>, vector<256x4xf32> -> vector<256x4xf32>
    %186 = arith.addf %180, %185 : vector<256x4xf32>
    %c2_229 = arith.constant 2 : index
    %c8_230 = arith.constant 8 : index
    %c0_231 = arith.constant 0 : index
    %187 = vector.load %arg10[%c2_229, %c8_230, %c0_231] : memref<18x25x8xf32, #tpu.memory_space<vmem>>, vector<16x16x8xf32>
    %188 = vector.shape_cast %187 : vector<16x16x8xf32> to vector<256x8xf32>
    %c2_232 = arith.constant 2 : index
    %c1_233 = arith.constant 1 : index
    %c0_234 = arith.constant 0 : index
    %c0_235 = arith.constant 0 : index
    %189 = vector.load %arg7[%c2_232, %c1_233, %c0_234, %c0_235] : memref<3x3x8x4xf32, #tpu.memory_space<vmem>>, vector<1x1x8x4xf32>
    %190 = vector.shape_cast %189 : vector<1x1x8x4xf32> to vector<8x4xf32>
    %cst_236 = arith.constant dense<0.000000e+00> : vector<256x4xf32>
    %191 = tpu.matmul %188, %190, %cst_236 {dimension_numbers = #tpu.dot_dimension_numbers<[1], [0], [0], [1], [0, 0, 1, 1], [], []>} : vector<256x8xf32>, vector<8x4xf32>, vector<256x4xf32> -> vector<256x4xf32>
    %192 = arith.addf %186, %191 : vector<256x4xf32>
    %c2_237 = arith.constant 2 : index
    %c9_238 = arith.constant 9 : index
    %c0_239 = arith.constant 0 : index
    %193 = vector.load %arg10[%c2_237, %c9_238, %c0_239] : memref<18x25x8xf32, #tpu.memory_space<vmem>>, vector<16x16x8xf32>
    %194 = vector.shape_cast %193 : vector<16x16x8xf32> to vector<256x8xf32>
    %c2_240 = arith.constant 2 : index
    %c2_241 = arith.constant 2 : index
    %c0_242 = arith.constant 0 : index
    %c0_243 = arith.constant 0 : index
    %195 = vector.load %arg7[%c2_240, %c2_241, %c0_242, %c0_243] : memref<3x3x8x4xf32, #tpu.memory_space<vmem>>, vector<1x1x8x4xf32>
    %196 = vector.shape_cast %195 : vector<1x1x8x4xf32> to vector<8x4xf32>
    %cst_244 = arith.constant dense<0.000000e+00> : vector<256x4xf32>
    %197 = tpu.matmul %194, %196, %cst_244 {dimension_numbers = #tpu.dot_dimension_numbers<[1], [0], [0], [1], [0, 0, 1, 1], [], []>} : vector<256x8xf32>, vector<8x4xf32>, vector<256x4xf32> -> vector<256x4xf32>
    %198 = arith.addf %192, %197 : vector<256x4xf32>
    %cst_245 = arith.constant 0.000000e+00 : f32
    %199 = vector.broadcast %cst_245 : f32 to vector<256x4xf32>
    %200 = arith.cmpf ogt, %198, %199 : vector<256x4xf32>
    %201 = vector.broadcast %141 : f32 to vector<256x4xf32>
    %202 = arith.mulf %201, %198 : vector<256x4xf32>
    %203 = arith.select %200, %198, %202 : vector<256x4xi1>, vector<256x4xf32>
    %c0_246 = arith.constant 0 : index
    %c0_247 = arith.constant 0 : index
    %c0_248 = arith.constant 0 : index
    %c0_249 = arith.constant 0 : index
    %204 = vector.load %arg2[%c0_246, %c0_247, %c0_248, %c0_249] : memref<1x16x16x4xf32, #tpu.memory_space<vmem>>, vector<1x16x16x4xf32>
    %205 = vector.shape_cast %204 : vector<1x16x16x4xf32> to vector<16x16x4xf32>
    %206 = vector.shape_cast %205 : vector<16x16x4xf32> to vector<256x4xf32>
    %207 = arith.addf %203, %206 : vector<256x4xf32>
    %208 = vector.shape_cast %207 : vector<256x4xf32> to vector<16x16x4xf32>
    %c0_250 = arith.constant 0 : index
    %c0_251 = arith.constant 0 : index
    %c0_252 = arith.constant 0 : index
    %c0_253 = arith.constant 0 : index
    %209 = vector.load %arg9[%c0_250, %c0_251, %c0_252, %c0_253] : memref<1x16x16x4xf32, #tpu.memory_space<vmem>>, vector<1x16x16x4xf32>
    %210 = vector.shape_cast %209 : vector<1x16x16x4xf32> to vector<16x16x4xf32>
    %211 = vector.shape_cast %208 : vector<16x16x4xf32> to vector<1x16x16x4xf32>
    tpu.vector_store %arg9[%c0_250, %c0_251, %c0_252, %c0_253], %211 {strides = array<i32>} : memref<1x16x16x4xf32, #tpu.memory_space<vmem>>, vector<1x16x16x4xf32>,
    return
  }
  func.func @transform_0(%arg0: i32, %arg1: memref<3xf32, #tpu.memory_space<smem>>) -> (i32, i32, i32, i32) {
    %c0_i32 = arith.constant 0 : i32
    %c0_i32_0 = arith.constant 0 : i32
    %c0_i32_1 = arith.constant 0 : i32
    %c0_i32_2 = arith.constant 0 : i32
    return %arg0, %c0_i32, %c0_i32_0, %c0_i32_1 : i32, i32, i32, i32
  }
  func.func @transform_1(%arg0: i32, %arg1: memref<3xf32, #tpu.memory_space<smem>>) -> (i32, i32, i32, i32) {
    %c0_i32 = arith.constant 0 : i32
    %c0_i32_0 = arith.constant 0 : i32
    %c0_i32_1 = arith.constant 0 : i32
    %c0_i32_2 = arith.constant 0 : i32
    %c0_i32_3 = arith.constant 0 : i32
    return %c0_i32, %c0_i32_0, %c0_i32_1, %c0_i32_2 : i32, i32, i32, i32
  }
  func.func @transform_2(%arg0: i32, %arg1: memref<3xf32, #tpu.memory_space<smem>>) -> (i32, i32) {
    %c0_i32 = arith.constant 0 : i32
    %c0_i32_0 = arith.constant 0 : i32
    %c0_i32_1 = arith.constant 0 : i32
    return %c0_i32, %c0_i32_0 : i32, i32
  }
  func.func @transform_3(%arg0: i32, %arg1: memref<3xf32, #tpu.memory_space<smem>>) -> (i32, i32, i32, i32) {
    %c0_i32 = arith.constant 0 : i32
    %c0_i32_0 = arith.constant 0 : i32
    %c0_i32_1 = arith.constant 0 : i32
    %c0_i32_2 = arith.constant 0 : i32
    %c0_i32_3 = arith.constant 0 : i32
    return %c0_i32, %c0_i32_0, %c0_i32_1, %c0_i32_2 : i32, i32, i32, i32
  }
  func.func @transform_4(%arg0: i32, %arg1: memref<3xf32, #tpu.memory_space<smem>>) -> (i32, i32) {
    %c0_i32 = arith.constant 0 : i32
    %c0_i32_0 = arith.constant 0 : i32
    %c0_i32_1 = arith.constant 0 : i32
    return %c0_i32, %c0_i32_0 : i32, i32
  }
  func.func @transform_5(%arg0: i32, %arg1: memref<3xf32, #tpu.memory_space<smem>>) -> (i32, i32, i32, i32) {
    %c0_i32 = arith.constant 0 : i32
    %c0_i32_0 = arith.constant 0 : i32
    %c0_i32_1 = arith.constant 0 : i32
    %c0_i32_2 = arith.constant 0 : i32
    %c0_i32_3 = arith.constant 0 : i32
    return %c0_i32, %c0_i32_0, %c0_i32_1, %c0_i32_2 : i32, i32, i32, i32
  }
  func.func @transform_6(%arg0: i32, %arg1: memref<3xf32, #tpu.memory_space<smem>>) -> (i32, i32) {
    %c0_i32 = arith.constant 0 : i32
    %c0_i32_0 = arith.constant 0 : i32
    %c0_i32_1 = arith.constant 0 : i32
    return %c0_i32, %c0_i32_0 : i32, i32
  }
  func.func @transform_7(%arg0: i32, %arg1: memref<3xf32, #tpu.memory_space<smem>>) -> (i32, i32, i32, i32) {
    %c0_i32 = arith.constant 0 : i32
    %c0_i32_0 = arith.constant 0 : i32
    %c0_i32_1 = arith.constant 0 : i32
    %c0_i32_2 = arith.constant 0 : i32
    return %arg0, %c0_i32, %c0_i32_0, %c0_i32_1 : i32, i32, i32, i32
  }
}

</mosaic_0001>

<bundles_post_ra>
// kernel: dcr_block_forward.1
= control target key start
LH: loop header
LB: loop body
LE: loop exit
PB: predicated region body
PF: predicated region fallthrough
CT: control target
= control target key end

     0   :  { %s19652_s0 = inlined_call_operand.vmem [shape: f32[3], index: 0, kind: input, shape index: {}]   ;;  %s19653_s1 = inlined_call_operand.vmem [shape: f32[2,16,16,4], index: 1, kind: input, shape index: {}]   ;;  %s19654_s2 = inlined_call_operand.vmem [shape: f32[3,3,4,2], index: 2, kind: input, shape index: {}]   ;;  %s19655_s3 = inlined_call_operand.vmem [shape: f32[1,2], index: 3, kind: input, shape index: {}]   ;;  %s19656_s4 = inlined_call_operand.vmem [shape: f32[3,3,6,2], index: 4, kind: input, shape index: {}]   ;;  %s19657_s5 = inlined_call_operand.vmem [shape: f32[1,2], index: 5, kind: input, shape index: {}]   ;;  %s19658_s6 = inlined_call_operand.vmem [shape: f32[3,3,8,4], index: 6, kind: input, shape index: {}]   ;;  %s19659_s7 = inlined_call_operand.vmem [shape: f32[1,4], index: 7, kind: input, shape index: {}]   ;;  %s19660_s8 = inlined_call_operand.vmem [shape: f32[2,16,16,4], index: 8, kind: output, shape index: {}]  }
   0x1   :  { %s13_s29 = sshll.u32 %s19652_s0, 4  ;;  %s14_s29 = int_to_ptr.vmem [resolvable:$true] %s13_s29 }
   0x2   :  { %s14866_s30 = scalar_lea.vmem %s14_s29, 16  ;;  %p14871_p1 = scmp.lt.s32.totalorder %s14_s29, %s14_s29 }
   0x3   :  { %p14867_p0 = scmp.ne.s32.totalorder %s14_s29, %s14866_s30  ;;  %p14872_p2 = scmp.lt.s32.totalorder %s14866_s30, %s14866_s30 }
   0x5   :  { %p14873_p3 = por %p14872_p2, %p14871_p1 }
   0x7   :  { %p14874_p4 = pnand %p14873_p3, %p14867_p0 }
   0x9   :  { %14877 = shalt.err (!%p14874_p4)  }
   0xa   :  { %s14888_s9 = smov [#allocation4]  }
   0xb   :  { %16 = dma.vmem_to_smem %s14_s29, 16, %s14888_s9, [#allocation3] }
   0xc   :  { %14882 = dma.done.wait [#allocation3], 16 }
   0xd   :  { %14883 = vsyncadd [#allocation3], 4294967280 }
   0xe   :  { %18 = sfence }
   0xf   :  { %s14940_s10 = smov 0  }
  0x10 LB: > { %s11686_s0 = sadd.s32 4294967295, %s14886_s10   ;;  %p11690_p5 = scmp.ge.s32.totalorder %s14886_s10, 1  ;;  %s14886_s10 = sphi %s14940_s10, %s24_s10  }
  0x11   : > { %p244_p6 = scmp.lt.s32.totalorder %s14886_s10, 3 }
  0x13   : > { %p245_p7 = pnand %p11690_p5, %p244_p6 }
  0x15   : > { %248 = sbr.rel (%p245_p7) target bundleno = 1701 (0x6a5), region = 48 }
  0x1a   : > { %v434_v0 = vld [vmem:[%s19654_s2] sm:$0xf]  ;;  %vm531_vm0 = vcmask 1043456   ;;  %vm286_vm1 = vcmask 64512   ;;  %v14889_v1 = vmov 0.0   ;;  %p14959_p8 = scmp.lt.s32.totalorder %s11686_s0, 1 }
  0x1b   : > { %14851 = vmatprep.subr.msk.mxu1 %vm531_vm0, %v434_v0  ;;  %13501 = vmatprep.subr.msk.mxu0 %vm531_vm0, %v434_v0  ;;  %287 = vst.msk [vmem:[#allocation2 + $0x7] sm:$0xff] %vm286_vm1, %v14889_v1  ;;  %288 = vst.msk [vmem:[#allocation2 + $0xf] sm:$0xff] %vm286_vm1, %v14889_v1  ;;  %vm296_vm2 = vcmask 57344   ;;  %v14966_v2 = vld [vmem:[%s19654_s2 + $0x4] sm:$0xf]  ;;  %vm289_vm3 = vcmask 58368  }
  0x1c   : > { %292 = vst.msk [vmem:[#allocation2 + $0x227] sm:$0xff] %vm286_vm1, %v14889_v1  ;;  %293 = vst.msk [vmem:[#allocation2 + $0x22f] sm:$0xff] %vm286_vm1, %v14889_v1  ;;  %v14971_v3 = vld [vmem:[%s19654_s2 + $0x8] sm:$0xf]  ;;  %14852 = vmatpush3.msk.msra.mxu1 %vm531_vm0, %v434_v0  ;;  %13502 = vmatpush3.msk.msra.mxu0 %vm531_vm0, %v434_v0  ;;  %s20403_s0 = smov (!%p14959_p8, %s11686_s0), 1  ;;  %vm361_vm4 = vcmask 31744  }
  0x1d   : > { %304 = vst.msk [vmem:[#allocation2 + $0x107] sm:$0x1] %vm296_vm2, %v14889_v1  ;;  %297 = vst.msk [vmem:[#allocation2 + $0x27] sm:$0x1] %vm296_vm2, %v14889_v1  ;;  %13551 = vmatprep.subr.msk.mxu1 %vm531_vm0, %v14966_v2  ;;  %13601 = vmatprep.subr.msk.mxu0 %vm531_vm0, %v14971_v3  ;;  %s12608_s18 = sshll.u32 %s20403_s0, 8  ;;  %vm4309_vm5 = vcmask 1045504  }
  0x1e   : > { %298 = vst.msk [vmem:[#allocation2 + $0x47] sm:$0x1] %vm296_vm2, %v14889_v1  ;;  %299 = vst.msk [vmem:[#allocation2 + $0x67] sm:$0x1] %vm296_vm2, %v14889_v1  ;;  %s15023_s21 = scalar_lea.vmem %s19653_s1, %s12608_s18  ;;  %v15031_v7 = vld [vmem:[%s19654_s2 + $0x10] sm:$0xf]  ;;  %s19404_s28 = scalar_lea.vmem %s19660_s8, %s12608_s18 }
  0x1f   : > { %300 = vst.msk [vmem:[#allocation2 + $0x87] sm:$0x1] %vm296_vm2, %v14889_v1  ;;  %301 = vst.msk [vmem:[#allocation2 + $0xa7] sm:$0x1] %vm296_vm2, %v14889_v1  ;;  %v343_v4 = vld [vmem:[%s15023_s21 + $0x70] sm:$0xff]  ;;  %v344_v5 = vld [vmem:[%s15023_s21 + $0x78] sm:$0xff] }
  0x20   : > { %302 = vst.msk [vmem:[#allocation2 + $0xc7] sm:$0x1] %vm296_vm2, %v14889_v1  ;;  %303 = vst.msk [vmem:[#allocation2 + $0xe7] sm:$0x1] %vm296_vm2, %v14889_v1  ;;  %v329_v6 = vld [vmem:[%s15023_s21] sm:$0xff]  ;;  %v330_v11 = vld [vmem:[%s15023_s21 + $0x8] sm:$0xff] }
  0x21   : > { %305 = vst.msk [vmem:[#allocation2 + $0x127] sm:$0x1] %vm296_vm2, %v14889_v1  ;;  %306 = vst.msk [vmem:[#allocation2 + $0x147] sm:$0x1] %vm296_vm2, %v14889_v1  ;;  %v345_v10 = vld [vmem:[%s15023_s21 + $0x80] sm:$0xff]  ;;  %v346_v12 = vld [vmem:[%s15023_s21 + $0x88] sm:$0xff] }
  0x22   : > { %307 = vst.msk [vmem:[#allocation2 + $0x167] sm:$0x1] %vm296_vm2, %v14889_v1  ;;  %308 = vst.msk [vmem:[#allocation2 + $0x187] sm:$0x1] %vm296_vm2, %v14889_v1  ;;  %v402_v8 = vld [vmem:[#allocation2 + $0x7] sm:$0xff]  ;;  %v403_v9 = vld [vmem:[#allocation2 + $0xf] sm:$0xff] }
  0x23   : > { %309 = vst.msk [vmem:[#allocation2 + $0x1a7] sm:$0x1] %vm296_vm2, %v14889_v1  ;;  %310 = vst.msk [vmem:[#allocation2 + $0x1c7] sm:$0x1] %vm296_vm2, %v14889_v1  ;;  %13503 = vmatprep.mubr.msk.f32.mxu0 %vm361_vm4, %v402_v8  ;;  %v331_v13 = vld [vmem:[%s15023_s21 + $0x10] sm:$0xff]  ;;  %v332_v15 = vld [vmem:[%s15023_s21 + $0x18] sm:$0xff] }
  0x24   : > { %311 = vst.msk [vmem:[#allocation2 + $0x1e7] sm:$0x1] %vm296_vm2, %v14889_v1  ;;  %312 = vst.msk [vmem:[#allocation2 + $0x207] sm:$0x1] %vm296_vm2, %v14889_v1  ;;  %13504 = vmatmul.mubr.msk.f32.vlgmr.msra.gmra.mxu0 %vm361_vm4, %v403_v9  ;;  %v347_v14 = vld [vmem:[%s15023_s21 + $0x90] sm:$0xff]  ;;  %v348_v16 = vld [vmem:[%s15023_s21 + $0x98] sm:$0xff] }
  0x25   : > { %313 = vst.msk [vmem:[#allocation2 + $0x38] sm:$0x1] %vm296_vm2, %v14889_v1  ;;  %314 = vst.msk [vmem:[#allocation2 + $0x58] sm:$0x1] %vm296_vm2, %v14889_v1  ;;  %13602 = vmatpush3.msk.msra.mxu0 %vm531_vm0, %v14971_v3  ;;  %v333_v17 = vld [vmem:[%s15023_s21 + $0x20] sm:$0xff]  ;;  %v334_v19 = vld [vmem:[%s15023_s21 + $0x28] sm:$0xff] }
  0x26   : > { %315 = vst.msk [vmem:[#allocation2 + $0x78] sm:$0x1] %vm296_vm2, %v14889_v1  ;;  %316 = vst.msk [vmem:[#allocation2 + $0x98] sm:$0x1] %vm296_vm2, %v14889_v1  ;;  %v349_v18 = vld [vmem:[%s15023_s21 + $0xa0] sm:$0xff]  ;;  %v350_v20 = vld [vmem:[%s15023_s21 + $0xa8] sm:$0xff]  ;;  %13701 = vmatprep.subr.msk.mxu0 %vm531_vm0, %v15031_v7 }
  0x27   : > { %317 = vst.msk [vmem:[#allocation2 + $0xb8] sm:$0x1] %vm296_vm2, %v14889_v1  ;;  %318 = vst.msk [vmem:[#allocation2 + $0xd8] sm:$0x1] %vm296_vm2, %v14889_v1  ;;  %v335_v21 = vld [vmem:[%s15023_s21 + $0x30] sm:$0xff]  ;;  %v336_v23 = vld [vmem:[%s15023_s21 + $0x38] sm:$0xff] }
  0x28   : > { %319 = vst.msk [vmem:[#allocation2 + $0xf8] sm:$0x1] %vm296_vm2, %v14889_v1  ;;  %320 = vst.msk [vmem:[#allocation2 + $0x118] sm:$0x1] %vm296_vm2, %v14889_v1  ;;  %v351_v22 = vld [vmem:[%s15023_s21 + $0xb0] sm:$0xff]  ;;  %v352_v24 = vld [vmem:[%s15023_s21 + $0xb8] sm:$0xff] }
  0x29   : > { %321 = vst.msk [vmem:[#allocation2 + $0x138] sm:$0x1] %vm296_vm2, %v14889_v1  ;;  %322 = vst.msk [vmem:[#allocation2 + $0x158] sm:$0x1] %vm296_vm2, %v14889_v1  ;;  %v337_v25 = vld [vmem:[%s15023_s21 + $0x40] sm:$0xff]  ;;  %v338_v27 = vld [vmem:[%s15023_s21 + $0x48] sm:$0xff] }
  0x2a   : > { %323 = vst.msk [vmem:[#allocation2 + $0x178] sm:$0x1] %vm296_vm2, %v14889_v1  ;;  %324 = vst.msk [vmem:[#allocation2 + $0x198] sm:$0x1] %vm296_vm2, %v14889_v1  ;;  %v353_v26 = vld [vmem:[%s15023_s21 + $0xc0] sm:$0xff]  ;;  %v354_v28 = vld [vmem:[%s15023_s21 + $0xc8] sm:$0xff] }
  0x2b   : > { %325 = vst.msk [vmem:[#allocation2 + $0x1b8] sm:$0x1] %vm296_vm2, %v14889_v1  ;;  %326 = vst.msk [vmem:[#allocation2 + $0x1d8] sm:$0x1] %vm296_vm2, %v14889_v1  ;;  %v15080_v29 = vld [vmem:[%s19654_s2 + $0xc] sm:$0xf] }
  0x2c   : > { %327 = vst.msk [vmem:[#allocation2 + $0x1f8] sm:$0x1] %vm296_vm2, %v14889_v1  ;;  %328 = vst.msk [vmem:[#allocation2 + $0x218] sm:$0x1] %vm296_vm2, %v14889_v1  ;;  %v339_v34 = vld [vmem:[%s15023_s21 + $0x50] sm:$0xff]  ;;  %v340_v44 = vld [vmem:[%s15023_s21 + $0x58] sm:$0xff] }
  0x2d   : > { %290 = vst.msk [vmem:[#allocation2 + $0x17] sm:$0x3] %vm289_vm3, %v14889_v1  ;;  %294 = vst.msk [vmem:[#allocation2 + $0x237] sm:$0x3] %vm289_vm3, %v14889_v1  ;;  %v355_v35 = vld [vmem:[%s15023_s21 + $0xd0] sm:$0xff]  ;;  %v356_v45 = vld [vmem:[%s15023_s21 + $0xd8] sm:$0xff] }
  0x2e   : > { %376 = vst.msk [vmem:[#allocation2 + $0x108] sm:$0xff] %vm361_vm4, %v343_v4  ;;  %377 = vst.msk [vmem:[#allocation2 + $0x110] sm:$0xff] %vm361_vm4, %v344_v5  ;;  %v341_v46 = vld [vmem:[%s15023_s21 + $0x60] sm:$0xff]  ;;  %v342_v50 = vld [vmem:[%s15023_s21 + $0x68] sm:$0xff]  ;;  %s16306_s17 = sld [smem:[#allocation4]]  ;;  %vm4212_vm6 = vcmask 48128  }
  0x2f   : > { %362 = vst.msk [vmem:[#allocation2 + $0x28] sm:$0xff] %vm361_vm4, %v329_v6  ;;  %378 = vst.msk [vmem:[#allocation2 + $0x128] sm:$0xff] %vm361_vm4, %v345_v10  ;;  %v357_v48 = vld [vmem:[%s15023_s21 + $0xe0] sm:$0xff]  ;;  %v358_v51 = vld [vmem:[%s15023_s21 + $0xe8] sm:$0xff]  ;;  %s14890_s24 = smov 4   ;;  %s14891_s29 = smov 6  }
  0x30   : > { %363 = vst.msk [vmem:[#allocation2 + $0x30] sm:$0xff] %vm361_vm4, %v330_v11  ;;  %379 = vst.msk [vmem:[#allocation2 + $0x130] sm:$0xff] %vm361_vm4, %v346_v12  ;;  %v1182_v3 = vld [vmem:[#allocation2 + $0x9] sm:$0xff]  ;;  %v15232_v10 = vld [vmem:[%s19654_s2 + $0x18] sm:$0xf]  ;;  %s12308_s25 = sld [smem:[#allocation4 + $0x2]] }
  0x31   : > { %364 = vst.msk [vmem:[#allocation2 + $0x48] sm:$0xff] %vm361_vm4, %v331_v13  ;;  %380 = vst.msk [vmem:[#allocation2 + $0x148] sm:$0xff] %vm361_vm4, %v347_v14  ;;  %v792_v5 = vld [vmem:[#allocation2 + $0x8] sm:$0xff]  ;;  %v15246_v13 = vld [vmem:[%s19654_s2 + $0x14] sm:$0xf] }
  0x32   : > { %365 = vst.msk [vmem:[#allocation2 + $0x50] sm:$0xff] %vm361_vm4, %v332_v15  ;;  %381 = vst.msk [vmem:[#allocation2 + $0x150] sm:$0xff] %vm361_vm4, %v348_v16  ;;  %v359_v15 = vld [vmem:[%s15023_s21 + $0xf0] sm:$0xff]  ;;  %v360_v16 = vld [vmem:[%s15023_s21 + $0xf8] sm:$0xff] }
  0x33   : > { %366 = vst.msk [vmem:[#allocation2 + $0x68] sm:$0xff] %vm361_vm4, %v333_v17  ;;  %382 = vst.msk [vmem:[#allocation2 + $0x168] sm:$0xff] %vm361_vm4, %v349_v18 }
  0x34   : > { %367 = vst.msk [vmem:[#allocation2 + $0x70] sm:$0xff] %vm361_vm4, %v334_v19  ;;  %383 = vst.msk [vmem:[#allocation2 + $0x170] sm:$0xff] %vm361_vm4, %v350_v20  ;;  %v1183_v6 = vld [vmem:[#allocation2 + $0x11] sm:$0xff] }
  0x35   : > { %368 = vst.msk [vmem:[#allocation2 + $0x88] sm:$0xff] %vm361_vm4, %v335_v21  ;;  %384 = vst.msk [vmem:[#allocation2 + $0x188] sm:$0xff] %vm361_vm4, %v351_v22  ;;  %v15082_v30 = vld [vmem:[#allocation2 + $0x107] sm:$0xff]  ;;  %v15084_v31 = vld [vmem:[#allocation2 + $0x10f] sm:$0xff] }
  0x36   : > { %369 = vst.msk [vmem:[#allocation2 + $0x90] sm:$0xff] %vm361_vm4, %v336_v23  ;;  %385 = vst.msk [vmem:[#allocation2 + $0x190] sm:$0xff] %vm361_vm4, %v352_v24  ;;  %v15086_v32 = vld [vmem:[#allocation2 + $0x27] sm:$0xff]  ;;  %13527 = vmatprep.mubr.msk.f32.mxu1 %vm361_vm4, %v15082_v30  ;;  %v793_v9 = vld [vmem:[#allocation2 + $0x10] sm:$0xff] }
  0x37   : > { %370 = vst.msk [vmem:[#allocation2 + $0xa8] sm:$0xff] %vm361_vm4, %v337_v25  ;;  %386 = vst.msk [vmem:[#allocation2 + $0x1a8] sm:$0xff] %vm361_vm4, %v353_v26  ;;  %13506 = vmatprep.mubr.msk.f32.mxu0 %vm361_vm4, %v15086_v32  ;;  %v15095_v33 = vld [vmem:[#allocation2 + $0x127] sm:$0xff]  ;;  %13528 = vmatmul.mubr.msk.f32.vlgmr.msra.gmra.mxu1 %vm361_vm4, %v15084_v31  ;;  %v15101_v36 = vld [vmem:[#allocation2 + $0x2f] sm:$0xff] }
  0x38   : > { %371 = vst.msk [vmem:[#allocation2 + $0xb0] sm:$0xff] %vm361_vm4, %v338_v27  ;;  %387 = vst.msk [vmem:[#allocation2 + $0x1b0] sm:$0xff] %vm361_vm4, %v354_v28  ;;  %v15103_v37 = vld [vmem:[#allocation2 + $0x47] sm:$0xff]  ;;  %13552 = vmatpush3.msk.msra.mxu1 %vm531_vm0, %v14966_v2  ;;  %13530 = vmatprep.mubr.msk.f32.mxu1 %vm361_vm4, %v15095_v33  ;;  %v15111_v38 = vld [vmem:[#allocation2 + $0x12f] sm:$0xff] }
  0x39   : > { %372 = vst.msk [vmem:[#allocation2 + $0xc8] sm:$0xff] %vm361_vm4, %v339_v34  ;;  %388 = vst.msk [vmem:[#allocation2 + $0x1c8] sm:$0xff] %vm361_vm4, %v355_v35  ;;  %13507 = vmatmul.mubr.msk.f32.gmra.mxu0 %vm361_vm4, %v15101_v36  ;;  %v15115_v39 = vld [vmem:[#allocation2 + $0x147] sm:$0xff]  ;;  %13651 = vmatprep.subr.msk.mxu1 %vm531_vm0, %v15080_v29  ;;  %v15121_v40 = vld [vmem:[#allocation2 + $0x4f] sm:$0xff] }
  0x3a   : > { %13509 = vmatprep.mubr.msk.f32.mxu0 %vm361_vm4, %v15103_v37  ;;  %v15125_v41 = vld [vmem:[#allocation2 + $0x67] sm:$0xff]  ;;  %v15129_v42 = vld [vmem:[#allocation2 + $0x14f] sm:$0xff]  ;;  %373 = vst.msk [vmem:[#allocation2 + $0xd0] sm:$0xff] %vm361_vm4, %v340_v44  ;;  %389 = vst.msk [vmem:[#allocation2 + $0x1d0] sm:$0xff] %vm361_vm4, %v356_v45 }
  0x3b   : > { %13531 = vmatmul.mubr.msk.f32.gmra.mxu1 %vm361_vm4, %v15111_v38  ;;  %v15131_v43 = vld [vmem:[#allocation2 + $0x167] sm:$0xff]  ;;  %v15140_v47 = vld [vmem:[#allocation2 + $0x6f] sm:$0xff]  ;;  %374 = vst.msk [vmem:[#allocation2 + $0xe8] sm:$0xff] %vm361_vm4, %v341_v46  ;;  %390 = vst.msk [vmem:[#allocation2 + $0x1e8] sm:$0xff] %vm361_vm4, %v357_v48 }
  0x3c   : > { %13533 = vmatprep.mubr.msk.f32.mxu1 %vm361_vm4, %v15115_v39  ;;  %v15148_v49 = vld [vmem:[#allocation2 + $0x87] sm:$0xff]  ;;  %v15155_v52 = vld [vmem:[#allocation2 + $0x16f] sm:$0xff]  ;;  %375 = vst.msk [vmem:[#allocation2 + $0xf0] sm:$0xff] %vm361_vm4, %v342_v50  ;;  %391 = vst.msk [vmem:[#allocation2 + $0x1f0] sm:$0xff] %vm361_vm4, %v358_v51 }
  0x3d   : > { %13510 = vmatmul.mubr.msk.f32.gmra.mxu0 %vm361_vm4, %v15121_v40  ;;  %v15161_v53 = vld [vmem:[#allocation2 + $0x187] sm:$0xff]  ;;  %v15165_v54 = vld [vmem:[#allocation2 + $0x8f] sm:$0xff]  ;;  %392 = vst.msk [vmem:[#allocation2 + $0x208] sm:$0xff] %vm361_vm4, %v359_v15  ;;  %393 = vst.msk [vmem:[#allocation2 + $0x210] sm:$0xff] %vm361_vm4, %v360_v16 }
  0x3e   : > { %13512 = vmatprep.mubr.msk.f32.mxu0 %vm361_vm4, %v15125_v41  ;;  %v15169_v55 = vld [vmem:[#allocation2 + $0xa7] sm:$0xff]  ;;  %v15173_v56 = vld [vmem:[#allocation2 + $0x18f] sm:$0xff] }
  0x3f   : > { %13534 = vmatmul.mubr.msk.f32.gmra.mxu1 %vm361_vm4, %v15129_v42  ;;  %v15177_v57 = vld [vmem:[#allocation2 + $0x1a7] sm:$0xff]  ;;  %v15181_v58 = vld [vmem:[#allocation2 + $0xaf] sm:$0xff] }
  0x40   : > { %13536 = vmatprep.mubr.msk.f32.mxu1 %vm361_vm4, %v15131_v43  ;;  %v15185_v59 = vld [vmem:[#allocation2 + $0xc7] sm:$0xff]  ;;  %v15189_v60 = vld [vmem:[#allocation2 + $0x1af] sm:$0xff] }
  0x41   : > { %13513 = vmatmul.mubr.msk.f32.gmra.mxu0 %vm361_vm4, %v15140_v47  ;;  %v15193_v61 = vld [vmem:[#allocation2 + $0x1c7] sm:$0xff]  ;;  %v15197_v62 = vld [vmem:[#allocation2 + $0xcf] sm:$0xff] }
  0x42   : > { %13515 = vmatprep.mubr.msk.f32.mxu0 %vm361_vm4, %v15148_v49  ;;  %v15201_v63 = vld [vmem:[#allocation2 + $0xe7] sm:$0xff]  ;;  %v15205_v0 = vld [vmem:[#allocation2 + $0x1cf] sm:$0xff] }
  0x43   : > { %13537 = vmatmul.mubr.msk.f32.gmra.mxu1 %vm361_vm4, %v15155_v52  ;;  %v15209_v1 = vld [vmem:[#allocation2 + $0x1e7] sm:$0xff]  ;;  %v15213_v2 = vld [vmem:[#allocation2 + $0xef] sm:$0xff] }
  0x44   : > { %13539 = vmatprep.mubr.msk.f32.mxu1 %vm361_vm4, %v15161_v53  ;;  %v15219_v4 = vld [vmem:[#allocation2 + $0x1ef] sm:$0xff] }
  0x45   : > { %13516 = vmatmul.mubr.msk.f32.gmra.mxu0 %vm361_vm4, %v15165_v54  ;;  %19780 = vst [vmem:[#allocation6_spill] sm:$0xff] %v15219_v4  ;;  %v15226_v8 = vld [vmem:[#allocation2 + $0x29] sm:$0xff]  ;;  %v15241_v12 = vld [vmem:[#allocation2 + $0x31] sm:$0xff] }
  0x46   : > { %13518 = vmatprep.mubr.msk.f32.mxu0 %vm361_vm4, %v15169_v55  ;;  %19781 = vst [vmem:[#allocation7_spill] sm:$0xff] %v15226_v8  ;;  %v15235_v11 = vld [vmem:[#allocation2 + $0x28] sm:$0xff]  ;;  %19782 = vst [vmem:[#allocation8_spill] sm:$0xff] %v15241_v12  ;;  %v15271_v18 = vld [vmem:[#allocation2 + $0x51] sm:$0xff] }
  0x47   : > { %13540 = vmatmul.mubr.msk.f32.gmra.mxu1 %vm361_vm4, %v15173_v56  ;;  %v15249_v14 = vld [vmem:[#allocation2 + $0x49] sm:$0xff]  ;;  %19784 = vst [vmem:[#allocation10_spill] sm:$0xff] %v15271_v18  ;;  %v15287_v22 = vld [vmem:[#allocation2 + $0x71] sm:$0xff] }
  0x48   : > { %13542 = vmatprep.mubr.msk.f32.mxu1 %vm361_vm4, %v15177_v57  ;;  %19783 = vst [vmem:[#allocation9_spill] sm:$0xff] %v15249_v14  ;;  %v15265_v17 = vld [vmem:[#allocation2 + $0x48] sm:$0xff]  ;;  %v15279_v20 = vld [vmem:[#allocation2 + $0x50] sm:$0xff]  ;;  %19786 = vst [vmem:[#allocation12_spill] sm:$0xff] %v15287_v22 }
  0x49   : > { %13519 = vmatmul.mubr.msk.f32.gmra.mxu0 %vm361_vm4, %v15181_v58  ;;  %v15275_v19 = vld [vmem:[#allocation2 + $0x69] sm:$0xff]  ;;  %v15303_v26 = vld [vmem:[#allocation2 + $0x91] sm:$0xff] }
  0x4a   : > { %13521 = vmatprep.mubr.msk.f32.mxu0 %vm361_vm4, %v15185_v59  ;;  %19785 = vst [vmem:[#allocation11_spill] sm:$0xff] %v15275_v19  ;;  %v15283_v21 = vld [vmem:[#allocation2 + $0x68] sm:$0xff]  ;;  %v15295_v24 = vld [vmem:[#allocation2 + $0x70] sm:$0xff]  ;;  %19788 = vst [vmem:[#allocation14_spill] sm:$0xff] %v15303_v26 }
  0x4b   : > { %13543 = vmatmul.mubr.msk.f32.gmra.mxu1 %vm361_vm4, %v15189_v60  ;;  %v15291_v23 = vld [vmem:[#allocation2 + $0x89] sm:$0xff]  ;;  %v15319_v34 = vld [vmem:[#allocation2 + $0xb1] sm:$0xff] }
  0x4c   : > { %13545 = vmatprep.mubr.msk.f32.mxu1 %vm361_vm4, %v15193_v61  ;;  %19787 = vst [vmem:[#allocation13_spill] sm:$0xff] %v15291_v23  ;;  %v15299_v25 = vld [vmem:[#allocation2 + $0x88] sm:$0xff]  ;;  %v15311_v28 = vld [vmem:[#allocation2 + $0x90] sm:$0xff]  ;;  %19790 = vst [vmem:[#allocation16_spill] sm:$0xff] %v15319_v34 }
  0x4d   : > { %13522 = vmatmul.mubr.msk.f32.gmra.mxu0 %vm361_vm4, %v15197_v62  ;;  %v15307_v27 = vld [vmem:[#allocation2 + $0xa9] sm:$0xff]  ;;  %v15335_v46 = vld [vmem:[#allocation2 + $0xd1] sm:$0xff] }
  0x4e   : > { %13524 = vmatprep.mubr.msk.f32.mxu0 %vm361_vm4, %v15201_v63  ;;  %19789 = vst [vmem:[#allocation15_spill] sm:$0xff] %v15307_v27  ;;  %v15323_v35 = vld [vmem:[#allocation2 + $0xc9] sm:$0xff]  ;;  %19792 = vst [vmem:[#allocation18_spill] sm:$0xff] %v15335_v46  ;;  %v15367_v15 = vld [vmem:[#allocation2 + $0x111] sm:$0xff] }
  0x4f   : > { %13546 = vmatmul.mubr.msk.f32.gmra.mxu1 %vm361_vm4, %v15205_v0  ;;  %19791 = vst [vmem:[#allocation17_spill] sm:$0xff] %v15323_v35  ;;  %v15327_v44 = vld [vmem:[#allocation2 + $0xb0] sm:$0xff]  ;;  %v15331_v45 = vld [vmem:[#allocation2 + $0xc8] sm:$0xff]  ;;  %19796 = vst [vmem:[#allocation22_spill] sm:$0xff] %v15367_v15 }
  0x50   : > { %13548 = vmatprep.mubr.msk.f32.mxu1 %vm361_vm4, %v15209_v1  ;;  %v15339_v48 = vld [vmem:[#allocation2 + $0xe9] sm:$0xff] }
  0x51   : > { %13525 = vmatmul.mubr.msk.f32.gmra.mxu0 %vm361_vm4, %v15213_v2  ;;  %19793 = vst [vmem:[#allocation19_spill] sm:$0xff] %v15339_v48  ;;  %v15343_v50 = vld [vmem:[#allocation2 + $0xd0] sm:$0xff]  ;;  %v15347_v51 = vld [vmem:[#allocation2 + $0xe8] sm:$0xff] }
  0x52   : > { %13603 = vmatprep.mubr.msk.f32.mxu0 %vm361_vm4, %v1182_v3  ;;  %v15351_v3 = vld [vmem:[#allocation2 + $0xf1] sm:$0xff]  ;;  %v15371_v16 = vld [vmem:[#allocation2 + $0x129] sm:$0xff] }
  0x53   : > { %13549 = vmatmul.mubr.msk.f32.gmra.mxu1 %vm361_vm4, %v15219_v4  ;;  %19794 = vst [vmem:[#allocation20_spill] sm:$0xff] %v15351_v3  ;;  %19797 = vst [vmem:[#allocation23_spill] sm:$0xff] %v15371_v16  ;;  %v15485_v4 = vld [vmem:[#allocation2 + $0x1f0] sm:$0xff] }
  0x54   : > { %13553 = vmatprep.mubr.msk.f32.mxu1 %vm361_vm4, %v792_v5  ;;  %v15355_v5 = vld [vmem:[#allocation2 + $0x109] sm:$0xff] }
  0x55   : > { %13604 = vmatmul.mubr.msk.f32.vlgmr.msra.gmra.mxu0 %vm361_vm4, %v1183_v6  ;;  %19795 = vst [vmem:[#allocation21_spill] sm:$0xff] %v15355_v5  ;;  %v15359_v6 = vld [vmem:[#allocation2 + $0xf0] sm:$0xff] }
  0x56   : > { %13702 = vmatpush3.msk.msra.mxu0 %vm531_vm0, %v15031_v7  ;;  %13606 = vmatprep.mubr.msk.f32.mxu0 %vm361_vm4, %v15226_v8  ;;  %v15259_v7 = vld [vmem:[#allocation2 + $0x30] sm:$0xff] }
  0x57   : > { %13554 = vmatmul.mubr.msk.f32.vlgmr.msra.gmra.mxu1 %vm361_vm4, %v793_v9  ;;  %13801 = vmatprep.subr.msk.mxu0 %vm531_vm0, %v15232_v10  ;;  %v15363_v9 = vld [vmem:[#allocation2 + $0x108] sm:$0xff]  ;;  %v15471_v8 = vld [vmem:[#allocation2 + $0x1d0] sm:$0xff] }
  0x58   : > { %13652 = vmatpush3.msk.msra.mxu1 %vm531_vm0, %v15080_v29  ;;  %13556 = vmatprep.mubr.msk.f32.mxu1 %vm361_vm4, %v15235_v11  ;;  %v15315_v29 = vld [vmem:[#allocation2 + $0xa8] sm:$0xff] }
  0x59   : > { %13607 = vmatmul.mubr.msk.f32.gmra.mxu0 %vm361_vm4, %v15241_v12  ;;  %13751 = vmatprep.subr.msk.mxu1 %vm531_vm0, %v15246_v13  ;;  %v15467_v12 = vld [vmem:[#allocation2 + $0x1e9] sm:$0xff] }
  0x5a   : > { %13609 = vmatprep.mubr.msk.f32.mxu0 %vm361_vm4, %v15249_v14  ;;  %v15455_v14 = vld [vmem:[#allocation2 + $0x1b0] sm:$0xff]  ;;  %19808 = vst [vmem:[#allocation34_spill] sm:$0xff] %v15467_v12 }
  0x5b   : > { %13557 = vmatmul.mubr.msk.f32.gmra.mxu1 %vm361_vm4, %v15259_v7 }
  0x5c   : > { %13559 = vmatprep.mubr.msk.f32.mxu1 %vm361_vm4, %v15265_v17 }
  0x5d   : > { %13610 = vmatmul.mubr.msk.f32.gmra.mxu0 %vm361_vm4, %v15271_v18  ;;  %v15451_v18 = vld [vmem:[#allocation2 + $0x1c9] sm:$0xff] }
  0x5e   : > { %13612 = vmatprep.mubr.msk.f32.mxu0 %vm361_vm4, %v15275_v19  ;;  %v15439_v19 = vld [vmem:[#allocation2 + $0x190] sm:$0xff]  ;;  %19807 = vst [vmem:[#allocation33_spill] sm:$0xff] %v15451_v18 }
  0x5f   : > { %13560 = vmatmul.mubr.msk.f32.gmra.mxu1 %vm361_vm4, %v15279_v20 }
  0x60   : > { %13562 = vmatprep.mubr.msk.f32.mxu1 %vm361_vm4, %v15283_v21 }
  0x61   : > { %13613 = vmatmul.mubr.msk.f32.gmra.mxu0 %vm361_vm4, %v15287_v22  ;;  %v15435_v22 = vld [vmem:[#allocation2 + $0x1a9] sm:$0xff] }
  0x62   : > { %13615 = vmatprep.mubr.msk.f32.mxu0 %vm361_vm4, %v15291_v23  ;;  %v15423_v23 = vld [vmem:[#allocation2 + $0x170] sm:$0xff]  ;;  %19805 = vst [vmem:[#allocation31_spill] sm:$0xff] %v15435_v22 }
  0x63   : > { %13563 = vmatmul.mubr.msk.f32.gmra.mxu1 %vm361_vm4, %v15295_v24 }
  0x64   : > { %13565 = vmatprep.mubr.msk.f32.mxu1 %vm361_vm4, %v15299_v25 }
  0x65   : > { %13616 = vmatmul.mubr.msk.f32.gmra.mxu0 %vm361_vm4, %v15303_v26  ;;  %v15419_v26 = vld [vmem:[#allocation2 + $0x189] sm:$0xff] }
  0x66   : > { %13618 = vmatprep.mubr.msk.f32.mxu0 %vm361_vm4, %v15307_v27  ;;  %v15407_v27 = vld [vmem:[#allocation2 + $0x150] sm:$0xff]  ;;  %19803 = vst [vmem:[#allocation29_spill] sm:$0xff] %v15419_v26 }
  0x67   : > { %13566 = vmatmul.mubr.msk.f32.gmra.mxu1 %vm361_vm4, %v15311_v28 }
  0x68   : > { %13568 = vmatprep.mubr.msk.f32.mxu1 %vm361_vm4, %v15315_v29 }
  0x69   : > { %13619 = vmatmul.mubr.msk.f32.gmra.mxu0 %vm361_vm4, %v15319_v34  ;;  %v15403_v34 = vld [vmem:[#allocation2 + $0x169] sm:$0xff] }
  0x6a   : > { %13621 = vmatprep.mubr.msk.f32.mxu0 %vm361_vm4, %v15323_v35  ;;  %v15391_v35 = vld [vmem:[#allocation2 + $0x130] sm:$0xff]  ;;  %19801 = vst [vmem:[#allocation27_spill] sm:$0xff] %v15403_v34 }
  0x6b   : > { %13569 = vmatmul.mubr.msk.f32.gmra.mxu1 %vm361_vm4, %v15327_v44 }
  0x6c   : > { %13571 = vmatprep.mubr.msk.f32.mxu1 %vm361_vm4, %v15331_v45 }
  0x6d   : > { %13622 = vmatmul.mubr.msk.f32.gmra.mxu0 %vm361_vm4, %v15335_v46  ;;  %v15387_v46 = vld [vmem:[#allocation2 + $0x149] sm:$0xff] }
  0x6e   : > { %13624 = vmatprep.mubr.msk.f32.mxu0 %vm361_vm4, %v15339_v48  ;;  %v15375_v48 = vld [vmem:[#allocation2 + $0x110] sm:$0xff]  ;;  %19799 = vst [vmem:[#allocation25_spill] sm:$0xff] %v15387_v46 }
  0x6f   : > { %13572 = vmatmul.mubr.msk.f32.gmra.mxu1 %vm361_vm4, %v15343_v50 }
  0x70   : > { %13574 = vmatprep.mubr.msk.f32.mxu1 %vm361_vm4, %v15347_v51 }
  0x71   : > { %13625 = vmatmul.mubr.msk.f32.gmra.mxu0 %vm361_vm4, %v15351_v3  ;;  %v15379_v3 = vld [vmem:[#allocation2 + $0x128] sm:$0xff] }
  0x72   : > { %13627 = vmatprep.mubr.msk.f32.mxu0 %vm361_vm4, %v15355_v5  ;;  %v15383_v5 = vld [vmem:[#allocation2 + $0x131] sm:$0xff] }
  0x73   : > { %13575 = vmatmul.mubr.msk.f32.gmra.mxu1 %vm361_vm4, %v15359_v6  ;;  %19798 = vst [vmem:[#allocation24_spill] sm:$0xff] %v15383_v5 }
  0x74   : > { %13577 = vmatprep.mubr.msk.f32.mxu1 %vm361_vm4, %v15363_v9 }
  0x75   : > { %13628 = vmatmul.mubr.msk.f32.gmra.mxu0 %vm361_vm4, %v15367_v15  ;;  %v15395_v15 = vld [vmem:[#allocation2 + $0x148] sm:$0xff] }
  0x76   : > { %13630 = vmatprep.mubr.msk.f32.mxu0 %vm361_vm4, %v15371_v16  ;;  %v15399_v16 = vld [vmem:[#allocation2 + $0x151] sm:$0xff] }
  0x77   : > { %13578 = vmatmul.mubr.msk.f32.gmra.mxu1 %vm361_vm4, %v15375_v48  ;;  %19800 = vst [vmem:[#allocation26_spill] sm:$0xff] %v15399_v16 }
  0x78   : > { %13580 = vmatprep.mubr.msk.f32.mxu1 %vm361_vm4, %v15379_v3 }
  0x79   : > { %13631 = vmatmul.mubr.msk.f32.gmra.mxu0 %vm361_vm4, %v15383_v5  ;;  %v15411_v5 = vld [vmem:[#allocation2 + $0x168] sm:$0xff] }
  0x7a   : > { %13633 = vmatprep.mubr.msk.f32.mxu0 %vm361_vm4, %v15387_v46  ;;  %v15415_v46 = vld [vmem:[#allocation2 + $0x171] sm:$0xff] }
  0x7b   : > { %13581 = vmatmul.mubr.msk.f32.gmra.mxu1 %vm361_vm4, %v15391_v35  ;;  %19802 = vst [vmem:[#allocation28_spill] sm:$0xff] %v15415_v46 }
  0x7c   : > { %13583 = vmatprep.mubr.msk.f32.mxu1 %vm361_vm4, %v15395_v15 }
  0x7d   : > { %13634 = vmatmul.mubr.msk.f32.gmra.mxu0 %vm361_vm4, %v15399_v16  ;;  %v15427_v16 = vld [vmem:[#allocation2 + $0x188] sm:$0xff] }
  0x7e   : > { %13636 = vmatprep.mubr.msk.f32.mxu0 %vm361_vm4, %v15403_v34  ;;  %v15431_v34 = vld [vmem:[#allocation2 + $0x191] sm:$0xff] }
  0x7f   : > { %13584 = vmatmul.mubr.msk.f32.gmra.mxu1 %vm361_vm4, %v15407_v27  ;;  %19804 = vst [vmem:[#allocation30_spill] sm:$0xff] %v15431_v34 }
  0x80   : > { %13586 = vmatprep.mubr.msk.f32.mxu1 %vm361_vm4, %v15411_v5 }
  0x81   : > { %13637 = vmatmul.mubr.msk.f32.gmra.mxu0 %vm361_vm4, %v15415_v46  ;;  %v15443_v46 = vld [vmem:[#allocation2 + $0x1a8] sm:$0xff] }
  0x82   : > { %13639 = vmatprep.mubr.msk.f32.mxu0 %vm361_vm4, %v15419_v26  ;;  %v15447_v26 = vld [vmem:[#allocation2 + $0x1b1] sm:$0xff] }
  0x83   : > { %13587 = vmatmul.mubr.msk.f32.gmra.mxu1 %vm361_vm4, %v15423_v23  ;;  %19806 = vst [vmem:[#allocation32_spill] sm:$0xff] %v15447_v26 }
  0x84   : > { %13589 = vmatprep.mubr.msk.f32.mxu1 %vm361_vm4, %v15427_v16 }
  0x85   : > { %13640 = vmatmul.mubr.msk.f32.gmra.mxu0 %vm361_vm4, %v15431_v34  ;;  %v15459_v34 = vld [vmem:[#allocation2 + $0x1c8] sm:$0xff] }
  0x86   : > { %13642 = vmatprep.mubr.msk.f32.mxu0 %vm361_vm4, %v15435_v22  ;;  %v15463_v22 = vld [vmem:[#allocation2 + $0x1d1] sm:$0xff] }
  0x87   : > { %13590 = vmatmul.mubr.msk.f32.gmra.mxu1 %vm361_vm4, %v15439_v19 }
  0x88   : > { %13592 = vmatprep.mubr.msk.f32.mxu1 %vm361_vm4, %v15443_v46 }
  0x89   : > { %13643 = vmatmul.mubr.msk.f32.gmra.mxu0 %vm361_vm4, %v15447_v26  ;;  %v15475_v26 = vld [vmem:[#allocation2 + $0x1e8] sm:$0xff] }
  0x8a   : > { %13645 = vmatprep.mubr.msk.f32.mxu0 %vm361_vm4, %v15451_v18  ;;  %v15479_v18 = vld [vmem:[#allocation2 + $0x1f1] sm:$0xff] }
  0x8b   : > { %13593 = vmatmul.mubr.msk.f32.gmra.mxu1 %vm361_vm4, %v15455_v14 }
  0x8c   : > { %13595 = vmatprep.mubr.msk.f32.mxu1 %vm361_vm4, %v15459_v34 }
  0x8d   : > { %13646 = vmatmul.mubr.msk.f32.gmra.mxu0 %vm361_vm4, %v15463_v22 }
  0x8e   : > { %13648 = vmatprep.mubr.msk.f32.mxu0 %vm361_vm4, %v15467_v12  ;;  %v15498_v12 = vld [vmem:[%s19654_s2 + $0x20] sm:$0xf] }
  0x8f   : > { %13596 = vmatmul.mubr.msk.f32.gmra.mxu1 %vm361_vm4, %v15471_v8 }
  0x90   : > { %13598 = vmatprep.mubr.msk.f32.mxu1 %vm361_vm4, %v15475_v26 }
  0x91   : > { %13649 = vmatmul.mubr.msk.f32.gmra.mxu0 %vm361_vm4, %v15479_v18 }
  0x92   : > { %13703 = vmatprep.mubr.msk.f32.mxu0 %vm361_vm4, %v15235_v11  ;;  %v15509_v11 = vld [vmem:[%s19654_s2 + $0x1c] sm:$0xf] }
  0x93   : > { %13599 = vmatmul.mubr.msk.f32.gmra.mxu1 %vm361_vm4, %v15485_v4 }
  0x94   : > { %13653 = vmatprep.mubr.msk.f32.mxu1 %vm361_vm4, %v15086_v32  ;;  %v15623_v32 = vld [vmem:[#allocation2 + $0x208] sm:$0xff] }
  0x95   : > { %13704 = vmatmul.mubr.msk.f32.vlgmr.msra.gmra.mxu0 %vm361_vm4, %v15259_v7  ;;  %v19817_v7 = vld [vmem:[#allocation13_spill] sm:$0xff] }
  0x96   : > { %13802 = vmatpush3.msk.msra.mxu0 %vm531_vm0, %v15232_v10  ;;  %13706 = vmatprep.mubr.msk.f32.mxu0 %vm361_vm4, %v15265_v17  ;;  %v19810_v10 = vld [vmem:[#allocation6_spill] sm:$0xff] }
  0x97   : > { %13654 = vmatmul.mubr.msk.f32.vlgmr.msra.gmra.mxu1 %vm361_vm4, %v15101_v36  ;;  %13901 = vmatprep.subr.msk.mxu0 %vm531_vm0, %v15498_v12  ;;  %v15629_v36 = vld [vmem:[#allocation2 + $0x207] sm:$0xff] }
  0x98   : > { %13752 = vmatpush3.msk.msra.mxu1 %vm531_vm0, %v15246_v13  ;;  %13656 = vmatprep.mubr.msk.f32.mxu1 %vm361_vm4, %v15103_v37  ;;  %v15639_v13 = vld [vmem:[#allocation2 + $0x20f] sm:$0xff] }
  0x99   : > { %13707 = vmatmul.mubr.msk.f32.gmra.mxu0 %vm361_vm4, %v15279_v20  ;;  %13851 = vmatprep.subr.msk.mxu1 %vm531_vm0, %v15509_v11 }
  0x9a   : > { %13709 = vmatprep.mubr.msk.f32.mxu0 %vm361_vm4, %v15283_v21 }
  0x9b   : > { %13657 = vmatmul.mubr.msk.f32.gmra.mxu1 %vm361_vm4, %v15121_v40 }
  0x9c   : > { %13659 = vmatprep.mubr.msk.f32.mxu1 %vm361_vm4, %v15125_v41 }
  0x9d   : > { %13710 = vmatmul.mubr.msk.f32.gmra.mxu0 %vm361_vm4, %v15295_v24 }
  0x9e   : > { %13712 = vmatprep.mubr.msk.f32.mxu0 %vm361_vm4, %v15299_v25 }
  0x9f   : > { %13660 = vmatmul.mubr.msk.f32.gmra.mxu1 %vm361_vm4, %v15140_v47 }
  0xa0   : > { %13662 = vmatprep.mubr.msk.f32.mxu1 %vm361_vm4, %v15148_v49 }
  0xa1   : > { %13713 = vmatmul.mubr.msk.f32.gmra.mxu0 %vm361_vm4, %v15311_v28 }
  0xa2   : > { %13715 = vmatprep.mubr.msk.f32.mxu0 %vm361_vm4, %v15315_v29 }
  0xa3   : > { %13663 = vmatmul.mubr.msk.f32.gmra.mxu1 %vm361_vm4, %v15165_v54 }
  0xa4   : > { %13665 = vmatprep.mubr.msk.f32.mxu1 %vm361_vm4, %v15169_v55 }
  0xa5   : > { %13716 = vmatmul.mubr.msk.f32.gmra.mxu0 %vm361_vm4, %v15327_v44 }
  0xa6   : > { %13718 = vmatprep.mubr.msk.f32.mxu0 %vm361_vm4, %v15331_v45 }
  0xa7   : > { %13666 = vmatmul.mubr.msk.f32.gmra.mxu1 %vm361_vm4, %v15181_v58 }
  0xa8   : > { %13668 = vmatprep.mubr.msk.f32.mxu1 %vm361_vm4, %v15185_v59 }
  0xa9   : > { %13719 = vmatmul.mubr.msk.f32.gmra.mxu0 %vm361_vm4, %v15343_v50 }
  0xaa   : > { %13721 = vmatprep.mubr.msk.f32.mxu0 %vm361_vm4, %v15347_v51 }
  0xab   : > { %13669 = vmatmul.mubr.msk.f32.gmra.mxu1 %vm361_vm4, %v15197_v62 }
  0xac   : > { %13671 = vmatprep.mubr.msk.f32.mxu1 %vm361_vm4, %v15201_v63 }
  0xad   : > { %13722 = vmatmul.mubr.msk.f32.gmra.mxu0 %vm361_vm4, %v15359_v6 }
  0xae   : > { %13724 = vmatprep.mubr.msk.f32.mxu0 %vm361_vm4, %v15363_v9 }
  0xaf   : > { %13672 = vmatmul.mubr.msk.f32.gmra.mxu1 %vm361_vm4, %v15213_v2 }
  0xb0   : > { %13674 = vmatprep.mubr.msk.f32.mxu1 %vm361_vm4, %v15082_v30 }
  0xb1   : > { %13725 = vmatmul.mubr.msk.f32.gmra.mxu0 %vm361_vm4, %v15375_v48 }
  0xb2   : > { %13727 = vmatprep.mubr.msk.f32.mxu0 %vm361_vm4, %v15379_v3 }
  0xb3   : > { %13675 = vmatmul.mubr.msk.f32.gmra.mxu1 %vm361_vm4, %v15084_v31 }
  0xb4   : > { %13677 = vmatprep.mubr.msk.f32.mxu1 %vm361_vm4, %v15095_v33 }
  0xb5   : > { %13728 = vmatmul.mubr.msk.f32.gmra.mxu0 %vm361_vm4, %v15391_v35 }
  0xb6   : > { %13730 = vmatprep.mubr.msk.f32.mxu0 %vm361_vm4, %v15395_v15 }
  0xb7   : > { %13678 = vmatmul.mubr.msk.f32.gmra.mxu1 %vm361_vm4, %v15111_v38 }
  0xb8   : > { %13680 = vmatprep.mubr.msk.f32.mxu1 %vm361_vm4, %v15115_v39 }
  0xb9   : > { %13731 = vmatmul.mubr.msk.f32.gmra.mxu0 %vm361_vm4, %v15407_v27 }
  0xba   : > { %13733 = vmatprep.mubr.msk.f32.mxu0 %vm361_vm4, %v15411_v5 }
  0xbb   : > { %13681 = vmatmul.mubr.msk.f32.gmra.mxu1 %vm361_vm4, %v15129_v42 }
  0xbc   : > { %13683 = vmatprep.mubr.msk.f32.mxu1 %vm361_vm4, %v15131_v43 }
  0xbd   : > { %13734 = vmatmul.mubr.msk.f32.gmra.mxu0 %vm361_vm4, %v15423_v23 }
  0xbe   : > { %13736 = vmatprep.mubr.msk.f32.mxu0 %vm361_vm4, %v15427_v16  ;;  %v19835_v16 = vld [vmem:[#allocation29_spill] sm:$0xff] }
  0xbf   : > { %13684 = vmatmul.mubr.msk.f32.gmra.mxu1 %vm361_vm4, %v15155_v52 }
  0xc0   : > { %13686 = vmatprep.mubr.msk.f32.mxu1 %vm361_vm4, %v15161_v53 }
  0xc1   : > { %13737 = vmatmul.mubr.msk.f32.gmra.mxu0 %vm361_vm4, %v15439_v19  ;;  %v19828_v19 = vld [vmem:[#allocation24_spill] sm:$0xff] }
  0xc2   : > { %13739 = vmatprep.mubr.msk.f32.mxu0 %vm361_vm4, %v15443_v46 }
  0xc3   : > { %13687 = vmatmul.mubr.msk.f32.gmra.mxu1 %vm361_vm4, %v15173_v56 }
  0xc4   : > { %13689 = vmatprep.mubr.msk.f32.mxu1 %vm361_vm4, %v15177_v57 }
  0xc5   : > { %13740 = vmatmul.mubr.msk.f32.gmra.mxu0 %vm361_vm4, %v15455_v14  ;;  %v19812_v14 = vld [vmem:[#allocation8_spill] sm:$0xff] }
  0xc6   : > { %13742 = vmatprep.mubr.msk.f32.mxu0 %vm361_vm4, %v15459_v34  ;;  %v19832_v34 = vld [vmem:[#allocation27_spill] sm:$0xff] }
  0xc7   : > { %13690 = vmatmul.mubr.msk.f32.gmra.mxu1 %vm361_vm4, %v15189_v60 }
  0xc8   : > { %13692 = vmatprep.mubr.msk.f32.mxu1 %vm361_vm4, %v15193_v61 }
  0xc9   : > { %13743 = vmatmul.mubr.msk.f32.gmra.mxu0 %vm361_vm4, %v15471_v8  ;;  %v15633_v8 = vld [vmem:[#allocation2 + $0x210] sm:$0xff] }
  0xca   : > { %13745 = vmatprep.mubr.msk.f32.mxu0 %vm361_vm4, %v15475_v26  ;;  %19809 = vst [vmem:[#allocation35_spill] sm:$0xff] %v15633_v8 }
  0xcb   : > { %13693 = vmatmul.mubr.msk.f32.gmra.mxu1 %vm361_vm4, %v15205_v0 }
  0xcc   : > { %13695 = vmatprep.mubr.msk.f32.mxu1 %vm361_vm4, %v15209_v1 }
  0xcd   : > { %13746 = vmatmul.mubr.msk.f32.gmra.mxu0 %vm361_vm4, %v15485_v4  ;;  %v19811_v4 = vld [vmem:[#allocation7_spill] sm:$0xff] }
  0xce   : > { %13748 = vmatprep.mubr.msk.f32.mxu0 %vm361_vm4, %v15623_v32 }
  0xcf   : > { %13696 = vmatmul.mubr.msk.f32.gmra.mxu1 %vm361_vm4, %v19810_v10 }
  0xd0   : > { %13698 = vmatprep.mubr.msk.f32.mxu1 %vm361_vm4, %v15629_v36 }
  0xd1   : > { %13749 = vmatmul.mubr.msk.f32.gmra.mxu0 %vm361_vm4, %v15633_v8 }
  0xd2   : > { %13803 = vmatprep.mubr.msk.f32.mxu0 %vm361_vm4, %v15103_v37  ;;  %v19813_v37 = vld [vmem:[#allocation9_spill] sm:$0xff] }
  0xd3   : > { %13699 = vmatmul.mubr.msk.f32.gmra.mxu1 %vm361_vm4, %v15639_v13 }
  0xd4   : > { %13753 = vmatprep.mubr.msk.f32.mxu1 %vm361_vm4, %v19811_v4 }
  0xd5   : > { %13804 = vmatmul.mubr.msk.f32.vlgmr.msra.gmra.mxu0 %vm361_vm4, %v15121_v40  ;;  %v19814_v40 = vld [vmem:[#allocation10_spill] sm:$0xff] }
  0xd6   : > { %13902 = vmatpush3.msk.msra.mxu0 %vm531_vm0, %v15498_v12  ;;  %13806 = vmatprep.mubr.msk.f32.mxu0 %vm361_vm4, %v15125_v41  ;;  %v19815_v12 = vld [vmem:[#allocation11_spill] sm:$0xff]  ;;  %v19816_v41 = vld [vmem:[#allocation12_spill] sm:$0xff] }
  0xd7   : > { %13754 = vmatmul.mubr.msk.f32.vlgmr.msra.gmra.mxu1 %vm361_vm4, %v19812_v14 }
  0xd8   : > { %13852 = vmatpush3.msk.msra.mxu1 %vm531_vm0, %v15509_v11  ;;  %13756 = vmatprep.mubr.msk.f32.mxu1 %vm361_vm4, %v19813_v37 }
  0xd9   : > { %13807 = vmatmul.mubr.msk.f32.gmra.mxu0 %vm361_vm4, %v15140_v47  ;;  %v19818_v47 = vld [vmem:[#allocation14_spill] sm:$0xff] }
  0xda   : > { %13809 = vmatprep.mubr.msk.f32.mxu0 %vm361_vm4, %v15148_v49  ;;  %v19819_v49 = vld [vmem:[#allocation15_spill] sm:$0xff] }
  0xdb   : > { %13757 = vmatmul.mubr.msk.f32.gmra.mxu1 %vm361_vm4, %v19814_v40 }
  0xdc   : > { %13759 = vmatprep.mubr.msk.f32.mxu1 %vm361_vm4, %v19815_v12 }
  0xdd   : > { %13810 = vmatmul.mubr.msk.f32.gmra.mxu0 %vm361_vm4, %v15165_v54  ;;  %v19820_v54 = vld [vmem:[#allocation16_spill] sm:$0xff] }
  0xde   : > { %13812 = vmatprep.mubr.msk.f32.mxu0 %vm361_vm4, %v15169_v55  ;;  %v19821_v55 = vld [vmem:[#allocation17_spill] sm:$0xff] }
  0xdf   : > { %13760 = vmatmul.mubr.msk.f32.gmra.mxu1 %vm361_vm4, %v19816_v41 }
  0xe0   : > { %13762 = vmatprep.mubr.msk.f32.mxu1 %vm361_vm4, %v19817_v7 }
  0xe1   : > { %13813 = vmatmul.mubr.msk.f32.gmra.mxu0 %vm361_vm4, %v15181_v58  ;;  %v19822_v58 = vld [vmem:[#allocation18_spill] sm:$0xff] }
  0xe2   : > { %13815 = vmatprep.mubr.msk.f32.mxu0 %vm361_vm4, %v15185_v59  ;;  %v19823_v59 = vld [vmem:[#allocation19_spill] sm:$0xff] }
  0xe3   : > { %13763 = vmatmul.mubr.msk.f32.gmra.mxu1 %vm361_vm4, %v19818_v47 }
  0xe4   : > { %13765 = vmatprep.mubr.msk.f32.mxu1 %vm361_vm4, %v19819_v49 }
  0xe5   : > { %13816 = vmatmul.mubr.msk.f32.gmra.mxu0 %vm361_vm4, %v15197_v62  ;;  %v19824_v62 = vld [vmem:[#allocation20_spill] sm:$0xff] }
  0xe6   : > { %13818 = vmatprep.mubr.msk.f32.mxu0 %vm361_vm4, %v15201_v63  ;;  %v19825_v63 = vld [vmem:[#allocation21_spill] sm:$0xff] }
  0xe7   : > { %13766 = vmatmul.mubr.msk.f32.gmra.mxu1 %vm361_vm4, %v19820_v54 }
  0xe8   : > { %13768 = vmatprep.mubr.msk.f32.mxu1 %vm361_vm4, %v19821_v55 }
  0xe9   : > { %13819 = vmatmul.mubr.msk.f32.gmra.mxu0 %vm361_vm4, %v15213_v2  ;;  %v19826_v2 = vld [vmem:[#allocation22_spill] sm:$0xff] }
  0xea   : > { %13821 = vmatprep.mubr.msk.f32.mxu0 %vm361_vm4, %v15082_v30  ;;  %v15711_v30 = vpop.f32.mrf.mxu0 }
  0xeb   : > { %13769 = vmatmul.mubr.msk.f32.gmra.mxu1 %vm361_vm4, %v19822_v58 }
  0xec   : > { %13771 = vmatprep.mubr.msk.f32.mxu1 %vm361_vm4, %v19823_v59 }
  0xed   : > { %13822 = vmatmul.mubr.msk.f32.gmra.mxu0 %vm361_vm4, %v15084_v31  ;;  %v19827_v31 = vld [vmem:[#allocation23_spill] sm:$0xff] }
  0xee   : > { %13824 = vmatprep.mubr.msk.f32.mxu0 %vm361_vm4, %v15095_v33  ;;  %v15721_v33 = vpop.f32.mrf.mxu0 }
  0xef   : > { %13772 = vmatmul.mubr.msk.f32.gmra.mxu1 %vm361_vm4, %v19824_v62 }
  0xf0   : > { %13774 = vmatprep.mubr.msk.f32.mxu1 %vm361_vm4, %v19825_v63 }
  0xf1   : > { %13825 = vmatmul.mubr.msk.f32.gmra.mxu0 %vm361_vm4, %v15111_v38 }
  0xf2   : > { %13827 = vmatprep.mubr.msk.f32.mxu0 %vm361_vm4, %v15115_v39  ;;  %v19829_v39 = vld [vmem:[#allocation25_spill] sm:$0xff] }
  0xf3   : > { %13775 = vmatmul.mubr.msk.f32.gmra.mxu1 %vm361_vm4, %v19826_v2 }
  0xf4   : > { %13777 = vmatprep.mubr.msk.f32.mxu1 %vm361_vm4, %v19827_v31 }
  0xf5   : > { %13828 = vmatmul.mubr.msk.f32.gmra.mxu0 %vm361_vm4, %v15129_v42 }
  0xf6   : > { %13830 = vmatprep.mubr.msk.f32.mxu0 %vm361_vm4, %v15131_v43  ;;  %v19831_v43 = vld [vmem:[#allocation26_spill] sm:$0xff] }
  0xf7   : > { %v15725_v38 = vpop.f32.mrf.mxu1  ;;  %13778 = vmatmul.mubr.msk.f32.gmra.mxu1 %vm361_vm4, %v19828_v19  ;;  %v19838_v19 = vld [vmem:[#allocation31_spill] sm:$0xff] }
  0xf8   : > { %13780 = vmatprep.mubr.msk.f32.mxu1 %vm361_vm4, %v19829_v39 }
  0xf9   : > { %v15731_v23 = vpop.f32.mrf.mxu1  ;;  %v15733_v26 = vpop.f32.mrf.mxu0  ;;  %13831 = vmatmul.mubr.msk.f32.gmra.mxu0 %vm361_vm4, %v15155_v52 }
  0xfa   : > { %19830 = vst [vmem:[#allocation6_spill] sm:$0xff] %v15731_v23  ;;  %13833 = vmatprep.mubr.msk.f32.mxu0 %vm361_vm4, %v15161_v53  ;;  %v19834_v53 = vld [vmem:[#allocation28_spill] sm:$0xff] }
  0xfb   : > { %v15739_v42 = vpop.f32.mrf.mxu1  ;;  %13781 = vmatmul.mubr.msk.f32.gmra.mxu1 %vm361_vm4, %v19831_v43  ;;  %v15743_v27 = vpop.f32.mrf.mxu0 }
  0xfc   : > { %13783 = vmatprep.mubr.msk.f32.mxu1 %vm361_vm4, %v19832_v34 }
  0xfd   : > { %v15747_v46 = vpop.f32.mrf.mxu1  ;;  %v15749_v5 = vpop.f32.mrf.mxu0  ;;  %13834 = vmatmul.mubr.msk.f32.gmra.mxu0 %vm361_vm4, %v15173_v56 }
  0xfe   : > { %19833 = vst [vmem:[#allocation7_spill] sm:$0xff] %v15747_v46  ;;  %13836 = vmatprep.mubr.msk.f32.mxu0 %vm361_vm4, %v15177_v57  ;;  %v19837_v57 = vld [vmem:[#allocation30_spill] sm:$0xff] }
  0xff   : > { %v15755_v52 = vpop.f32.mrf.mxu1  ;;  %13784 = vmatmul.mubr.msk.f32.gmra.mxu1 %vm361_vm4, %v19834_v53  ;;  %v15759_v15 = vpop.f32.mrf.mxu0  ;;  %v19841_v53 = vld [vmem:[#allocation33_spill] sm:$0xff] }
 0x100   : > { %13786 = vmatprep.mubr.msk.f32.mxu1 %vm361_vm4, %v19835_v16 }
 0x101   : > { %v15763_v11 = vpop.f32.mrf.mxu1  ;;  %v15765_v4 = vpop.f32.mrf.mxu0  ;;  %13837 = vmatmul.mubr.msk.f32.gmra.mxu0 %vm361_vm4, %v15189_v60 }
 0x102   : > { %19836 = vst [vmem:[#allocation8_spill] sm:$0xff] %v15763_v11  ;;  %13839 = vmatprep.mubr.msk.f32.mxu0 %vm361_vm4, %v15193_v61  ;;  %v19840_v61 = vld [vmem:[#allocation32_spill] sm:$0xff] }
 0x103   : > { %v15771_v56 = vpop.f32.mrf.mxu1  ;;  %13787 = vmatmul.mubr.msk.f32.gmra.mxu1 %vm361_vm4, %v19837_v57  ;;  %v15775_v14 = vpop.f32.mrf.mxu0 }
 0x104   : > { %13789 = vmatprep.mubr.msk.f32.mxu1 %vm361_vm4, %v19838_v19  ;;  %v2773_v19 = vld [vmem:[#allocation2 + $0x227] sm:$0xff] }
 0x105   : > { %v15779_v39 = vpop.f32.mrf.mxu1  ;;  %v15781_v43 = vpop.f32.mrf.mxu0  ;;  %13840 = vmatmul.mubr.msk.f32.gmra.mxu0 %vm361_vm4, %v15205_v0 }
 0x106   : > { %19839 = vst [vmem:[#allocation9_spill] sm:$0xff] %v15779_v39  ;;  %13842 = vmatprep.mubr.msk.f32.mxu0 %vm361_vm4, %v15209_v1 }
 0x107   : > { %v15787_v60 = vpop.f32.mrf.mxu1  ;;  %13790 = vmatmul.mubr.msk.f32.gmra.mxu1 %vm361_vm4, %v19840_v61  ;;  %v15791_v34 = vpop.f32.mrf.mxu0  ;;  %v19843_v61 = vld [vmem:[#allocation34_spill] sm:$0xff] }
 0x108   : > { %13792 = vmatprep.mubr.msk.f32.mxu1 %vm361_vm4, %v19841_v53 }
 0x109   : > { %v15795_v16 = vpop.f32.mrf.mxu1  ;;  %v15797_v57 = vpop.f32.mrf.mxu0  ;;  %13843 = vmatmul.mubr.msk.f32.gmra.mxu0 %vm361_vm4, %v19810_v10  ;;  %v15817_v10 = vld [vmem:[#allocation2 + $0x209] sm:$0xff] }
 0x10a   : > { %19842 = vst [vmem:[#allocation10_spill] sm:$0xff] %v15795_v16  ;;  %13845 = vmatprep.mubr.msk.f32.mxu0 %vm361_vm4, %v15629_v36  ;;  %v2774_v36 = vld [vmem:[#allocation2 + $0x22f] sm:$0xff] }
 0x10b   : > { %v15803_v0 = vpop.f32.mrf.mxu1  ;;  %13793 = vmatmul.mubr.msk.f32.gmra.mxu1 %vm361_vm4, %v15463_v22  ;;  %v15807_v1 = vpop.f32.mrf.mxu0 }
 0x10c   : > { %13795 = vmatprep.mubr.msk.f32.mxu1 %vm361_vm4, %v19843_v61  ;;  %v15828_v61 = vld [vmem:[#allocation2 + $0x211] sm:$0xff] }
 0x10d   : > { %v15811_v53 = vpop.f32.mrf.mxu1  ;;  %v15813_v16 = vpop.f32.mrf.mxu0  ;;  %13846 = vmatmul.mubr.msk.f32.gmra.mxu0 %vm361_vm4, %v15639_v13 }
 0x10e   : > { %19844 = vst [vmem:[#allocation11_spill] sm:$0xff] %v15811_v53  ;;  %13848 = vmatprep.mubr.msk.f32.mxu0 %vm361_vm4, %v2773_v19 }
 0x10f   : > { %v15820_v39 = vpop.f32.mrf.mxu1  ;;  %13796 = vmatmul.mubr.msk.f32.gmra.mxu1 %vm361_vm4, %v15479_v18  ;;  %v15824_v22 = vpop.f32.mrf.mxu0  ;;  %v15840_v18 = vld [vmem:[%s19655_s3] ss:$0 sm:$0xff] }
 0x110   : > { %13798 = vmatprep.mubr.msk.f32.mxu1 %vm361_vm4, %v15817_v10  ;;  %v761_v46 = vadd.f32 %v15711_v30, %v15840_v18 }
 0x111   : > { %v15830_v53 = vpop.f32.mrf.mxu1  ;;  %v15832_v13 = vpop.f32.mrf.mxu0  ;;  %13849 = vmatmul.mubr.msk.f32.gmra.mxu0 %vm361_vm4, %v2774_v36 }
 0x112   : > { %19845 = vst [vmem:[#allocation12_spill] sm:$0xff] %v15830_v53  ;;  %13903 = vmatprep.mubr.msk.f32.mxu0 %vm361_vm4, %v19813_v37 }
 0x113   : > { %v13550_v19 = vpop.f32.mrf.mxu1  ;;  %13799 = vmatmul.mubr.msk.f32.gmra.mxu1 %vm361_vm4, %v15828_v61  ;;  %v15844_v11 = vpop.f32.mrf.mxu0 }
 0x114   : > { %v15847_v53 = vadd.f32 %v13550_v19, %v15840_v18  ;;  %13853 = vmatprep.mubr.msk.f32.mxu1 %vm361_vm4, %v15265_v17  ;;  %v760_v17 = vadd.f32 %v15840_v18, %v15721_v33 }
 0x115   : > { %v15851_v36 = vpop.f32.mrf.mxu1  ;;  %v13605_v37 = vpop.f32.mrf.mxu0  ;;  %13904 = vmatmul.mubr.msk.f32.vlgmr.msra.gmra.mxu0 %vm361_vm4, %v19814_v40 }
 0x116   : > { %19846 = vst [vmem:[#allocation13_spill] sm:$0xff] %v15847_v53  ;;  %19847 = vst [vmem:[#allocation14_spill] sm:$0xff] %v15851_v36  ;;  %13906 = vmatprep.mubr.msk.f32.mxu0 %vm361_vm4, %v19815_v12  ;;  %v763_v12 = vadd.f32 %v15733_v26, %v15840_v18 }
 0x117   : > { %v13555_v23 = vpop.f32.mrf.mxu1  ;;  %13854 = vmatmul.mubr.msk.f32.vlgmr.msra.gmra.mxu1 %vm361_vm4, %v15279_v20  ;;  %v1381_v19 = vpop.f32.mrf.mxu0 }
 0x118   : > { %v1151_v53 = vadd.f32 %v13555_v23, %v761_v46  ;;  %13856 = vmatprep.mubr.msk.f32.mxu1 %vm361_vm4, %v15283_v21  ;;  %v762_v21 = vadd.f32 %v15840_v18, %v15743_v27 }
 0x119   : > { %v991_v36 = vpop.f32.mrf.mxu1  ;;  %v13608_v40 = vpop.f32.mrf.mxu0  ;;  %13907 = vmatmul.mubr.msk.f32.gmra.mxu0 %vm361_vm4, %v19816_v41 }
 0x11a   : > { %v15869_v30 = vadd.f32 %v13605_v37, %v1151_v53  ;;  %v1150_v8 = vadd.f32 %v991_v36, %v760_v17  ;;  %13909 = vmatprep.mubr.msk.f32.mxu0 %vm361_vm4, %v19817_v7  ;;  %v765_v7 = vadd.f32 %v15749_v5, %v15840_v18 }
 0x11b   : > { %v13558_v20 = vpop.f32.mrf.mxu1  ;;  %13857 = vmatmul.mubr.msk.f32.gmra.mxu1 %vm361_vm4, %v15295_v24  ;;  %v1391_v33 = vpop.f32.mrf.mxu0 }
 0x11c   : > { %v15877_v23 = vadd.f32 %v1381_v19, %v1150_v8  ;;  %v1153_v41 = vadd.f32 %v13558_v20, %v763_v12  ;;  %13859 = vmatprep.mubr.msk.f32.mxu1 %vm361_vm4, %v15299_v25  ;;  %v764_v25 = vadd.f32 %v15840_v18, %v15759_v15 }
 0x11d   : > { %v1001_v26 = vpop.f32.mrf.mxu1  ;;  %v13611_v46 = vpop.f32.mrf.mxu0  ;;  %13910 = vmatmul.mubr.msk.f32.gmra.mxu0 %vm361_vm4, %v19818_v47 }
 0x11e   : > { %v15885_v53 = vadd.f32 %v13608_v40, %v1153_v41  ;;  %v1152_v24 = vadd.f32 %v1001_v26, %v762_v21  ;;  %13912 = vmatprep.mubr.msk.f32.mxu0 %vm361_vm4, %v19819_v49  ;;  %v767_v49 = vadd.f32 %v15765_v4, %v15840_v18 }
 0x11f   : > { %v13561_v8 = vpop.f32.mrf.mxu1  ;;  %13860 = vmatmul.mubr.msk.f32.gmra.mxu1 %vm361_vm4, %v15311_v28  ;;  %v1401_v27 = vpop.f32.mrf.mxu0 }
 0x120   : > { %v15893_v36 = vadd.f32 %v1391_v33, %v1152_v24  ;;  %v1155_v47 = vadd.f32 %v13561_v8, %v765_v7  ;;  %13862 = vmatprep.mubr.msk.f32.mxu1 %vm361_vm4, %v15315_v29  ;;  %v766_v29 = vadd.f32 %v15840_v18, %v15775_v14 }
 0x121   : > { %v1011_v5 = vpop.f32.mrf.mxu1  ;;  %v13614_v37 = vpop.f32.mrf.mxu0  ;;  %13913 = vmatmul.mubr.msk.f32.gmra.mxu0 %vm361_vm4, %v19820_v54 }
 0x122   : > { %v15901_v19 = vadd.f32 %v13611_v46, %v1155_v47  ;;  %v1154_v28 = vadd.f32 %v1011_v5, %v764_v25  ;;  %13915 = vmatprep.mubr.msk.f32.mxu0 %vm361_vm4, %v19821_v55  ;;  %v769_v55 = vadd.f32 %v15781_v43, %v15840_v18  ;;  %v3539_v25 = vld [vmem:[#allocation2 + $0x149] sm:$0xff]  ;;  %v772_v47 = vadd.f32 %v15840_v18, %v15824_v22  ;;  %v3540_v22 = vld [vmem:[#allocation2 + $0x151] sm:$0xff] }
 0x123   : > { %v13564_v15 = vpop.f32.mrf.mxu1  ;;  %13863 = vmatmul.mubr.msk.f32.gmra.mxu1 %vm361_vm4, %v15327_v44  ;;  %v1411_v17 = vpop.f32.mrf.mxu0 }
 0x124   : > { %v15909_v40 = vadd.f32 %v1401_v27, %v1154_v28  ;;  %v1157_v54 = vadd.f32 %v13564_v15, %v767_v49  ;;  %13865 = vmatprep.mubr.msk.f32.mxu1 %vm361_vm4, %v15331_v45  ;;  %v768_v45 = vadd.f32 %v15840_v18, %v15791_v34  ;;  %v775_v49 = vadd.f32 %v15832_v13, %v15840_v18  ;;  %v3150_v13 = vld [vmem:[#allocation2 + $0x150] sm:$0xff] }
 0x125   : > { %v1021_v4 = vpop.f32.mrf.mxu1  ;;  %v13617_v12 = vpop.f32.mrf.mxu0  ;;  %13916 = vmatmul.mubr.msk.f32.gmra.mxu0 %vm361_vm4, %v19822_v58 }
 0x126   : > { %v15917_v20 = vadd.f32 %v13614_v37, %v1157_v54  ;;  %v1156_v44 = vadd.f32 %v1021_v4, %v766_v29  ;;  %13918 = vmatprep.mubr.msk.f32.mxu0 %vm361_vm4, %v19823_v59  ;;  %v771_v59 = vadd.f32 %v15797_v57, %v15840_v18  ;;  %v774_v29 = vadd.f32 %v15840_v18, %v15844_v11  ;;  %v3542_v11 = vld [vmem:[#allocation2 + $0x171] sm:$0xff] }
 0x127   : > { %v13567_v14 = vpop.f32.mrf.mxu1  ;;  %13866 = vmatmul.mubr.msk.f32.gmra.mxu1 %vm361_vm4, %v15343_v50  ;;  %v1421_v33 = vpop.f32.mrf.mxu0 }
 0x128   : > { %v15925_v21 = vadd.f32 %v1411_v17, %v1156_v44  ;;  %v1159_v58 = vadd.f32 %v13567_v14, %v769_v55  ;;  %13868 = vmatprep.mubr.msk.f32.mxu1 %vm361_vm4, %v15347_v51  ;;  %v770_v51 = vadd.f32 %v15840_v18, %v15807_v1  ;;  %v3538_v1 = vld [vmem:[#allocation2 + $0x131] sm:$0xff]  ;;  %v3151_v44 = vld [vmem:[#allocation2 + $0x168] sm:$0xff]  ;;  %v777_v14 = vadd.f32 %v15725_v38, %v15840_v18 }
 0x129   : > { %v1031_v43 = vpop.f32.mrf.mxu1  ;;  %v13620_v41 = vpop.f32.mrf.mxu0  ;;  %13919 = vmatmul.mubr.msk.f32.gmra.mxu0 %vm361_vm4, %v19824_v62 }
 0x12a   : > { %v15933_v26 = vadd.f32 %v13617_v12, %v1159_v58  ;;  %v1158_v50 = vadd.f32 %v1031_v43, %v768_v45  ;;  %13921 = vmatprep.mubr.msk.f32.mxu0 %vm361_vm4, %v19825_v63  ;;  %v773_v63 = vadd.f32 %v15813_v16, %v15840_v18  ;;  %v3543_v43 = vld [vmem:[#allocation2 + $0x189] sm:$0xff] }
 0x12b   : > { %v13570_v34 = vpop.f32.mrf.mxu1  ;;  %13869 = vmatmul.mubr.msk.f32.gmra.mxu1 %vm361_vm4, %v15359_v6  ;;  %v1431_v46 = vpop.f32.mrf.mxu0 }
 0x12c   : > { %v15941_v7 = vadd.f32 %v1421_v33, %v1158_v50  ;;  %v1161_v62 = vadd.f32 %v13570_v34, %v771_v59  ;;  %13871 = vmatprep.mubr.msk.f32.mxu1 %vm361_vm4, %v15363_v9  ;;  %v3152_v50 = vld [vmem:[#allocation2 + $0x170] sm:$0xff] }
 0x12d   : > { %v1041_v57 = vpop.f32.mrf.mxu1  ;;  %v13623_v24 = vpop.f32.mrf.mxu0  ;;  %13922 = vmatmul.mubr.msk.f32.gmra.mxu0 %vm361_vm4, %v19826_v2 }
 0x12e   : > { %v15949_v8 = vadd.f32 %v13620_v41, %v1161_v62  ;;  %v1160_v6 = vadd.f32 %v1041_v57, %v770_v51  ;;  %13924 = vmatprep.mubr.msk.f32.mxu0 %vm361_vm4, %v19827_v31  ;;  %v3149_v31 = vld [vmem:[#allocation2 + $0x148] sm:$0xff]  ;;  %v779_v51 = vadd.f32 %v15739_v42, %v15840_v18  ;;  %v3544_v57 = vld [vmem:[#allocation2 + $0x191] sm:$0xff] }
 0x12f   : > { %v13573_v27 = vpop.f32.mrf.mxu1  ;;  %13872 = vmatmul.mubr.msk.f32.gmra.mxu1 %vm361_vm4, %v15375_v48  ;;  %v1441_v9 = vpop.f32.mrf.mxu0  ;;  %v3155_v42 = vld [vmem:[#allocation2 + $0x1a8] sm:$0xff] }
 0x130   : > { %v15957_v2 = vadd.f32 %v1431_v46, %v1160_v6  ;;  %v1163_v5 = vadd.f32 %v13573_v27, %v773_v63  ;;  %13874 = vmatprep.mubr.msk.f32.mxu1 %vm361_vm4, %v15379_v3  ;;  %v3541_v3 = vld [vmem:[#allocation2 + $0x169] sm:$0xff] }
 0x131   : > { %v1051_v16 = vpop.f32.mrf.mxu1  ;;  %v13626_v37 = vpop.f32.mrf.mxu0  ;;  %13925 = vmatmul.mubr.msk.f32.gmra.mxu0 %vm361_vm4, %v3538_v1  ;;  %v3153_v46 = vld [vmem:[#allocation2 + $0x188] sm:$0xff]  ;;  %v3154_v27 = vld [vmem:[#allocation2 + $0x190] sm:$0xff] }
 0x132   : > { %v15964_v48 = vadd.f32 %v13623_v24, %v1163_v5  ;;  %v1162_v28 = vadd.f32 %v1051_v16, %v772_v47  ;;  %13927 = vmatprep.mubr.msk.f32.mxu0 %vm361_vm4, %v3539_v25  ;;  %v3545_v6 = vld [vmem:[#allocation2 + $0x1a9] sm:$0xff]  ;;  %v781_v47 = vadd.f32 %v15755_v52, %v15840_v18  ;;  %v3546_v16 = vld [vmem:[#allocation2 + $0x1b1] sm:$0xff] }
 0x133   : > { %v13576_v15 = vpop.f32.mrf.mxu1  ;;  %13875 = vmatmul.mubr.msk.f32.gmra.mxu1 %vm361_vm4, %v15391_v35  ;;  %v1451_v17 = vpop.f32.mrf.mxu0  ;;  %v3157_v52 = vld [vmem:[#allocation2 + $0x1c8] sm:$0xff] }
 0x134   : > { %v15971_v54 = vadd.f32 %v1441_v9, %v1162_v28  ;;  %v1165_v4 = vadd.f32 %v13576_v15, %v775_v49  ;;  %13877 = vmatprep.mubr.msk.f32.mxu1 %vm361_vm4, %v3149_v31  ;;  %v3547_v49 = vld [vmem:[#allocation2 + $0x1c9] sm:$0xff] }
 0x135   : > { %v1061_v12 = vpop.f32.mrf.mxu1  ;;  %v13629_v55 = vpop.f32.mrf.mxu0  ;;  %13928 = vmatmul.mubr.msk.f32.gmra.mxu0 %vm361_vm4, %v3540_v22  ;;  %v3156_v22 = vld [vmem:[#allocation2 + $0x1b0] sm:$0xff] }
 0x136   : > { %v15977_v35 = vadd.f32 %v13626_v37, %v1165_v4  ;;  %v1164_v33 = vadd.f32 %v1061_v12, %v774_v29  ;;  %13930 = vmatprep.mubr.msk.f32.mxu0 %vm361_vm4, %v3541_v3  ;;  %v783_v3 = vadd.f32 %v15771_v56, %v15840_v18  ;;  %v3548_v4 = vld [vmem:[#allocation2 + $0x1d1] sm:$0xff]  ;;  %v3159_v56 = vld [vmem:[#allocation2 + $0x1e8] sm:$0xff] }
 0x137   : > { %v13579_v45 = vpop.f32.mrf.mxu1  ;;  %13878 = vmatmul.mubr.msk.f32.gmra.mxu1 %vm361_vm4, %v3150_v13  ;;  %v15981_v58 = vpop.f32.mrf.mxu0 }
 0x138   : > { %v15983_v41 = vadd.f32 %v1451_v17, %v1164_v33  ;;  %v1167_v59 = vadd.f32 %v13579_v45, %v777_v14  ;;  %13880 = vmatprep.mubr.msk.f32.mxu1 %vm361_vm4, %v3151_v44  ;;  %v3158_v14 = vld [vmem:[#allocation2 + $0x1d0] sm:$0xff]  ;;  %v785_v45 = vadd.f32 %v15787_v60, %v15840_v18  ;;  %v787_v60 = vadd.f32 %v15803_v0, %v15840_v18  ;;  %v3163_v0 = vld [vmem:[#allocation2 + $0x228] sm:$0xff] }
 0x139   : > { %v15986_v34 = vpop.f32.mrf.mxu1  ;;  %v13632_v38 = vpop.f32.mrf.mxu0  ;;  %13931 = vmatmul.mubr.msk.f32.gmra.mxu0 %vm361_vm4, %v3542_v11 }
 0x13a   : > { %19848 = vst [vmem:[#allocation15_spill] sm:$0xff] %v15983_v41  ;;  %v15991_v62 = vadd.f32 %v13629_v55, %v1167_v59  ;;  %13933 = vmatprep.mubr.msk.f32.mxu0 %vm361_vm4, %v3543_v43  ;;  %v3549_v55 = vld [vmem:[#allocation2 + $0x1e9] sm:$0xff]  ;;  %v3550_v59 = vld [vmem:[#allocation2 + $0x1f1] sm:$0xff] }
 0x13b   : > { %v13582_v24 = vpop.f32.mrf.mxu1  ;;  %13881 = vmatmul.mubr.msk.f32.gmra.mxu1 %vm361_vm4, %v3152_v50  ;;  %v15995_v63 = vpop.f32.mrf.mxu0 }
 0x13c   : > { %v1169_v1 = vadd.f32 %v13582_v24, %v779_v51  ;;  %13883 = vmatprep.mubr.msk.f32.mxu1 %vm361_vm4, %v3153_v46  ;;  %v3160_v51 = vld [vmem:[#allocation2 + $0x1f0] sm:$0xff] }
 0x13d   : > { %v15998_v9 = vpop.f32.mrf.mxu1  ;;  %v13635_v25 = vpop.f32.mrf.mxu0  ;;  %13934 = vmatmul.mubr.msk.f32.gmra.mxu0 %vm361_vm4, %v3544_v57 }
 0x13e   : > { %v16003_v5 = vadd.f32 %v13632_v38, %v1169_v1  ;;  %13936 = vmatprep.mubr.msk.f32.mxu0 %vm361_vm4, %v3545_v6 }
 0x13f   : > { %v13585_v37 = vpop.f32.mrf.mxu1  ;;  %13884 = vmatmul.mubr.msk.f32.gmra.mxu1 %vm361_vm4, %v3154_v27  ;;  %v16007_v31 = vpop.f32.mrf.mxu0 }
 0x140   : > { %v1171_v28 = vadd.f32 %v13585_v37, %v781_v47  ;;  %13886 = vmatprep.mubr.msk.f32.mxu1 %vm361_vm4, %v3155_v42 }
 0x141   : > { %v16010_v15 = vpop.f32.mrf.mxu1  ;;  %v13638_v17 = vpop.f32.mrf.mxu0  ;;  %13937 = vmatmul.mubr.msk.f32.gmra.mxu0 %vm361_vm4, %v3546_v16 }
 0x142   : > { %v16015_v29 = vadd.f32 %v13635_v25, %v1171_v28  ;;  %13939 = vmatprep.mubr.msk.f32.mxu0 %vm361_vm4, %v3547_v49  ;;  %v3553_v25 = vld [vmem:[#allocation2 + $0x229] sm:$0xff]  ;;  %v3554_v49 = vld [vmem:[#allocation2 + $0x231] sm:$0xff] }
 0x143   : > { %v13588_v13 = vpop.f32.mrf.mxu1  ;;  %13887 = vmatmul.mubr.msk.f32.gmra.mxu1 %vm361_vm4, %v3156_v22  ;;  %v16019_v12 = vpop.f32.mrf.mxu0  ;;  %v19854_v22 = vld [vmem:[#allocation35_spill] sm:$0xff] }
 0x144   : > { %19849 = vst [vmem:[#allocation16_spill] sm:$0xff] %v16019_v12  ;;  %v1173_v44 = vadd.f32 %v13588_v13, %v783_v3  ;;  %13889 = vmatprep.mubr.msk.f32.mxu1 %vm361_vm4, %v3157_v52  ;;  %v3164_v52 = vld [vmem:[#allocation2 + $0x230] sm:$0xff] }
 0x145   : > { %v16022_v33 = vpop.f32.mrf.mxu1  ;;  %v13641_v11 = vpop.f32.mrf.mxu0  ;;  %13940 = vmatmul.mubr.msk.f32.gmra.mxu0 %vm361_vm4, %v3548_v4 }
 0x146   : > { %v16027_v43 = vadd.f32 %v13638_v17, %v1173_v44  ;;  %13942 = vmatprep.mubr.msk.f32.mxu0 %vm361_vm4, %v3549_v55  ;;  %v19858_v55 = vld [vmem:[#allocation13_spill] sm:$0xff] }
 0x147   : > { %v13591_v50 = vpop.f32.mrf.mxu1  ;;  %13890 = vmatmul.mubr.msk.f32.gmra.mxu1 %vm361_vm4, %v3158_v14  ;;  %v16031_v38 = vpop.f32.mrf.mxu0 }
 0x148   : > { %19850 = vst [vmem:[#allocation17_spill] sm:$0xff] %v16031_v38  ;;  %v1175_v46 = vadd.f32 %v13591_v50, %v785_v45  ;;  %13892 = vmatprep.mubr.msk.f32.mxu1 %vm361_vm4, %v3159_v56 }
 0x149   : > { %v16034_v57 = vpop.f32.mrf.mxu1  ;;  %v13644_v24 = vpop.f32.mrf.mxu0  ;;  %13943 = vmatmul.mubr.msk.f32.gmra.mxu0 %vm361_vm4, %v3550_v59 }
 0x14a   : > { %19851 = vst [vmem:[#allocation18_spill] sm:$0xff] %v16034_v57  ;;  %v16039_v6 = vadd.f32 %v13641_v11, %v1175_v46  ;;  %13945 = vmatprep.mubr.msk.f32.mxu0 %vm361_vm4, %v15817_v10  ;;  %v789_v10 = vadd.f32 %v15820_v39, %v15840_v18 }
 0x14b   : > { %v13594_v1 = vpop.f32.mrf.mxu1  ;;  %13893 = vmatmul.mubr.msk.f32.gmra.mxu1 %vm361_vm4, %v3160_v51  ;;  %v16044_v27 = vpop.f32.mrf.mxu0 }
 0x14c   : > { %19852 = vst [vmem:[#allocation19_spill] sm:$0xff] %v16044_v27  ;;  %v1177_v42 = vadd.f32 %v13594_v1, %v787_v60  ;;  %13895 = vmatprep.mubr.msk.f32.mxu1 %vm361_vm4, %v15623_v32 }
 0x14d   : > { %v16048_v47 = vpop.f32.mrf.mxu1  ;;  %v13647_v16 = vpop.f32.mrf.mxu0  ;;  %13946 = vmatmul.mubr.msk.f32.gmra.mxu0 %vm361_vm4, %v15828_v61 }
 0x14e   : > { %19853 = vst [vmem:[#allocation20_spill] sm:$0xff] %v16048_v47  ;;  %v16054_v37 = vadd.f32 %v13644_v24, %v1177_v42  ;;  %13948 = vmatprep.mubr.msk.f32.mxu0 %vm361_vm4, %v3553_v25 }
 0x14f   : > { %v13597_v28 = vpop.f32.mrf.mxu1  ;;  %13896 = vmatmul.mubr.msk.f32.gmra.mxu1 %vm361_vm4, %v19854_v22  ;;  %v16059_v32 = vpop.f32.mrf.mxu0 }
 0x150   : > { %19855 = vst [vmem:[#allocation21_spill] sm:$0xff] %v16059_v32  ;;  %v1179_v17 = vadd.f32 %v13597_v28, %v789_v10  ;;  %13898 = vmatprep.mubr.msk.f32.mxu1 %vm361_vm4, %v3163_v0 }
 0x151   : > { %v16062_v61 = vpop.f32.mrf.mxu1  ;;  %v13650_v3 = vpop.f32.mrf.mxu0  ;;  %13949 = vmatmul.mubr.msk.f32.gmra.mxu0 %vm361_vm4, %v3554_v49 }
 0x152   : > { %19856 = vst [vmem:[#allocation22_spill] sm:$0xff] %v16062_v61  ;;  %v16065_v39 = vadd.f32 %v13647_v16, %v1179_v17 }
 0x153   : > { %v13600_v4 = vpop.f32.mrf.mxu1  ;;  %13899 = vmatmul.mubr.msk.f32.gmra.mxu1 %vm361_vm4, %v3164_v52  ;;  %v16068_v13 = vpop.f32.mrf.mxu0 }
 0x154   : > { %19857 = vst [vmem:[#allocation23_spill] sm:$0xff] %v16068_v13  ;;  %v1181_v44 = vadd.f32 %v13600_v4, %v19858_v55 }
 0x155   : > { %v16071_v14 = vpop.f32.mrf.mxu1  ;;  %v13705_v11 = vpop.f32.mrf.mxu0 }
 0x156   : > { %19859 = vst [vmem:[#allocation24_spill] sm:$0xff] %v16071_v14  ;;  %v16073_v56 = vadd.f32 %v13650_v3, %v1181_v44 }
 0x157   : > { %v13655_v45 = vpop.f32.mrf.mxu1  ;;  %v16075_v59 = vpop.f32.mrf.mxu0 }
 0x158   : > { %v1931_v50 = vadd.f32 %v13655_v45, %v15869_v30 }
 0x159   : > { %v16078_v46 = vpop.f32.mrf.mxu1  ;;  %v13708_v51 = vpop.f32.mrf.mxu0 }
 0x15a   : > { %v16080_v24 = vadd.f32 %v13705_v11, %v1931_v50 }
 0x15b   : > { %v13658_v60 = vpop.f32.mrf.mxu1  ;;  %v16082_v1 = vpop.f32.mrf.mxu0 }
 0x15c   : > { %v1933_v25 = vadd.f32 %v13658_v60, %v15885_v53 }
 0x15d   : > { %v16085_v42 = vpop.f32.mrf.mxu1  ;;  %v13711_v16 = vpop.f32.mrf.mxu0 }
 0x15e   : > { %v16087_v0 = vadd.f32 %v13708_v51, %v1933_v25 }
 0x15f   : > { %v13661_v10 = vpop.f32.mrf.mxu1  ;;  %v16089_v49 = vpop.f32.mrf.mxu0 }
 0x160   : > { %v1935_v30 = vadd.f32 %v13661_v10, %v15901_v19 }
 0x161   : > { %v16092_v28 = vpop.f32.mrf.mxu1  ;;  %v13714_v22 = vpop.f32.mrf.mxu0 }
 0x162   : > { %v16094_v17 = vadd.f32 %v13711_v16, %v1935_v30 }
 0x163   : > { %v13664_v52 = vpop.f32.mrf.mxu1  ;;  %v16096_v3 = vpop.f32.mrf.mxu0 }
 0x164   : > { %v1937_v53 = vadd.f32 %v13664_v52, %v15917_v20 }
 0x165   : > { %v16099_v4 = vpop.f32.mrf.mxu1  ;;  %v13717_v55 = vpop.f32.mrf.mxu0 }
 0x166   : > { %v16101_v44 = vadd.f32 %v13714_v22, %v1937_v53 }
 0x167   : > { %v13667_v11 = vpop.f32.mrf.mxu1  ;;  %v16103_v45 = vpop.f32.mrf.mxu0 }
 0x168   : > { %v1939_v19 = vadd.f32 %v13667_v11, %v15933_v26 }
 0x169   : > { %v16106_v50 = vpop.f32.mrf.mxu1  ;;  %v13720_v51 = vpop.f32.mrf.mxu0 }
 0x16a   : > { %v16108_v60 = vadd.f32 %v13717_v55, %v1939_v19 }
 0x16b   : > { %v13670_v25 = vpop.f32.mrf.mxu1  ;;  %v16110_v16 = vpop.f32.mrf.mxu0 }
 0x16c   : > { %19860 = vst [vmem:[#allocation25_spill] sm:$0xff] %v16110_v16  ;;  %v1941_v20 = vadd.f32 %v13670_v25, %v15949_v8 }
 0x16d   : > { %v16113_v10 = vpop.f32.mrf.mxu1  ;;  %v13723_v30 = vpop.f32.mrf.mxu0 }
 0x16e   : > { %v16115_v22 = vadd.f32 %v13720_v51, %v1941_v20 }
 0x16f   : > { %v13673_v52 = vpop.f32.mrf.mxu1  ;;  %v16117_v53 = vpop.f32.mrf.mxu0 }
 0x170   : > { %19861 = vst [vmem:[#allocation26_spill] sm:$0xff] %v16117_v53  ;;  %v1943_v26 = vadd.f32 %v13673_v52, %v15964_v48 }
 0x171   : > { %v16120_v11 = vpop.f32.mrf.mxu1  ;;  %v13726_v13 = vpop.f32.mrf.mxu0 }
 0x172   : > { %v16122_v55 = vadd.f32 %v13723_v30, %v1943_v26 }
 0x173   : > { %v13676_v19 = vpop.f32.mrf.mxu1  ;;  %v16124_v14 = vpop.f32.mrf.mxu0 }
 0x174   : > { %19862 = vst [vmem:[#allocation27_spill] sm:$0xff] %v16124_v14  ;;  %v1945_v8 = vadd.f32 %v13676_v19, %v15977_v35 }
 0x175   : > { %v16127_v25 = vpop.f32.mrf.mxu1  ;;  %v13729_v32 = vpop.f32.mrf.mxu0 }
 0x176   : > { %19863 = vst [vmem:[#allocation28_spill] sm:$0xff] %v16127_v25  ;;  %v16129_v51 = vadd.f32 %v13726_v13, %v1945_v8 }
 0x177   : > { %v13679_v20 = vpop.f32.mrf.mxu1  ;;  %v16131_v61 = vpop.f32.mrf.mxu0 }
 0x178   : > { %19864 = vst [vmem:[#allocation29_spill] sm:$0xff] %v16131_v61  ;;  %v1947_v48 = vadd.f32 %v13679_v20, %v15991_v62 }
 0x179   : > { %v16134_v52 = vpop.f32.mrf.mxu1  ;;  %v13732_v27 = vpop.f32.mrf.mxu0 }
 0x17a   : > { %19865 = vst [vmem:[#allocation30_spill] sm:$0xff] %v16134_v52  ;;  %v16136_v30 = vadd.f32 %v13729_v32, %v1947_v48 }
 0x17b   : > { %v13682_v26 = vpop.f32.mrf.mxu1  ;;  %v16138_v47 = vpop.f32.mrf.mxu0 }
 0x17c   : > { %19866 = vst [vmem:[#allocation31_spill] sm:$0xff] %v16138_v47  ;;  %v1949_v35 = vadd.f32 %v13682_v26, %v16003_v5 }
 0x17d   : > { %v16141_v19 = vpop.f32.mrf.mxu1  ;;  %v13735_v14 = vpop.f32.mrf.mxu0 }
 0x17e   : > { %19867 = vst [vmem:[#allocation32_spill] sm:$0xff] %v16141_v19  ;;  %v16143_v13 = vadd.f32 %v13732_v27, %v1949_v35 }
 0x17f   : > { %v13685_v8 = vpop.f32.mrf.mxu1  ;;  %v16145_v38 = vpop.f32.mrf.mxu0 }
 0x180   : > { %19868 = vst [vmem:[#allocation33_spill] sm:$0xff] %v16145_v38  ;;  %v1951_v62 = vadd.f32 %v13685_v8, %v16015_v29 }
 0x181   : > { %v16148_v20 = vpop.f32.mrf.mxu1  ;;  %v13738_v61 = vpop.f32.mrf.mxu0 }
 0x182   : > { %19869 = vst [vmem:[#allocation34_spill] sm:$0xff] %v16148_v20  ;;  %v16150_v32 = vadd.f32 %v13735_v14, %v1951_v62 }
 0x183   : > { %v13688_v48 = vpop.f32.mrf.mxu1  ;;  %v16152_v52 = vpop.f32.mrf.mxu0 }
 0x184   : > { %19870 = vst [vmem:[#allocation35_spill] sm:$0xff] %v16152_v52  ;;  %v1953_v5 = vadd.f32 %v13688_v48, %v16027_v43 }
 0x185   : > { %v16155_v26 = vpop.f32.mrf.mxu1  ;;  %v13741_v47 = vpop.f32.mrf.mxu0 }
 0x186   : > { %19871 = vst [vmem:[#allocation13_spill] sm:$0xff] %v16155_v26  ;;  %v16157_v27 = vadd.f32 %v13738_v61, %v1953_v5 }
 0x187   : > { %v13691_v35 = vpop.f32.mrf.mxu1  ;;  %v16159_v19 = vpop.f32.mrf.mxu0 }
 0x188   : > { %19872 = vst [vmem:[#allocation36_spill] sm:$0xff] %v16159_v19  ;;  %v1955_v29 = vadd.f32 %v13691_v35, %v16039_v6 }
 0x189   : > { %v16162_v8 = vpop.f32.mrf.mxu1  ;;  %v13744_v38 = vpop.f32.mrf.mxu0 }
 0x18a   : > { %19873 = vst [vmem:[#allocation37_spill] sm:$0xff] %v16162_v8  ;;  %v16164_v14 = vadd.f32 %v13741_v47, %v1955_v29 }
 0x18b   : > { %v13694_v62 = vpop.f32.mrf.mxu1  ;;  %v16166_v20 = vpop.f32.mrf.mxu0 }
 0x18c   : > { %19874 = vst [vmem:[#allocation38_spill] sm:$0xff] %v16166_v20  ;;  %v1957_v43 = vadd.f32 %v13694_v62, %v16054_v37 }
 0x18d   : > { %v16169_v48 = vpop.f32.mrf.mxu1  ;;  %v13747_v52 = vpop.f32.mrf.mxu0 }
 0x18e   : > { %19875 = vst [vmem:[#allocation39_spill] sm:$0xff] %v16169_v48  ;;  %v16171_v61 = vadd.f32 %v13744_v38, %v1957_v43 }
 0x18f   : > { %v13697_v5 = vpop.f32.mrf.mxu1  ;;  %v16173_v26 = vpop.f32.mrf.mxu0 }
 0x190   : > { %19876 = vst [vmem:[#allocation40_spill] sm:$0xff] %v16173_v26  ;;  %v1959_v6 = vadd.f32 %v13697_v5, %v16065_v39 }
 0x191   : > { %v16176_v35 = vpop.f32.mrf.mxu1  ;;  %v13750_v19 = vpop.f32.mrf.mxu0 }
 0x192   : > { %19877 = vst [vmem:[#allocation41_spill] sm:$0xff] %v16176_v35  ;;  %v16178_v47 = vadd.f32 %v13747_v52, %v1959_v6  ;;  %v4211_v52 = vld [vmem:[%s19656_s4] sm:$0x3f] }
 0x193   : > { %v13700_v29 = vpop.f32.mrf.mxu1  ;;  %v16180_v8 = vpop.f32.mrf.mxu0  ;;  %13951 = vmatprep.subr.msk.mxu1 %vm4309_vm5, %v4211_v52 }
 0x194   : > { %19878 = vst [vmem:[#allocation42_spill] sm:$0xff] %v16180_v8  ;;  %v1961_v37 = vadd.f32 %v13700_v29, %v16073_v56  ;;  %13952 = vmatpush3.msk.msra.mxu1 %vm4309_vm5, %v4211_v52 }
 0x195   : > { %v16183_v62 = vpop.f32.mrf.mxu1  ;;  %v13805_v20 = vpop.f32.mrf.mxu0 }
 0x196   : > { %19879 = vst [vmem:[#allocation43_spill] sm:$0xff] %v16183_v62  ;;  %v16185_v38 = vadd.f32 %v13750_v19, %v1961_v37 }
 0x197   : > { %v13755_v43 = vpop.f32.mrf.mxu1  ;;  %v16187_v48 = vpop.f32.mrf.mxu0 }
 0x198   : > { %v2711_v39 = vadd.f32 %v13755_v43, %v16080_v24 }
 0x199   : > { %v16190_v5 = vpop.f32.mrf.mxu1  ;;  %v13808_v26 = vpop.f32.mrf.mxu0 }
 0x19a   : > { %v16195_v6 = vadd.f32 %v13805_v20, %v2711_v39 }
 0x19b   : > { %v13758_v56 = vpop.f32.mrf.mxu1  ;;  %v16198_v19 = vpop.f32.mrf.mxu0 }
 0x19c   : > { %v2713_v29 = vadd.f32 %v13758_v56, %v16087_v0 }
 0x19d   : > { %v16202_v24 = vpop.f32.mrf.mxu1  ;;  %v13811_v37 = vpop.f32.mrf.mxu0 }
 0x19e   : > { %v16204_v43 = vadd.f32 %v13808_v26, %v2713_v29 }
 0x19f   : > { %v13761_v8 = vpop.f32.mrf.mxu1  ;;  %v16206_v62 = vpop.f32.mrf.mxu0 }
 0x1a0   : > { %v2715_v20 = vadd.f32 %v13761_v8, %v16094_v17 }
 0x1a1   : > { %v16209_v39 = vpop.f32.mrf.mxu1  ;;  %v13814_v35 = vpop.f32.mrf.mxu0 }
 0x1a2   : > { %v16211_v25 = vadd.f32 %v13811_v37, %v2715_v20 }
 0x1a3   : > { %v13764_v41 = vpop.f32.mrf.mxu1  ;;  %v16213_v57 = vpop.f32.mrf.mxu0 }
 0x1a4   : > { %19880 = vst [vmem:[#allocation44_spill] sm:$0xff] %v16213_v57  ;;  %v2717_v0 = vadd.f32 %v13764_v41, %v16101_v44 }
 0x1a5   : > { %v16216_v52 = vpop.f32.mrf.mxu1  ;;  %v13817_v56 = vpop.f32.mrf.mxu0 }
 0x1a6   : > { %v16218_v26 = vadd.f32 %v13814_v35, %v2717_v0 }
 0x1a7   : > { %v13767_v29 = vpop.f32.mrf.mxu1  ;;  %v16220_v53 = vpop.f32.mrf.mxu0 }
 0x1a8   : > { %19881 = vst [vmem:[#allocation45_spill] sm:$0xff] %v16218_v26  ;;  %19882 = vst [vmem:[#allocation46_spill] sm:$0xff] %v16220_v53  ;;  %v2719_v17 = vadd.f32 %v13767_v29, %v16108_v60 }
 0x1a9   : > { %v16223_v8 = vpop.f32.mrf.mxu1  ;;  %v13820_v16 = vpop.f32.mrf.mxu0 }
 0x1aa   : > { %v16225_v37 = vadd.f32 %v13817_v56, %v2719_v17 }
 0x1ab   : > { %v13770_v20 = vpop.f32.mrf.mxu1  ;;  %v16227_v12 = vpop.f32.mrf.mxu0 }
 0x1ac   : > { %19883 = vst [vmem:[#allocation47_spill] sm:$0xff] %v16225_v37  ;;  %19884 = vst [vmem:[#allocation48_spill] sm:$0xff] %v16227_v12  ;;  %v2721_v41 = vadd.f32 %v13770_v20, %v16115_v22 }
 0x1ad   : > { %v16230_v44 = vpop.f32.mrf.mxu1  ;;  %v13823_v57 = vpop.f32.mrf.mxu0 }
 0x1ae   : > { %v16232_v35 = vadd.f32 %v13820_v16, %v2721_v41 }
 0x1af   : > { %v13773_v0 = vpop.f32.mrf.mxu1  ;;  %v16234_v26 = vpop.f32.mrf.mxu0 }
 0x1b0   : > { %19885 = vst [vmem:[#allocation49_spill] sm:$0xff] %v16232_v35  ;;  %19886 = vst [vmem:[#allocation50_spill] sm:$0xff] %v16234_v26  ;;  %v2723_v60 = vadd.f32 %v13773_v0, %v16122_v55 }
 0x1b1   : > { %v16237_v29 = vpop.f32.mrf.mxu1  ;;  %v13826_v53 = vpop.f32.mrf.mxu0 }
 0x1b2   : > { %v16239_v56 = vadd.f32 %v13823_v57, %v2723_v60 }
 0x1b3   : > { %v13776_v17 = vpop.f32.mrf.mxu1  ;;  %v16241_v37 = vpop.f32.mrf.mxu0 }
 0x1b4   : > { %19887 = vst [vmem:[#allocation51_spill] sm:$0xff] %v16239_v56  ;;  %19888 = vst [vmem:[#allocation52_spill] sm:$0xff] %v16241_v37  ;;  %v2725_v22 = vadd.f32 %v13776_v17, %v16129_v51 }
 0x1b5   : > { %v16244_v20 = vpop.f32.mrf.mxu1  ;;  %v13829_v12 = vpop.f32.mrf.mxu0 }
 0x1b6   : > { %v16246_v16 = vadd.f32 %v13826_v53, %v2725_v22 }
 0x1b7   : > { %v13779_v41 = vpop.f32.mrf.mxu1  ;;  %v16248_v35 = vpop.f32.mrf.mxu0 }
 0x1b8   : > { %19889 = vst [vmem:[#allocation53_spill] sm:$0xff] %v16246_v16  ;;  %19890 = vst [vmem:[#allocation54_spill] sm:$0xff] %v16248_v35  ;;  %v2727_v55 = vadd.f32 %v13779_v41, %v16136_v30 }
 0x1b9   : > { %v16251_v0 = vpop.f32.mrf.mxu1  ;;  %v13832_v26 = vpop.f32.mrf.mxu0 }
 0x1ba   : > { %v16253_v57 = vadd.f32 %v13829_v12, %v2727_v55 }
 0x1bb   : > { %v13782_v60 = vpop.f32.mrf.mxu1  ;;  %v16255_v56 = vpop.f32.mrf.mxu0 }
 0x1bc   : > { %19891 = vst [vmem:[#allocation55_spill] sm:$0xff] %v16253_v57  ;;  %19892 = vst [vmem:[#allocation56_spill] sm:$0xff] %v16255_v56  ;;  %v2729_v51 = vadd.f32 %v13782_v60, %v16143_v13 }
 0x1bd   : > { %v16258_v17 = vpop.f32.mrf.mxu1  ;;  %v13835_v37 = vpop.f32.mrf.mxu0 }
 0x1be   : > { %v16260_v53 = vadd.f32 %v13832_v26, %v2729_v51 }
 0x1bf   : > { %v13785_v22 = vpop.f32.mrf.mxu1  ;;  %v16262_v16 = vpop.f32.mrf.mxu0 }
 0x1c0   : > { %19893 = vst [vmem:[#allocation57_spill] sm:$0xff] %v16260_v53  ;;  %19894 = vst [vmem:[#allocation58_spill] sm:$0xff] %v16262_v16  ;;  %v2731_v30 = vadd.f32 %v13785_v22, %v16150_v32 }
 0x1c1   : > { %v16265_v41 = vpop.f32.mrf.mxu1  ;;  %v13838_v35 = vpop.f32.mrf.mxu0 }
 0x1c2   : > { %v16267_v12 = vadd.f32 %v13835_v37, %v2731_v30 }
 0x1c3   : > { %v13788_v55 = vpop.f32.mrf.mxu1  ;;  %v16269_v57 = vpop.f32.mrf.mxu0 }
 0x1c4   : > { %19895 = vst [vmem:[#allocation59_spill] sm:$0xff] %v16267_v12  ;;  %19896 = vst [vmem:[#allocation60_spill] sm:$0xff] %v16269_v57  ;;  %v2733_v13 = vadd.f32 %v13788_v55, %v16157_v27 }
 0x1c5   : > { %v16272_v60 = vpop.f32.mrf.mxu1  ;;  %v13841_v56 = vpop.f32.mrf.mxu0 }
 0x1c6   : > { %v16274_v26 = vadd.f32 %v13838_v35, %v2733_v13  ;;  %v1930_v35 = vadd.f32 %v16078_v46, %v15877_v23 }
 0x1c7   : > { %v13791_v51 = vpop.f32.mrf.mxu1  ;;  %v16276_v53 = vpop.f32.mrf.mxu0 }
 0x1c8   : > { %19897 = vst [vmem:[#allocation61_spill] sm:$0xff] %v16276_v53  ;;  %v2735_v32 = vadd.f32 %v13791_v51, %v16164_v14 }
 0x1c9   : > { %v16279_v22 = vpop.f32.mrf.mxu1  ;;  %v13844_v16 = vpop.f32.mrf.mxu0 }
 0x1ca   : > { %v16281_v37 = vadd.f32 %v13841_v56, %v2735_v32 }
 0x1cb   : > { %v13794_v30 = vpop.f32.mrf.mxu1  ;;  %v16283_v12 = vpop.f32.mrf.mxu0 }
 0x1cc   : > { %19898 = vst [vmem:[#allocation62_spill] sm:$0xff] %v16281_v37  ;;  %19899 = vst [vmem:[#allocation63_spill] sm:$0xff] %v16283_v12  ;;  %v2737_v27 = vadd.f32 %v13794_v30, %v16171_v61  ;;  %v2320_v12 = vadd.f32 %v16075_v59, %v1930_v35  ;;  %v1932_v61 = vadd.f32 %v16085_v42, %v15893_v36  ;;  %v19904_v42 = vld [vmem:[#allocation7_spill] sm:$0xff] }
 0x1cd   : > { %v16286_v55 = vpop.f32.mrf.mxu1  ;;  %v13847_v57 = vpop.f32.mrf.mxu0  ;;  %v1934_v59 = vadd.f32 %v16092_v28, %v15909_v40  ;;  %v19909_v40 = vld [vmem:[#allocation11_spill] sm:$0xff] }
 0x1ce   : > { %19900 = vst [vmem:[#allocation64_spill] sm:$0xff] %v16286_v55  ;;  %v16290_v13 = vadd.f32 %v13844_v16, %v2737_v27  ;;  %v2710_v23 = vadd.f32 %v16190_v5, %v2320_v12  ;;  %v19905_v27 = vld [vmem:[#allocation8_spill] sm:$0xff]  ;;  %v2322_v5 = vadd.f32 %v16082_v1, %v1932_v61  ;;  %v19907_v12 = vld [vmem:[#allocation9_spill] sm:$0xff]  ;;  %v16329_v28 = vadd.f32 %v15840_v18, %v19909_v40  ;;  %v4179_v61 = vld [vmem:[#allocation2 + $0x7] sm:$0xff] }
 0x1cf   : > { %v13797_v53 = vpop.f32.mrf.mxu1  ;;  %v16292_v14 = vpop.f32.mrf.mxu0  ;;  %v780_v35 = vadd.f32 %v15840_v18, %v19905_v27  ;;  %v2324_v40 = vadd.f32 %v16089_v49, %v1934_v59  ;;  %13953 = vmatprep.mubr.msk.f32.mxu1 %vm4212_vm6, %v4179_v61 }
 0x1d0   : > { %v2739_v51 = vadd.f32 %v13797_v53, %v16178_v47  ;;  %v19903_v47 = vld [vmem:[#allocation6_spill] sm:$0xff]  ;;  %v3101_v27 = vadd.f32 %v16187_v48, %v2710_v23  ;;  %v2712_v1 = vadd.f32 %v16202_v24, %v2322_v5  ;;  %v4571_v24 = vld [vmem:[#allocation2 + $0x10] sm:$0xff] }
 0x1d1   : > { %v16295_v56 = vpop.f32.mrf.mxu1  ;;  %v13850_v32 = vpop.f32.mrf.mxu0  ;;  %v776_v16 = vadd.f32 %v15840_v18, %v19903_v47  ;;  %v19910_v23 = vld [vmem:[#allocation12_spill] sm:$0xff] }
 0x1d2   : > { %v16300_v30 = vadd.f32 %v13847_v57, %v2739_v51  ;;  %v778_v57 = vadd.f32 %v15840_v18, %v19904_v42  ;;  %v19908_v51 = vld [vmem:[#allocation10_spill] sm:$0xff] }
 0x1d3   : > { %v13800_v37 = vpop.f32.mrf.mxu1  ;;  %v16302_v55 = vpop.f32.mrf.mxu0  ;;  %v16325_v47 = vadd.f32 %v15840_v18, %v19908_v51  ;;  %v1166_v42 = vadd.f32 %v15986_v34, %v776_v16  ;;  %v1936_v34 = vadd.f32 %v16099_v4, %v15925_v21  ;;  %v1938_v21 = vadd.f32 %v16106_v50, %v15941_v7  ;;  %v19911_v4 = vld [vmem:[#allocation14_spill] sm:$0xff] }
 0x1d4   : > { %19901 = vst [vmem:[#allocation65_spill] sm:$0xff] %v16300_v30  ;;  %19902 = vst [vmem:[#allocation66_spill] sm:$0xff] %v16302_v55  ;;  %v2741_v46 = vadd.f32 %v13800_v37, %v16185_v38  ;;  %v782_v37 = vadd.f32 %v15840_v18, %v19907_v12  ;;  %v4180_v12 = vld [vmem:[#allocation2 + $0xf] sm:$0xff]  ;;  %v1168_v51 = vadd.f32 %v15998_v9, %v778_v57  ;;  %v16364_v50 = vstv %s16306_s17 }
 0x1d5   : > { %v16312_v53 = vpop.f32.mrf.mxu1  ;;  %v13905_v36 = vpop.f32.mrf.mxu0  ;;  %v16349_v9 = vadd.f32 %v15840_v18, %v19910_v23  ;;  %13954 = vmatmul.mubr.msk.f32.vlgmr.msra.gmra.mxu1 %vm4212_vm6, %v4180_v12  ;;  %v16357_v59 = vadd.f32 %v15840_v18, %v19911_v4  ;;  %v2714_v57 = vadd.f32 %v16209_v39, %v2324_v40  ;;  %v3103_v7 = vadd.f32 %v16198_v19, %v2712_v1  ;;  %v19914_v4 = vld [vmem:[#allocation16_spill] sm:$0xff] }
 0x1d6   : > { %v16319_v38 = vadd.f32 %v13850_v32, %v2741_v46  ;;  %v12036_v46 = vld [vmem:[%s19656_s4 + $0x8] sm:$0x3f]  ;;  %v16370_v18 = vadd.f32 %v15981_v58, %v1166_v42  ;;  %v16373_v39 = vadd.f32 %v15995_v63, %v1168_v51 }
 0x1d7   : > { %v13855_v55 = vpop.f32.mrf.mxu1  ;;  %v3722_v30 = vpop.f32.mrf.mxu0  ;;  %14001 = vmatprep.subr.msk.mxu0 %vm4309_vm5, %v12036_v46  ;;  %v3105_v40 = vadd.f32 %v16206_v62, %v2714_v57  ;;  %v1940_v62 = vadd.f32 %v16113_v10, %v15957_v2  ;;  %v19915_v57 = vld [vmem:[#allocation25_spill] sm:$0xff] }
 0x1d8   : > { %19906 = vst [vmem:[#allocation6_spill] sm:$0xff] %v16319_v38  ;;  %v3492_v32 = vadd.f32 %v13855_v55, %v16195_v6  ;;  %v4570_v6 = vld [vmem:[#allocation2 + $0x8] sm:$0xff]  ;;  %v12070_v55 = vld [vmem:[%s19656_s4 + $0x10] sm:$0x3f]  ;;  %14002 = vmatpush3.msk.msra.mxu0 %vm4309_vm5, %v12036_v46 }
 0x1d9   : > { %v3332_v16 = vpop.f32.mrf.mxu1  ;;  %v13908_v48 = vpop.f32.mrf.mxu0  ;;  %14003 = vmatprep.mubr.msk.f32.mxu0 %vm4212_vm6, %v4570_v6  ;;  %14051 = vmatprep.subr.msk.mxu1 %vm4309_vm5, %v12070_v55 }
 0x1da   : > { %v3491_v49 = vadd.f32 %v3332_v16, %v3101_v27  ;;  %v3882_v5 = vadd.f32 %v13905_v36, %v3492_v32  ;;  %14004 = vmatmul.mubr.msk.f32.vlgmr.msra.gmra.mxu0 %vm4212_vm6, %v4571_v24  ;;  %14052 = vmatpush3.msk.msra.mxu1 %vm4309_vm5, %v12070_v55  ;;  %v1170_v36 = vadd.f32 %v16010_v15, %v780_v35  ;;  %v19912_v24 = vld [vmem:[#allocation44_spill] sm:$0xff] }
 0x1db   : > { %v13858_v61 = vpop.f32.mrf.mxu1  ;;  %v3732_v38 = vpop.f32.mrf.mxu0  ;;  %v2326_v32 = vadd.f32 %v16096_v3, %v1936_v34  ;;  %v1172_v34 = vadd.f32 %v16022_v33, %v782_v37 }
 0x1dc   : > { %v3881_v27 = vadd.f32 %v3722_v30, %v3491_v49  ;;  %v3494_v46 = vadd.f32 %v13858_v61, %v16204_v43  ;;  %v2328_v30 = vadd.f32 %v16103_v45, %v1938_v21  ;;  %v3947_v42 = vmul.f32 %v16364_v50, %v3882_v5 }
 0x1dd   : > { %v3342_v19 = vpop.f32.mrf.mxu1  ;;  %v13911_v1 = vpop.f32.mrf.mxu0  ;;  %v2716_v58 = vadd.f32 %v16216_v52, %v2326_v32  ;;  %vm3914_vm8 = vcmp.gt.f32.partialorder %v3882_v5, 0.0  ;;  %v16384_v45 = vadd.f32 %v16007_v31, %v1170_v36  ;;  %v1942_v52 = vadd.f32 %v16120_v11, %v15971_v54  ;;  %v19913_v11 = vld [vmem:[#allocation45_spill] sm:$0xff] }
 0x1de   : > { %v3493_v12 = vadd.f32 %v3342_v19, %v3103_v7  ;;  %vm3913_vm7 = vcmp.gt.f32.partialorder %v3881_v27, 0.0  ;;  %v3946_v43 = vmul.f32 %v16364_v50, %v3881_v27  ;;  %v3884_v63 = vadd.f32 %v13908_v48, %v3494_v46  ;;  %v19916_v7 = vld [vmem:[#allocation26_spill] sm:$0xff] }
 0x1df   : > { %v13861_v51 = vpop.f32.mrf.mxu1  ;;  %v3742_v16 = vpop.f32.mrf.mxu0  ;;  %v3107_v55 = vadd.f32 %v19912_v24, %v2716_v58  ;;  %v3979_v10 = vsel %vm3914_vm8, %v3882_v5, %v3947_v42  ;;  %v2330_v61 = vadd.f32 %v19915_v57, %v1940_v62  ;;  %v19917_v5 = vld [vmem:[#allocation46_spill] sm:$0xff]  ;;  %v19920_v62 = vld [vmem:[#allocation15_spill] sm:$0xff] }
 0x1e0   : > { %v3883_v15 = vadd.f32 %v3732_v38, %v3493_v12  ;;  %v3496_v3 = vadd.f32 %v13861_v51, %v16211_v25  ;;  %v3978_v35 = vsel %vm3913_vm7, %v3881_v27, %v3946_v43  ;;  %v2718_v25 = vadd.f32 %v16223_v8, %v2328_v30  ;;  %v19918_v51 = vld [vmem:[#allocation47_spill] sm:$0xff] }
 0x1e1   : > { %v3352_v6 = vpop.f32.mrf.mxu1  ;;  %4042 = vrot.lane.b32.xlu0 %v3978_v35, %s14890_s24  ;;  %v13914_v38 = vpop.f32.mrf.mxu0  ;;  %v3949_v33 = vmul.f32 %v16364_v50, %v3884_v63  ;;  %vm3916_vm10 = vcmp.gt.f32.partialorder %v3884_v63, 0.0  ;;  %v16399_v8 = vadd.f32 %v19914_v4, %v1172_v34  ;;  %v2332_v27 = vadd.f32 %v19916_v7, %v1942_v52  ;;  %v19919_v35 = vld [vmem:[#allocation18_spill] sm:$0xff]  ;;  %v19921_v52 = vld [vmem:[#allocation28_spill] sm:$0xff]  ;;  %v19925_v4 = vld [vmem:[#allocation17_spill] sm:$0xff] }
 0x1e2   : > { %v3495_v48 = vadd.f32 %v3352_v6, %v3105_v40  ;;  %vm3915_vm9 = vcmp.gt.f32.partialorder %v3883_v15, 0.0  ;;  %v3948_v31 = vmul.f32 %v16364_v50, %v3883_v15  ;;  %v3886_v37 = vadd.f32 %v13911_v1, %v3496_v3  ;;  %v19926_v57 = vld [vmem:[#allocation27_spill] sm:$0xff]  ;;  %v19927_v7 = vld [vmem:[#allocation29_spill] sm:$0xff] }
 0x1e3   : > { %v13864_v2 = vpop.f32.mrf.mxu1  ;;  %v3752_v54 = vpop.f32.mrf.mxu0  ;;  %v3109_v32 = vadd.f32 %v19917_v5, %v2718_v25  ;;  %v2720_v30 = vadd.f32 %v16230_v44, %v2330_v61  ;;  %v3981_v58 = vsel %vm3916_vm10, %v3884_v63, %v3949_v33  ;;  %v1174_v34 = vadd.f32 %v19919_v35, %v16325_v47  ;;  %v19922_v44 = vld [vmem:[#allocation30_spill] sm:$0xff]  ;;  %v19930_v35 = vld [vmem:[#allocation20_spill] sm:$0xff] }
 0x1e4   : > { %v3498_v23 = vadd.f32 %v13864_v2, %v19913_v11  ;;  %v3885_v21 = vadd.f32 %v3742_v16, %v3495_v48  ;;  %v3980_v49 = vsel %vm3915_vm9, %v3883_v15, %v3948_v31  ;;  %v3951_v12 = vmul.f32 %v16364_v50, %v3886_v37  ;;  %v19924_v11 = vld [vmem:[#allocation49_spill] sm:$0xff] }
 0x1e5   : > { %v3362_v46 = vpop.f32.mrf.mxu1  ;;  %4044 = vrot.lane.b32.xlu0 %v3979_v10, %s14890_s24  ;;  %4046 = vrot.lane.b32.xlu1 %v3980_v49, %s14890_s24  ;;  %v13917_v36 = vpop.f32.mrf.mxu0  ;;  %vm3918_vm12 = vcmp.gt.f32.partialorder %v3886_v37, 0.0  ;;  %v1944_v6 = vadd.f32 %v19921_v52, %v19920_v62  ;;  %v1946_v25 = vadd.f32 %v19922_v44, %v16370_v18  ;;  %v19931_v62 = vld [vmem:[#allocation32_spill] sm:$0xff] }
 0x1e6   : > { %v3497_v19 = vadd.f32 %v3362_v46, %v3107_v55  ;;  %vm3917_vm11 = vcmp.gt.f32.partialorder %v3885_v21, 0.0  ;;  %v3950_v1 = vmul.f32 %v16364_v50, %v3885_v21  ;;  %v3888_v43 = vadd.f32 %v13914_v38, %v3498_v23  ;;  %v19923_v55 = vld [vmem:[#allocation48_spill] sm:$0xff] }
 0x1e7   : > { %v13867_v40 = vpop.f32.mrf.mxu1  ;;  %v3762_v42 = vpop.f32.mrf.mxu0  ;;  %v2722_v38 = vadd.f32 %v16237_v29, %v2332_v27  ;;  %v3111_v47 = vadd.f32 %v19923_v55, %v2720_v30  ;;  %v3983_v18 = vsel %vm3918_vm12, %v3886_v37, %v3951_v12  ;;  %v16426_v29 = vadd.f32 %v19925_v4, %v1174_v34  ;;  %v19928_v37 = vld [vmem:[#allocation50_spill] sm:$0xff] }
 0x1e8   : > { %v3500_v16 = vadd.f32 %v13867_v40, %v19918_v51  ;;  %v3887_v15 = vadd.f32 %v3752_v54, %v3497_v19  ;;  %v3982_v3 = vsel %vm3917_vm11, %v3885_v21, %v3950_v1  ;;  %v3953_v33 = vmul.f32 %v16364_v50, %v3888_v43  ;;  %v19929_v51 = vld [vmem:[#allocation51_spill] sm:$0xff] }
 0x1e9   : > { %v3372_v48 = vpop.f32.mrf.mxu1  ;;  %4048 = vrot.lane.b32.xlu1 %v3981_v58, %s14890_s24  ;;  %4050 = vrot.lane.b32.xlu0 %v3982_v3, %s14890_s24  ;;  %v13920_v63 = vpop.f32.mrf.mxu0  ;;  %vm3920_vm14 = vcmp.gt.f32.partialorder %v3888_v43, 0.0  ;;  %v2334_v61 = vadd.f32 %v19926_v57, %v1944_v6  ;;  %v2336_v27 = vadd.f32 %v19927_v7, %v1946_v25  ;;  %v3113_v5 = vadd.f32 %v19928_v37, %v2722_v38  ;;  %v19933_v38 = vld [vmem:[#allocation52_spill] sm:$0xff] }
 0x1ea   : > { %v3499_v31 = vadd.f32 %v3372_v48, %v3109_v32  ;;  %vm3919_vm13 = vcmp.gt.f32.partialorder %v3887_v15, 0.0  ;;  %v3952_v24 = vmul.f32 %v16364_v50, %v3887_v15  ;;  %v3890_v2 = vadd.f32 %v13917_v36, %v3500_v16 }
 0x1eb   : > { %v13870_v10 = vpop.f32.mrf.mxu1  ;;  %v3772_v54 = vpop.f32.mrf.mxu0  ;;  %v2724_v1 = vadd.f32 %v16244_v20, %v2334_v61  ;;  %v3985_v58 = vsel %vm3920_vm14, %v3888_v43, %v3953_v33  ;;  %v1176_v34 = vadd.f32 %v19930_v35, %v16329_v28  ;;  %v1948_v52 = vadd.f32 %v19931_v62, %v16373_v39  ;;  %v19932_v20 = vld [vmem:[#allocation34_spill] sm:$0xff] }
 0x1ec   : > { %v3502_v23 = vadd.f32 %v13870_v10, %v19924_v11  ;;  %v3889_v21 = vadd.f32 %v3762_v42, %v3499_v31  ;;  %v3984_v49 = vsel %vm3919_vm13, %v3887_v15, %v3952_v24  ;;  %v3955_v30 = vmul.f32 %v16364_v50, %v3890_v2  ;;  %v19936_v11 = vld [vmem:[#allocation31_spill] sm:$0xff] }
 0x1ed   : > { %v3382_v46 = vpop.f32.mrf.mxu1  ;;  %4052 = vrot.lane.b32.xlu1 %v3983_v18, %s14890_s24  ;;  %4054 = vrot.lane.b32.xlu0 %v3984_v49, %s14890_s24  ;;  %v13923_v36 = vpop.f32.mrf.mxu0  ;;  %vm3922_vm0 = vcmp.gt.f32.partialorder %v3890_v2, 0.0  ;;  %v1950_v6 = vadd.f32 %v19932_v20, %v16384_v45  ;;  %v2726_v25 = vadd.f32 %v16251_v0, %v2336_v27  ;;  %v3115_v28 = vadd.f32 %v19933_v38, %v2724_v1  ;;  %v19939_v1 = vld [vmem:[#allocation55_spill] sm:$0xff]  ;;  %v19943_v20 = vld [vmem:[#allocation56_spill] sm:$0xff] }
 0x1ee   : > { %v3501_v32 = vadd.f32 %v3382_v46, %v3111_v47  ;;  %vm3921_vm15 = vcmp.gt.f32.partialorder %v3889_v21, 0.0  ;;  %v3954_v19 = vmul.f32 %v16364_v50, %v3889_v21  ;;  %v3892_v12 = vadd.f32 %v13920_v63, %v3502_v23  ;;  %v19934_v47 = vld [vmem:[#allocation53_spill] sm:$0xff] }
 0x1ef   : > { %v13873_v40 = vpop.f32.mrf.mxu1  ;;  %v3782_v42 = vpop.f32.mrf.mxu0  ;;  %v3987_v45 = vsel %vm3922_vm0, %v3890_v2, %v3955_v30  ;;  %v2338_v23 = vadd.f32 %v19936_v11, %v1948_v52  ;;  %v19938_v2 = vld [vmem:[#allocation54_spill] sm:$0xff] }
 0x1f0   : > { %v3504_v16 = vadd.f32 %v13873_v40, %v19929_v51  ;;  %v3891_v15 = vadd.f32 %v3772_v54, %v3501_v32  ;;  %v3986_v3 = vsel %vm3921_vm15, %v3889_v21, %v3954_v19  ;;  %v3957_v31 = vmul.f32 %v16364_v50, %v3892_v12  ;;  %v19935_v54 = vld [vmem:[#allocation19_spill] sm:$0xff]  ;;  %v19937_v21 = vld [vmem:[#allocation33_spill] sm:$0xff] }
 0x1f1   : > { %v3392_v44 = vpop.f32.mrf.mxu1  ;;  %4056 = vrot.lane.b32.xlu1 %v3985_v58, %s14890_s24  ;;  %4058 = vrot.lane.b32.xlu0 %v3986_v3, %s14890_s24  ;;  %v13926_v43 = vpop.f32.mrf.mxu0  ;;  %vm3924_vm3 = vcmp.gt.f32.partialorder %v3892_v12, 0.0  ;;  %v16453_v0 = vadd.f32 %v19935_v54, %v1176_v34  ;;  %v2340_v49 = vadd.f32 %v19937_v21, %v1950_v6  ;;  %v3117_v61 = vadd.f32 %v19938_v2, %v2726_v25  ;;  %v19944_v25 = vld [vmem:[#allocation57_spill] sm:$0xff]  ;;  %v19949_v2 = vld [vmem:[#allocation59_spill] sm:$0xff] }
 0x1f2   : > { %v3503_v48 = vadd.f32 %v3392_v44, %v3113_v5  ;;  %vm3923_vm2 = vcmp.gt.f32.partialorder %v3891_v15, 0.0  ;;  %v3956_v63 = vmul.f32 %v16364_v50, %v3891_v15  ;;  %v3894_v39 = vadd.f32 %v13923_v36, %v3504_v16  ;;  %v19941_v16 = vld [vmem:[#allocation13_spill] sm:$0xff] }
 0x1f3   : > { %v13876_v24 = vpop.f32.mrf.mxu1  ;;  %v3792_v55 = vpop.f32.mrf.mxu0  ;;  %v2728_v46 = vadd.f32 %v16258_v17, %v2338_v23  ;;  %v3989_v32 = vsel %vm3924_vm3, %v3892_v12, %v3957_v31  ;;  %v19942_v17 = vld [vmem:[#allocation37_spill] sm:$0xff]  ;;  %v2730_v34 = vadd.f32 %v16265_v41, %v2340_v49  ;;  %v19946_v31 = vld [vmem:[#allocation35_spill] sm:$0xff] }
 0x1f4   : > { %v3506_v33 = vadd.f32 %v13876_v24, %v19934_v47  ;;  %v3893_v10 = vadd.f32 %v3782_v42, %v3503_v48  ;;  %v3988_v18 = vsel %vm3923_vm2, %v3891_v15, %v3956_v63  ;;  %v3959_v36 = vmul.f32 %v16364_v50, %v3894_v39  ;;  %v19940_v42 = vld [vmem:[#allocation22_spill] sm:$0xff] }
 0x1f5   : > { %v3402_v4 = vpop.f32.mrf.mxu1  ;;  %4060 = vrot.lane.b32.xlu1 %v3987_v45, %s14890_s24  ;;  %4062 = vrot.lane.b32.xlu0 %v3988_v18, %s14890_s24  ;;  %v13929_v57 = vpop.f32.mrf.mxu0  ;;  %vm3926_vm8 = vcmp.gt.f32.partialorder %v3894_v39, 0.0  ;;  %v1178_v51 = vadd.f32 %v19940_v42, %v16349_v9  ;;  %v1952_v15 = vadd.f32 %v19941_v16, %v16399_v8  ;;  %v1954_v3 = vadd.f32 %v19942_v17, %v16426_v29  ;;  %v19947_v45 = vld [vmem:[#allocation36_spill] sm:$0xff] }
 0x1f6   : > { %v3505_v7 = vadd.f32 %v3402_v4, %v3115_v28  ;;  %vm3925_vm7 = vcmp.gt.f32.partialorder %v3893_v10, 0.0  ;;  %v3958_v27 = vmul.f32 %v16364_v50, %v3893_v10  ;;  %v3896_v37 = vadd.f32 %v13926_v43, %v3506_v33  ;;  %v19945_v28 = vld [vmem:[#allocation21_spill] sm:$0xff]  ;;  %v19953_v42 = vld [vmem:[#allocation60_spill] sm:$0xff] }
 0x1f7   : > { %v13879_v5 = vpop.f32.mrf.mxu1  ;;  %v3802_v19 = vpop.f32.mrf.mxu0  ;;  %v3119_v9 = vadd.f32 %v19943_v20, %v2728_v46  ;;  %v3991_v29 = vsel %vm3926_vm8, %v3894_v39, %v3959_v36  ;;  %v1568_v41 = vadd.f32 %v19945_v28, %v1178_v51  ;;  %v2342_v24 = vadd.f32 %v19946_v31, %v1952_v15  ;;  %v19950_v46 = vld [vmem:[#allocation24_spill] sm:$0xff] }
 0x1f8   : > { %v3508_v30 = vadd.f32 %v13879_v5, %v19939_v1  ;;  %v3895_v40 = vadd.f32 %v3792_v55, %v3505_v7  ;;  %v3990_v58 = vsel %vm3925_vm7, %v3893_v10, %v3958_v27  ;;  %v3961_v6 = vmul.f32 %v16364_v50, %v3896_v37  ;;  %v19948_v10 = vld [vmem:[#allocation58_spill] sm:$0xff]  ;;  %v19951_v5 = vld [vmem:[#allocation39_spill] sm:$0xff]  ;;  %v19956_v20 = vld [vmem:[#allocation40_spill] sm:$0xff] }
 0x1f9   : > { %v3412_v35 = vpop.f32.mrf.mxu1  ;;  %4064 = vrot.lane.b32.xlu1 %v3989_v32, %s14890_s24  ;;  %4066 = vrot.lane.b32.xlu0 %v3990_v58, %s14890_s24  ;;  %v13932_v12 = vpop.f32.mrf.mxu0  ;;  %vm3928_vm10 = vcmp.gt.f32.partialorder %v3896_v37, 0.0  ;;  %v2344_v55 = vadd.f32 %v19947_v45, %v1954_v3  ;;  %v3121_v39 = vadd.f32 %v19948_v10, %v2730_v34  ;;  %v2732_v11 = vadd.f32 %v16272_v60, %v2342_v24  ;;  %v19954_v34 = vld [vmem:[#allocation23_spill] sm:$0xff]  ;;  %v19959_v24 = vld [vmem:[#allocation62_spill] sm:$0xff] }
 0x1fa   : > { %v3507_v62 = vadd.f32 %v3412_v35, %v3117_v61  ;;  %vm3927_vm9 = vcmp.gt.f32.partialorder %v3895_v40, 0.0  ;;  %v3960_v52 = vmul.f32 %v16364_v50, %v3895_v40  ;;  %v3898_v8 = vadd.f32 %v13929_v57, %v3508_v30 }
 0x1fb   : > { %v13882_v44 = vpop.f32.mrf.mxu1  ;;  %v3812_v43 = vpop.f32.mrf.mxu0  ;;  %v3993_v4 = vsel %vm3928_vm10, %v3896_v37, %v3961_v6  ;;  %v1180_v36 = vadd.f32 %v19950_v46, %v16357_v59  ;;  %v1956_v32 = vadd.f32 %v19951_v5, %v16453_v0  ;;  %v2734_v30 = vadd.f32 %v16279_v22, %v2344_v55  ;;  %v19962_v5 = vld [vmem:[#allocation42_spill] sm:$0xff] }
 0x1fc   : > { %v3510_v48 = vadd.f32 %v13882_v44, %v19944_v25  ;;  %v3897_v63 = vadd.f32 %v3802_v19, %v3507_v62  ;;  %v3992_v38 = vsel %vm3927_vm9, %v3895_v40, %v3960_v52  ;;  %v3963_v23 = vmul.f32 %v16364_v50, %v3898_v8  ;;  %v19952_v19 = vld [vmem:[#allocation41_spill] sm:$0xff]  ;;  %v19955_v62 = vld [vmem:[#allocation38_spill] sm:$0xff]  ;;  %v19958_v25 = vld [vmem:[#allocation64_spill] sm:$0xff] }
 0x1fd   : > { %v3422_v47 = vpop.f32.mrf.mxu1  ;;  %4068 = vrot.lane.b32.xlu1 %v3991_v29, %s14890_s24  ;;  %4070 = vrot.lane.b32.xlu0 %v3992_v38, %s14890_s24  ;;  %v13935_v33 = vpop.f32.mrf.mxu0  ;;  %vm3930_vm12 = vcmp.gt.f32.partialorder %v3898_v8, 0.0  ;;  %v1958_v60 = vadd.f32 %v19952_v19, %v1568_v41  ;;  %v3123_v51 = vadd.f32 %v19953_v42, %v2732_v11  ;;  %v1570_v22 = vadd.f32 %v19954_v34, %v1180_v36  ;;  %v19957_v29 = vld [vmem:[#allocation61_spill] sm:$0xff] }
 0x1fe   : > { %v3509_v18 = vadd.f32 %v3422_v47, %v3119_v9  ;;  %vm3929_vm11 = vcmp.gt.f32.partialorder %v3897_v63, 0.0  ;;  %v3962_v54 = vmul.f32 %v16364_v50, %v3897_v63  ;;  %v3900_v21 = vadd.f32 %v13932_v12, %v3510_v48 }
 0x1ff   : > { %v13885_v49 = vpop.f32.mrf.mxu1  ;;  %v3822_v57 = vpop.f32.mrf.mxu0  ;;  %v3995_v15 = vsel %vm3930_vm12, %v3898_v8, %v3963_v23  ;;  %v2346_v52 = vadd.f32 %v19955_v62, %v1956_v32  ;;  %v2348_v9 = vadd.f32 %v19956_v20, %v1958_v60  ;;  %v3125_v8 = vadd.f32 %v19957_v29, %v2734_v30  ;;  %v19965_v20 = vld [vmem:[#allocation6_spill] sm:$0xff] }
 0x200   : > { %v3512_v61 = vadd.f32 %v13885_v49, %v19949_v2  ;;  %v3899_v7 = vadd.f32 %v3812_v43, %v3509_v18  ;;  %v3994_v27 = vsel %vm3929_vm11, %v3897_v63, %v3962_v54  ;;  %v3965_v59 = vmul.f32 %v16364_v50, %v3900_v21 }
 0x201   : > { %v3432_v1 = vpop.f32.mrf.mxu1  ;;  %4072 = vrot.lane.b32.xlu1 %v3993_v4, %s14890_s24  ;;  %4074 = vrot.lane.b32.xlu0 %v3994_v27, %s14890_s24  ;;  %v13938_v37 = vpop.f32.mrf.mxu0  ;;  %vm3932_vm14 = vcmp.gt.f32.partialorder %v3900_v21, 0.0  ;;  %v2736_v48 = vadd.f32 %v19958_v25, %v2346_v52  ;;  %v2738_v54 = vadd.f32 %v16295_v56, %v2348_v9 }
 0x202   : > { %v3511_v40 = vadd.f32 %v3432_v1, %v3121_v39  ;;  %vm3931_vm13 = vcmp.gt.f32.partialorder %v3899_v7, 0.0  ;;  %v3964_v58 = vmul.f32 %v16364_v50, %v3899_v7  ;;  %v3902_v16 = vadd.f32 %v13935_v33, %v3512_v61  ;;  %v19960_v33 = vld [vmem:[#allocation43_spill] sm:$0xff] }
 0x203   : > { %v13888_v0 = vpop.f32.mrf.mxu1  ;;  %v3832_v17 = vpop.f32.mrf.mxu0  ;;  %v3997_v41 = vsel %vm3932_vm14, %v3900_v21, %v3965_v59  ;;  %v1960_v10 = vadd.f32 %v19960_v33, %v1570_v22  ;;  %v19961_v21 = vld [vmem:[#allocation63_spill] sm:$0xff]  ;;  %v3129_v60 = vadd.f32 %v16292_v14, %v2738_v54  ;;  %v19963_v59 = vld [vmem:[#allocation65_spill] sm:$0xff] }
 0x204   : > { %v3514_v3 = vadd.f32 %v13888_v0, %v16274_v26  ;;  %v3901_v35 = vadd.f32 %v3822_v57, %v3511_v40  ;;  %v3996_v12 = vsel %vm3931_vm13, %v3899_v7, %v3964_v58  ;;  %v3967_v63 = vmul.f32 %v16364_v50, %v3902_v16 }
 0x205   : > { %v3442_v6 = vpop.f32.mrf.mxu1  ;;  %4076 = vrot.lane.b32.xlu1 %v3995_v15, %s14890_s24  ;;  %4078 = vrot.lane.b32.xlu0 %v3996_v12, %s14890_s24  ;;  %v13941_v44 = vpop.f32.mrf.mxu0  ;;  %vm3934_vm0 = vcmp.gt.f32.partialorder %v3902_v16, 0.0  ;;  %v3127_v49 = vadd.f32 %v19961_v21, %v2736_v48  ;;  %v2350_v32 = vadd.f32 %v19962_v5, %v1960_v10 }
 0x206   : > { %v3513_v43 = vadd.f32 %v3442_v6, %v3123_v51  ;;  %vm3933_vm15 = vcmp.gt.f32.partialorder %v3901_v35, 0.0  ;;  %v3966_v26 = vmul.f32 %v16364_v50, %v3901_v35  ;;  %v3904_v38 = vadd.f32 %v13938_v37, %v3514_v3 }
 0x207   : > { %v13891_v28 = vpop.f32.mrf.mxu1  ;;  %v3842_v31 = vpop.f32.mrf.mxu0  ;;  %v3999_v61 = vsel %vm3934_vm0, %v3902_v16, %v3967_v63  ;;  %v2740_v30 = vadd.f32 %v16312_v53, %v2350_v32 }
 0x208   : > { %v3516_v45 = vadd.f32 %v13891_v28, %v19959_v24  ;;  %v3903_v55 = vadd.f32 %v3832_v17, %v3513_v43  ;;  %v3998_v47 = vsel %vm3933_vm15, %v3901_v35, %v3966_v26  ;;  %v3969_v4 = vmul.f32 %v16364_v50, %v3904_v38  ;;  %v19964_v35 = vld [vmem:[#allocation66_spill] sm:$0xff] }
 0x209   : > { %v3452_v39 = vpop.f32.mrf.mxu1  ;;  %4080 = vrot.lane.b32.xlu1 %v3997_v41, %s14890_s24  ;;  %4082 = vrot.lane.b32.xlu0 %v3998_v47, %s14890_s24  ;;  %v13944_v18 = vpop.f32.mrf.mxu0  ;;  %vm3936_vm3 = vcmp.gt.f32.partialorder %v3904_v38, 0.0  ;;  %v3131_v12 = vadd.f32 %v19964_v35, %v2740_v30  ;;  %v16549_v24 = vld [vmem:[%s19656_s4 + $0x20] sm:$0x3f]  ;;  %vm4138_vm15 = vcmask 48160  }
 0x20a   : > { %v3515_v11 = vadd.f32 %v3452_v39, %v3125_v8  ;;  %vm3935_vm2 = vcmp.gt.f32.partialorder %v3903_v55, 0.0  ;;  %v3968_v23 = vmul.f32 %v16364_v50, %v3903_v55  ;;  %v3906_v57 = vadd.f32 %v13941_v44, %v3516_v45  ;;  %14151 = vmatprep.subr.msk.mxu1 %vm4309_vm5, %v16549_v24 }
 0x20b   : > { %v13894_v2 = vpop.f32.mrf.mxu1  ;;  %v3852_v7 = vpop.f32.mrf.mxu0  ;;  %v4001_v42 = vsel %vm3936_vm3, %v3904_v38, %v3969_v4 }
 0x20c   : > { %v3518_v27 = vadd.f32 %v13894_v2, %v16290_v13  ;;  %v3905_v46 = vadd.f32 %v3842_v31, %v3515_v11  ;;  %v4000_v36 = vsel %vm3935_vm2, %v3903_v55, %v3968_v23  ;;  %v3971_v13 = vmul.f32 %v16364_v50, %v3906_v57  ;;  %v12104_v31 = vld [vmem:[%s19656_s4 + $0x18] sm:$0x3f] }
 0x20d   : > { %v3462_v56 = vpop.f32.mrf.mxu1  ;;  %4084 = vrot.lane.b32.xlu1 %v3999_v61, %s14890_s24  ;;  %4086 = vrot.lane.b32.xlu0 %v4000_v36, %s14890_s24  ;;  %v13947_v19 = vpop.f32.mrf.mxu0  ;;  %vm3938_vm8 = vcmp.gt.f32.partialorder %v3906_v57, 0.0 }
 0x20e   : > { %v3517_v1 = vadd.f32 %v3462_v56, %v3127_v49  ;;  %vm3937_vm7 = vcmp.gt.f32.partialorder %v3905_v46, 0.0  ;;  %v3970_v37 = vmul.f32 %v16364_v50, %v3905_v46  ;;  %v3908_v40 = vadd.f32 %v13944_v18, %v3518_v27  ;;  %14101 = vmatprep.subr.msk.mxu0 %vm4309_vm5, %v12104_v31  ;;  %v16565_v18 = vld [vmem:[%s19656_s4 + $0x28] sm:$0x3f] }
 0x20f   : > { %v13897_v58 = vpop.f32.mrf.mxu1  ;;  %v3862_v51 = vpop.f32.mrf.mxu0  ;;  %v4003_v52 = vsel %vm3938_vm8, %v3906_v57, %v3971_v13  ;;  %14102 = vmatpush3.msk.msra.mxu0 %vm4309_vm5, %v12104_v31 }
 0x210   : > { %v3520_v16 = vadd.f32 %v13897_v58, %v19963_v59  ;;  %v3907_v0 = vadd.f32 %v3852_v7, %v3517_v1  ;;  %v4002_v15 = vsel %vm3937_vm7, %v3905_v46, %v3970_v37  ;;  %v3973_v34 = vmul.f32 %v16364_v50, %v3908_v40  ;;  %14201 = vmatprep.subr.msk.mxu0 %vm4309_vm5, %v16565_v18 }
 0x211   : > { %v3472_v17 = vpop.f32.mrf.mxu1  ;;  %4088 = vrot.lane.b32.xlu1 %v4001_v42, %s14890_s24  ;;  %4090 = vrot.lane.b32.xlu0 %v4002_v15, %s14890_s24  ;;  %v13950_v14 = vpop.f32.mrf.mxu0  ;;  %vm3940_vm10 = vcmp.gt.f32.partialorder %v3908_v40, 0.0 }
 0x212   : > { %v3519_v3 = vadd.f32 %v3472_v17, %v3129_v60  ;;  %vm3939_vm9 = vcmp.gt.f32.partialorder %v3907_v0, 0.0  ;;  %v3972_v53 = vmul.f32 %v16364_v50, %v3907_v0  ;;  %v3910_v22 = vadd.f32 %v13947_v19, %v3520_v16 }
 0x213   : > { %v13900_v62 = vpop.f32.mrf.mxu1  ;;  %v3872_v8 = vpop.f32.mrf.mxu0  ;;  %v4005_v63 = vsel %vm3940_vm10, %v3908_v40, %v3973_v34 }
 0x214   : > { %v3522_v9 = vadd.f32 %v13900_v62, %v19965_v20  ;;  %v3909_v6 = vadd.f32 %v3862_v51, %v3519_v3  ;;  %v4004_v44 = vsel %vm3939_vm9, %v3907_v0, %v3972_v53  ;;  %v3975_v48 = vmul.f32 %v16364_v50, %v3910_v22 }
 0x215   : > { %v3482_v29 = vpop.f32.mrf.mxu1  ;;  %4092 = vrot.lane.b32.xlu1 %v4003_v52, %s14890_s24  ;;  %4094 = vrot.lane.b32.xlu0 %v4004_v44, %s14890_s24  ;;  %vm3942_vm13 = vcmp.gt.f32.partialorder %v3910_v22, 0.0 }
 0x216   : > { %v3521_v43 = vadd.f32 %v3482_v29, %v3131_v12  ;;  %v3912_v26 = vadd.f32 %v13950_v14, %v3522_v9  ;;  %vm3941_vm11 = vcmp.gt.f32.partialorder %v3909_v6, 0.0  ;;  %v3974_v25 = vmul.f32 %v16364_v50, %v3909_v6 }
 0x217   : > { %v4007_v47 = vsel %vm3942_vm13, %v3910_v22, %v3975_v48 }
 0x218   : > { %v3977_v38 = vmul.f32 %v16364_v50, %v3912_v26  ;;  %v3911_v28 = vadd.f32 %v3872_v8, %v3521_v43  ;;  %v4006_v41 = vsel %vm3941_vm11, %v3909_v6, %v3974_v25  ;;  %vm3944_vm12 = vcmp.gt.f32.partialorder %v3912_v26, 0.0 }
 0x219   : > { %4096 = vrot.lane.b32.xlu1 %v4005_v63, %s14890_s24  ;;  %4098 = vrot.lane.b32.xlu0 %v4006_v41, %s14890_s24 }
 0x21a   : > { %vm3943_vm14 = vcmp.gt.f32.partialorder %v3911_v28, 0.0  ;;  %v3976_v45 = vmul.f32 %v16364_v50, %v3911_v28  ;;  %v4009_v55 = vsel %vm3944_vm12, %v3912_v26, %v3977_v38 }
 0x21c   : > { %v4008_v33 = vsel %vm3943_vm14, %v3911_v28, %v3976_v45 }
 0x21d   : > { %4100 = vrot.lane.b32.xlu1 %v4007_v47, %s14890_s24  ;;  %4102 = vrot.lane.b32.xlu0 %v4008_v33, %s14890_s24 }
 0x221   : > { %4104 = vrot.lane.b32.xlu1 %v4009_v55, %s14890_s24  ;;  %s17838_s24 = sld [smem:[#allocation4 + $0x1]] }
 0x253   : > { %v4043_v10 = vpop.permute.xlu0 %4042 }
 0x254   : > { %4139 = vst.msk [vmem:[#allocation2 + $0x28] sm:$0xff] %vm4138_vm15, %v4043_v10 }
 0x257   : > { %v4045_v50 = vpop.permute.xlu0 %4044  ;;  %v4047_v39 = vpop.permute.xlu1 %4046 }
 0x258   : > { %4140 = vst.msk [vmem:[#allocation2 + $0x30] sm:$0xff] %vm4138_vm15, %v4045_v50  ;;  %4141 = vst.msk [vmem:[#allocation2 + $0x48] sm:$0xff] %vm4138_vm15, %v4047_v39 }
 0x25b   : > { %v4049_v54 = vpop.permute.xlu1 %4048  ;;  %v4051_v11 = vpop.permute.xlu0 %4050  ;;  %v16569_v23 = vld [vmem:[#allocation2 + $0x27] sm:$0xff] }
 0x25c   : > { %v16571_v21 = vld [vmem:[#allocation2 + $0x28] sm:$0xff]  ;;  %4142 = vst.msk [vmem:[#allocation2 + $0x50] sm:$0xff] %vm4138_vm15, %v4049_v54  ;;  %4143 = vst.msk [vmem:[#allocation2 + $0x68] sm:$0xff] %vm4138_vm15, %v4051_v11  ;;  %13956 = vmatprep.mubr.msk.f32.mxu1 %vm4212_vm6, %v16569_v23 }
 0x25d   : > { %14006 = vmatprep.mubr.msk.f32.mxu0 %vm4212_vm6, %v16571_v21 }
 0x25f   : > { %v4053_v49 = vpop.permute.xlu1 %4052  ;;  %v4055_v4 = vpop.permute.xlu0 %4054  ;;  %v16579_v57 = vld [vmem:[#allocation2 + $0x2f] sm:$0xff]  ;;  %v16583_v61 = vld [vmem:[#allocation2 + $0x47] sm:$0xff] }
 0x260   : > { %v16581_v2 = vld [vmem:[#allocation2 + $0x30] sm:$0xff]  ;;  %4144 = vst.msk [vmem:[#allocation2 + $0x70] sm:$0xff] %vm4138_vm15, %v4053_v49  ;;  %4145 = vst.msk [vmem:[#allocation2 + $0x88] sm:$0xff] %vm4138_vm15, %v4055_v4  ;;  %13957 = vmatmul.mubr.msk.f32.gmra.mxu1 %vm4212_vm6, %v16579_v57  ;;  %v16591_v7 = vld [vmem:[#allocation2 + $0x48] sm:$0xff] }
 0x261   : > { %14007 = vmatmul.mubr.msk.f32.gmra.mxu0 %vm4212_vm6, %v16581_v2  ;;  %13959 = vmatprep.mubr.msk.f32.mxu1 %vm4212_vm6, %v16583_v61 }
 0x262   : > { %14009 = vmatprep.mubr.msk.f32.mxu0 %vm4212_vm6, %v16591_v7 }
 0x263   : > { %v4057_v27 = vpop.permute.xlu1 %4056  ;;  %v4059_v46 = vpop.permute.xlu0 %4058  ;;  %v16597_v36 = vld [vmem:[#allocation2 + $0x4f] sm:$0xff]  ;;  %v16601_v32 = vld [vmem:[#allocation2 + $0x67] sm:$0xff] }
 0x264   : > { %v16599_v5 = vld [vmem:[#allocation2 + $0x50] sm:$0xff]  ;;  %4146 = vst.msk [vmem:[#allocation2 + $0x90] sm:$0xff] %vm4138_vm15, %v4057_v27  ;;  %4147 = vst.msk [vmem:[#allocation2 + $0xa8] sm:$0xff] %vm4138_vm15, %v4059_v46  ;;  %13960 = vmatmul.mubr.msk.f32.gmra.mxu1 %vm4212_vm6, %v16597_v36  ;;  %v16609_v56 = vld [vmem:[#allocation2 + $0x68] sm:$0xff] }
 0x265   : > { %14010 = vmatmul.mubr.msk.f32.gmra.mxu0 %vm4212_vm6, %v16599_v5  ;;  %13962 = vmatprep.mubr.msk.f32.mxu1 %vm4212_vm6, %v16601_v32 }
 0x266   : > { %14012 = vmatprep.mubr.msk.f32.mxu0 %vm4212_vm6, %v16609_v56 }
 0x267   : > { %v4061_v19 = vpop.permute.xlu1 %4060  ;;  %v4063_v60 = vpop.permute.xlu0 %4062  ;;  %v16615_v1 = vld [vmem:[#allocation2 + $0x6f] sm:$0xff]  ;;  %v16619_v30 = vld [vmem:[#allocation2 + $0x87] sm:$0xff] }
 0x268   : > { %v16617_v37 = vld [vmem:[#allocation2 + $0x70] sm:$0xff]  ;;  %19966 = vst [vmem:[#allocation7_spill] sm:$0xff] %v16619_v30  ;;  %4148 = vst.msk [vmem:[#allocation2 + $0xb0] sm:$0xff] %vm4138_vm15, %v4061_v19  ;;  %13963 = vmatmul.mubr.msk.f32.gmra.mxu1 %vm4212_vm6, %v16615_v1  ;;  %v16627_v13 = vld [vmem:[#allocation2 + $0x88] sm:$0xff] }
 0x269   : > { %4149 = vst.msk [vmem:[#allocation2 + $0xc8] sm:$0xff] %vm4138_vm15, %v4063_v60  ;;  %14013 = vmatmul.mubr.msk.f32.gmra.mxu0 %vm4212_vm6, %v16617_v37  ;;  %13965 = vmatprep.mubr.msk.f32.mxu1 %vm4212_vm6, %v16619_v30 }
 0x26a   : > { %14015 = vmatprep.mubr.msk.f32.mxu0 %vm4212_vm6, %v16627_v13 }
 0x26b   : > { %v4065_v40 = vpop.permute.xlu1 %4064  ;;  %v4067_v58 = vpop.permute.xlu0 %4066  ;;  %v16633_v42 = vld [vmem:[#allocation2 + $0x8f] sm:$0xff]  ;;  %v16637_v59 = vld [vmem:[#allocation2 + $0xa7] sm:$0xff] }
 0x26c   : > { %19967 = vst [vmem:[#allocation8_spill] sm:$0xff] %v16633_v42  ;;  %v16635_v51 = vld [vmem:[#allocation2 + $0x90] sm:$0xff]  ;;  %19968 = vst [vmem:[#allocation9_spill] sm:$0xff] %v16637_v59  ;;  %13966 = vmatmul.mubr.msk.f32.gmra.mxu1 %vm4212_vm6, %v16633_v42  ;;  %v16645_v16 = vld [vmem:[#allocation2 + $0xa8] sm:$0xff] }
 0x26d   : > { %4150 = vst.msk [vmem:[#allocation2 + $0xd0] sm:$0xff] %vm4138_vm15, %v4065_v40  ;;  %4151 = vst.msk [vmem:[#allocation2 + $0xe8] sm:$0xff] %vm4138_vm15, %v4067_v58  ;;  %14016 = vmatmul.mubr.msk.f32.gmra.mxu0 %vm4212_vm6, %v16635_v51  ;;  %13968 = vmatprep.mubr.msk.f32.mxu1 %vm4212_vm6, %v16637_v59 }
 0x26e   : > { %14018 = vmatprep.mubr.msk.f32.mxu0 %vm4212_vm6, %v16645_v16 }
 0x26f   : > { %v4069_v0 = vpop.permute.xlu1 %4068  ;;  %v4071_v15 = vpop.permute.xlu0 %4070  ;;  %v16651_v17 = vld [vmem:[#allocation2 + $0xaf] sm:$0xff] }
 0x270   : > { %19969 = vst [vmem:[#allocation10_spill] sm:$0xff] %v16651_v17  ;;  %v16653_v14 = vld [vmem:[#allocation2 + $0xb0] sm:$0xff]  ;;  %v16655_v3 = vld [vmem:[#allocation2 + $0xc7] sm:$0xff]  ;;  %4152 = vst.msk [vmem:[#allocation2 + $0xf0] sm:$0xff] %vm4138_vm15, %v4069_v0  ;;  %13969 = vmatmul.mubr.msk.f32.gmra.mxu1 %vm4212_vm6, %v16651_v17 }
 0x271   : > { %19970 = vst [vmem:[#allocation11_spill] sm:$0xff] %v16655_v3  ;;  %4153 = vst.msk [vmem:[#allocation2 + $0x108] sm:$0xff] %vm4138_vm15, %v4071_v15  ;;  %14019 = vmatmul.mubr.msk.f32.gmra.mxu0 %vm4212_vm6, %v16653_v14  ;;  %v16663_v53 = vld [vmem:[#allocation2 + $0xc8] sm:$0xff]  ;;  %13971 = vmatprep.mubr.msk.f32.mxu1 %vm4212_vm6, %v16655_v3 }
 0x272   : > { %14021 = vmatprep.mubr.msk.f32.mxu0 %vm4212_vm6, %v16663_v53 }
 0x273   : > { %v4073_v35 = vpop.permute.xlu1 %4072  ;;  %v4075_v12 = vpop.permute.xlu0 %4074 }
 0x274   : > { %v16669_v34 = vld [vmem:[#allocation2 + $0xcf] sm:$0xff]  ;;  %v16673_v62 = vld [vmem:[#allocation2 + $0xe7] sm:$0xff]  ;;  %4154 = vst.msk [vmem:[#allocation2 + $0x110] sm:$0xff] %vm4138_vm15, %v4073_v35  ;;  %4155 = vst.msk [vmem:[#allocation2 + $0x128] sm:$0xff] %vm4138_vm15, %v4075_v12 }
 0x275   : > { %19971 = vst [vmem:[#allocation12_spill] sm:$0xff] %v16669_v34  ;;  %v16671_v22 = vld [vmem:[#allocation2 + $0xd0] sm:$0xff]  ;;  %19972 = vst [vmem:[#allocation14_spill] sm:$0xff] %v16673_v62  ;;  %13972 = vmatmul.mubr.msk.f32.gmra.mxu1 %vm4212_vm6, %v16669_v34  ;;  %v16681_v52 = vld [vmem:[#allocation2 + $0xe8] sm:$0xff] }
 0x276   : > { %14022 = vmatmul.mubr.msk.f32.gmra.mxu0 %vm4212_vm6, %v16671_v22  ;;  %13974 = vmatprep.mubr.msk.f32.mxu1 %vm4212_vm6, %v16673_v62 }
 0x277   : > { %14024 = vmatprep.mubr.msk.f32.mxu0 %vm4212_vm6, %v16681_v52  ;;  %v4077_v20 = vpop.permute.xlu1 %4076  ;;  %v4079_v9 = vpop.permute.xlu0 %4078  ;;  %v16687_v6 = vld [vmem:[#allocation2 + $0xef] sm:$0xff] }
 0x278   : > { %19973 = vst [vmem:[#allocation44_spill] sm:$0xff] %v16687_v6  ;;  %v16689_v44 = vld [vmem:[#allocation2 + $0xf0] sm:$0xff]  ;;  %v16691_v29 = vld [vmem:[#allocation2 + $0x107] sm:$0xff]  ;;  %4156 = vst.msk [vmem:[#allocation2 + $0x130] sm:$0xff] %vm4138_vm15, %v4077_v20 }
 0x279   : > { %19974 = vst [vmem:[#allocation45_spill] sm:$0xff] %v16691_v29  ;;  %4157 = vst.msk [vmem:[#allocation2 + $0x148] sm:$0xff] %vm4138_vm15, %v4079_v9  ;;  %13975 = vmatmul.mubr.msk.f32.gmra.mxu1 %vm4212_vm6, %v16687_v6  ;;  %v16699_v8 = vld [vmem:[#allocation2 + $0x108] sm:$0xff] }
 0x27a   : > { %14025 = vmatmul.mubr.msk.f32.gmra.mxu0 %vm4212_vm6, %v16689_v44  ;;  %13977 = vmatprep.mubr.msk.f32.mxu1 %vm4212_vm6, %v16691_v29 }
 0x27b   : > { %14027 = vmatprep.mubr.msk.f32.mxu0 %vm4212_vm6, %v16699_v8  ;;  %v4081_v43 = vpop.permute.xlu1 %4080  ;;  %v4083_v26 = vpop.permute.xlu0 %4082  ;;  %v16705_v25 = vld [vmem:[#allocation2 + $0x10f] sm:$0xff]  ;;  %v16709_v63 = vld [vmem:[#allocation2 + $0x127] sm:$0xff] }
 0x27c   : > { %19975 = vst [vmem:[#allocation16_spill] sm:$0xff] %v16705_v25  ;;  %v16707_v48 = vld [vmem:[#allocation2 + $0x110] sm:$0xff]  ;;  %19976 = vst [vmem:[#allocation25_spill] sm:$0xff] %v16709_v63  ;;  %v16717_v38 = vld [vmem:[#allocation2 + $0x128] sm:$0xff] }
 0x27d   : > { %4158 = vst.msk [vmem:[#allocation2 + $0x150] sm:$0xff] %vm4138_vm15, %v4081_v43  ;;  %4159 = vst.msk [vmem:[#allocation2 + $0x168] sm:$0xff] %vm4138_vm15, %v4083_v26  ;;  %13978 = vmatmul.mubr.msk.f32.gmra.mxu1 %vm4212_vm6, %v16705_v25 }
 0x27e   : > { %14028 = vmatmul.mubr.msk.f32.gmra.mxu0 %vm4212_vm6, %v16707_v48  ;;  %13980 = vmatprep.mubr.msk.f32.mxu1 %vm4212_vm6, %v16709_v63 }
 0x27f   : > { %14030 = vmatprep.mubr.msk.f32.mxu0 %vm4212_vm6, %v16717_v38  ;;  %v4085_v28 = vpop.permute.xlu1 %4084  ;;  %v4087_v41 = vpop.permute.xlu0 %4086  ;;  %v16723_v31 = vld [vmem:[#allocation2 + $0x12f] sm:$0xff] }
 0x280   : > { %19977 = vst [vmem:[#allocation26_spill] sm:$0xff] %v16723_v31  ;;  %v16725_v45 = vld [vmem:[#allocation2 + $0x130] sm:$0xff]  ;;  %v16727_v55 = vld [vmem:[#allocation2 + $0x147] sm:$0xff]  ;;  %4160 = vst.msk [vmem:[#allocation2 + $0x170] sm:$0xff] %vm4138_vm15, %v4085_v28 }
 0x281   : > { %19978 = vst [vmem:[#allocation46_spill] sm:$0xff] %v16727_v55  ;;  %4161 = vst.msk [vmem:[#allocation2 + $0x188] sm:$0xff] %vm4138_vm15, %v4087_v41  ;;  %13981 = vmatmul.mubr.msk.f32.gmra.mxu1 %vm4212_vm6, %v16723_v31  ;;  %v16735_v47 = vld [vmem:[#allocation2 + $0x148] sm:$0xff] }
 0x282   : > { %14031 = vmatmul.mubr.msk.f32.gmra.mxu0 %vm4212_vm6, %v16725_v45  ;;  %13983 = vmatprep.mubr.msk.f32.mxu1 %vm4212_vm6, %v16727_v55 }
 0x283   : > { %14033 = vmatprep.mubr.msk.f32.mxu0 %vm4212_vm6, %v16735_v47  ;;  %v4089_v33 = vpop.permute.xlu1 %4088  ;;  %v4091_v10 = vpop.permute.xlu0 %4090 }
 0x284   : > { %v16741_v50 = vld [vmem:[#allocation2 + $0x14f] sm:$0xff]  ;;  %v16745_v54 = vld [vmem:[#allocation2 + $0x167] sm:$0xff]  ;;  %4162 = vst.msk [vmem:[#allocation2 + $0x190] sm:$0xff] %vm4138_vm15, %v4089_v33  ;;  %4163 = vst.msk [vmem:[#allocation2 + $0x1a8] sm:$0xff] %vm4138_vm15, %v4091_v10 }
 0x285   : > { %19979 = vst [vmem:[#allocation47_spill] sm:$0xff] %v16741_v50  ;;  %v16743_v39 = vld [vmem:[#allocation2 + $0x150] sm:$0xff]  ;;  %19980 = vst [vmem:[#allocation18_spill] sm:$0xff] %v16745_v54  ;;  %13984 = vmatmul.mubr.msk.f32.gmra.mxu1 %vm4212_vm6, %v16741_v50  ;;  %v16753_v11 = vld [vmem:[#allocation2 + $0x168] sm:$0xff] }
 0x286   : > { %14034 = vmatmul.mubr.msk.f32.gmra.mxu0 %vm4212_vm6, %v16743_v39  ;;  %13986 = vmatprep.mubr.msk.f32.mxu1 %vm4212_vm6, %v16745_v54 }
 0x287   : > { %14036 = vmatprep.mubr.msk.f32.mxu0 %vm4212_vm6, %v16753_v11  ;;  %v4093_v49 = vpop.permute.xlu1 %4092  ;;  %v4095_v4 = vpop.permute.xlu0 %4094  ;;  %v16759_v27 = vld [vmem:[#allocation2 + $0x16f] sm:$0xff] }
 0x288   : > { %19981 = vst [vmem:[#allocation15_spill] sm:$0xff] %v16759_v27  ;;  %v16761_v46 = vld [vmem:[#allocation2 + $0x170] sm:$0xff]  ;;  %v16763_v19 = vld [vmem:[#allocation2 + $0x187] sm:$0xff]  ;;  %4164 = vst.msk [vmem:[#allocation2 + $0x1b0] sm:$0xff] %vm4138_vm15, %v4093_v49 }
 0x289   : > { %19982 = vst [vmem:[#allocation28_spill] sm:$0xff] %v16763_v19  ;;  %4165 = vst.msk [vmem:[#allocation2 + $0x1c8] sm:$0xff] %vm4138_vm15, %v4095_v4  ;;  %13987 = vmatmul.mubr.msk.f32.gmra.mxu1 %vm4212_vm6, %v16759_v27  ;;  %v16771_v60 = vld [vmem:[#allocation2 + $0x188] sm:$0xff] }
 0x28a   : > { %14037 = vmatmul.mubr.msk.f32.gmra.mxu0 %vm4212_vm6, %v16761_v46  ;;  %13989 = vmatprep.mubr.msk.f32.mxu1 %vm4212_vm6, %v16763_v19 }
 0x28b   : > { %14039 = vmatprep.mubr.msk.f32.mxu0 %vm4212_vm6, %v16771_v60  ;;  %v4097_v40 = vpop.permute.xlu1 %4096  ;;  %v4099_v58 = vpop.permute.xlu0 %4098  ;;  %v16777_v0 = vld [vmem:[#allocation2 + $0x18f] sm:$0xff]  ;;  %v16781_v35 = vld [vmem:[#allocation2 + $0x1a7] sm:$0xff] }
 0x28c   : > { %19983 = vst [vmem:[#allocation30_spill] sm:$0xff] %v16777_v0  ;;  %v16779_v15 = vld [vmem:[#allocation2 + $0x190] sm:$0xff]  ;;  %19984 = vst [vmem:[#allocation48_spill] sm:$0xff] %v16781_v35  ;;  %v16789_v12 = vld [vmem:[#allocation2 + $0x1a8] sm:$0xff] }
 0x28d   : > { %4166 = vst.msk [vmem:[#allocation2 + $0x1d0] sm:$0xff] %vm4138_vm15, %v4097_v40  ;;  %4167 = vst.msk [vmem:[#allocation2 + $0x1e8] sm:$0xff] %vm4138_vm15, %v4099_v58  ;;  %13990 = vmatmul.mubr.msk.f32.gmra.mxu1 %vm4212_vm6, %v16777_v0  ;;  %v4960_v58 = vld [vmem:[#allocation2 + $0x9] sm:$0xff] }
 0x28e   : > { %14040 = vmatmul.mubr.msk.f32.gmra.mxu0 %vm4212_vm6, %v16779_v15  ;;  %13992 = vmatprep.mubr.msk.f32.mxu1 %vm4212_vm6, %v16781_v35 }
 0x28f   : > { %14042 = vmatprep.mubr.msk.f32.mxu0 %vm4212_vm6, %v16789_v12  ;;  %v4101_v20 = vpop.permute.xlu1 %4100  ;;  %v4103_v9 = vpop.permute.xlu0 %4102  ;;  %v16795_v43 = vld [vmem:[#allocation2 + $0x1af] sm:$0xff] }
 0x290   : > { %19985 = vst [vmem:[#allocation49_spill] sm:$0xff] %v16795_v43  ;;  %v16797_v26 = vld [vmem:[#allocation2 + $0x1b0] sm:$0xff]  ;;  %v16799_v28 = vld [vmem:[#allocation2 + $0x1c7] sm:$0xff]  ;;  %4168 = vst.msk [vmem:[#allocation2 + $0x1f0] sm:$0xff] %vm4138_vm15, %v4101_v20 }
 0x291   : > { %19986 = vst [vmem:[#allocation17_spill] sm:$0xff] %v16797_v26  ;;  %19987 = vst [vmem:[#allocation27_spill] sm:$0xff] %v16799_v28  ;;  %13993 = vmatmul.mubr.msk.f32.gmra.mxu1 %vm4212_vm6, %v16795_v43  ;;  %v16807_v41 = vld [vmem:[#allocation2 + $0x1c8] sm:$0xff] }
 0x292   : > { %4169 = vst.msk [vmem:[#allocation2 + $0x208] sm:$0xff] %vm4138_vm15, %v4103_v9  ;;  %14043 = vmatmul.mubr.msk.f32.gmra.mxu0 %vm4212_vm6, %v16797_v26  ;;  %19988 = vst [vmem:[#allocation29_spill] sm:$0xff] %v16807_v41  ;;  %13995 = vmatprep.mubr.msk.f32.mxu1 %vm4212_vm6, %v16799_v28 }
 0x293   : > { %14045 = vmatprep.mubr.msk.f32.mxu0 %vm4212_vm6, %v16807_v41  ;;  %v4105_v33 = vpop.permute.xlu1 %4104 }
 0x294   : > { %v16813_v10 = vld [vmem:[#allocation2 + $0x1cf] sm:$0xff]  ;;  %v16817_v4 = vld [vmem:[#allocation2 + $0x1e7] sm:$0xff]  ;;  %4170 = vst.msk [vmem:[#allocation2 + $0x210] sm:$0xff] %vm4138_vm15, %v4105_v33 }
 0x295   : > { %19989 = vst [vmem:[#allocation50_spill] sm:$0xff] %v16813_v10  ;;  %v16815_v49 = vld [vmem:[#allocation2 + $0x1d0] sm:$0xff]  ;;  %19991 = vst [vmem:[#allocation20_spill] sm:$0xff] %v16817_v4  ;;  %13996 = vmatmul.mubr.msk.f32.gmra.mxu1 %vm4212_vm6, %v16813_v10  ;;  %v16824_v40 = vld [vmem:[#allocation2 + $0x1e8] sm:$0xff] }
 0x296   : > { %19990 = vst [vmem:[#allocation51_spill] sm:$0xff] %v16815_v49  ;;  %14046 = vmatmul.mubr.msk.f32.gmra.mxu0 %vm4212_vm6, %v16815_v49  ;;  %19992 = vst [vmem:[#allocation32_spill] sm:$0xff] %v16824_v40  ;;  %13998 = vmatprep.mubr.msk.f32.mxu1 %vm4212_vm6, %v16817_v4  ;;  %v4961_v33 = vld [vmem:[#allocation2 + $0x11] sm:$0xff]  ;;  %v13955_v49 = vpop.f32.mrf.mxu1 }
 0x297   : > { %14048 = vmatprep.mubr.msk.f32.mxu0 %vm4212_vm6, %v16824_v40  ;;  %v16830_v20 = vld [vmem:[#allocation2 + $0x1ef] sm:$0xff]  ;;  %v16844_v40 = vld [vmem:[%s19657_s5] ss:$0 sm:$0xff] }
 0x298   : > { %v16832_v9 = vld [vmem:[#allocation2 + $0x1f0] sm:$0xff]  ;;  %19994 = vst [vmem:[#allocation52_spill] sm:$0xff] %v16844_v40  ;;  %v4539_v41 = vadd.f32 %v13955_v49, %v16844_v40 }
 0x299   : > { %19993 = vst [vmem:[#allocation34_spill] sm:$0xff] %v16832_v9  ;;  %13999 = vmatmul.mubr.msk.f32.gmra.mxu1 %vm4212_vm6, %v16830_v20  ;;  %v16872_v49 = vld [vmem:[#allocation2 + $0x31] sm:$0xff]  ;;  %v17040_v40 = vld [vmem:[#allocation2 + $0x207] sm:$0xff] }
 0x29a   : > { %14049 = vmatmul.mubr.msk.f32.gmra.mxu0 %vm4212_vm6, %v16832_v9  ;;  %14053 = vmatprep.mubr.msk.f32.mxu1 %vm4212_vm6, %v4960_v58  ;;  %v16850_v9 = vld [vmem:[#allocation2 + $0x29] sm:$0xff]  ;;  %v16860_v58 = vld [vmem:[%s19656_s4 + $0x38] sm:$0x3f]  ;;  %v14005_v26 = vpop.f32.mrf.mxu0  ;;  %19996 = vst [vmem:[#allocation19_spill] sm:$0xff] %v17040_v40 }
 0x29b   : > { %14103 = vmatprep.mubr.msk.f32.mxu0 %vm4212_vm6, %v16569_v23  ;;  %v16855_v23 = vld [vmem:[%s19656_s4 + $0x30] sm:$0x3f] }
 0x29d   : > { %14054 = vmatmul.mubr.msk.f32.vlgmr.msra.gmra.mxu1 %vm4212_vm6, %v4961_v33  ;;  %v16906_v33 = vld [vmem:[#allocation2 + $0x89] sm:$0xff] }
 0x29e   : > { %14104 = vmatmul.mubr.msk.f32.vlgmr.msra.gmra.mxu0 %vm4212_vm6, %v16579_v57  ;;  %14152 = vmatpush3.msk.msra.mxu1 %vm4309_vm5, %v16549_v24  ;;  %v16866_v57 = vadd.f32 %v14005_v26, %v4539_v41  ;;  %v16882_v24 = vld [vmem:[#allocation2 + $0x49] sm:$0xff]  ;;  %v16900_v41 = vld [vmem:[#allocation2 + $0x71] sm:$0xff] }
 0x29f   : > { %14056 = vmatprep.mubr.msk.f32.mxu1 %vm4212_vm6, %v16850_v9  ;;  %14106 = vmatprep.mubr.msk.f32.mxu0 %vm4212_vm6, %v16583_v61  ;;  %v16894_v26 = vld [vmem:[#allocation2 + $0x69] sm:$0xff] }
 0x2a0   : > { %19995 = vst [vmem:[#allocation53_spill] sm:$0xff] %v16866_v57  ;;  %14202 = vmatpush3.msk.msra.mxu0 %vm4309_vm5, %v16565_v18  ;;  %14251 = vmatprep.subr.msk.mxu1 %vm4309_vm5, %v16855_v23  ;;  %v16888_v18 = vld [vmem:[#allocation2 + $0x51] sm:$0xff] }
 0x2a1   : > { %14301 = vmatprep.subr.msk.mxu0 %vm4309_vm5, %v16860_v58  ;;  %14057 = vmatmul.mubr.msk.f32.gmra.mxu1 %vm4212_vm6, %v16872_v49  ;;  %v16912_v57 = vld [vmem:[#allocation2 + $0x91] sm:$0xff] }
 0x2a2   : > { %14107 = vmatmul.mubr.msk.f32.gmra.mxu0 %vm4212_vm6, %v16597_v36  ;;  %14059 = vmatprep.mubr.msk.f32.mxu1 %vm4212_vm6, %v16882_v24 }
 0x2a3   : > { %14109 = vmatprep.mubr.msk.f32.mxu0 %vm4212_vm6, %v16601_v32 }
 0x2a5   : > { %14060 = vmatmul.mubr.msk.f32.gmra.mxu1 %vm4212_vm6, %v16888_v18 }
 0x2a6   : > { %14110 = vmatmul.mubr.msk.f32.gmra.mxu0 %vm4212_vm6, %v16615_v1  ;;  %14062 = vmatprep.mubr.msk.f32.mxu1 %vm4212_vm6, %v16894_v26 }
 0x2a7   : > { %14112 = vmatprep.mubr.msk.f32.mxu0 %vm4212_vm6, %v16619_v30  ;;  %v16918_v30 = vld [vmem:[#allocation2 + $0xa9] sm:$0xff] }
 0x2a9   : > { %14063 = vmatmul.mubr.msk.f32.gmra.mxu1 %vm4212_vm6, %v16900_v41 }
 0x2aa   : > { %14113 = vmatmul.mubr.msk.f32.gmra.mxu0 %vm4212_vm6, %v16633_v42  ;;  %14065 = vmatprep.mubr.msk.f32.mxu1 %vm4212_vm6, %v16906_v33  ;;  %v16924_v42 = vld [vmem:[#allocation2 + $0xb1] sm:$0xff] }
 0x2ab   : > { %14115 = vmatprep.mubr.msk.f32.mxu0 %vm4212_vm6, %v16637_v59  ;;  %v16930_v59 = vld [vmem:[#allocation2 + $0xc9] sm:$0xff] }
 0x2ad   : > { %14066 = vmatmul.mubr.msk.f32.gmra.mxu1 %vm4212_vm6, %v16912_v57 }
 0x2ae   : > { %14116 = vmatmul.mubr.msk.f32.gmra.mxu0 %vm4212_vm6, %v16651_v17  ;;  %14068 = vmatprep.mubr.msk.f32.mxu1 %vm4212_vm6, %v16918_v30  ;;  %v16936_v17 = vld [vmem:[#allocation2 + $0xd1] sm:$0xff] }
 0x2af   : > { %14118 = vmatprep.mubr.msk.f32.mxu0 %vm4212_vm6, %v16655_v3  ;;  %v16942_v3 = vld [vmem:[#allocation2 + $0xe9] sm:$0xff] }
 0x2b1   : > { %14069 = vmatmul.mubr.msk.f32.gmra.mxu1 %vm4212_vm6, %v16924_v42 }
 0x2b2   : > { %14119 = vmatmul.mubr.msk.f32.gmra.mxu0 %vm4212_vm6, %v16669_v34  ;;  %14071 = vmatprep.mubr.msk.f32.mxu1 %vm4212_vm6, %v16930_v59  ;;  %v16948_v34 = vld [vmem:[#allocation2 + $0xf1] sm:$0xff] }
 0x2b3   : > { %14121 = vmatprep.mubr.msk.f32.mxu0 %vm4212_vm6, %v16673_v62  ;;  %v16954_v62 = vld [vmem:[#allocation2 + $0x109] sm:$0xff] }
 0x2b5   : > { %14072 = vmatmul.mubr.msk.f32.gmra.mxu1 %vm4212_vm6, %v16936_v17 }
 0x2b6   : > { %14122 = vmatmul.mubr.msk.f32.gmra.mxu0 %vm4212_vm6, %v16687_v6  ;;  %14074 = vmatprep.mubr.msk.f32.mxu1 %vm4212_vm6, %v16942_v3  ;;  %v16960_v6 = vld [vmem:[#allocation2 + $0x111] sm:$0xff] }
 0x2b7   : > { %14124 = vmatprep.mubr.msk.f32.mxu0 %vm4212_vm6, %v16691_v29  ;;  %v16966_v29 = vld [vmem:[#allocation2 + $0x129] sm:$0xff] }
 0x2b9   : > { %14075 = vmatmul.mubr.msk.f32.gmra.mxu1 %vm4212_vm6, %v16948_v34 }
 0x2ba   : > { %14125 = vmatmul.mubr.msk.f32.gmra.mxu0 %vm4212_vm6, %v16705_v25  ;;  %14077 = vmatprep.mubr.msk.f32.mxu1 %vm4212_vm6, %v16954_v62  ;;  %v16972_v25 = vld [vmem:[#allocation2 + $0x131] sm:$0xff] }
 0x2bb   : > { %14127 = vmatprep.mubr.msk.f32.mxu0 %vm4212_vm6, %v16709_v63  ;;  %v16978_v63 = vld [vmem:[#allocation2 + $0x149] sm:$0xff] }
 0x2bd   : > { %14078 = vmatmul.mubr.msk.f32.gmra.mxu1 %vm4212_vm6, %v16960_v6 }
 0x2be   : > { %14128 = vmatmul.mubr.msk.f32.gmra.mxu0 %vm4212_vm6, %v16723_v31  ;;  %14080 = vmatprep.mubr.msk.f32.mxu1 %vm4212_vm6, %v16966_v29  ;;  %v16984_v31 = vld [vmem:[#allocation2 + $0x151] sm:$0xff] }
 0x2bf   : > { %14130 = vmatprep.mubr.msk.f32.mxu0 %vm4212_vm6, %v16727_v55  ;;  %v16990_v55 = vld [vmem:[#allocation2 + $0x169] sm:$0xff] }
 0x2c1   : > { %14081 = vmatmul.mubr.msk.f32.gmra.mxu1 %vm4212_vm6, %v16972_v25 }
 0x2c2   : > { %14131 = vmatmul.mubr.msk.f32.gmra.mxu0 %vm4212_vm6, %v16741_v50  ;;  %14083 = vmatprep.mubr.msk.f32.mxu1 %vm4212_vm6, %v16978_v63  ;;  %v16996_v50 = vld [vmem:[#allocation2 + $0x171] sm:$0xff] }
 0x2c3   : > { %14133 = vmatprep.mubr.msk.f32.mxu0 %vm4212_vm6, %v16745_v54  ;;  %v17002_v54 = vld [vmem:[#allocation2 + $0x189] sm:$0xff] }
 0x2c5   : > { %14084 = vmatmul.mubr.msk.f32.gmra.mxu1 %vm4212_vm6, %v16984_v31 }
 0x2c6   : > { %14134 = vmatmul.mubr.msk.f32.gmra.mxu0 %vm4212_vm6, %v16759_v27  ;;  %14086 = vmatprep.mubr.msk.f32.mxu1 %vm4212_vm6, %v16990_v55  ;;  %v17008_v27 = vld [vmem:[#allocation2 + $0x191] sm:$0xff] }
 0x2c7   : > { %14136 = vmatprep.mubr.msk.f32.mxu0 %vm4212_vm6, %v16763_v19  ;;  %v17014_v19 = vld [vmem:[#allocation2 + $0x1a9] sm:$0xff] }
 0x2c9   : > { %14087 = vmatmul.mubr.msk.f32.gmra.mxu1 %vm4212_vm6, %v16996_v50 }
 0x2ca   : > { %14137 = vmatmul.mubr.msk.f32.gmra.mxu0 %vm4212_vm6, %v16777_v0  ;;  %14089 = vmatprep.mubr.msk.f32.mxu1 %vm4212_vm6, %v17002_v54  ;;  %v17020_v0 = vld [vmem:[#allocation2 + $0x1b1] sm:$0xff] }
 0x2cb   : > { %14139 = vmatprep.mubr.msk.f32.mxu0 %vm4212_vm6, %v16781_v35  ;;  %v17026_v35 = vld [vmem:[#allocation2 + $0x1c9] sm:$0xff] }
 0x2cd   : > { %14090 = vmatmul.mubr.msk.f32.gmra.mxu1 %vm4212_vm6, %v17008_v27 }
 0x2ce   : > { %14140 = vmatmul.mubr.msk.f32.gmra.mxu0 %vm4212_vm6, %v16795_v43  ;;  %14092 = vmatprep.mubr.msk.f32.mxu1 %vm4212_vm6, %v17014_v19  ;;  %v17032_v43 = vld [vmem:[#allocation2 + $0x1d1] sm:$0xff] }
 0x2cf   : > { %14142 = vmatprep.mubr.msk.f32.mxu0 %vm4212_vm6, %v16799_v28  ;;  %v17038_v28 = vld [vmem:[#allocation2 + $0x1e9] sm:$0xff] }
 0x2d1   : > { %14093 = vmatmul.mubr.msk.f32.gmra.mxu1 %vm4212_vm6, %v17020_v0 }
 0x2d2   : > { %14143 = vmatmul.mubr.msk.f32.gmra.mxu0 %vm4212_vm6, %v16813_v10  ;;  %14095 = vmatprep.mubr.msk.f32.mxu1 %vm4212_vm6, %v17026_v35  ;;  %v17046_v10 = vld [vmem:[#allocation2 + $0x1f1] sm:$0xff] }
 0x2d3   : > { %14145 = vmatprep.mubr.msk.f32.mxu0 %vm4212_vm6, %v16817_v4  ;;  %v17048_v4 = vld [vmem:[#allocation2 + $0x20f] sm:$0xff] }
 0x2d5   : > { %14096 = vmatmul.mubr.msk.f32.gmra.mxu1 %vm4212_vm6, %v17032_v43 }
 0x2d6   : > { %14146 = vmatmul.mubr.msk.f32.gmra.mxu0 %vm4212_vm6, %v16830_v20  ;;  %14098 = vmatprep.mubr.msk.f32.mxu1 %vm4212_vm6, %v17038_v28 }
 0x2d7   : > { %14148 = vmatprep.mubr.msk.f32.mxu0 %vm4212_vm6, %v17040_v40  ;;  %v17065_v40 = vld [vmem:[%s19656_s4 + $0x40] sm:$0x3f] }
 0x2d9   : > { %14099 = vmatmul.mubr.msk.f32.gmra.mxu1 %vm4212_vm6, %v17046_v10 }
 0x2da   : > { %14149 = vmatmul.mubr.msk.f32.gmra.mxu0 %vm4212_vm6, %v17048_v4  ;;  %14153 = vmatprep.mubr.msk.f32.mxu1 %vm4212_vm6, %v16571_v21  ;;  %v19997_v21 = vld [vmem:[#allocation17_spill] sm:$0xff] }
 0x2db   : > { %14203 = vmatprep.mubr.msk.f32.mxu0 %vm4212_vm6, %v16850_v9  ;;  %v20007_v9 = vld [vmem:[#allocation11_spill] sm:$0xff] }
 0x2dd   : > { %14154 = vmatmul.mubr.msk.f32.vlgmr.msra.gmra.mxu1 %vm4212_vm6, %v16581_v2  ;;  %v19998_v2 = vld [vmem:[#allocation29_spill] sm:$0xff] }
 0x2de   : > { %14204 = vmatmul.mubr.msk.f32.vlgmr.msra.gmra.mxu0 %vm4212_vm6, %v16872_v49  ;;  %14252 = vmatpush3.msk.msra.mxu1 %vm4309_vm5, %v16855_v23 }
 0x2df   : > { %14156 = vmatprep.mubr.msk.f32.mxu1 %vm4212_vm6, %v16591_v7  ;;  %14206 = vmatprep.mubr.msk.f32.mxu0 %vm4212_vm6, %v16882_v24 }
 0x2e0   : > { %14302 = vmatpush3.msk.msra.mxu0 %vm4309_vm5, %v16860_v58  ;;  %14351 = vmatprep.subr.msk.mxu1 %vm4309_vm5, %v17065_v40 }
 0x2e1   : > { %14157 = vmatmul.mubr.msk.f32.gmra.mxu1 %vm4212_vm6, %v16599_v5 }
 0x2e2   : > { %14207 = vmatmul.mubr.msk.f32.gmra.mxu0 %vm4212_vm6, %v16888_v18  ;;  %14159 = vmatprep.mubr.msk.f32.mxu1 %vm4212_vm6, %v16609_v56 }
 0x2e3   : > { %14209 = vmatprep.mubr.msk.f32.mxu0 %vm4212_vm6, %v16894_v26 }
 0x2e5   : > { %14160 = vmatmul.mubr.msk.f32.gmra.mxu1 %vm4212_vm6, %v16617_v37 }
 0x2e6   : > { %14210 = vmatmul.mubr.msk.f32.gmra.mxu0 %vm4212_vm6, %v16900_v41  ;;  %14162 = vmatprep.mubr.msk.f32.mxu1 %vm4212_vm6, %v16627_v13 }
 0x2e7   : > { %14212 = vmatprep.mubr.msk.f32.mxu0 %vm4212_vm6, %v16906_v33  ;;  %v20008_v33 = vld [vmem:[#allocation12_spill] sm:$0xff] }
 0x2e9   : > { %14163 = vmatmul.mubr.msk.f32.gmra.mxu1 %vm4212_vm6, %v16635_v51 }
 0x2ea   : > { %14213 = vmatmul.mubr.msk.f32.gmra.mxu0 %vm4212_vm6, %v16912_v57  ;;  %14165 = vmatprep.mubr.msk.f32.mxu1 %vm4212_vm6, %v16645_v16 }
 0x2eb   : > { %14215 = vmatprep.mubr.msk.f32.mxu0 %vm4212_vm6, %v16918_v30  ;;  %v19999_v30 = vld [vmem:[#allocation51_spill] sm:$0xff] }
 0x2ed   : > { %14166 = vmatmul.mubr.msk.f32.gmra.mxu1 %vm4212_vm6, %v16653_v14 }
 0x2ee   : > { %14216 = vmatmul.mubr.msk.f32.gmra.mxu0 %vm4212_vm6, %v16924_v42  ;;  %14168 = vmatprep.mubr.msk.f32.mxu1 %vm4212_vm6, %v16663_v53  ;;  %v20000_v42 = vld [vmem:[#allocation32_spill] sm:$0xff] }
 0x2ef   : > { %14218 = vmatprep.mubr.msk.f32.mxu0 %vm4212_vm6, %v16930_v59  ;;  %v20001_v59 = vld [vmem:[#allocation34_spill] sm:$0xff] }
 0x2f1   : > { %14169 = vmatmul.mubr.msk.f32.gmra.mxu1 %vm4212_vm6, %v16671_v22 }
 0x2f2   : > { %14219 = vmatmul.mubr.msk.f32.gmra.mxu0 %vm4212_vm6, %v16936_v17  ;;  %14171 = vmatprep.mubr.msk.f32.mxu1 %vm4212_vm6, %v16681_v52  ;;  %v17185_v17 = vld [vmem:[#allocation2 + $0x208] sm:$0xff] }
 0x2f3   : > { %14221 = vmatprep.mubr.msk.f32.mxu0 %vm4212_vm6, %v16942_v3  ;;  %v17187_v3 = vld [vmem:[#allocation2 + $0x209] sm:$0xff] }
 0x2f5   : > { %14172 = vmatmul.mubr.msk.f32.gmra.mxu1 %vm4212_vm6, %v16689_v44 }
 0x2f6   : > { %14222 = vmatmul.mubr.msk.f32.gmra.mxu0 %vm4212_vm6, %v16948_v34  ;;  %14174 = vmatprep.mubr.msk.f32.mxu1 %vm4212_vm6, %v16699_v8  ;;  %v17193_v34 = vld [vmem:[#allocation2 + $0x210] sm:$0xff] }
 0x2f7   : > { %14224 = vmatprep.mubr.msk.f32.mxu0 %vm4212_vm6, %v16954_v62  ;;  %v17195_v62 = vld [vmem:[#allocation2 + $0x211] sm:$0xff] }
 0x2f9   : > { %14175 = vmatmul.mubr.msk.f32.gmra.mxu1 %vm4212_vm6, %v16707_v48 }
 0x2fa   : > { %14225 = vmatmul.mubr.msk.f32.gmra.mxu0 %vm4212_vm6, %v16960_v6  ;;  %14177 = vmatprep.mubr.msk.f32.mxu1 %vm4212_vm6, %v16717_v38  ;;  %v17209_v6 = vpop.f32.mrf.mxu0 }
 0x2fb   : > { %14227 = vmatprep.mubr.msk.f32.mxu0 %vm4212_vm6, %v16966_v29  ;;  %v17215_v29 = vpop.f32.mrf.mxu1 }
 0x2fd   : > { %14178 = vmatmul.mubr.msk.f32.gmra.mxu1 %vm4212_vm6, %v16725_v45 }
 0x2fe   : > { %14228 = vmatmul.mubr.msk.f32.gmra.mxu0 %vm4212_vm6, %v16972_v25  ;;  %14180 = vmatprep.mubr.msk.f32.mxu1 %vm4212_vm6, %v16735_v47  ;;  %v20003_v25 = vld [vmem:[#allocation7_spill] sm:$0xff] }
 0x2ff   : > { %14230 = vmatprep.mubr.msk.f32.mxu0 %vm4212_vm6, %v16978_v63 }
 0x301   : > { %14181 = vmatmul.mubr.msk.f32.gmra.mxu1 %vm4212_vm6, %v16743_v39 }
 0x302   : > { %14231 = vmatmul.mubr.msk.f32.gmra.mxu0 %vm4212_vm6, %v16984_v31  ;;  %14183 = vmatprep.mubr.msk.f32.mxu1 %vm4212_vm6, %v16753_v11 }
 0x303   : > { %14233 = vmatprep.mubr.msk.f32.mxu0 %vm4212_vm6, %v16990_v55 }
 0x305   : > { %14184 = vmatmul.mubr.msk.f32.gmra.mxu1 %vm4212_vm6, %v16761_v46 }
 0x306   : > { %14234 = vmatmul.mubr.msk.f32.gmra.mxu0 %vm4212_vm6, %v16996_v50  ;;  %14186 = vmatprep.mubr.msk.f32.mxu1 %vm4212_vm6, %v16771_v60 }
 0x307   : > { %14236 = vmatprep.mubr.msk.f32.mxu0 %vm4212_vm6, %v17002_v54 }
 0x309   : > { %14187 = vmatmul.mubr.msk.f32.gmra.mxu1 %vm4212_vm6, %v16779_v15 }
 0x30a   : > { %14237 = vmatmul.mubr.msk.f32.gmra.mxu0 %vm4212_vm6, %v17008_v27  ;;  %14189 = vmatprep.mubr.msk.f32.mxu1 %vm4212_vm6, %v16789_v12  ;;  %v20005_v27 = vld [vmem:[#allocation9_spill] sm:$0xff] }
 0x30b   : > { %14239 = vmatprep.mubr.msk.f32.mxu0 %vm4212_vm6, %v17014_v19 }
 0x30d   : > { %14190 = vmatmul.mubr.msk.f32.gmra.mxu1 %vm4212_vm6, %v19997_v21 }
 0x30e   : > { %14240 = vmatmul.mubr.msk.f32.gmra.mxu0 %vm4212_vm6, %v17020_v0  ;;  %14192 = vmatprep.mubr.msk.f32.mxu1 %vm4212_vm6, %v19998_v2 }
 0x30f   : > { %14242 = vmatprep.mubr.msk.f32.mxu0 %vm4212_vm6, %v17026_v35 }
 0x311   : > { %14193 = vmatmul.mubr.msk.f32.gmra.mxu1 %vm4212_vm6, %v19999_v30 }
 0x312   : > { %14243 = vmatmul.mubr.msk.f32.gmra.mxu0 %vm4212_vm6, %v17032_v43  ;;  %14195 = vmatprep.mubr.msk.f32.mxu1 %vm4212_vm6, %v20000_v42 }
 0x313   : > { %14245 = vmatprep.mubr.msk.f32.mxu0 %vm4212_vm6, %v17038_v28 }
 0x315   : > { %14196 = vmatmul.mubr.msk.f32.gmra.mxu1 %vm4212_vm6, %v20001_v59 }
 0x316   : > { %14246 = vmatmul.mubr.msk.f32.gmra.mxu0 %vm4212_vm6, %v17046_v10  ;;  %14198 = vmatprep.mubr.msk.f32.mxu1 %vm4212_vm6, %v17185_v17  ;;  %v20006_v10 = vld [vmem:[#allocation10_spill] sm:$0xff] }
 0x317   : > { %14248 = vmatprep.mubr.msk.f32.mxu0 %vm4212_vm6, %v17187_v3 }
 0x319   : > { %14199 = vmatmul.mubr.msk.f32.gmra.mxu1 %vm4212_vm6, %v17193_v34 }
 0x31a   : > { %14249 = vmatmul.mubr.msk.f32.gmra.mxu0 %vm4212_vm6, %v17195_v62  ;;  %14253 = vmatprep.mubr.msk.f32.mxu1 %vm4212_vm6, %v16583_v61 }
 0x31b   : > { %14303 = vmatprep.mubr.msk.f32.mxu0 %vm4212_vm6, %v16591_v7 }
 0x31d   : > { %14254 = vmatmul.mubr.msk.f32.vlgmr.msra.gmra.mxu1 %vm4212_vm6, %v16597_v36  ;;  %v20002_v36 = vld [vmem:[#allocation52_spill] sm:$0xff] }
 0x31e   : > { %14304 = vmatmul.mubr.msk.f32.vlgmr.msra.gmra.mxu0 %vm4212_vm6, %v16599_v5  ;;  %14352 = vmatpush3.msk.msra.mxu1 %vm4309_vm5, %v17065_v40 }
 0x31f   : > { %14256 = vmatprep.mubr.msk.f32.mxu1 %vm4212_vm6, %v16601_v32  ;;  %14306 = vmatprep.mubr.msk.f32.mxu0 %vm4212_vm6, %v16609_v56 }
 0x320   : > { %v13958_v61 = vpop.f32.mrf.mxu1 }
 0x321   : > { %v14008_v7 = vpop.f32.mrf.mxu0  ;;  %14257 = vmatmul.mubr.msk.f32.gmra.mxu1 %vm4212_vm6, %v16615_v1  ;;  %v4541_v5 = vadd.f32 %v13958_v61, %v20002_v36  ;;  %v20004_v1 = vld [vmem:[#allocation8_spill] sm:$0xff] }
 0x322   : > { %14307 = vmatmul.mubr.msk.f32.gmra.mxu0 %vm4212_vm6, %v16617_v37  ;;  %14259 = vmatprep.mubr.msk.f32.mxu1 %vm4212_vm6, %v20003_v25  ;;  %v4389_v32 = vpop.f32.mrf.mxu1 }
 0x323   : > { %14309 = vmatprep.mubr.msk.f32.mxu0 %vm4212_vm6, %v16627_v13  ;;  %v4779_v63 = vpop.f32.mrf.mxu0  ;;  %v17228_v31 = vadd.f32 %v14008_v7, %v4541_v5  ;;  %v4540_v56 = vadd.f32 %v20002_v36, %v4389_v32  ;;  %v20009_v7 = vld [vmem:[#allocation14_spill] sm:$0xff] }
 0x324   : > { %v13961_v55 = vpop.f32.mrf.mxu1 }
 0x325   : > { %v14011_v50 = vpop.f32.mrf.mxu0  ;;  %14260 = vmatmul.mubr.msk.f32.gmra.mxu1 %vm4212_vm6, %v20004_v1  ;;  %v17235_v37 = vadd.f32 %v4779_v63, %v4540_v56  ;;  %v4543_v54 = vadd.f32 %v13961_v55, %v20002_v36  ;;  %v20010_v55 = vld [vmem:[#allocation44_spill] sm:$0xff]  ;;  %v20011_v1 = vld [vmem:[#allocation45_spill] sm:$0xff] }
 0x326   : > { %14310 = vmatmul.mubr.msk.f32.gmra.mxu0 %vm4212_vm6, %v16635_v51  ;;  %14262 = vmatprep.mubr.msk.f32.mxu1 %vm4212_vm6, %v20005_v27  ;;  %v4399_v13 = vpop.f32.mrf.mxu1 }
 0x327   : > { %14312 = vmatprep.mubr.msk.f32.mxu0 %vm4212_vm6, %v16645_v16  ;;  %v4789_v19 = vpop.f32.mrf.mxu0  ;;  %v17242_v0 = vadd.f32 %v14011_v50, %v4543_v54  ;;  %v4542_v35 = vadd.f32 %v20002_v36, %v4399_v13 }
 0x328   : > { %v13964_v43 = vpop.f32.mrf.mxu1 }
 0x329   : > { %v14014_v28 = vpop.f32.mrf.mxu0  ;;  %14263 = vmatmul.mubr.msk.f32.gmra.mxu1 %vm4212_vm6, %v20006_v10  ;;  %v17249_v51 = vadd.f32 %v4789_v19, %v4542_v35  ;;  %v4545_v40 = vadd.f32 %v13964_v43, %v20002_v36  ;;  %v20012_v43 = vld [vmem:[#allocation16_spill] sm:$0xff]  ;;  %v20013_v10 = vld [vmem:[#allocation25_spill] sm:$0xff] }
 0x32a   : > { %14313 = vmatmul.mubr.msk.f32.gmra.mxu0 %vm4212_vm6, %v16653_v14  ;;  %14265 = vmatprep.mubr.msk.f32.mxu1 %vm4212_vm6, %v20007_v9  ;;  %v4409_v16 = vpop.f32.mrf.mxu1 }
 0x32b   : > { %14315 = vmatprep.mubr.msk.f32.mxu0 %vm4212_vm6, %v16663_v53  ;;  %v4799_v23 = vpop.f32.mrf.mxu0  ;;  %v17256_v58 = vadd.f32 %v14014_v28, %v4545_v40  ;;  %v4544_v57 = vadd.f32 %v20002_v36, %v4409_v16 }
 0x32c   : > { %v13967_v49 = vpop.f32.mrf.mxu1 }
 0x32d   : > { %v14017_v41 = vpop.f32.mrf.mxu0  ;;  %14266 = vmatmul.mubr.msk.f32.gmra.mxu1 %vm4212_vm6, %v20008_v33  ;;  %v17263_v14 = vadd.f32 %v4799_v23, %v4544_v57  ;;  %v4547_v61 = vadd.f32 %v13967_v49, %v20002_v36  ;;  %v20014_v49 = vld [vmem:[#allocation26_spill] sm:$0xff] }
 0x32e   : > { %14316 = vmatmul.mubr.msk.f32.gmra.mxu0 %vm4212_vm6, %v16671_v22  ;;  %14268 = vmatprep.mubr.msk.f32.mxu1 %vm4212_vm6, %v20009_v7  ;;  %v4419_v53 = vpop.f32.mrf.mxu1  ;;  %v20015_v33 = vld [vmem:[#allocation46_spill] sm:$0xff] }
 0x32f   : > { %14318 = vmatprep.mubr.msk.f32.mxu0 %vm4212_vm6, %v16681_v52  ;;  %v4809_v5 = vpop.f32.mrf.mxu0  ;;  %v17270_v25 = vadd.f32 %v14017_v41, %v4547_v61  ;;  %v4546_v32 = vadd.f32 %v20002_v36, %v4419_v53 }
 0x330   : > { %v13970_v63 = vpop.f32.mrf.mxu1 }
 0x331   : > { %v14020_v56 = vpop.f32.mrf.mxu0  ;;  %14269 = vmatmul.mubr.msk.f32.gmra.mxu1 %vm4212_vm6, %v20010_v55  ;;  %v17277_v22 = vadd.f32 %v4809_v5, %v4546_v32  ;;  %v4549_v50 = vadd.f32 %v13970_v63, %v20002_v36  ;;  %v20016_v63 = vld [vmem:[#allocation47_spill] sm:$0xff]  ;;  %v20017_v55 = vld [vmem:[#allocation18_spill] sm:$0xff] }
 0x332   : > { %14319 = vmatmul.mubr.msk.f32.gmra.mxu0 %vm4212_vm6, %v16689_v44  ;;  %14271 = vmatprep.mubr.msk.f32.mxu1 %vm4212_vm6, %v20011_v1  ;;  %v4429_v52 = vpop.f32.mrf.mxu1 }
 0x333   : > { %14321 = vmatprep.mubr.msk.f32.mxu0 %vm4212_vm6, %v16699_v8  ;;  %v4819_v54 = vpop.f32.mrf.mxu0  ;;  %v17284_v27 = vadd.f32 %v14020_v56, %v4549_v50  ;;  %v4548_v13 = vadd.f32 %v20002_v36, %v4429_v52 }
 0x335   : > { %v13973_v19 = vpop.f32.mrf.mxu1  ;;  %14272 = vmatmul.mubr.msk.f32.gmra.mxu1 %vm4212_vm6, %v20012_v43  ;;  %v17291_v44 = vadd.f32 %v4819_v54, %v4548_v13  ;;  %v20018_v13 = vld [vmem:[#allocation15_spill] sm:$0xff] }
 0x336   : > { %v14023_v35 = vpop.f32.mrf.mxu0  ;;  %14322 = vmatmul.mubr.msk.f32.gmra.mxu0 %vm4212_vm6, %v16707_v48  ;;  %v4551_v28 = vadd.f32 %v13973_v19, %v20002_v36  ;;  %14274 = vmatprep.mubr.msk.f32.mxu1 %vm4212_vm6, %v20013_v10  ;;  %v20019_v19 = vld [vmem:[#allocation28_spill] sm:$0xff] }
 0x337   : > { %14324 = vmatprep.mubr.msk.f32.mxu0 %vm4212_vm6, %v16717_v38  ;;  %v4439_v8 = vpop.f32.mrf.mxu1 }
 0x338   : > { %v4829_v40 = vpop.f32.mrf.mxu0  ;;  %v17298_v9 = vadd.f32 %v14023_v35, %v4551_v28  ;;  %v4550_v16 = vadd.f32 %v20002_v36, %v4439_v8  ;;  %v20020_v8 = vld [vmem:[#allocation30_spill] sm:$0xff] }
 0x339   : > { %v13976_v23 = vpop.f32.mrf.mxu1  ;;  %14275 = vmatmul.mubr.msk.f32.gmra.mxu1 %vm4212_vm6, %v20014_v49 }
 0x33a   : > { %v14026_v57 = vpop.f32.mrf.mxu0  ;;  %14325 = vmatmul.mubr.msk.f32.gmra.mxu0 %vm4212_vm6, %v16725_v45  ;;  %v17305_v48 = vadd.f32 %v4829_v40, %v4550_v16  ;;  %v4553_v41 = vadd.f32 %v13976_v23, %v20002_v36  ;;  %14277 = vmatprep.mubr.msk.f32.mxu1 %vm4212_vm6, %v20015_v33  ;;  %v20021_v40 = vld [vmem:[#allocation48_spill] sm:$0xff]  ;;  %v20023_v33 = vld [vmem:[#allocation27_spill] sm:$0xff] }
 0x33b   : > { %14327 = vmatprep.mubr.msk.f32.mxu0 %vm4212_vm6, %v16735_v47  ;;  %v4449_v38 = vpop.f32.mrf.mxu1 }
 0x33c   : > { %v4839_v61 = vpop.f32.mrf.mxu0  ;;  %v17312_v7 = vadd.f32 %v14026_v57, %v4553_v41  ;;  %v4552_v53 = vadd.f32 %v20002_v36, %v4449_v38  ;;  %v20022_v41 = vld [vmem:[#allocation49_spill] sm:$0xff] }
 0x33d   : > { %v13979_v5 = vpop.f32.mrf.mxu1  ;;  %14278 = vmatmul.mubr.msk.f32.gmra.mxu1 %vm4212_vm6, %v20016_v63  ;;  %v20025_v63 = vld [vmem:[#allocation20_spill] sm:$0xff] }
 0x33e   : > { %v14029_v32 = vpop.f32.mrf.mxu0  ;;  %14328 = vmatmul.mubr.msk.f32.gmra.mxu0 %vm4212_vm6, %v16743_v39  ;;  %v17319_v45 = vadd.f32 %v4839_v61, %v4552_v53  ;;  %v4555_v56 = vadd.f32 %v13979_v5, %v20002_v36  ;;  %14280 = vmatprep.mubr.msk.f32.mxu1 %vm4212_vm6, %v20017_v55 }
 0x33f   : > { %14330 = vmatprep.mubr.msk.f32.mxu0 %vm4212_vm6, %v16753_v11  ;;  %v17326_v47 = vpop.f32.mrf.mxu1 }
 0x340   : > { %v17328_v50 = vpop.f32.mrf.mxu0  ;;  %v17330_v1 = vadd.f32 %v14029_v32, %v4555_v56  ;;  %v20024_v32 = vld [vmem:[#allocation50_spill] sm:$0xff] }
 0x341   : > { %v13982_v52 = vpop.f32.mrf.mxu1  ;;  %14281 = vmatmul.mubr.msk.f32.gmra.mxu1 %vm4212_vm6, %v20018_v13  ;;  %v20026_v13 = vld [vmem:[#allocation19_spill] sm:$0xff] }
 0x342   : > { %v14032_v54 = vpop.f32.mrf.mxu0  ;;  %14331 = vmatmul.mubr.msk.f32.gmra.mxu0 %vm4212_vm6, %v16761_v46  ;;  %v4557_v39 = vadd.f32 %v13982_v52, %v20002_v36  ;;  %14283 = vmatprep.mubr.msk.f32.mxu1 %vm4212_vm6, %v20019_v19  ;;  %v6550_v19 = vld [vmem:[#allocation2 + $0x227] sm:$0xff] }
 0x343   : > { %14333 = vmatprep.mubr.msk.f32.mxu0 %vm4212_vm6, %v16771_v60  ;;  %v17341_v11 = vpop.f32.mrf.mxu1 }
 0x344   : > { %v17343_v35 = vpop.f32.mrf.mxu0  ;;  %v17345_v43 = vadd.f32 %v14032_v54, %v4557_v39 }
 0x345   : > { %v13985_v28 = vpop.f32.mrf.mxu1  ;;  %14284 = vmatmul.mubr.msk.f32.gmra.mxu1 %vm4212_vm6, %v20020_v8 }
 0x346   : > { %v14035_v10 = vpop.f32.mrf.mxu0  ;;  %14334 = vmatmul.mubr.msk.f32.gmra.mxu0 %vm4212_vm6, %v16779_v15  ;;  %v4559_v46 = vadd.f32 %v13985_v28, %v20002_v36  ;;  %14286 = vmatprep.mubr.msk.f32.mxu1 %vm4212_vm6, %v20021_v40  ;;  %v6940_v28 = vld [vmem:[#allocation2 + $0x228] sm:$0xff] }
 0x347   : > { %14336 = vmatprep.mubr.msk.f32.mxu0 %vm4212_vm6, %v16789_v12  ;;  %v17356_v60 = vpop.f32.mrf.mxu1 }
 0x348   : > { %v17358_v16 = vpop.f32.mrf.mxu0  ;;  %v17360_v23 = vadd.f32 %v14035_v10, %v4559_v46  ;;  %v6941_v46 = vld [vmem:[#allocation2 + $0x230] sm:$0xff] }
 0x349   : > { %v13988_v57 = vpop.f32.mrf.mxu1  ;;  %14287 = vmatmul.mubr.msk.f32.gmra.mxu1 %vm4212_vm6, %v20022_v41 }
 0x34a   : > { %v14038_v49 = vpop.f32.mrf.mxu0  ;;  %14337 = vmatmul.mubr.msk.f32.gmra.mxu0 %vm4212_vm6, %v19997_v21  ;;  %v4561_v15 = vadd.f32 %v13988_v57, %v20002_v36  ;;  %14289 = vmatprep.mubr.msk.f32.mxu1 %vm4212_vm6, %v20023_v33 }
 0x34b   : > { %14339 = vmatprep.mubr.msk.f32.mxu0 %vm4212_vm6, %v19998_v2  ;;  %v17371_v12 = vpop.f32.mrf.mxu1 }
 0x34c   : > { %v17373_v38 = vpop.f32.mrf.mxu0  ;;  %v17375_v61 = vadd.f32 %v14038_v49, %v4561_v15 }
 0x34d   : > { %v13991_v53 = vpop.f32.mrf.mxu1  ;;  %14290 = vmatmul.mubr.msk.f32.gmra.mxu1 %vm4212_vm6, %v20024_v32 }
 0x34e   : > { %v14041_v5 = vpop.f32.mrf.mxu0  ;;  %14340 = vmatmul.mubr.msk.f32.gmra.mxu0 %vm4212_vm6, %v19999_v30  ;;  %v4563_v21 = vadd.f32 %v13991_v53, %v20002_v36  ;;  %14292 = vmatprep.mubr.msk.f32.mxu1 %vm4212_vm6, %v20025_v63 }
 0x34f   : > { %14342 = vmatprep.mubr.msk.f32.mxu0 %vm4212_vm6, %v20000_v42  ;;  %v17386_v2 = vpop.f32.mrf.mxu1 }
 0x350   : > { %v17388_v56 = vpop.f32.mrf.mxu0  ;;  %v17390_v55 = vadd.f32 %v14041_v5, %v4563_v21  ;;  %v20027_v21 = vld [vmem:[#allocation53_spill] sm:$0xff] }
 0x351   : > { %v13994_v52 = vpop.f32.mrf.mxu1  ;;  %14293 = vmatmul.mubr.msk.f32.gmra.mxu1 %vm4212_vm6, %v16830_v20 }
 0x352   : > { %v14044_v54 = vpop.f32.mrf.mxu0  ;;  %14343 = vmatmul.mubr.msk.f32.gmra.mxu0 %vm4212_vm6, %v20001_v59  ;;  %v4565_v30 = vadd.f32 %v13994_v52, %v20002_v36  ;;  %14295 = vmatprep.mubr.msk.f32.mxu1 %vm4212_vm6, %v20026_v13 }
 0x353   : > { %14345 = vmatprep.mubr.msk.f32.mxu0 %vm4212_vm6, %v17185_v17  ;;  %v17401_v42 = vpop.f32.mrf.mxu1  ;;  %v6551_v17 = vld [vmem:[#allocation2 + $0x22f] sm:$0xff] }
 0x354   : > { %v17403_v39 = vpop.f32.mrf.mxu0  ;;  %v17405_v10 = vadd.f32 %v14044_v54, %v4565_v30  ;;  %v7303_v54 = vld [vmem:[#allocation2 + $0x71] sm:$0xff] }
 0x355   : > { %v13997_v20 = vpop.f32.mrf.mxu1  ;;  %14296 = vmatmul.mubr.msk.f32.gmra.mxu1 %vm4212_vm6, %v17048_v4 }
 0x356   : > { %v14047_v8 = vpop.f32.mrf.mxu0  ;;  %14346 = vmatmul.mubr.msk.f32.gmra.mxu0 %vm4212_vm6, %v17193_v34  ;;  %v4567_v59 = vadd.f32 %v13997_v20, %v20002_v36  ;;  %14298 = vmatprep.mubr.msk.f32.mxu1 %vm4212_vm6, %v6550_v19  ;;  %v7304_v19 = vld [vmem:[#allocation2 + $0x89] sm:$0xff] }
 0x357   : > { %14348 = vmatprep.mubr.msk.f32.mxu0 %vm4212_vm6, %v6940_v28  ;;  %v17414_v40 = vpop.f32.mrf.mxu1 }
 0x358   : > { %v17416_v57 = vpop.f32.mrf.mxu0  ;;  %v17418_v49 = vadd.f32 %v14047_v8, %v4567_v59  ;;  %v7305_v59 = vld [vmem:[#allocation2 + $0x91] sm:$0xff] }
 0x359   : > { %v14000_v41 = vpop.f32.mrf.mxu1  ;;  %14299 = vmatmul.mubr.msk.f32.gmra.mxu1 %vm4212_vm6, %v6551_v17 }
 0x35a   : > { %v14050_v15 = vpop.f32.mrf.mxu0  ;;  %14349 = vmatmul.mubr.msk.f32.gmra.mxu0 %vm4212_vm6, %v6941_v46  ;;  %v4569_v4 = vadd.f32 %v14000_v41, %v20002_v36  ;;  %14353 = vmatprep.mubr.msk.f32.mxu1 %vm4212_vm6, %v16882_v24  ;;  %v7306_v41 = vld [vmem:[#allocation2 + $0xa9] sm:$0xff] }
 0x35b   : > { %v17425_v34 = vpop.f32.mrf.mxu1 }
 0x35c   : > { %v17427_v33 = vpop.f32.mrf.mxu0  ;;  %v17429_v53 = vadd.f32 %v14050_v15, %v4569_v4 }
 0x35d   : > { %v14055_v5 = vpop.f32.mrf.mxu1  ;;  %14354 = vmatmul.mubr.msk.f32.vlgmr.msra.gmra.mxu1 %vm4212_vm6, %v16888_v18 }
 0x35e   : > { %v14105_v32 = vpop.f32.mrf.mxu0  ;;  %v5319_v63 = vadd.f32 %v14055_v5, %v20027_v21  ;;  %14356 = vmatprep.mubr.msk.f32.mxu1 %vm4212_vm6, %v16894_v26 }
 0x35f   : > { %v17436_v36 = vpop.f32.mrf.mxu1 }
 0x360   : > { %v17438_v52 = vpop.f32.mrf.mxu0  ;;  %v17440_v24 = vadd.f32 %v14105_v32, %v5319_v63 }
 0x361   : > { %v14058_v30 = vpop.f32.mrf.mxu1  ;;  %14357 = vmatmul.mubr.msk.f32.gmra.mxu1 %vm4212_vm6, %v7303_v54  ;;  %v7308_v54 = vld [vmem:[#allocation2 + $0xc9] sm:$0xff] }
 0x362   : > { %v14108_v13 = vpop.f32.mrf.mxu0  ;;  %v5321_v28 = vadd.f32 %v14058_v30, %v17228_v31  ;;  %14359 = vmatprep.mubr.msk.f32.mxu1 %vm4212_vm6, %v7304_v19 }
 0x363   : > { %v5169_v18 = vpop.f32.mrf.mxu1 }
 0x364   : > { %v17445_v20 = vpop.f32.mrf.mxu0  ;;  %v17447_v26 = vadd.f32 %v14108_v13, %v5321_v28  ;;  %v17450_v8 = vadd.f32 %v5169_v18, %v17235_v37  ;;  %v7307_v37 = vld [vmem:[#allocation2 + $0xb1] sm:$0xff] }
 0x365   : > { %v14061_v17 = vpop.f32.mrf.mxu1  ;;  %14360 = vmatmul.mubr.msk.f32.gmra.mxu1 %vm4212_vm6, %v7305_v59 }
 0x366   : > { %v14111_v46 = vpop.f32.mrf.mxu0  ;;  %v5323_v15 = vadd.f32 %v14061_v17, %v17242_v0  ;;  %14362 = vmatprep.mubr.msk.f32.mxu1 %vm4212_vm6, %v7306_v41  ;;  %v7310_v17 = vld [vmem:[#allocation2 + $0xe9] sm:$0xff] }
 0x367   : > { %v5179_v31 = vpop.f32.mrf.mxu1 }
 0x368   : > { %v17455_v4 = vpop.f32.mrf.mxu0  ;;  %v17457_v5 = vadd.f32 %v14111_v46, %v5323_v15  ;;  %v17460_v32 = vadd.f32 %v5179_v31, %v17249_v51  ;;  %v7309_v51 = vld [vmem:[#allocation2 + $0xd1] sm:$0xff] }
 0x369   : > { %v14064_v21 = vpop.f32.mrf.mxu1  ;;  %14363 = vmatmul.mubr.msk.f32.gmra.mxu1 %vm4212_vm6, %v7307_v37 }
 0x36a   : > { %v14114_v63 = vpop.f32.mrf.mxu0  ;;  %v5325_v30 = vadd.f32 %v14064_v21, %v17256_v58  ;;  %14365 = vmatprep.mubr.msk.f32.mxu1 %vm4212_vm6, %v7308_v54 }
 0x36b   : > { %v5189_v0 = vpop.f32.mrf.mxu1 }
 0x36c   : > { %v17465_v13 = vpop.f32.mrf.mxu0  ;;  %v17467_v19 = vadd.f32 %v14114_v63, %v5325_v30  ;;  %v17470_v28 = vadd.f32 %v5189_v0, %v17263_v14  ;;  %v7311_v14 = vld [vmem:[#allocation2 + $0xf1] sm:$0xff]  ;;  %v7312_v63 = vld [vmem:[#allocation2 + $0x109] sm:$0xff] }
 0x36d   : > { %v14067_v18 = vpop.f32.mrf.mxu1  ;;  %14366 = vmatmul.mubr.msk.f32.gmra.mxu1 %vm4212_vm6, %v7309_v51 }
 0x36e   : > { %v14117_v59 = vpop.f32.mrf.mxu0  ;;  %v5327_v46 = vadd.f32 %v14067_v18, %v17270_v25  ;;  %14368 = vmatprep.mubr.msk.f32.mxu1 %vm4212_vm6, %v7310_v17  ;;  %v7314_v17 = vld [vmem:[#allocation2 + $0x129] sm:$0xff] }
 0x36f   : > { %v5199_v58 = vpop.f32.mrf.mxu1 }
 0x370   : > { %v17475_v41 = vpop.f32.mrf.mxu0  ;;  %v17477_v15 = vadd.f32 %v14117_v59, %v5327_v46  ;;  %v17480_v31 = vadd.f32 %v5199_v58, %v17277_v22  ;;  %v7313_v22 = vld [vmem:[#allocation2 + $0x111] sm:$0xff] }
 0x371   : > { %v14070_v37 = vpop.f32.mrf.mxu1  ;;  %14369 = vmatmul.mubr.msk.f32.gmra.mxu1 %vm4212_vm6, %v7311_v14 }
 0x372   : > { %v14120_v21 = vpop.f32.mrf.mxu0  ;;  %v5329_v54 = vadd.f32 %v14070_v37, %v17284_v27  ;;  %14371 = vmatprep.mubr.msk.f32.mxu1 %vm4212_vm6, %v7312_v63 }
 0x373   : > { %v5209_v25 = vpop.f32.mrf.mxu1 }
 0x374   : > { %v17485_v30 = vpop.f32.mrf.mxu0  ;;  %v17487_v0 = vadd.f32 %v14120_v21, %v5329_v54  ;;  %v17490_v51 = vadd.f32 %v5209_v25, %v17291_v44  ;;  %v7315_v44 = vld [vmem:[#allocation2 + $0x131] sm:$0xff]  ;;  %v7316_v54 = vld [vmem:[#allocation2 + $0x149] sm:$0xff] }
 0x375   : > { %20028 = vst [vmem:[#allocation31_spill] sm:$0xff] %v17485_v30  ;;  %v14073_v18 = vpop.f32.mrf.mxu1  ;;  %14372 = vmatmul.mubr.msk.f32.gmra.mxu1 %vm4212_vm6, %v7313_v22 }
 0x376   : > { %20029 = vst [vmem:[#allocation33_spill] sm:$0xff] %v17490_v51  ;;  %v14123_v59 = vpop.f32.mrf.mxu0  ;;  %v5331_v46 = vadd.f32 %v14073_v18, %v17298_v9  ;;  %14374 = vmatprep.mubr.msk.f32.mxu1 %vm4212_vm6, %v7314_v17 }
 0x377   : > { %v5219_v27 = vpop.f32.mrf.mxu1 }
 0x378   : > { %v17495_v58 = vpop.f32.mrf.mxu0  ;;  %v17497_v14 = vadd.f32 %v14123_v59, %v5331_v46  ;;  %v17500_v37 = vadd.f32 %v5219_v27, %v17305_v48  ;;  %v7317_v48 = vld [vmem:[#allocation2 + $0x151] sm:$0xff]  ;;  %v7318_v27 = vld [vmem:[#allocation2 + $0x169] sm:$0xff] }
 0x379   : > { %20030 = vst [vmem:[#allocation54_spill] sm:$0xff] %v17495_v58  ;;  %v14076_v21 = vpop.f32.mrf.mxu1  ;;  %14375 = vmatmul.mubr.msk.f32.gmra.mxu1 %vm4212_vm6, %v7315_v44 }
 0x37a   : > { %20031 = vst [vmem:[#allocation55_spill] sm:$0xff] %v17500_v37  ;;  %v14126_v63 = vpop.f32.mrf.mxu0  ;;  %v5333_v25 = vadd.f32 %v14076_v21, %v17312_v7  ;;  %14377 = vmatprep.mubr.msk.f32.mxu1 %vm4212_vm6, %v7316_v54 }
 0x37b   : > { %v5229_v9 = vpop.f32.mrf.mxu1 }
 0x37c   : > { %v17505_v22 = vpop.f32.mrf.mxu0  ;;  %v17507_v18 = vadd.f32 %v14126_v63, %v5333_v25  ;;  %v17510_v59 = vadd.f32 %v5229_v9, %v17319_v45  ;;  %v7319_v63 = vld [vmem:[#allocation2 + $0x171] sm:$0xff]  ;;  %v7320_v9 = vld [vmem:[#allocation2 + $0x189] sm:$0xff] }
 0x37d   : > { %20032 = vst [vmem:[#allocation22_spill] sm:$0xff] %v17505_v22  ;;  %v14079_v17 = vpop.f32.mrf.mxu1  ;;  %14378 = vmatmul.mubr.msk.f32.gmra.mxu1 %vm4212_vm6, %v7317_v48 }
 0x37e   : > { %20033 = vst [vmem:[#allocation13_spill] sm:$0xff] %v17510_v59  ;;  %v14129_v46 = vpop.f32.mrf.mxu0  ;;  %v5335_v44 = vadd.f32 %v14079_v17, %v17330_v1  ;;  %14380 = vmatprep.mubr.msk.f32.mxu1 %vm4212_vm6, %v7318_v27  ;;  %v7321_v27 = vld [vmem:[#allocation2 + $0x191] sm:$0xff] }
 0x37f   : > { %v17515_v7 = vpop.f32.mrf.mxu1 }
 0x380   : > { %v17517_v21 = vpop.f32.mrf.mxu0  ;;  %v17519_v54 = vadd.f32 %v14129_v46, %v5335_v44  ;;  %v7322_v44 = vld [vmem:[#allocation2 + $0x1a9] sm:$0xff] }
 0x381   : > { %20034 = vst [vmem:[#allocation37_spill] sm:$0xff] %v17517_v21  ;;  %v14082_v25 = vpop.f32.mrf.mxu1  ;;  %14381 = vmatmul.mubr.msk.f32.gmra.mxu1 %vm4212_vm6, %v7319_v63 }
 0x382   : > { %v14132_v45 = vpop.f32.mrf.mxu0  ;;  %v5337_v22 = vadd.f32 %v14082_v25, %v17345_v43  ;;  %14383 = vmatprep.mubr.msk.f32.mxu1 %vm4212_vm6, %v7320_v9  ;;  %v7323_v9 = vld [vmem:[#allocation2 + $0x1b1] sm:$0xff] }
 0x383   : > { %v17524_v48 = vpop.f32.mrf.mxu1 }
 0x384   : > { %v17526_v1 = vpop.f32.mrf.mxu0  ;;  %v17528_v17 = vadd.f32 %v14132_v45, %v5337_v22  ;;  %v7324_v45 = vld [vmem:[#allocation2 + $0x1c9] sm:$0xff] }
 0x385   : > { %20035 = vst [vmem:[#allocation56_spill] sm:$0xff] %v17526_v1  ;;  %v14085_v21 = vpop.f32.mrf.mxu1  ;;  %14384 = vmatmul.mubr.msk.f32.gmra.mxu1 %vm4212_vm6, %v7321_v27 }
 0x386   : > { %v14135_v46 = vpop.f32.mrf.mxu0  ;;  %v5339_v59 = vadd.f32 %v14085_v21, %v17360_v23  ;;  %14386 = vmatprep.mubr.msk.f32.mxu1 %vm4212_vm6, %v7322_v44  ;;  %v7325_v44 = vld [vmem:[#allocation2 + $0x1d1] sm:$0xff] }
 0x387   : > { %v17533_v63 = vpop.f32.mrf.mxu1 }
 0x388   : > { %20036 = vst [vmem:[#allocation57_spill] sm:$0xff] %v17533_v63  ;;  %v17535_v43 = vpop.f32.mrf.mxu0  ;;  %v17537_v25 = vadd.f32 %v14135_v46, %v5339_v59  ;;  %v7326_v46 = vld [vmem:[#allocation2 + $0x1e9] sm:$0xff] }
 0x389   : > { %20037 = vst [vmem:[#allocation21_spill] sm:$0xff] %v17535_v43  ;;  %v14088_v1 = vpop.f32.mrf.mxu1  ;;  %14387 = vmatmul.mubr.msk.f32.gmra.mxu1 %vm4212_vm6, %v7323_v9 }
 0x38a   : > { %v14138_v22 = vpop.f32.mrf.mxu0  ;;  %v5341_v58 = vadd.f32 %v14088_v1, %v17375_v61  ;;  %14389 = vmatprep.mubr.msk.f32.mxu1 %vm4212_vm6, %v7324_v45  ;;  %v7327_v45 = vld [vmem:[#allocation2 + $0x1f1] sm:$0xff] }
 0x38b   : > { %v17542_v27 = vpop.f32.mrf.mxu1 }
 0x38c   : > { %20038 = vst [vmem:[#allocation35_spill] sm:$0xff] %v17542_v27  ;;  %v17544_v23 = vpop.f32.mrf.mxu0  ;;  %v17546_v21 = vadd.f32 %v14138_v22, %v5341_v58 }
 0x38d   : > { %20039 = vst [vmem:[#allocation36_spill] sm:$0xff] %v17544_v23  ;;  %v14091_v43 = vpop.f32.mrf.mxu1  ;;  %14390 = vmatmul.mubr.msk.f32.gmra.mxu1 %vm4212_vm6, %v7325_v44 }
 0x38e   : > { %v14141_v59 = vpop.f32.mrf.mxu0  ;;  %v5343_v63 = vadd.f32 %v14091_v43, %v17390_v55  ;;  %14392 = vmatprep.mubr.msk.f32.mxu1 %vm4212_vm6, %v7326_v46  ;;  %v7330_v43 = vld [vmem:[#allocation2 + $0x229] sm:$0xff] }
 0x38f   : > { %v17551_v9 = vpop.f32.mrf.mxu1 }
 0x390   : > { %20040 = vst [vmem:[#allocation58_spill] sm:$0xff] %v17551_v9  ;;  %v17553_v61 = vpop.f32.mrf.mxu0  ;;  %v17555_v1 = vadd.f32 %v14141_v59, %v5343_v63 }
 0x391   : > { %20041 = vst [vmem:[#allocation59_spill] sm:$0xff] %v17553_v61  ;;  %v14094_v23 = vpop.f32.mrf.mxu1  ;;  %14393 = vmatmul.mubr.msk.f32.gmra.mxu1 %vm4212_vm6, %v7327_v45 }
 0x392   : > { %v14144_v58 = vpop.f32.mrf.mxu0  ;;  %v5345_v22 = vadd.f32 %v14094_v23, %v17405_v10  ;;  %14395 = vmatprep.mubr.msk.f32.mxu1 %vm4212_vm6, %v17187_v3  ;;  %v7331_v10 = vld [vmem:[#allocation2 + $0x231] sm:$0xff] }
 0x393   : > { %v17561_v44 = vpop.f32.mrf.mxu1 }
 0x394   : > { %20042 = vst [vmem:[#allocation24_spill] sm:$0xff] %v17561_v44  ;;  %v17563_v55 = vpop.f32.mrf.mxu0  ;;  %v17565_v46 = vadd.f32 %v14144_v58, %v5345_v22 }
 0x395   : > { %20043 = vst [vmem:[#allocation39_spill] sm:$0xff] %v17563_v55  ;;  %v14097_v61 = vpop.f32.mrf.mxu1  ;;  %14396 = vmatmul.mubr.msk.f32.gmra.mxu1 %vm4212_vm6, %v17195_v62 }
 0x396   : > { %v14147_v63 = vpop.f32.mrf.mxu0  ;;  %v5347_v59 = vadd.f32 %v14097_v61, %v17418_v49  ;;  %14398 = vmatprep.mubr.msk.f32.mxu1 %vm4212_vm6, %v7330_v43 }
 0x397   : > { %v17571_v23 = vpop.f32.mrf.mxu1 }
 0x398   : > { %20044 = vst [vmem:[#allocation41_spill] sm:$0xff] %v17571_v23  ;;  %v17573_v3 = vpop.f32.mrf.mxu0  ;;  %v17575_v45 = vadd.f32 %v14147_v63, %v5347_v59 }
 0x399   : > { %20045 = vst [vmem:[#allocation60_spill] sm:$0xff] %v17573_v3  ;;  %v14100_v55 = vpop.f32.mrf.mxu1  ;;  %14399 = vmatmul.mubr.msk.f32.gmra.mxu1 %vm4212_vm6, %v7331_v10 }
 0x39a   : > { %v14150_v44 = vpop.f32.mrf.mxu0  ;;  %v5349_v58 = vadd.f32 %v14100_v55, %v17429_v53 }
 0x39b   : > { %v17579_v22 = vpop.f32.mrf.mxu1 }
 0x39c   : > { %20046 = vst [vmem:[#allocation23_spill] sm:$0xff] %v17579_v22  ;;  %v17581_v62 = vpop.f32.mrf.mxu0  ;;  %v17583_v49 = vadd.f32 %v14150_v44, %v5349_v58 }
 0x39d   : > { %20047 = vst [vmem:[#allocation38_spill] sm:$0xff] %v17581_v62  ;;  %v14155_v61 = vpop.f32.mrf.mxu1 }
 0x39e   : > { %v17585_v43 = vpop.f32.mrf.mxu0  ;;  %v17588_v23 = vadd.f32 %v14155_v61, %v17440_v24 }
 0x39f   : > { %v17590_v63 = vpop.f32.mrf.mxu1 }
 0x3a0   : > { %v17592_v59 = vpop.f32.mrf.mxu0 }
 0x3a1   : > { %v14158_v3 = vpop.f32.mrf.mxu1 }
 0x3a2   : > { %v17594_v10 = vpop.f32.mrf.mxu0  ;;  %v17597_v53 = vadd.f32 %v14158_v3, %v17447_v26 }
 0x3a3   : > { %v17599_v55 = vpop.f32.mrf.mxu1 }
 0x3a4   : > { %v17601_v44 = vpop.f32.mrf.mxu0 }
 0x3a5   : > { %v14161_v58 = vpop.f32.mrf.mxu1 }
 0x3a6   : > { %v17603_v62 = vpop.f32.mrf.mxu0  ;;  %v17606_v24 = vadd.f32 %v14161_v58, %v17457_v5 }
 0x3a7   : > { %20048 = vst [vmem:[#allocation40_spill] sm:$0xff] %v17603_v62  ;;  %v17608_v61 = vpop.f32.mrf.mxu1 }
 0x3a8   : > { %20049 = vst [vmem:[#allocation61_spill] sm:$0xff] %v17606_v24  ;;  %v17610_v22 = vpop.f32.mrf.mxu0 }
 0x3a9   : > { %20050 = vst [vmem:[#allocation64_spill] sm:$0xff] %v17610_v22  ;;  %v14164_v9 = vpop.f32.mrf.mxu1 }
 0x3aa   : > { %v17612_v27 = vpop.f32.mrf.mxu0  ;;  %v17615_v26 = vadd.f32 %v14164_v9, %v17467_v19 }
 0x3ab   : > { %20051 = vst [vmem:[#allocation62_spill] sm:$0xff] %v17612_v27  ;;  %v17617_v3 = vpop.f32.mrf.mxu1 }
 0x3ac   : > { %20052 = vst [vmem:[#allocation43_spill] sm:$0xff] %v17615_v26  ;;  %v17619_v37 = vpop.f32.mrf.mxu0 }
 0x3ad   : > { %20053 = vst [vmem:[#allocation63_spill] sm:$0xff] %v17619_v37  ;;  %v14167_v30 = vpop.f32.mrf.mxu1 }
 0x3ae   : > { %v17621_v51 = vpop.f32.mrf.mxu0  ;;  %v17624_v5 = vadd.f32 %v14167_v30, %v17477_v15 }
 0x3af   : > { %20054 = vst [vmem:[#allocation42_spill] sm:$0xff] %v17621_v51  ;;  %v17626_v58 = vpop.f32.mrf.mxu1 }
 0x3b0   : > { %20055 = vst [vmem:[#allocation65_spill] sm:$0xff] %v17624_v5  ;;  %v17628_v62 = vpop.f32.mrf.mxu0 }
 0x3b1   : > { %20056 = vst [vmem:[#allocation66_spill] sm:$0xff] %v17628_v62  ;;  %v14170_v22 = vpop.f32.mrf.mxu1 }
 0x3b2   : > { %v17630_v24 = vpop.f32.mrf.mxu0  ;;  %v17633_v19 = vadd.f32 %v14170_v22, %v17487_v0 }
 0x3b3   : > { %20057 = vst [vmem:[#allocation6_spill] sm:$0xff] %v17630_v24  ;;  %v17635_v9 = vpop.f32.mrf.mxu1 }
 0x3b4   : > { %20058 = vst [vmem:[#allocation17_spill] sm:$0xff] %v17633_v19  ;;  %20059 = vst [vmem:[#allocation29_spill] sm:$0xff] %v17635_v9  ;;  %v17637_v27 = vpop.f32.mrf.mxu0 }
 0x3b5   : > { %20060 = vst [vmem:[#allocation51_spill] sm:$0xff] %v17637_v27  ;;  %v14173_v37 = vpop.f32.mrf.mxu1 }
 0x3b6   : > { %v17639_v26 = vpop.f32.mrf.mxu0  ;;  %v17642_v15 = vadd.f32 %v14173_v37, %v17497_v14 }
 0x3b7   : > { %20061 = vst [vmem:[#allocation32_spill] sm:$0xff] %v17639_v26  ;;  %v17644_v30 = vpop.f32.mrf.mxu1 }
 0x3b8   : > { %20062 = vst [vmem:[#allocation34_spill] sm:$0xff] %v17642_v15  ;;  %20063 = vst [vmem:[#allocation52_spill] sm:$0xff] %v17644_v30  ;;  %v17646_v51 = vpop.f32.mrf.mxu0 }
 0x3b9   : > { %20064 = vst [vmem:[#allocation7_spill] sm:$0xff] %v17646_v51  ;;  %v14176_v62 = vpop.f32.mrf.mxu1 }
 0x3ba   : > { %v17648_v5 = vpop.f32.mrf.mxu0  ;;  %v17651_v0 = vadd.f32 %v14176_v62, %v17507_v18 }
 0x3bb   : > { %20065 = vst [vmem:[#allocation8_spill] sm:$0xff] %v17648_v5  ;;  %v17653_v22 = vpop.f32.mrf.mxu1 }
 0x3bc   : > { %20066 = vst [vmem:[#allocation9_spill] sm:$0xff] %v17651_v0  ;;  %20067 = vst [vmem:[#allocation10_spill] sm:$0xff] %v17653_v22  ;;  %v17655_v24 = vpop.f32.mrf.mxu0 }
 0x3bd   : > { %20068 = vst [vmem:[#allocation11_spill] sm:$0xff] %v17655_v24  ;;  %v14179_v27 = vpop.f32.mrf.mxu1 }
 0x3be   : > { %v17657_v19 = vpop.f32.mrf.mxu0  ;;  %v17660_v14 = vadd.f32 %v14179_v27, %v17519_v54 }
 0x3bf   : > { %20069 = vst [vmem:[#allocation12_spill] sm:$0xff] %v17657_v19  ;;  %v17662_v37 = vpop.f32.mrf.mxu1 }
 0x3c0   : > { %20070 = vst [vmem:[#allocation14_spill] sm:$0xff] %v17660_v14  ;;  %20071 = vst [vmem:[#allocation44_spill] sm:$0xff] %v17662_v37  ;;  %v17664_v26 = vpop.f32.mrf.mxu0 }
 0x3c1   : > { %20072 = vst [vmem:[#allocation45_spill] sm:$0xff] %v17664_v26  ;;  %v14182_v51 = vpop.f32.mrf.mxu1 }
 0x3c2   : > { %v17666_v15 = vpop.f32.mrf.mxu0  ;;  %v17669_v18 = vadd.f32 %v14182_v51, %v17528_v17 }
 0x3c3   : > { %20073 = vst [vmem:[#allocation16_spill] sm:$0xff] %v17666_v15  ;;  %v17671_v62 = vpop.f32.mrf.mxu1 }
 0x3c4   : > { %20074 = vst [vmem:[#allocation25_spill] sm:$0xff] %v17669_v18  ;;  %20075 = vst [vmem:[#allocation26_spill] sm:$0xff] %v17671_v62  ;;  %v17673_v5 = vpop.f32.mrf.mxu0 }
 0x3c5   : > { %20076 = vst [vmem:[#allocation46_spill] sm:$0xff] %v17673_v5  ;;  %v14185_v24 = vpop.f32.mrf.mxu1 }
 0x3c6   : > { %v17675_v0 = vpop.f32.mrf.mxu0  ;;  %v17678_v54 = vadd.f32 %v14185_v24, %v17537_v25 }
 0x3c7   : > { %20077 = vst [vmem:[#allocation47_spill] sm:$0xff] %v17675_v0  ;;  %v17680_v27 = vpop.f32.mrf.mxu1 }
 0x3c8   : > { %20078 = vst [vmem:[#allocation18_spill] sm:$0xff] %v17678_v54  ;;  %20079 = vst [vmem:[#allocation15_spill] sm:$0xff] %v17680_v27  ;;  %v17682_v19 = vpop.f32.mrf.mxu0 }
 0x3c9   : > { %20080 = vst [vmem:[#allocation28_spill] sm:$0xff] %v17682_v19  ;;  %v14188_v26 = vpop.f32.mrf.mxu1 }
 0x3ca   : > { %v17684_v14 = vpop.f32.mrf.mxu0  ;;  %v17687_v51 = vadd.f32 %v14188_v26, %v17546_v21 }
 0x3cb   : > { %20081 = vst [vmem:[#allocation30_spill] sm:$0xff] %v17684_v14  ;;  %v17689_v17 = vpop.f32.mrf.mxu1 }
 0x3cc   : > { %20082 = vst [vmem:[#allocation48_spill] sm:$0xff] %v17687_v51  ;;  %20083 = vst [vmem:[#allocation49_spill] sm:$0xff] %v17689_v17  ;;  %v17691_v15 = vpop.f32.mrf.mxu0 }
 0x3cd   : > { %20084 = vst [vmem:[#allocation27_spill] sm:$0xff] %v17691_v15  ;;  %v14191_v5 = vpop.f32.mrf.mxu1 }
 0x3ce   : > { %v17693_v18 = vpop.f32.mrf.mxu0  ;;  %v17696_v25 = vadd.f32 %v14191_v5, %v17555_v1 }
 0x3cf   : > { %20085 = vst [vmem:[#allocation50_spill] sm:$0xff] %v17693_v18  ;;  %v17698_v24 = vpop.f32.mrf.mxu1 }
 0x3d0   : > { %20086 = vst [vmem:[#allocation20_spill] sm:$0xff] %v17696_v25  ;;  %20087 = vst [vmem:[#allocation19_spill] sm:$0xff] %v17698_v24  ;;  %v17700_v0 = vpop.f32.mrf.mxu0 }
 0x3d1   : > { %20088 = vst [vmem:[#allocation53_spill] sm:$0xff] %v17700_v0  ;;  %v14194_v19 = vpop.f32.mrf.mxu1 }
 0x3d2   : > { %v17702_v54 = vpop.f32.mrf.mxu0  ;;  %v17705_v21 = vadd.f32 %v14194_v19, %v17565_v46 }
 0x3d3   : > { %20089 = vst [vmem:[#allocation67_spill] sm:$0xff] %v17702_v54  ;;  %v17707_v26 = vpop.f32.mrf.mxu1 }
 0x3d4   : > { %20090 = vst [vmem:[#allocation68_spill] sm:$0xff] %v17705_v21  ;;  %20091 = vst [vmem:[#allocation69_spill] sm:$0xff] %v17707_v26  ;;  %v17709_v14 = vpop.f32.mrf.mxu0 }
 0x3d5   : > { %20092 = vst [vmem:[#allocation70_spill] sm:$0xff] %v17709_v14  ;;  %v14197_v15 = vpop.f32.mrf.mxu1 }
 0x3d6   : > { %v17711_v51 = vpop.f32.mrf.mxu0  ;;  %v17714_v1 = vadd.f32 %v14197_v15, %v17575_v45 }
 0x3d7   : > { %20093 = vst [vmem:[#allocation71_spill] sm:$0xff] %v17711_v51  ;;  %v17716_v5 = vpop.f32.mrf.mxu1  ;;  %v7988_v51 = vld [vmem:[%s19658_s6] sm:$0xff] }
 0x3d8   : > { %20094 = vst [vmem:[#allocation72_spill] sm:$0xff] %v17714_v1  ;;  %20095 = vst [vmem:[#allocation73_spill] sm:$0xff] %v17716_v5  ;;  %v17718_v18 = vpop.f32.mrf.mxu0  ;;  %14401 = vmatprep.subr.mxu0 %v7988_v51 }
 0x3d9   : > { %20096 = vst [vmem:[#allocation74_spill] sm:$0xff] %v17718_v18  ;;  %v14200_v0 = vpop.f32.mrf.mxu1  ;;  %14402 = vmatpush3.msra.mxu0 %v7988_v51 }
 0x3da   : > { %v17720_v25 = vpop.f32.mrf.mxu0  ;;  %v17723_v46 = vadd.f32 %v14200_v0, %v17583_v49 }
 0x3db   : > { %20097 = vst [vmem:[#allocation75_spill] sm:$0xff] %v17720_v25  ;;  %v17725_v19 = vpop.f32.mrf.mxu1 }
 0x3dc   : > { %20098 = vst [vmem:[#allocation76_spill] sm:$0xff] %v17723_v46  ;;  %20099 = vst [vmem:[#allocation77_spill] sm:$0xff] %v17725_v19  ;;  %v17727_v54 = vpop.f32.mrf.mxu0 }
 0x3dd   : > { %20100 = vst [vmem:[#allocation78_spill] sm:$0xff] %v17727_v54  ;;  %v17732_v45 = vpop.f32.mrf.mxu1 }
 0x3de   : > { %v17734_v15 = vpop.f32.mrf.mxu0 }
 0x3df   : > { %v17736_v18 = vpop.f32.mrf.mxu1 }
 0x3e0   : > { %v17738_v25 = vpop.f32.mrf.mxu0 }
 0x3e1   : > { %v17740_v49 = vpop.f32.mrf.mxu1 }
 0x3e2   : > { %v17744_v46 = vpop.f32.mrf.mxu0 }
 0x3e3   : > { %v17742_v0 = vpop.f32.mrf.mxu1 }
 0x3e4   : > { %v17750_v1 = vpop.f32.mrf.mxu0 }
 0x3e5   : > { %v17746_v54 = vpop.f32.mrf.mxu1 }
 0x3e6   : > { %v17756_v51 = vpop.f32.mrf.mxu0 }
 0x3e7   : > { %v17748_v19 = vpop.f32.mrf.mxu1 }
 0x3e8   : > { %v17762_v24 = vpop.f32.mrf.mxu0 }
 0x3e9   : > { %v17752_v5 = vpop.f32.mrf.mxu1  ;;  %20105 = vst [vmem:[#allocation83_spill] sm:$0xff] %v17762_v24 }
 0x3ea   : > { %20101 = vst [vmem:[#allocation79_spill] sm:$0xff] %v17752_v5  ;;  %v17768_v62 = vpop.f32.mrf.mxu0 }
 0x3eb   : > { %v17754_v14 = vpop.f32.mrf.mxu1  ;;  %20108 = vst [vmem:[#allocation86_spill] sm:$0xff] %v17768_v62 }
 0x3ec   : > { %20102 = vst [vmem:[#allocation80_spill] sm:$0xff] %v17754_v14  ;;  %v17774_v30 = vpop.f32.mrf.mxu0 }
 0x3ed   : > { %v17758_v21 = vpop.f32.mrf.mxu1  ;;  %20111 = vst [vmem:[#allocation89_spill] sm:$0xff] %v17774_v30 }
 0x3ee   : > { %20103 = vst [vmem:[#allocation81_spill] sm:$0xff] %v17758_v21  ;;  %v17780_v21 = vpop.f32.mrf.mxu0 }
 0x3ef   : > { %v17760_v26 = vpop.f32.mrf.mxu1  ;;  %20114 = vst [vmem:[#allocation92_spill] sm:$0xff] %v17780_v21 }
 0x3f0   : > { %20104 = vst [vmem:[#allocation82_spill] sm:$0xff] %v17760_v26 }
 0x3f1   : > { %v17764_v17 = vpop.f32.mrf.mxu1 }
 0x3f2   : > { %20106 = vst [vmem:[#allocation84_spill] sm:$0xff] %v17764_v17  ;;  %v17786_v17 = vpop.f32.mrf.mxu0 }
 0x3f3   : > { %v17766_v27 = vpop.f32.mrf.mxu1  ;;  %20117 = vst [vmem:[#allocation95_spill] sm:$0xff] %v17786_v17 }
 0x3f4   : > { %20107 = vst [vmem:[#allocation85_spill] sm:$0xff] %v17766_v27 }
 0x3f5   : > { %v17770_v37 = vpop.f32.mrf.mxu1 }
 0x3f6   : > { %20109 = vst [vmem:[#allocation87_spill] sm:$0xff] %v17770_v37  ;;  %v17792_v37 = vpop.f32.mrf.mxu0 }
 0x3f7   : > { %v17772_v22 = vpop.f32.mrf.mxu1  ;;  %20120 = vst [vmem:[#allocation98_spill] sm:$0xff] %v17792_v37 }
 0x3f8   : > { %20110 = vst [vmem:[#allocation88_spill] sm:$0xff] %v17772_v22 }
 0x3f9   : > { %v17776_v9 = vpop.f32.mrf.mxu1 }
 0x3fa   : > { %20112 = vst [vmem:[#allocation90_spill] sm:$0xff] %v17776_v9  ;;  %v17802_v9 = vpop.f32.mrf.mxu0 }
 0x3fb   : > { %v17778_v14 = vpop.f32.mrf.mxu1 }
 0x3fc   : > { %20113 = vst [vmem:[#allocation91_spill] sm:$0xff] %v17778_v14  ;;  %v14865_v14 = vld [vmem:[%s19657_s5] ss:$0 sm:$0xff] }
 0x3fd   : > { %v17782_v26 = vpop.f32.mrf.mxu1 }
 0x3fe   : > { %20115 = vst [vmem:[#allocation93_spill] sm:$0xff] %v17782_v26  ;;  %v4538_v26 = vadd.f32 %v14865_v14, %v17215_v29  ;;  %v4554_v29 = vadd.f32 %v14865_v14, %v17326_v47  ;;  %v4568_v47 = vadd.f32 %v14865_v14, %v17425_v34 }
 0x3ff   : > { %v17784_v24 = vpop.f32.mrf.mxu1 }
 0x400   : > { %20116 = vst [vmem:[#allocation94_spill] sm:$0xff] %v17784_v24 }
 0x401   : > { %v17788_v27 = vpop.f32.mrf.mxu1 }
 0x402   : > { %20118 = vst [vmem:[#allocation96_spill] sm:$0xff] %v17788_v27  ;;  %v17809_v27 = vpop.f32.mrf.mxu0 }
 0x403   : > { %v17790_v62 = vpop.f32.mrf.mxu1  ;;  %20125 = vst [vmem:[#allocation103_spill] sm:$0xff] %v17809_v27 }
 0x404   : > { %20119 = vst [vmem:[#allocation97_spill] sm:$0xff] %v17790_v62  ;;  %v4928_v62 = vadd.f32 %v17209_v6, %v4538_v26  ;;  %v17816_v21 = vpop.f32.mrf.mxu0  ;;  %v4558_v6 = vadd.f32 %v14865_v14, %v17356_v60  ;;  %v4560_v26 = vadd.f32 %v14865_v14, %v17371_v12  ;;  %v4944_v12 = vadd.f32 %v17328_v50, %v4554_v29  ;;  %v20134_v29 = vld [vmem:[#allocation40_spill] sm:$0xff] }
 0x405   : > { %v17794_v22 = vpop.f32.mrf.mxu1 }
 0x406   : > { %20121 = vst [vmem:[#allocation99_spill] sm:$0xff] %v17794_v22 }
 0x407   : > { %v17796_v30 = vpop.f32.mrf.mxu1 }
 0x408   : > { %20122 = vst [vmem:[#allocation100_spill] sm:$0xff] %v17796_v30  ;;  %v5318_v30 = vadd.f32 %v17436_v36, %v4928_v62  ;;  %v4564_v36 = vadd.f32 %v14865_v14, %v17401_v42  ;;  %v4566_v62 = vadd.f32 %v14865_v14, %v17414_v40  ;;  %v6489_v42 = vadd.f32 %v17585_v43, %v17588_v23 }
 0x409   : > { %v17804_v24 = vpop.f32.mrf.mxu1  ;;  %v4948_v40 = vadd.f32 %v17358_v16, %v4558_v6  ;;  %v5714_v43 = vadd.f32 %v17465_v13, %v17470_v28 }
 0x40a   : > { %20123 = vst [vmem:[#allocation101_spill] sm:$0xff] %v17804_v24  ;;  %v4556_v24 = vadd.f32 %v14865_v14, %v17341_v11  ;;  %v5710_v11 = vadd.f32 %v17445_v20, %v17450_v8  ;;  %v17858_v50 = vadd.f32 %v17416_v57, %v4566_v62  ;;  %v6879_v16 = vadd.f32 %v17732_v45, %v6489_v42  ;;  %v20133_v45 = vld [vmem:[#allocation61_spill] sm:$0xff] }
 0x40b   : > { %v17806_v17 = vpop.f32.mrf.mxu1  ;;  %v6493_v6 = vadd.f32 %v20134_v29, %v20133_v45  ;;  %v17907_v62 = vstv %s17838_s24 }
 0x40c   : > { %20124 = vst [vmem:[#allocation102_spill] sm:$0xff] %v17806_v17  ;;  %v5708_v17 = vadd.f32 %v17438_v52, %v5318_v30  ;;  %v17846_v52 = vadd.f32 %v17373_v38, %v4560_v26  ;;  %v6100_v20 = vadd.f32 %v17599_v55, %v5710_v11  ;;  %v17865_v38 = vadd.f32 %v17427_v33, %v4568_v47  ;;  %v7956_v55 = vld [vmem:[#allocation2 + $0x7] sm:$0xff]  ;;  %v7957_v30 = vld [vmem:[#allocation2 + $0xf] sm:$0xff]  ;;  %v20137_v11 = vld [vmem:[#allocation37_spill] sm:$0xff] }
 0x40d   : > { %v17811_v37 = vpop.f32.mrf.mxu1  ;;  %v5334_v33 = vadd.f32 %v17515_v7, %v4944_v12  ;;  %14403 = vmatprep.mubr.msk.f32.mxu0 %vm286_vm1, %v7956_v55  ;;  %v12375_v7 = vld [vmem:[%s19658_s6 + $0x10] sm:$0xff]  ;;  %v6883_v55 = vadd.f32 %v17746_v54, %v6493_v6  ;;  %v20145_v6 = vld [vmem:[#allocation21_spill] sm:$0xff] }
 0x40e   : > { %20126 = vst [vmem:[#allocation104_spill] sm:$0xff] %v17811_v37  ;;  %v4562_v37 = vadd.f32 %v14865_v14, %v17386_v2  ;;  %v4946_v2 = vadd.f32 %v17343_v35, %v4556_v24  ;;  %v6491_v14 = vadd.f32 %v17594_v10, %v17597_v53  ;;  %v6490_v13 = vadd.f32 %v17601_v44, %v6100_v20  ;;  %v8343_v10 = vld [vmem:[#allocation2 + $0x10] sm:$0xff]  ;;  %v20129_v53 = vld [vmem:[#allocation33_spill] sm:$0xff]  ;;  %v20132_v24 = vld [vmem:[#allocation54_spill] sm:$0xff] }
 0x40f   : > { %v17814_v22 = vpop.f32.mrf.mxu1  ;;  %14404 = vmatmul.mubr.msk.f32.vlgmr.msra.gmra.mxu0 %vm286_vm1, %v7957_v30  ;;  %14501 = vmatprep.subr.mxu0 %v12375_v7  ;;  %v17915_v12 = vadd.f32 %v20137_v11, %v5334_v33  ;;  %v20138_v20 = vld [vmem:[#allocation56_spill] sm:$0xff] }
 0x410   : > { %20127 = vst [vmem:[#allocation105_spill] sm:$0xff] %v17814_v22  ;;  %v17831_v22 = vpop.f32.mrf.mxu0  ;;  %v17849_v34 = vadd.f32 %v17388_v56, %v4562_v37  ;;  %v5712_v56 = vadd.f32 %v17455_v4, %v17460_v32  ;;  %v5336_v32 = vadd.f32 %v17524_v48, %v4946_v2  ;;  %v20130_v37 = vld [vmem:[#allocation31_spill] sm:$0xff]  ;;  %v7269_v48 = vadd.f32 %v17734_v15, %v6879_v16  ;;  %v20135_v15 = vld [vmem:[#allocation13_spill] sm:$0xff] }
 0x411   : > { %v17818_v5 = vpop.f32.mrf.mxu1  ;;  %v6881_v44 = vadd.f32 %v17740_v49, %v6491_v14  ;;  %v6880_v26 = vadd.f32 %v17742_v0, %v6490_v13  ;;  %14502 = vmatpush3.msra.mxu0 %v12375_v7  ;;  %v20136_v49 = vld [vmem:[#allocation22_spill] sm:$0xff]  ;;  %v20139_v0 = vld [vmem:[#allocation64_spill] sm:$0xff] }
 0x412   : > { %20128 = vst [vmem:[#allocation106_spill] sm:$0xff] %v17818_v5  ;;  %v6098_v5 = vadd.f32 %v17590_v63, %v5708_v17  ;;  %v17855_v63 = vadd.f32 %v17403_v39, %v4564_v36  ;;  %v17862_v23 = vpop.f32.mrf.mxu0  ;;  %v5716_v39 = vadd.f32 %v17475_v41, %v17480_v31  ;;  %v6102_v28 = vadd.f32 %v17608_v61, %v5712_v56  ;;  %v8342_v31 = vld [vmem:[#allocation2 + $0x8] sm:$0xff] }
 0x413   : > { %v17826_v27 = vpop.f32.mrf.mxu1  ;;  %14453 = vmatprep.mubr.msk.f32.mxu1 %vm286_vm1, %v8342_v31  ;;  %v20131_v17 = vld [vmem:[#allocation55_spill] sm:$0xff]  ;;  %v17912_v47 = vadd.f32 %v20136_v49, %v20135_v15  ;;  %v6104_v56 = vadd.f32 %v17617_v3, %v5714_v43  ;;  %v7271_v30 = vadd.f32 %v17744_v46, %v6881_v44  ;;  %v7273_v44 = vadd.f32 %v17756_v51, %v6883_v55  ;;  %v20149_v49 = vld [vmem:[#allocation80_spill] sm:$0xff]  ;;  %v20151_v55 = vld [vmem:[#allocation29_spill] sm:$0xff] }
 0x414   : > { %v6488_v35 = vadd.f32 %v17592_v59, %v6098_v5  ;;  %v12342_v59 = vld [vmem:[%s19658_s6 + $0x8] sm:$0xff]  ;;  %v17896_v61 = vpop.f32.mrf.mxu0  ;;  %v17901_v5 = vadd.f32 %v20132_v24, %v20131_v17  ;;  %v6492_v16 = vadd.f32 %v20139_v0, %v6102_v28  ;;  %v7270_v28 = vadd.f32 %v17750_v1, %v6880_v26 }
 0x415   : > { %v17836_v60 = vpop.f32.mrf.mxu1  ;;  %14451 = vmatprep.subr.mxu1 %v12342_v59  ;;  %v20141_v31 = vld [vmem:[#allocation43_spill] sm:$0xff] }
 0x416   : > { %v6878_v4 = vadd.f32 %v17736_v18, %v6488_v35  ;;  %14452 = vmatpush3.msra.mxu1 %v12342_v59  ;;  %v5718_v18 = vadd.f32 %v20130_v37, %v20129_v53  ;;  %v17919_v35 = vadd.f32 %v20138_v20, %v5336_v32  ;;  %v17925_v14 = vpop.f32.mrf.mxu0  ;;  %v20142_v32 = vld [vmem:[#allocation62_spill] sm:$0xff]  ;;  %v6882_v3 = vadd.f32 %v17748_v19, %v6492_v16  ;;  %v20143_v53 = vld [vmem:[#allocation63_spill] sm:$0xff] }
 0x417   : > { %v17852_v8 = vpop.f32.mrf.mxu1  ;;  %14454 = vmatmul.mubr.msk.f32.vlgmr.msra.gmra.mxu1 %vm286_vm1, %v8343_v10  ;;  %v6495_v7 = vadd.f32 %v20142_v32, %v20141_v31  ;;  %v6494_v37 = vadd.f32 %v20143_v53, %v6104_v56  ;;  %v20148_v51 = vld [vmem:[#allocation83_spill] sm:$0xff]  ;;  %v20150_v16 = vld [vmem:[#allocation66_spill] sm:$0xff] }
 0x418   : > { %v7268_v2 = vadd.f32 %v17738_v25, %v6878_v4  ;;  %v20140_v25 = vld [vmem:[#allocation57_spill] sm:$0xff]  ;;  %v17939_v1 = vpop.f32.mrf.mxu0  ;;  %v7272_v15 = vadd.f32 %v20148_v51, %v6882_v3  ;;  %v20154_v3 = vld [vmem:[#allocation35_spill] sm:$0xff] }
 0x419   : > { %v17873_v57 = vpop.f32.mrf.mxu1  ;;  %v5338_v4 = vadd.f32 %v20140_v25, %v4948_v40  ;;  %v20144_v40 = vld [vmem:[#allocation79_spill] sm:$0xff]  ;;  %v6884_v11 = vadd.f32 %v20149_v49, %v6494_v37  ;;  %v20158_v37 = vld [vmem:[#allocation82_spill] sm:$0xff] }
 0x41a   : > { %v6885_v17 = vadd.f32 %v20144_v40, %v6495_v7  ;;  %v17956_v31 = vpop.f32.mrf.mxu0 }
 0x41b   : > { %v17886_v41 = vpop.f32.mrf.mxu1  ;;  %v17943_v26 = vadd.f32 %v20145_v6, %v5338_v4  ;;  %v20161_v6 = vld [vmem:[#allocation92_spill] sm:$0xff] }
 0x41d   : > { %v14355_v36 = vpop.f32.mrf.mxu1 }
 0x41e   : > { %v7659_v42 = vadd.f32 %v14355_v36, %v7269_v48  ;;  %v6106_v48 = vadd.f32 %v17626_v58, %v5716_v39  ;;  %v20146_v36 = vld [vmem:[#allocation65_spill] sm:$0xff]  ;;  %v20147_v58 = vld [vmem:[#allocation42_spill] sm:$0xff] }
 0x41f   : > { %v7499_v59 = vpop.f32.mrf.mxu1  ;;  %v6497_v39 = vadd.f32 %v20147_v58, %v20146_v36  ;;  %v20162_v58 = vld [vmem:[#allocation84_spill] sm:$0xff] }
 0x420   : > { %v7724_v33 = vmul.f32 %v17907_v62, %v7659_v42  ;;  %v7658_v13 = vadd.f32 %v7499_v59, %v7268_v2  ;;  %vm7691_vm5 = vcmp.gt.f32.partialorder %v7659_v42, 0.0  ;;  %v6496_v56 = vadd.f32 %v20150_v16, %v6106_v48  ;;  %v20165_v16 = vld [vmem:[#allocation32_spill] sm:$0xff] }
 0x421   : > { %v14358_v43 = vpop.f32.mrf.mxu1  ;;  %v6108_v59 = vadd.f32 %v20151_v55, %v5718_v18 }
 0x422   : > { %v7661_v54 = vadd.f32 %v14358_v43, %v7271_v30  ;;  %v7756_v10 = vsel %vm7691_vm5, %v7659_v42, %v7724_v33  ;;  %vm7690_vm6 = vcmp.gt.f32.partialorder %v7658_v13, 0.0  ;;  %v7723_v46 = vmul.f32 %v17907_v62, %v7658_v13  ;;  %v20152_v30 = vld [vmem:[#allocation86_spill] sm:$0xff] }
 0x423   : > { %v7509_v24 = vpop.f32.mrf.mxu1  ;;  %7821 = vrot.lane.b32.xlu1 %v7756_v10, %s14891_s29  ;;  %v7275_v33 = vadd.f32 %v20152_v30, %v6885_v17  ;;  %v5340_v43 = vadd.f32 %v20154_v3, %v17846_v52  ;;  %v20156_v10 = vld [vmem:[#allocation6_spill] sm:$0xff]  ;;  %v6886_v48 = vadd.f32 %v20158_v37, %v6496_v56  ;;  %v20166_v56 = vld [vmem:[#allocation95_spill] sm:$0xff] }
 0x424   : > { %v7726_v19 = vmul.f32 %v17907_v62, %v7661_v54  ;;  %v7660_v45 = vadd.f32 %v7509_v24, %v7270_v28  ;;  %v7755_v29 = vsel %vm7690_vm6, %v7658_v13, %v7723_v46  ;;  %vm7693_vm0 = vcmp.gt.f32.partialorder %v7661_v54, 0.0  ;;  %v20153_v13 = vld [vmem:[#allocation81_spill] sm:$0xff] }
 0x425   : > { %v14361_v2 = vpop.f32.mrf.mxu1  ;;  %7819 = vrot.lane.b32.xlu0 %v7755_v29, %s14891_s29  ;;  %v6887_v25 = vadd.f32 %v20153_v13, %v6497_v39  ;;  %v20157_v46 = vld [vmem:[#allocation89_spill] sm:$0xff]  ;;  %v20160_v29 = vld [vmem:[#allocation52_spill] sm:$0xff]  ;;  %v7276_v55 = vadd.f32 %v20166_v56, %v6886_v48 }
 0x426   : > { %v7663_v42 = vadd.f32 %v14361_v2, %v7273_v44  ;;  %v7758_v20 = vsel %vm7693_vm0, %v7661_v54, %v7726_v19  ;;  %vm7692_vm2 = vcmp.gt.f32.partialorder %v7660_v45, 0.0  ;;  %v7725_v0 = vmul.f32 %v17907_v62, %v7660_v45  ;;  %v20155_v54 = vld [vmem:[#allocation17_spill] sm:$0xff]  ;;  %v20159_v19 = vld [vmem:[#allocation51_spill] sm:$0xff] }
 0x427   : > { %v7519_v4 = vpop.f32.mrf.mxu1  ;;  %7825 = vrot.lane.b32.xlu1 %v7758_v20, %s14891_s29  ;;  %v6499_v18 = vadd.f32 %v20156_v10, %v20155_v54  ;;  %v7274_v53 = vadd.f32 %v20157_v46, %v6884_v11  ;;  %v6110_v52 = vadd.f32 %v20160_v29, %v17901_v5  ;;  %v7277_v36 = vadd.f32 %v20161_v6, %v6887_v25  ;;  %v20171_v10 = vld [vmem:[#allocation87_spill] sm:$0xff]  ;;  %v20175_v29 = vld [vmem:[#allocation88_spill] sm:$0xff] }
 0x428   : > { %v7728_v32 = vmul.f32 %v17907_v62, %v7663_v42  ;;  %v7662_v7 = vadd.f32 %v7519_v4, %v7272_v15  ;;  %v7757_v28 = vsel %vm7692_vm2, %v7660_v45, %v7725_v0  ;;  %vm7695_vm3 = vcmp.gt.f32.partialorder %v7663_v42, 0.0  ;;  %v17973_v15 = vpop.f32.mrf.mxu0  ;;  %v20164_v0 = vld [vmem:[#allocation34_spill] sm:$0xff] }
 0x429   : > { %v14364_v44 = vpop.f32.mrf.mxu1  ;;  %7823 = vrot.lane.b32.xlu0 %v7757_v28, %s14891_s29  ;;  %v6498_v45 = vadd.f32 %v20159_v19, %v6108_v59  ;;  %v6889_v39 = vadd.f32 %v20162_v58, %v6499_v18  ;;  %v6501_v5 = vadd.f32 %v20165_v16, %v20164_v0  ;;  %v20167_v59 = vld [vmem:[#allocation85_spill] sm:$0xff]  ;;  %v20169_v28 = vld [vmem:[#allocation10_spill] sm:$0xff]  ;;  %v20174_v19 = vld [vmem:[#allocation8_spill] sm:$0xff] }
 0x42a   : > { %v7665_v40 = vadd.f32 %v14364_v44, %v7275_v33  ;;  %v7760_v17 = vsel %vm7695_vm3, %v7663_v42, %v7728_v32  ;;  %vm7694_vm7 = vcmp.gt.f32.partialorder %v7662_v7, 0.0  ;;  %v7727_v24 = vmul.f32 %v17907_v62, %v7662_v7  ;;  %v20163_v42 = vld [vmem:[#allocation36_spill] sm:$0xff]  ;;  %v20168_v32 = vld [vmem:[#allocation7_spill] sm:$0xff]  ;;  %v20179_v0 = vld [vmem:[#allocation90_spill] sm:$0xff] }
 0x42b   : > { %v7529_v51 = vpop.f32.mrf.mxu1  ;;  %7829 = vrot.lane.b32.xlu1 %v7760_v17, %s14891_s29  ;;  %v17977_v20 = vadd.f32 %v20163_v42, %v5340_v43  ;;  %v6888_v30 = vadd.f32 %v20167_v59, %v6498_v45  ;;  %v6112_v3 = vadd.f32 %v20169_v28, %v17912_v47  ;;  %v20170_v43 = vld [vmem:[#allocation98_spill] sm:$0xff]  ;;  %v6891_v18 = vadd.f32 %v20171_v10, %v6501_v5  ;;  %v20184_v10 = vld [vmem:[#allocation45_spill] sm:$0xff] }
 0x42c   : > { %v7730_v49 = vmul.f32 %v17907_v62, %v7665_v40  ;;  %v7664_v11 = vadd.f32 %v7529_v51, %v7274_v53  ;;  %v7759_v2 = vsel %vm7694_vm7, %v7662_v7, %v7727_v24  ;;  %vm7697_vm8 = vcmp.gt.f32.partialorder %v7665_v40, 0.0  ;;  %v17991_v53 = vpop.f32.mrf.mxu0  ;;  %v20173_v24 = vld [vmem:[#allocation9_spill] sm:$0xff]  ;;  %v20176_v51 = vld [vmem:[#allocation11_spill] sm:$0xff] }
 0x42d   : > { %v14367_v33 = vpop.f32.mrf.mxu1  ;;  %7827 = vrot.lane.b32.xlu0 %v7759_v2, %s14891_s29  ;;  %v6500_v7 = vadd.f32 %v20168_v32, %v6110_v52  ;;  %v7279_v54 = vadd.f32 %v20170_v43, %v6889_v39  ;;  %v6503_v47 = vadd.f32 %v20174_v19, %v20173_v24  ;;  %v7278_v45 = vadd.f32 %v17802_v9, %v6888_v30  ;;  %v20178_v2 = vld [vmem:[#allocation103_spill] sm:$0xff] }
 0x42e   : > { %v7667_v13 = vadd.f32 %v14367_v33, %v7277_v36  ;;  %v7762_v25 = vsel %vm7697_vm8, %v7665_v40, %v7730_v49  ;;  %vm7696_vm9 = vcmp.gt.f32.partialorder %v7664_v11, 0.0  ;;  %v7729_v4 = vmul.f32 %v17907_v62, %v7664_v11  ;;  %v20172_v40 = vld [vmem:[#allocation58_spill] sm:$0xff]  ;;  %v18008_v5 = vpop.f32.mrf.mxu0  ;;  %v20180_v30 = vld [vmem:[#allocation59_spill] sm:$0xff] }
 0x42f   : > { %v7539_v46 = vpop.f32.mrf.mxu1  ;;  %7833 = vrot.lane.b32.xlu1 %v7762_v25, %s14891_s29  ;;  %v5342_v17 = vadd.f32 %v20172_v40, %v17849_v34  ;;  %v6890_v52 = vadd.f32 %v20175_v29, %v6500_v7  ;;  %v6502_v49 = vadd.f32 %v20176_v51, %v6112_v3  ;;  %v7281_v42 = vadd.f32 %v20178_v2, %v6891_v18  ;;  %v20182_v25 = vld [vmem:[#allocation12_spill] sm:$0xff]  ;;  %v20183_v32 = vld [vmem:[#allocation91_spill] sm:$0xff] }
 0x430   : > { %v7732_v37 = vmul.f32 %v17907_v62, %v7667_v13  ;;  %v7666_v48 = vadd.f32 %v7539_v46, %v7276_v55  ;;  %v7761_v44 = vsel %vm7696_vm9, %v7664_v11, %v7729_v4  ;;  %vm7699_vm10 = vcmp.gt.f32.partialorder %v7667_v13, 0.0  ;;  %v20177_v11 = vld [vmem:[#allocation44_spill] sm:$0xff]  ;;  %v20185_v46 = vld [vmem:[#allocation26_spill] sm:$0xff] }
 0x431   : > { %v14370_v6 = vpop.f32.mrf.mxu1  ;;  %7831 = vrot.lane.b32.xlu0 %v7761_v44, %s14891_s29  ;;  %v6114_v34 = vadd.f32 %v20177_v11, %v17915_v12  ;;  %v6893_v16 = vadd.f32 %v20179_v0, %v6503_v47  ;;  %v18012_v33 = vadd.f32 %v20180_v30, %v5342_v17  ;;  %v7280_v4 = vadd.f32 %v17816_v21, %v6890_v52  ;;  %v20186_v44 = vld [vmem:[#allocation93_spill] sm:$0xff]  ;;  %v18026_v17 = vpop.f32.mrf.mxu0 }
 0x432   : > { %v7669_v36 = vadd.f32 %v14370_v6, %v7279_v54  ;;  %v7764_v58 = vsel %vm7699_vm10, %v7667_v13, %v7732_v37  ;;  %vm7698_vm11 = vcmp.gt.f32.partialorder %v7666_v48, 0.0  ;;  %v7731_v39 = vmul.f32 %v17907_v62, %v7666_v48  ;;  %v20181_v13 = vld [vmem:[#allocation14_spill] sm:$0xff]  ;;  %v20188_v52 = vld [vmem:[#allocation25_spill] sm:$0xff]  ;;  %v20189_v6 = vld [vmem:[#allocation16_spill] sm:$0xff] }
 0x433   : > { %v7549_v9 = vpop.f32.mrf.mxu1  ;;  %7837 = vrot.lane.b32.xlu1 %v7764_v58, %s14891_s29  ;;  %v6505_v12 = vadd.f32 %v20182_v25, %v20181_v13  ;;  %v6892_v7 = vadd.f32 %v20183_v32, %v6502_v49  ;;  %v6504_v18 = vadd.f32 %v20184_v10, %v6114_v34  ;;  %v6116_v37 = vadd.f32 %v20185_v46, %v17919_v35  ;;  %v20191_v34 = vld [vmem:[#allocation46_spill] sm:$0xff]  ;;  %v20194_v13 = vld [vmem:[#allocation39_spill] sm:$0xff]  ;;  %v20198_v10 = vld [vmem:[#allocation28_spill] sm:$0xff] }
 0x434   : > { %v7734_v56 = vmul.f32 %v17907_v62, %v7669_v36  ;;  %v7668_v55 = vadd.f32 %v7549_v9, %v7278_v45  ;;  %v7763_v59 = vsel %vm7698_vm11, %v7666_v48, %v7731_v39  ;;  %vm7701_vm12 = vcmp.gt.f32.partialorder %v7669_v36, 0.0  ;;  %v20187_v45 = vld [vmem:[#allocation24_spill] sm:$0xff]  ;;  %v20199_v46 = vld [vmem:[#allocation49_spill] sm:$0xff] }
 0x435   : > { %v14373_v28 = vpop.f32.mrf.mxu1  ;;  %7835 = vrot.lane.b32.xlu0 %v7763_v59, %s14891_s29  ;;  %v7283_v48 = vadd.f32 %v17831_v22, %v6893_v16  ;;  %v6895_v40 = vadd.f32 %v20186_v44, %v6505_v12  ;;  %v5344_v29 = vadd.f32 %v20187_v45, %v17855_v63  ;;  %v6507_v35 = vadd.f32 %v20189_v6, %v20188_v52  ;;  %v20193_v16 = vld [vmem:[#allocation96_spill] sm:$0xff]  ;;  %v20195_v12 = vld [vmem:[#allocation18_spill] sm:$0xff]  ;;  %v20200_v44 = vld [vmem:[#allocation99_spill] sm:$0xff] }
 0x436   : > { %v7671_v3 = vadd.f32 %v14373_v28, %v7281_v42  ;;  %v7766_v43 = vsel %vm7701_vm12, %v7669_v36, %v7734_v56  ;;  %vm7700_vm13 = vcmp.gt.f32.partialorder %v7668_v55, 0.0  ;;  %v7733_v54 = vmul.f32 %v17907_v62, %v7668_v55  ;;  %v20190_v36 = vld [vmem:[#allocation94_spill] sm:$0xff]  ;;  %v20192_v42 = vld [vmem:[#allocation15_spill] sm:$0xff]  ;;  %v18043_v56 = vpop.f32.mrf.mxu0  ;;  %v20201_v45 = vld [vmem:[#allocation41_spill] sm:$0xff] }
 0x437   : > { %v7559_v21 = vpop.f32.mrf.mxu1  ;;  %7841 = vrot.lane.b32.xlu1 %v7766_v43, %s14891_s29  ;;  %v7282_v22 = vadd.f32 %v17862_v23, %v6892_v7  ;;  %v6894_v58 = vadd.f32 %v20190_v36, %v6504_v18  ;;  %v6506_v2 = vadd.f32 %v20191_v34, %v6116_v37  ;;  %v6118_v63 = vadd.f32 %v20192_v42, %v17943_v26  ;;  %v20202_v52 = vld [vmem:[#allocation48_spill] sm:$0xff]  ;;  %v20203_v6 = vld [vmem:[#allocation30_spill] sm:$0xff]  ;;  %v20206_v34 = vld [vmem:[#allocation19_spill] sm:$0xff] }
 0x438   : > { %v7736_v24 = vmul.f32 %v17907_v62, %v7671_v3  ;;  %v7670_v19 = vadd.f32 %v7559_v21, %v7280_v4  ;;  %v7765_v47 = vsel %vm7700_vm13, %v7668_v55, %v7733_v54  ;;  %vm7703_vm14 = vcmp.gt.f32.partialorder %v7671_v3, 0.0  ;;  %v20196_v4 = vld [vmem:[#allocation47_spill] sm:$0xff]  ;;  %v18059_v21 = vpop.f32.mrf.mxu0  ;;  %v20207_v42 = vld [vmem:[#allocation101_spill] sm:$0xff] }
 0x439   : > { %v14376_v39 = vpop.f32.mrf.mxu1  ;;  %7839 = vrot.lane.b32.xlu0 %v7765_v47, %s14891_s29  ;;  %v7285_v0 = vadd.f32 %v17896_v61, %v6895_v40  ;;  %v6897_v9 = vadd.f32 %v20193_v16, %v6507_v35  ;;  %v5734_v25 = vadd.f32 %v20194_v13, %v5344_v29  ;;  %v6509_v32 = vadd.f32 %v20196_v4, %v20195_v12  ;;  %v20197_v61 = vld [vmem:[#allocation97_spill] sm:$0xff]  ;;  %v20204_v35 = vld [vmem:[#allocation100_spill] sm:$0xff]  ;;  %v20210_v13 = vld [vmem:[#allocation50_spill] sm:$0xff] }
 0x43a   : > { %v7673_v51 = vadd.f32 %v14376_v39, %v7283_v48  ;;  %v7768_v49 = vsel %vm7703_vm14, %v7671_v3, %v7736_v24  ;;  %vm7702_vm15 = vcmp.gt.f32.partialorder %v7670_v19, 0.0  ;;  %v7735_v11 = vmul.f32 %v17907_v62, %v7670_v19  ;;  %v20211_v4 = vld [vmem:[#allocation102_spill] sm:$0xff] }
 0x43b   : > { %v7569_v23 = vpop.f32.mrf.mxu1  ;;  %7845 = vrot.lane.b32.xlu1 %v7768_v49, %s14891_s29  ;;  %v7284_v26 = vadd.f32 %v17925_v14, %v6894_v58  ;;  %v6896_v7 = vadd.f32 %v20197_v61, %v6506_v2  ;;  %v6508_v18 = vadd.f32 %v20198_v10, %v6118_v63  ;;  %v6120_v37 = vadd.f32 %v20199_v46, %v17977_v20  ;;  %v20205_v49 = vld [vmem:[#allocation27_spill] sm:$0xff] }
 0x43c   : > { %v7738_v55 = vmul.f32 %v17907_v62, %v7673_v51  ;;  %v7672_v59 = vadd.f32 %v7569_v23, %v7282_v22  ;;  %v7767_v30 = vsel %vm7702_vm15, %v7670_v19, %v7735_v11  ;;  %vm7705_vm5 = vcmp.gt.f32.partialorder %v7673_v51, 0.0 }
 0x43d   : > { %v14379_v28 = vpop.f32.mrf.mxu1  ;;  %7843 = vrot.lane.b32.xlu0 %v7767_v30, %s14891_s29  ;;  %v7287_v48 = vadd.f32 %v17939_v1, %v6897_v9  ;;  %v6899_v40 = vadd.f32 %v20200_v44, %v6509_v32  ;;  %v5346_v29 = vadd.f32 %v20201_v45, %v17858_v50  ;;  %v6511_v20 = vadd.f32 %v20203_v6, %v20202_v52  ;;  %v20209_v30 = vld [vmem:[#allocation20_spill] sm:$0xff] }
 0x43e   : > { %v7675_v3 = vadd.f32 %v14379_v28, %v7285_v0  ;;  %v7770_v43 = vsel %vm7705_vm5, %v7673_v51, %v7738_v55  ;;  %vm7704_vm6 = vcmp.gt.f32.partialorder %v7672_v59, 0.0  ;;  %v7737_v54 = vmul.f32 %v17907_v62, %v7672_v59  ;;  %v14344_v0 = vpop.f32.mrf.mxu0  ;;  %v20208_v55 = vld [vmem:[#allocation60_spill] sm:$0xff]  ;;  %v20212_v28 = vld [vmem:[#allocation53_spill] sm:$0xff] }
 0x43f   : > { %v7579_v14 = vpop.f32.mrf.mxu1  ;;  %7849 = vrot.lane.b32.xlu1 %v7770_v43, %s14891_s29  ;;  %v7286_v1 = vadd.f32 %v17956_v31, %v6896_v7  ;;  %v6898_v22 = vadd.f32 %v20204_v35, %v6508_v18  ;;  %v6510_v11 = vadd.f32 %v20205_v49, %v6120_v37  ;;  %v6122_v50 = vadd.f32 %v20206_v34, %v18012_v33  ;;  %v20213_v43 = vld [vmem:[#allocation69_spill] sm:$0xff]  ;;  %v20214_v18 = vld [vmem:[#allocation104_spill] sm:$0xff]  ;;  %v20219_v35 = vld [vmem:[#allocation70_spill] sm:$0xff] }
 0x440   : > { %v7740_v24 = vmul.f32 %v17907_v62, %v7675_v3  ;;  %v7674_v19 = vadd.f32 %v7579_v14, %v7284_v26  ;;  %v7769_v47 = vsel %vm7704_vm6, %v7672_v59, %v7737_v54  ;;  %vm7707_vm0 = vcmp.gt.f32.partialorder %v7675_v3, 0.0  ;;  %v20215_v14 = vld [vmem:[#allocation23_spill] sm:$0xff] }
 0x441   : > { %v14382_v36 = vpop.f32.mrf.mxu1  ;;  %7847 = vrot.lane.b32.xlu0 %v7769_v47, %s14891_s29  ;;  %v7289_v2 = vadd.f32 %v17973_v15, %v6899_v40  ;;  %v6901_v63 = vadd.f32 %v20207_v42, %v6511_v20  ;;  %v5736_v59 = vadd.f32 %v20208_v55, %v5346_v29  ;;  %v6513_v12 = vadd.f32 %v20210_v13, %v20209_v30  ;;  %v20217_v47 = vld [vmem:[#allocation67_spill] sm:$0xff]  ;;  %v20225_v13 = vld [vmem:[#allocation74_spill] sm:$0xff] }
 0x442   : > { %v7677_v58 = vadd.f32 %v14382_v36, %v7287_v48  ;;  %v7772_v39 = vsel %vm7707_vm0, %v7675_v3, %v7740_v24  ;;  %vm7706_vm2 = vcmp.gt.f32.partialorder %v7674_v19, 0.0  ;;  %v7739_v51 = vmul.f32 %v17907_v62, %v7674_v19  ;;  %v20220_v36 = vld [vmem:[#allocation73_spill] sm:$0xff] }
 0x443   : > { %v7589_v31 = vpop.f32.mrf.mxu1  ;;  %7853 = vrot.lane.b32.xlu1 %v7772_v39, %s14891_s29  ;;  %v7288_v33 = vadd.f32 %v17991_v53, %v6898_v22  ;;  %v6900_v15 = vadd.f32 %v20211_v4, %v6510_v11  ;;  %v6512_v3 = vadd.f32 %v20212_v28, %v6122_v50  ;;  %v6124_v54 = vadd.f32 %v20213_v43, %v5734_v25  ;;  %v7239_v53 = vpop.f32.mrf.mxu0  ;;  %v20221_v39 = vld [vmem:[#allocation106_spill] sm:$0xff]  ;;  %v20227_v28 = vld [vmem:[#allocation76_spill] sm:$0xff] }
 0x444   : > { %v7742_v16 = vmul.f32 %v17907_v62, %v7677_v58  ;;  %v7676_v9 = vadd.f32 %v7589_v31, %v7286_v1  ;;  %v7771_v23 = vsel %vm7706_vm2, %v7674_v19, %v7739_v51  ;;  %vm7709_vm3 = vcmp.gt.f32.partialorder %v7677_v58, 0.0  ;;  %v20216_v19 = vld [vmem:[#allocation68_spill] sm:$0xff]  ;;  %v20224_v31 = vld [vmem:[#allocation71_spill] sm:$0xff] }
 0x445   : > { %v14385_v32 = vpop.f32.mrf.mxu1  ;;  %7851 = vrot.lane.b32.xlu0 %v7771_v23, %s14891_s29  ;;  %v7291_v10 = vadd.f32 %v18008_v5, %v6901_v63  ;;  %v6903_v46 = vadd.f32 %v20214_v18, %v6513_v12  ;;  %v5348_v24 = vadd.f32 %v20215_v14, %v17865_v38  ;;  %v6515_v45 = vadd.f32 %v20217_v47, %v20216_v19  ;;  %v20218_v5 = vld [vmem:[#allocation105_spill] sm:$0xff]  ;;  %v20223_v63 = vld [vmem:[#allocation72_spill] sm:$0xff] }
 0x446   : > { %v7679_v26 = vadd.f32 %v14385_v32, %v7289_v2  ;;  %v7774_v61 = vsel %vm7709_vm3, %v7677_v58, %v7742_v16  ;;  %vm7708_vm7 = vcmp.gt.f32.partialorder %v7676_v9, 0.0  ;;  %v7741_v7 = vmul.f32 %v17907_v62, %v7676_v9  ;;  %v20222_v2 = vld [vmem:[#allocation38_spill] sm:$0xff] }
 0x447   : > { %v7599_v37 = vpop.f32.mrf.mxu1  ;;  %7857 = vrot.lane.b32.xlu1 %v7774_v61, %s14891_s29  ;;  %v7290_v25 = vadd.f32 %v18026_v17, %v6900_v15  ;;  %v6902_v29 = vadd.f32 %v20218_v5, %v6512_v3  ;;  %v6514_v22 = vadd.f32 %v20219_v35, %v6124_v54  ;;  %v6126_v58 = vadd.f32 %v20220_v36, %v5736_v59  ;;  %v14347_v17 = vpop.f32.mrf.mxu0  ;;  %v20228_v3 = vld [vmem:[#allocation75_spill] sm:$0xff] }
 0x448   : > { %v7744_v48 = vmul.f32 %v17907_v62, %v7679_v26  ;;  %v7678_v44 = vadd.f32 %v7599_v37, %v7288_v33  ;;  %v7773_v40 = vsel %vm7708_vm7, %v7676_v9, %v7741_v7  ;;  %vm7711_vm8 = vcmp.gt.f32.partialorder %v7679_v26, 0.0  ;;  %v20226_v33 = vld [vmem:[#allocation77_spill] sm:$0xff] }
 0x449   : > { %v14388_v52 = vpop.f32.mrf.mxu1  ;;  %7855 = vrot.lane.b32.xlu0 %v7773_v40, %s14891_s29  ;;  %v7293_v38 = vadd.f32 %v18043_v56, %v6903_v46  ;;  %v6905_v51 = vadd.f32 %v20221_v39, %v6515_v45  ;;  %v5738_v42 = vadd.f32 %v20222_v2, %v5348_v24  ;;  %v6517_v16 = vadd.f32 %v20224_v31, %v20223_v63 }
 0x44a   : > { %v7681_v6 = vadd.f32 %v14388_v52, %v7291_v10  ;;  %v7776_v20 = vsel %vm7711_vm8, %v7679_v26, %v7744_v48  ;;  %vm7710_vm9 = vcmp.gt.f32.partialorder %v7678_v44, 0.0  ;;  %v7743_v1 = vmul.f32 %v17907_v62, %v7678_v44  ;;  %v20229_v48 = vld [vmem:[#allocation78_spill] sm:$0xff] }
 0x44b   : > { %v7609_v49 = vpop.f32.mrf.mxu1  ;;  %7861 = vrot.lane.b32.xlu1 %v7776_v20, %s14891_s29  ;;  %v7292_v9 = vadd.f32 %v18059_v21, %v6902_v29  ;;  %v6904_v56 = vadd.f32 %v17826_v27, %v6514_v22  ;;  %v6516_v12 = vadd.f32 %v20225_v13, %v6126_v58  ;;  %v6128_v4 = vadd.f32 %v20226_v33, %v5738_v42  ;;  %v7249_v21 = vpop.f32.mrf.mxu0  ;;  %v12408_v58 = vld [vmem:[%s19658_s6 + $0x18] sm:$0xff] }
 0x44c   : > { %v7746_v11 = vmul.f32 %v17907_v62, %v7681_v6  ;;  %v7680_v34 = vadd.f32 %v7609_v49, %v7290_v25  ;;  %v7775_v50 = vsel %vm7710_vm9, %v7678_v44, %v7743_v1  ;;  %vm7713_vm10 = vcmp.gt.f32.partialorder %v7681_v6, 0.0  ;;  %14551 = vmatprep.subr.mxu1 %v12408_v58  ;;  %v18138_v49 = vld [vmem:[%s19658_s6 + $0x20] sm:$0xff] }
 0x44d   : > { %v14391_v23 = vpop.f32.mrf.mxu1  ;;  %7859 = vrot.lane.b32.xlu0 %v7775_v50, %s14891_s29  ;;  %v7295_v15 = vadd.f32 %v14344_v0, %v6905_v51  ;;  %v6907_v32 = vadd.f32 %v17836_v60, %v6517_v16  ;;  %v6519_v43 = vadd.f32 %v20228_v3, %v20227_v28  ;;  %v7294_v54 = vadd.f32 %v7239_v53, %v6904_v56  ;;  %v14350_v0 = vpop.f32.mrf.mxu0  ;;  %v18153_v56 = vld [vmem:[%s19658_s6 + $0x28] sm:$0xff] }
 0x44e   : > { %v7683_v55 = vadd.f32 %v14391_v23, %v7293_v38  ;;  %v7778_v59 = vsel %vm7713_vm10, %v7681_v6, %v7746_v11  ;;  %vm7712_vm11 = vcmp.gt.f32.partialorder %v7680_v34, 0.0  ;;  %v7745_v30 = vmul.f32 %v17907_v62, %v7680_v34  ;;  %14552 = vmatpush3.msra.mxu1 %v12408_v58  ;;  %14601 = vmatprep.subr.mxu0 %v18138_v49 }
 0x44f   : > { %v7619_v26 = vpop.f32.mrf.mxu1  ;;  %7865 = vrot.lane.b32.xlu1 %v7778_v59, %s14891_s29  ;;  %v6906_v10 = vadd.f32 %v17852_v8, %v6516_v12  ;;  %v6518_v44 = vadd.f32 %v20229_v48, %v6128_v4  ;;  %v7297_v40 = vadd.f32 %v14347_v17, %v6907_v32  ;;  %v6909_v14 = vadd.f32 %v17873_v57, %v6519_v43  ;;  %v7259_v5 = vpop.f32.mrf.mxu0 }
 0x450   : > { %v7748_v27 = vmul.f32 %v17907_v62, %v7683_v55  ;;  %v7682_v61 = vadd.f32 %v7619_v26, %v7292_v9  ;;  %v7777_v7 = vsel %vm7712_vm11, %v7680_v34, %v7745_v30  ;;  %vm7715_vm12 = vcmp.gt.f32.partialorder %v7683_v55, 0.0  ;;  %14651 = vmatprep.subr.mxu1 %v18153_v56 }
 0x451   : > { %v14394_v18 = vpop.f32.mrf.mxu1  ;;  %7863 = vrot.lane.b32.xlu0 %v7777_v7, %s14891_s29  ;;  %v7296_v47 = vadd.f32 %v7249_v21, %v6906_v10  ;;  %v6908_v45 = vadd.f32 %v17886_v41, %v6518_v44  ;;  %v7299_v6 = vadd.f32 %v14350_v0, %v6909_v14  ;;  %vm7915_vm3 = vcmask 64560  }
 0x452   : > { %v7685_v60 = vadd.f32 %v14394_v18, %v7295_v15  ;;  %v7780_v46 = vsel %vm7715_vm12, %v7683_v55, %v7748_v27  ;;  %vm7714_vm13 = vcmp.gt.f32.partialorder %v7682_v61, 0.0  ;;  %v7747_v37 = vmul.f32 %v17907_v62, %v7682_v61 }
 0x453   : > { %v7629_v24 = vpop.f32.mrf.mxu1  ;;  %7869 = vrot.lane.b32.xlu1 %v7780_v46, %s14891_s29  ;;  %v7298_v36 = vadd.f32 %v7259_v5, %v6908_v45 }
 0x454   : > { %v7750_v53 = vmul.f32 %v17907_v62, %v7685_v60  ;;  %v7684_v8 = vadd.f32 %v7629_v24, %v7294_v54  ;;  %v7779_v19 = vsel %vm7714_vm13, %v7682_v61, %v7747_v37  ;;  %vm7717_vm14 = vcmp.gt.f32.partialorder %v7685_v60, 0.0 }
 0x455   : > { %v14397_v25 = vpop.f32.mrf.mxu1  ;;  %7867 = vrot.lane.b32.xlu0 %v7779_v19, %s14891_s29 }
 0x456   : > { %v7687_v29 = vadd.f32 %v14397_v25, %v7297_v40  ;;  %v7782_v52 = vsel %vm7717_vm14, %v7685_v60, %v7750_v53  ;;  %vm7716_vm15 = vcmp.gt.f32.partialorder %v7684_v8, 0.0  ;;  %v7749_v57 = vmul.f32 %v17907_v62, %v7684_v8 }
 0x457   : > { %v7639_v20 = vpop.f32.mrf.mxu1  ;;  %7873 = vrot.lane.b32.xlu1 %v7782_v52, %s14891_s29 }
 0x458   : > { %v7752_v1 = vmul.f32 %v17907_v62, %v7687_v29  ;;  %v7686_v35 = vadd.f32 %v7639_v20, %v7296_v47  ;;  %v7781_v22 = vsel %vm7716_vm15, %v7684_v8, %v7749_v57  ;;  %vm7719_vm5 = vcmp.gt.f32.partialorder %v7687_v29, 0.0 }
 0x459   : > { %v14400_v41 = vpop.f32.mrf.mxu1  ;;  %7871 = vrot.lane.b32.xlu0 %v7781_v22, %s14891_s29 }
 0x45a   : > { %v7689_v38 = vadd.f32 %v14400_v41, %v7299_v6  ;;  %v7784_v39 = vsel %vm7719_vm5, %v7687_v29, %v7752_v1  ;;  %vm7718_vm6 = vcmp.gt.f32.partialorder %v7686_v35, 0.0  ;;  %v7751_v51 = vmul.f32 %v17907_v62, %v7686_v35 }
 0x45b   : > { %v7649_v17 = vpop.f32.mrf.mxu1  ;;  %7877 = vrot.lane.b32.xlu1 %v7784_v39, %s14891_s29 }
 0x45c   : > { %v7754_v11 = vmul.f32 %v17907_v62, %v7689_v38  ;;  %v7688_v34 = vadd.f32 %v7649_v17, %v7298_v36  ;;  %v7783_v50 = vsel %vm7718_vm6, %v7686_v35, %v7751_v51  ;;  %vm7721_vm0 = vcmp.gt.f32.partialorder %v7689_v38, 0.0 }
 0x45d   : > { %7875 = vrot.lane.b32.xlu0 %v7783_v50, %s14891_s29 }
 0x45e   : > { %v7786_v2 = vsel %vm7721_vm0, %v7689_v38, %v7754_v11  ;;  %vm7720_vm2 = vcmp.gt.f32.partialorder %v7688_v34, 0.0  ;;  %v7753_v42 = vmul.f32 %v17907_v62, %v7688_v34 }
 0x45f   : > { %7881 = vrot.lane.b32.xlu1 %v7786_v2, %s14891_s29 }
 0x460   : > { %v7785_v63 = vsel %vm7720_vm2, %v7688_v34, %v7753_v42 }
 0x461   : > { %7879 = vrot.lane.b32.xlu0 %v7785_v63, %s14891_s29 }
 0x495   : > { %v7822_v31 = vpop.permute.xlu1 %7821 }
 0x496   : > { %7917 = vst.msk [vmem:[#allocation2 + $0x30] sm:$0xff] %vm7915_vm3, %v7822_v31 }
 0x497   : > { %v7820_v16 = vpop.permute.xlu0 %7819 }
 0x498   : > { %7916 = vst.msk [vmem:[#allocation2 + $0x28] sm:$0xff] %vm7915_vm3, %v7820_v16 }
 0x499   : > { %v7826_v9 = vpop.permute.xlu1 %7825 }
 0x49a   : > { %7919 = vst.msk [vmem:[#allocation2 + $0x50] sm:$0xff] %vm7915_vm3, %v7826_v9 }
 0x49b   : > { %v7824_v62 = vpop.permute.xlu0 %7823 }
 0x49c   : > { %7918 = vst.msk [vmem:[#allocation2 + $0x48] sm:$0xff] %vm7915_vm3, %v7824_v62 }
 0x49d   : > { %v7830_v23 = vpop.permute.xlu1 %7829  ;;  %v18169_v12 = vld [vmem:[#allocation2 + $0x30] sm:$0xff] }
 0x49e   : > { %7921 = vst.msk [vmem:[#allocation2 + $0x70] sm:$0xff] %vm7915_vm3, %v7830_v23 }
 0x49f   : > { %v7828_v55 = vpop.permute.xlu0 %7827  ;;  %v18158_v59 = vld [vmem:[#allocation2 + $0x27] sm:$0xff]  ;;  %v18162_v13 = vld [vmem:[#allocation2 + $0x2f] sm:$0xff] }
 0x4a0   : > { %v18160_v30 = vld [vmem:[#allocation2 + $0x28] sm:$0xff]  ;;  %14406 = vmatprep.mubr.msk.f32.mxu0 %vm286_vm1, %v18158_v59  ;;  %7920 = vst.msk [vmem:[#allocation2 + $0x68] sm:$0xff] %vm7915_vm3, %v7828_v55 }
 0x4a1   : > { %14456 = vmatprep.mubr.msk.f32.mxu1 %vm286_vm1, %v18160_v30  ;;  %14407 = vmatmul.mubr.msk.f32.gmra.mxu0 %vm286_vm1, %v18162_v13  ;;  %v7834_v33 = vpop.permute.xlu1 %7833  ;;  %v18187_v21 = vld [vmem:[#allocation2 + $0x50] sm:$0xff] }
 0x4a2   : > { %14457 = vmatmul.mubr.msk.f32.gmra.mxu1 %vm286_vm1, %v18169_v12  ;;  %7923 = vst.msk [vmem:[#allocation2 + $0x90] sm:$0xff] %vm7915_vm3, %v7834_v33 }
 0x4a3   : > { %v7832_v4 = vpop.permute.xlu0 %7831  ;;  %v18176_v15 = vld [vmem:[#allocation2 + $0x47] sm:$0xff]  ;;  %v18180_v26 = vld [vmem:[#allocation2 + $0x4f] sm:$0xff] }
 0x4a4   : > { %v18178_v32 = vld [vmem:[#allocation2 + $0x48] sm:$0xff]  ;;  %7922 = vst.msk [vmem:[#allocation2 + $0x88] sm:$0xff] %vm7915_vm3, %v7832_v4  ;;  %14409 = vmatprep.mubr.msk.f32.mxu0 %vm286_vm1, %v18176_v15 }
 0x4a5   : > { %14459 = vmatprep.mubr.msk.f32.mxu1 %vm286_vm1, %v18178_v32  ;;  %14410 = vmatmul.mubr.msk.f32.gmra.mxu0 %vm286_vm1, %v18180_v26  ;;  %v7838_v27 = vpop.permute.xlu1 %7837  ;;  %v18205_v43 = vld [vmem:[#allocation2 + $0x70] sm:$0xff] }
 0x4a6   : > { %14460 = vmatmul.mubr.msk.f32.gmra.mxu1 %vm286_vm1, %v18187_v21  ;;  %7925 = vst.msk [vmem:[#allocation2 + $0xb0] sm:$0xff] %vm7915_vm3, %v7838_v27 }
 0x4a7   : > { %v7836_v61 = vpop.permute.xlu0 %7835  ;;  %v18194_v7 = vld [vmem:[#allocation2 + $0x67] sm:$0xff]  ;;  %v18198_v3 = vld [vmem:[#allocation2 + $0x6f] sm:$0xff] }
 0x4a8   : > { %v18196_v28 = vld [vmem:[#allocation2 + $0x68] sm:$0xff]  ;;  %7924 = vst.msk [vmem:[#allocation2 + $0xa8] sm:$0xff] %vm7915_vm3, %v7836_v61  ;;  %14412 = vmatprep.mubr.msk.f32.mxu0 %vm286_vm1, %v18194_v7 }
 0x4a9   : > { %14462 = vmatprep.mubr.msk.f32.mxu1 %vm286_vm1, %v18196_v28  ;;  %14413 = vmatmul.mubr.msk.f32.gmra.mxu0 %vm286_vm1, %v18198_v3  ;;  %v7842_v54 = vpop.permute.xlu1 %7841  ;;  %v18223_v46 = vld [vmem:[#allocation2 + $0x90] sm:$0xff] }
 0x4aa   : > { %14463 = vmatmul.mubr.msk.f32.gmra.mxu1 %vm286_vm1, %v18205_v43  ;;  %7927 = vst.msk [vmem:[#allocation2 + $0xd0] sm:$0xff] %vm7915_vm3, %v7842_v54 }
 0x4ab   : > { %v7840_v10 = vpop.permute.xlu0 %7839  ;;  %v18212_v18 = vld [vmem:[#allocation2 + $0x87] sm:$0xff]  ;;  %v18216_v60 = vld [vmem:[#allocation2 + $0x8f] sm:$0xff] }
 0x4ac   : > { %20230 = vst [vmem:[#allocation33_spill] sm:$0xff] %v18212_v18  ;;  %v18214_v0 = vld [vmem:[#allocation2 + $0x88] sm:$0xff]  ;;  %20231 = vst [vmem:[#allocation31_spill] sm:$0xff] %v18216_v60  ;;  %14415 = vmatprep.mubr.msk.f32.mxu0 %vm286_vm1, %v18212_v18 }
 0x4ad   : > { %7926 = vst.msk [vmem:[#allocation2 + $0xc8] sm:$0xff] %vm7915_vm3, %v7840_v10  ;;  %14465 = vmatprep.mubr.msk.f32.mxu1 %vm286_vm1, %v18214_v0  ;;  %14416 = vmatmul.mubr.msk.f32.gmra.mxu0 %vm286_vm1, %v18216_v60  ;;  %v7846_v37 = vpop.permute.xlu1 %7845  ;;  %v18241_v24 = vld [vmem:[#allocation2 + $0xb0] sm:$0xff] }
 0x4ae   : > { %14466 = vmatmul.mubr.msk.f32.gmra.mxu1 %vm286_vm1, %v18223_v46  ;;  %7929 = vst.msk [vmem:[#allocation2 + $0xf0] sm:$0xff] %vm7915_vm3, %v7846_v37 }
 0x4af   : > { %v7844_v48 = vpop.permute.xlu0 %7843  ;;  %v18230_v44 = vld [vmem:[#allocation2 + $0xa7] sm:$0xff]  ;;  %v18234_v14 = vld [vmem:[#allocation2 + $0xaf] sm:$0xff] }
 0x4b0   : > { %20232 = vst [vmem:[#allocation55_spill] sm:$0xff] %v18230_v44  ;;  %v18232_v40 = vld [vmem:[#allocation2 + $0xa8] sm:$0xff]  ;;  %20233 = vst [vmem:[#allocation54_spill] sm:$0xff] %v18234_v14  ;;  %14418 = vmatprep.mubr.msk.f32.mxu0 %vm286_vm1, %v18230_v44 }
 0x4b1   : > { %7928 = vst.msk [vmem:[#allocation2 + $0xe8] sm:$0xff] %vm7915_vm3, %v7844_v48  ;;  %14468 = vmatprep.mubr.msk.f32.mxu1 %vm286_vm1, %v18232_v40  ;;  %14419 = vmatmul.mubr.msk.f32.gmra.mxu0 %vm286_vm1, %v18234_v14  ;;  %v7850_v53 = vpop.permute.xlu1 %7849  ;;  %v18259_v25 = vld [vmem:[#allocation2 + $0xd0] sm:$0xff] }
 0x4b2   : > { %14469 = vmatmul.mubr.msk.f32.gmra.mxu1 %vm286_vm1, %v18241_v24  ;;  %7931 = vst.msk [vmem:[#allocation2 + $0x110] sm:$0xff] %vm7915_vm3, %v7850_v53 }
 0x4b3   : > { %v7848_v8 = vpop.permute.xlu0 %7847 }
 0x4b4   : > { %v18248_v19 = vld [vmem:[#allocation2 + $0xc7] sm:$0xff]  ;;  %v18252_v45 = vld [vmem:[#allocation2 + $0xcf] sm:$0xff]  ;;  %7930 = vst.msk [vmem:[#allocation2 + $0x108] sm:$0xff] %vm7915_vm3, %v7848_v8 }
 0x4b5   : > { %20234 = vst [vmem:[#allocation61_spill] sm:$0xff] %v18248_v19  ;;  %v18250_v47 = vld [vmem:[#allocation2 + $0xc8] sm:$0xff]  ;;  %20235 = vst [vmem:[#allocation40_spill] sm:$0xff] %v18252_v45  ;;  %14421 = vmatprep.mubr.msk.f32.mxu0 %vm286_vm1, %v18248_v19  ;;  %v7854_v5 = vpop.permute.xlu1 %7853  ;;  %v18277_v20 = vld [vmem:[#allocation2 + $0xf0] sm:$0xff] }
 0x4b6   : > { %14471 = vmatprep.mubr.msk.f32.mxu1 %vm286_vm1, %v18250_v47  ;;  %14422 = vmatmul.mubr.msk.f32.gmra.mxu0 %vm286_vm1, %v18252_v45  ;;  %7933 = vst.msk [vmem:[#allocation2 + $0x130] sm:$0xff] %vm7915_vm3, %v7854_v5 }
 0x4b7   : > { %14472 = vmatmul.mubr.msk.f32.gmra.mxu1 %vm286_vm1, %v18259_v25  ;;  %v7852_v29 = vpop.permute.xlu0 %7851 }
 0x4b8   : > { %v18266_v52 = vld [vmem:[#allocation2 + $0xe7] sm:$0xff]  ;;  %v18270_v6 = vld [vmem:[#allocation2 + $0xef] sm:$0xff]  ;;  %7932 = vst.msk [vmem:[#allocation2 + $0x128] sm:$0xff] %vm7915_vm3, %v7852_v29 }
 0x4b9   : > { %20236 = vst [vmem:[#allocation13_spill] sm:$0xff] %v18266_v52  ;;  %v18268_v57 = vld [vmem:[#allocation2 + $0xe8] sm:$0xff]  ;;  %20237 = vst [vmem:[#allocation22_spill] sm:$0xff] %v18270_v6  ;;  %14424 = vmatprep.mubr.msk.f32.mxu0 %vm286_vm1, %v18266_v52  ;;  %v7858_v1 = vpop.permute.xlu1 %7857  ;;  %v18295_v58 = vld [vmem:[#allocation2 + $0x110] sm:$0xff] }
 0x4ba   : > { %14474 = vmatprep.mubr.msk.f32.mxu1 %vm286_vm1, %v18268_v57  ;;  %14425 = vmatmul.mubr.msk.f32.gmra.mxu0 %vm286_vm1, %v18270_v6  ;;  %7935 = vst.msk [vmem:[#allocation2 + $0x150] sm:$0xff] %vm7915_vm3, %v7858_v1 }
 0x4bb   : > { %14475 = vmatmul.mubr.msk.f32.gmra.mxu1 %vm286_vm1, %v18277_v20  ;;  %v7856_v35 = vpop.permute.xlu0 %7855  ;;  %v18284_v22 = vld [vmem:[#allocation2 + $0x107] sm:$0xff]  ;;  %v18288_v41 = vld [vmem:[#allocation2 + $0x10f] sm:$0xff] }
 0x4bc   : > { %20238 = vst [vmem:[#allocation37_spill] sm:$0xff] %v18284_v22  ;;  %v18286_v36 = vld [vmem:[#allocation2 + $0x108] sm:$0xff]  ;;  %20239 = vst [vmem:[#allocation56_spill] sm:$0xff] %v18288_v41  ;;  %14427 = vmatprep.mubr.msk.f32.mxu0 %vm286_vm1, %v18284_v22 }
 0x4bd   : > { %7934 = vst.msk [vmem:[#allocation2 + $0x148] sm:$0xff] %vm7915_vm3, %v7856_v35  ;;  %14477 = vmatprep.mubr.msk.f32.mxu1 %vm286_vm1, %v18286_v36  ;;  %v7862_v38 = vpop.permute.xlu1 %7861  ;;  %v18313_v34 = vld [vmem:[#allocation2 + $0x130] sm:$0xff] }
 0x4be   : > { %14428 = vmatmul.mubr.msk.f32.gmra.mxu0 %vm286_vm1, %v18288_v41  ;;  %7937 = vst.msk [vmem:[#allocation2 + $0x170] sm:$0xff] %vm7915_vm3, %v7862_v38 }
 0x4bf   : > { %14478 = vmatmul.mubr.msk.f32.gmra.mxu1 %vm286_vm1, %v18295_v58  ;;  %v7860_v39 = vpop.permute.xlu0 %7859  ;;  %v18302_v51 = vld [vmem:[#allocation2 + $0x127] sm:$0xff]  ;;  %v18306_v11 = vld [vmem:[#allocation2 + $0x12f] sm:$0xff] }
 0x4c0   : > { %20240 = vst [vmem:[#allocation64_spill] sm:$0xff] %v18302_v51  ;;  %v18304_v17 = vld [vmem:[#allocation2 + $0x128] sm:$0xff]  ;;  %20241 = vst [vmem:[#allocation57_spill] sm:$0xff] %v18306_v11  ;;  %14430 = vmatprep.mubr.msk.f32.mxu0 %vm286_vm1, %v18302_v51 }
 0x4c1   : > { %7936 = vst.msk [vmem:[#allocation2 + $0x168] sm:$0xff] %vm7915_vm3, %v7860_v39  ;;  %14480 = vmatprep.mubr.msk.f32.mxu1 %vm286_vm1, %v18304_v17  ;;  %v7866_v50 = vpop.permute.xlu1 %7865  ;;  %v18331_v16 = vld [vmem:[#allocation2 + $0x150] sm:$0xff] }
 0x4c2   : > { %14431 = vmatmul.mubr.msk.f32.gmra.mxu0 %vm286_vm1, %v18306_v11  ;;  %7939 = vst.msk [vmem:[#allocation2 + $0x190] sm:$0xff] %vm7915_vm3, %v7866_v50 }
 0x4c3   : > { %14481 = vmatmul.mubr.msk.f32.gmra.mxu1 %vm286_vm1, %v18313_v34  ;;  %v7864_v2 = vpop.permute.xlu0 %7863 }
 0x4c4   : > { %v18320_v42 = vld [vmem:[#allocation2 + $0x147] sm:$0xff]  ;;  %v18324_v31 = vld [vmem:[#allocation2 + $0x14f] sm:$0xff]  ;;  %7938 = vst.msk [vmem:[#allocation2 + $0x188] sm:$0xff] %vm7915_vm3, %v7864_v2 }
 0x4c5   : > { %20242 = vst [vmem:[#allocation43_spill] sm:$0xff] %v18320_v42  ;;  %v18322_v63 = vld [vmem:[#allocation2 + $0x148] sm:$0xff]  ;;  %20243 = vst [vmem:[#allocation62_spill] sm:$0xff] %v18324_v31  ;;  %14433 = vmatprep.mubr.msk.f32.mxu0 %vm286_vm1, %v18320_v42  ;;  %v7870_v9 = vpop.permute.xlu1 %7869  ;;  %v18349_v4 = vld [vmem:[#allocation2 + $0x170] sm:$0xff] }
 0x4c6   : > { %14483 = vmatprep.mubr.msk.f32.mxu1 %vm286_vm1, %v18322_v63  ;;  %14434 = vmatmul.mubr.msk.f32.gmra.mxu0 %vm286_vm1, %v18324_v31  ;;  %7941 = vst.msk [vmem:[#allocation2 + $0x1b0] sm:$0xff] %vm7915_vm3, %v7870_v9 }
 0x4c7   : > { %14484 = vmatmul.mubr.msk.f32.gmra.mxu1 %vm286_vm1, %v18331_v16  ;;  %v7868_v62 = vpop.permute.xlu0 %7867 }
 0x4c8   : > { %v18338_v23 = vld [vmem:[#allocation2 + $0x167] sm:$0xff]  ;;  %v18342_v33 = vld [vmem:[#allocation2 + $0x16f] sm:$0xff]  ;;  %7940 = vst.msk [vmem:[#allocation2 + $0x1a8] sm:$0xff] %vm7915_vm3, %v7868_v62 }
 0x4c9   : > { %20244 = vst [vmem:[#allocation63_spill] sm:$0xff] %v18338_v23  ;;  %v18340_v55 = vld [vmem:[#allocation2 + $0x168] sm:$0xff]  ;;  %20245 = vst [vmem:[#allocation79_spill] sm:$0xff] %v18342_v33  ;;  %14436 = vmatprep.mubr.msk.f32.mxu0 %vm286_vm1, %v18338_v23  ;;  %v7874_v27 = vpop.permute.xlu1 %7873  ;;  %v18367_v48 = vld [vmem:[#allocation2 + $0x190] sm:$0xff] }
 0x4ca   : > { %14486 = vmatprep.mubr.msk.f32.mxu1 %vm286_vm1, %v18340_v55  ;;  %14437 = vmatmul.mubr.msk.f32.gmra.mxu0 %vm286_vm1, %v18342_v33  ;;  %7943 = vst.msk [vmem:[#allocation2 + $0x1d0] sm:$0xff] %vm7915_vm3, %v7874_v27  ;;  %v8729_v27 = vld [vmem:[#allocation2 + $0x9] sm:$0xff] }
 0x4cb   : > { %14487 = vmatmul.mubr.msk.f32.gmra.mxu1 %vm286_vm1, %v18349_v4  ;;  %v7872_v61 = vpop.permute.xlu0 %7871  ;;  %v18356_v54 = vld [vmem:[#allocation2 + $0x187] sm:$0xff]  ;;  %v18360_v37 = vld [vmem:[#allocation2 + $0x18f] sm:$0xff] }
 0x4cc   : > { %20246 = vst [vmem:[#allocation21_spill] sm:$0xff] %v18356_v54  ;;  %v18358_v10 = vld [vmem:[#allocation2 + $0x188] sm:$0xff]  ;;  %20247 = vst [vmem:[#allocation65_spill] sm:$0xff] %v18360_v37  ;;  %14439 = vmatprep.mubr.msk.f32.mxu0 %vm286_vm1, %v18356_v54 }
 0x4cd   : > { %7942 = vst.msk [vmem:[#allocation2 + $0x1c8] sm:$0xff] %vm7915_vm3, %v7872_v61  ;;  %14489 = vmatprep.mubr.msk.f32.mxu1 %vm286_vm1, %v18358_v10  ;;  %v7878_v53 = vpop.permute.xlu1 %7877  ;;  %v18385_v35 = vld [vmem:[#allocation2 + $0x1b0] sm:$0xff] }
 0x4ce   : > { %14440 = vmatmul.mubr.msk.f32.gmra.mxu0 %vm286_vm1, %v18360_v37  ;;  %7945 = vst.msk [vmem:[#allocation2 + $0x1f0] sm:$0xff] %vm7915_vm3, %v7878_v53  ;;  %20250 = vst [vmem:[#allocation80_spill] sm:$0xff] %v18385_v35 }
 0x4cf   : > { %14490 = vmatmul.mubr.msk.f32.gmra.mxu1 %vm286_vm1, %v18367_v48  ;;  %v7876_v8 = vpop.permute.xlu0 %7875  ;;  %v18374_v5 = vld [vmem:[#allocation2 + $0x1a7] sm:$0xff]  ;;  %v18378_v1 = vld [vmem:[#allocation2 + $0x1af] sm:$0xff] }
 0x4d0   : > { %20248 = vst [vmem:[#allocation42_spill] sm:$0xff] %v18374_v5  ;;  %v18376_v29 = vld [vmem:[#allocation2 + $0x1a8] sm:$0xff]  ;;  %20249 = vst [vmem:[#allocation83_spill] sm:$0xff] %v18378_v1  ;;  %14442 = vmatprep.mubr.msk.f32.mxu0 %vm286_vm1, %v18374_v5 }
 0x4d1   : > { %7944 = vst.msk [vmem:[#allocation2 + $0x1e8] sm:$0xff] %vm7915_vm3, %v7876_v8  ;;  %14492 = vmatprep.mubr.msk.f32.mxu1 %vm286_vm1, %v18376_v29  ;;  %v7882_v38 = vpop.permute.xlu1 %7881  ;;  %v18403_v62 = vld [vmem:[#allocation2 + $0x1d0] sm:$0xff] }
 0x4d2   : > { %14443 = vmatmul.mubr.msk.f32.gmra.mxu0 %vm286_vm1, %v18378_v1  ;;  %7947 = vst.msk [vmem:[#allocation2 + $0x210] sm:$0xff] %vm7915_vm3, %v7882_v38  ;;  %20254 = vst [vmem:[#allocation81_spill] sm:$0xff] %v18403_v62 }
 0x4d3   : > { %14493 = vmatmul.mubr.msk.f32.gmra.mxu1 %vm286_vm1, %v18385_v35  ;;  %v7880_v39 = vpop.permute.xlu0 %7879 }
 0x4d4   : > { %v18392_v50 = vld [vmem:[#allocation2 + $0x1c7] sm:$0xff]  ;;  %v18396_v9 = vld [vmem:[#allocation2 + $0x1cf] sm:$0xff]  ;;  %7946 = vst.msk [vmem:[#allocation2 + $0x208] sm:$0xff] %vm7915_vm3, %v7880_v39 }
 0x4d5   : > { %20251 = vst [vmem:[#allocation66_spill] sm:$0xff] %v18392_v50  ;;  %v18394_v2 = vld [vmem:[#allocation2 + $0x1c8] sm:$0xff]  ;;  %20253 = vst [vmem:[#allocation86_spill] sm:$0xff] %v18396_v9  ;;  %14445 = vmatprep.mubr.msk.f32.mxu0 %vm286_vm1, %v18392_v50  ;;  %v18419_v38 = vld [vmem:[#allocation2 + $0x1f0] sm:$0xff] }
 0x4d6   : > { %20252 = vst [vmem:[#allocation29_spill] sm:$0xff] %v18394_v2  ;;  %14495 = vmatprep.mubr.msk.f32.mxu1 %vm286_vm1, %v18394_v2  ;;  %14446 = vmatmul.mubr.msk.f32.gmra.mxu0 %vm286_vm1, %v18396_v9  ;;  %20257 = vst [vmem:[#allocation6_spill] sm:$0xff] %v18419_v38  ;;  %v8730_v39 = vld [vmem:[#allocation2 + $0x11] sm:$0xff] }
 0x4d7   : > { %14496 = vmatmul.mubr.msk.f32.gmra.mxu1 %vm286_vm1, %v18403_v62  ;;  %v18431_v62 = vld [vmem:[%s19659_s7] ss:$0 sm:$0xff]  ;;  %v14455_v35 = vpop.f32.mrf.mxu1 }
 0x4d8   : > { %v18409_v61 = vld [vmem:[#allocation2 + $0x1e7] sm:$0xff]  ;;  %v18413_v8 = vld [vmem:[#allocation2 + $0x1ef] sm:$0xff]  ;;  %20258 = vst [vmem:[#allocation89_spill] sm:$0xff] %v18431_v62 }
 0x4d9   : > { %20255 = vst [vmem:[#allocation35_spill] sm:$0xff] %v18409_v61  ;;  %v18411_v53 = vld [vmem:[#allocation2 + $0x1e8] sm:$0xff]  ;;  %14448 = vmatprep.mubr.msk.f32.mxu0 %vm286_vm1, %v18409_v61 }
 0x4da   : > { %20256 = vst [vmem:[#allocation17_spill] sm:$0xff] %v18411_v53  ;;  %14498 = vmatprep.mubr.msk.f32.mxu1 %vm286_vm1, %v18411_v53  ;;  %14449 = vmatmul.mubr.msk.f32.gmra.mxu0 %vm286_vm1, %v18413_v8  ;;  %v14405_v53 = vpop.f32.mrf.mxu0 }
 0x4db   : > { %14499 = vmatmul.mubr.msk.f32.gmra.mxu1 %vm286_vm1, %v18419_v38  ;;  %14503 = vmatprep.mubr.msk.f32.mxu0 %vm286_vm1, %v8729_v27  ;;  %v8311_v2 = vadd.f32 %v14405_v53, %v18431_v62  ;;  %v18437_v38 = vld [vmem:[#allocation2 + $0x29] sm:$0xff]  ;;  %v18447_v27 = vld [vmem:[%s19658_s6 + $0x38] sm:$0xff] }
 0x4dc   : > { %14553 = vmatprep.mubr.msk.f32.mxu1 %vm286_vm1, %v18158_v59  ;;  %v18442_v59 = vld [vmem:[%s19658_s6 + $0x30] sm:$0xff]  ;;  %v18623_v62 = vld [vmem:[#allocation2 + $0x207] sm:$0xff] }
 0x4dd   : > { %v18452_v53 = vadd.f32 %v14455_v35, %v8311_v2  ;;  %v18477_v35 = vld [vmem:[#allocation2 + $0x69] sm:$0xff]  ;;  %v18483_v2 = vld [vmem:[#allocation2 + $0x71] sm:$0xff]  ;;  %20260 = vst [vmem:[#allocation51_spill] sm:$0xff] %v18623_v62 }
 0x4de   : > { %14504 = vmatmul.mubr.msk.f32.vlgmr.msra.gmra.mxu0 %vm286_vm1, %v8730_v39  ;;  %v18489_v39 = vld [vmem:[#allocation2 + $0x89] sm:$0xff] }
 0x4df   : > { %14554 = vmatmul.mubr.msk.f32.vlgmr.msra.gmra.mxu1 %vm286_vm1, %v18162_v13  ;;  %14602 = vmatpush3.msra.mxu0 %v18138_v49  ;;  %20259 = vst [vmem:[#allocation82_spill] sm:$0xff] %v18452_v53  ;;  %v18457_v13 = vld [vmem:[#allocation2 + $0x31] sm:$0xff]  ;;  %v18465_v49 = vld [vmem:[#allocation2 + $0x49] sm:$0xff] }
 0x4e0   : > { %14506 = vmatprep.mubr.msk.f32.mxu0 %vm286_vm1, %v18437_v38  ;;  %14556 = vmatprep.mubr.msk.f32.mxu1 %vm286_vm1, %v18176_v15  ;;  %v18495_v53 = vld [vmem:[#allocation2 + $0x91] sm:$0xff] }
 0x4e1   : > { %14652 = vmatpush3.msra.mxu1 %v18153_v56  ;;  %14701 = vmatprep.subr.mxu0 %v18442_v59  ;;  %v18471_v56 = vld [vmem:[#allocation2 + $0x51] sm:$0xff] }
 0x4e2   : > { %14751 = vmatprep.subr.mxu1 %v18447_v27  ;;  %14507 = vmatmul.mubr.msk.f32.gmra.mxu0 %vm286_vm1, %v18457_v13 }
 0x4e3   : > { %14557 = vmatmul.mubr.msk.f32.gmra.mxu1 %vm286_vm1, %v18180_v26  ;;  %14509 = vmatprep.mubr.msk.f32.mxu0 %vm286_vm1, %v18465_v49 }
 0x4e4   : > { %14559 = vmatprep.mubr.msk.f32.mxu1 %vm286_vm1, %v18194_v7 }
 0x4e6   : > { %14510 = vmatmul.mubr.msk.f32.gmra.mxu0 %vm286_vm1, %v18471_v56 }
 0x4e7   : > { %14560 = vmatmul.mubr.msk.f32.gmra.mxu1 %vm286_vm1, %v18198_v3  ;;  %14512 = vmatprep.mubr.msk.f32.mxu0 %vm286_vm1, %v18477_v35 }
 0x4e8   : > { %14562 = vmatprep.mubr.msk.f32.mxu1 %vm286_vm1, %v18212_v18  ;;  %v18501_v18 = vld [vmem:[#allocation2 + $0xa9] sm:$0xff] }
 0x4ea   : > { %14513 = vmatmul.mubr.msk.f32.gmra.mxu0 %vm286_vm1, %v18483_v2 }
 0x4eb   : > { %14563 = vmatmul.mubr.msk.f32.gmra.mxu1 %vm286_vm1, %v18216_v60  ;;  %14515 = vmatprep.mubr.msk.f32.mxu0 %vm286_vm1, %v18489_v39  ;;  %v18507_v60 = vld [vmem:[#allocation2 + $0xb1] sm:$0xff] }
 0x4ec   : > { %14565 = vmatprep.mubr.msk.f32.mxu1 %vm286_vm1, %v18230_v44  ;;  %v18513_v44 = vld [vmem:[#allocation2 + $0xc9] sm:$0xff] }
 0x4ee   : > { %14516 = vmatmul.mubr.msk.f32.gmra.mxu0 %vm286_vm1, %v18495_v53 }
 0x4ef   : > { %14566 = vmatmul.mubr.msk.f32.gmra.mxu1 %vm286_vm1, %v18234_v14  ;;  %14518 = vmatprep.mubr.msk.f32.mxu0 %vm286_vm1, %v18501_v18  ;;  %v18519_v14 = vld [vmem:[#allocation2 + $0xd1] sm:$0xff] }
 0x4f0   : > { %14568 = vmatprep.mubr.msk.f32.mxu1 %vm286_vm1, %v18248_v19  ;;  %v18525_v19 = vld [vmem:[#allocation2 + $0xe9] sm:$0xff] }
 0x4f2   : > { %14519 = vmatmul.mubr.msk.f32.gmra.mxu0 %vm286_vm1, %v18507_v60 }
 0x4f3   : > { %14569 = vmatmul.mubr.msk.f32.gmra.mxu1 %vm286_vm1, %v18252_v45  ;;  %14521 = vmatprep.mubr.msk.f32.mxu0 %vm286_vm1, %v18513_v44  ;;  %v18531_v45 = vld [vmem:[#allocation2 + $0xf1] sm:$0xff] }
 0x4f4   : > { %14571 = vmatprep.mubr.msk.f32.mxu1 %vm286_vm1, %v18266_v52  ;;  %v18537_v52 = vld [vmem:[#allocation2 + $0x109] sm:$0xff] }
 0x4f6   : > { %14522 = vmatmul.mubr.msk.f32.gmra.mxu0 %vm286_vm1, %v18519_v14 }
 0x4f7   : > { %14572 = vmatmul.mubr.msk.f32.gmra.mxu1 %vm286_vm1, %v18270_v6  ;;  %14524 = vmatprep.mubr.msk.f32.mxu0 %vm286_vm1, %v18525_v19  ;;  %v18543_v6 = vld [vmem:[#allocation2 + $0x111] sm:$0xff] }
 0x4f8   : > { %14574 = vmatprep.mubr.msk.f32.mxu1 %vm286_vm1, %v18284_v22  ;;  %v18549_v22 = vld [vmem:[#allocation2 + $0x129] sm:$0xff] }
 0x4fa   : > { %14525 = vmatmul.mubr.msk.f32.gmra.mxu0 %vm286_vm1, %v18531_v45 }
 0x4fb   : > { %14575 = vmatmul.mubr.msk.f32.gmra.mxu1 %vm286_vm1, %v18288_v41  ;;  %14527 = vmatprep.mubr.msk.f32.mxu0 %vm286_vm1, %v18537_v52  ;;  %v18555_v41 = vld [vmem:[#allocation2 + $0x131] sm:$0xff] }
 0x4fc   : > { %14577 = vmatprep.mubr.msk.f32.mxu1 %vm286_vm1, %v18302_v51  ;;  %v18561_v51 = vld [vmem:[#allocation2 + $0x149] sm:$0xff] }
 0x4fe   : > { %14528 = vmatmul.mubr.msk.f32.gmra.mxu0 %vm286_vm1, %v18543_v6 }
 0x4ff   : > { %14578 = vmatmul.mubr.msk.f32.gmra.mxu1 %vm286_vm1, %v18306_v11  ;;  %14530 = vmatprep.mubr.msk.f32.mxu0 %vm286_vm1, %v18549_v22  ;;  %v18567_v11 = vld [vmem:[#allocation2 + $0x151] sm:$0xff] }
 0x500   : > { %14580 = vmatprep.mubr.msk.f32.mxu1 %vm286_vm1, %v18320_v42  ;;  %v18573_v42 = vld [vmem:[#allocation2 + $0x169] sm:$0xff] }
 0x502   : > { %14531 = vmatmul.mubr.msk.f32.gmra.mxu0 %vm286_vm1, %v18555_v41 }
 0x503   : > { %14581 = vmatmul.mubr.msk.f32.gmra.mxu1 %vm286_vm1, %v18324_v31  ;;  %14533 = vmatprep.mubr.msk.f32.mxu0 %vm286_vm1, %v18561_v51  ;;  %v18579_v31 = vld [vmem:[#allocation2 + $0x171] sm:$0xff] }
 0x504   : > { %14583 = vmatprep.mubr.msk.f32.mxu1 %vm286_vm1, %v18338_v23  ;;  %v18585_v23 = vld [vmem:[#allocation2 + $0x189] sm:$0xff] }
 0x506   : > { %14534 = vmatmul.mubr.msk.f32.gmra.mxu0 %vm286_vm1, %v18567_v11 }
 0x507   : > { %14584 = vmatmul.mubr.msk.f32.gmra.mxu1 %vm286_vm1, %v18342_v33  ;;  %14536 = vmatprep.mubr.msk.f32.mxu0 %vm286_vm1, %v18573_v42  ;;  %v18591_v33 = vld [vmem:[#allocation2 + $0x191] sm:$0xff] }
 0x508   : > { %14586 = vmatprep.mubr.msk.f32.mxu1 %vm286_vm1, %v18356_v54  ;;  %v18597_v54 = vld [vmem:[#allocation2 + $0x1a9] sm:$0xff] }
 0x50a   : > { %14537 = vmatmul.mubr.msk.f32.gmra.mxu0 %vm286_vm1, %v18579_v31 }
 0x50b   : > { %14587 = vmatmul.mubr.msk.f32.gmra.mxu1 %vm286_vm1, %v18360_v37  ;;  %14539 = vmatprep.mubr.msk.f32.mxu0 %vm286_vm1, %v18585_v23  ;;  %v18603_v37 = vld [vmem:[#allocation2 + $0x1b1] sm:$0xff] }
 0x50c   : > { %14589 = vmatprep.mubr.msk.f32.mxu1 %vm286_vm1, %v18374_v5  ;;  %v18609_v5 = vld [vmem:[#allocation2 + $0x1c9] sm:$0xff] }
 0x50e   : > { %14540 = vmatmul.mubr.msk.f32.gmra.mxu0 %vm286_vm1, %v18591_v33 }
 0x50f   : > { %14590 = vmatmul.mubr.msk.f32.gmra.mxu1 %vm286_vm1, %v18378_v1  ;;  %14542 = vmatprep.mubr.msk.f32.mxu0 %vm286_vm1, %v18597_v54  ;;  %v18615_v1 = vld [vmem:[#allocation2 + $0x1d1] sm:$0xff] }
 0x510   : > { %14592 = vmatprep.mubr.msk.f32.mxu1 %vm286_vm1, %v18392_v50  ;;  %v18621_v50 = vld [vmem:[#allocation2 + $0x1e9] sm:$0xff] }
 0x512   : > { %14543 = vmatmul.mubr.msk.f32.gmra.mxu0 %vm286_vm1, %v18603_v37 }
 0x513   : > { %14593 = vmatmul.mubr.msk.f32.gmra.mxu1 %vm286_vm1, %v18396_v9  ;;  %14545 = vmatprep.mubr.msk.f32.mxu0 %vm286_vm1, %v18609_v5  ;;  %v18629_v9 = vld [vmem:[#allocation2 + $0x1f1] sm:$0xff] }
 0x514   : > { %14595 = vmatprep.mubr.msk.f32.mxu1 %vm286_vm1, %v18409_v61  ;;  %v18631_v61 = vld [vmem:[#allocation2 + $0x20f] sm:$0xff] }
 0x516   : > { %14546 = vmatmul.mubr.msk.f32.gmra.mxu0 %vm286_vm1, %v18615_v1 }
 0x517   : > { %14596 = vmatmul.mubr.msk.f32.gmra.mxu1 %vm286_vm1, %v18413_v8  ;;  %14548 = vmatprep.mubr.msk.f32.mxu0 %vm286_vm1, %v18621_v50 }
 0x518   : > { %14598 = vmatprep.mubr.msk.f32.mxu1 %vm286_vm1, %v18623_v62  ;;  %v18648_v62 = vld [vmem:[%s19658_s6 + $0x40] sm:$0xff] }
 0x51a   : > { %14549 = vmatmul.mubr.msk.f32.gmra.mxu0 %vm286_vm1, %v18629_v9 }
 0x51b   : > { %14599 = vmatmul.mubr.msk.f32.gmra.mxu1 %vm286_vm1, %v18631_v61  ;;  %14603 = vmatprep.mubr.msk.f32.mxu0 %vm286_vm1, %v18160_v30  ;;  %v20261_v30 = vld [vmem:[#allocation80_spill] sm:$0xff] }
 0x51c   : > { %14653 = vmatprep.mubr.msk.f32.mxu1 %vm286_vm1, %v18437_v38  ;;  %v20271_v38 = vld [vmem:[#allocation61_spill] sm:$0xff] }
 0x51e   : > { %14604 = vmatmul.mubr.msk.f32.vlgmr.msra.gmra.mxu0 %vm286_vm1, %v18169_v12  ;;  %v20262_v12 = vld [vmem:[#allocation29_spill] sm:$0xff] }
 0x51f   : > { %14654 = vmatmul.mubr.msk.f32.vlgmr.msra.gmra.mxu1 %vm286_vm1, %v18457_v13  ;;  %14702 = vmatpush3.msra.mxu0 %v18442_v59 }
 0x520   : > { %14606 = vmatprep.mubr.msk.f32.mxu0 %vm286_vm1, %v18178_v32  ;;  %14656 = vmatprep.mubr.msk.f32.mxu1 %vm286_vm1, %v18465_v49 }
 0x521   : > { %14752 = vmatpush3.msra.mxu1 %v18447_v27  ;;  %14801 = vmatprep.subr.mxu0 %v18648_v62 }
 0x522   : > { %14607 = vmatmul.mubr.msk.f32.gmra.mxu0 %vm286_vm1, %v18187_v21 }
 0x523   : > { %14657 = vmatmul.mubr.msk.f32.gmra.mxu1 %vm286_vm1, %v18471_v56  ;;  %14609 = vmatprep.mubr.msk.f32.mxu0 %vm286_vm1, %v18196_v28 }
 0x524   : > { %14659 = vmatprep.mubr.msk.f32.mxu1 %vm286_vm1, %v18477_v35 }
 0x526   : > { %14610 = vmatmul.mubr.msk.f32.gmra.mxu0 %vm286_vm1, %v18205_v43 }
 0x527   : > { %14660 = vmatmul.mubr.msk.f32.gmra.mxu1 %vm286_vm1, %v18483_v2  ;;  %14612 = vmatprep.mubr.msk.f32.mxu0 %vm286_vm1, %v18214_v0 }
 0x528   : > { %14662 = vmatprep.mubr.msk.f32.mxu1 %vm286_vm1, %v18489_v39  ;;  %v20272_v39 = vld [vmem:[#allocation40_spill] sm:$0xff] }
 0x52a   : > { %14613 = vmatmul.mubr.msk.f32.gmra.mxu0 %vm286_vm1, %v18223_v46 }
 0x52b   : > { %14663 = vmatmul.mubr.msk.f32.gmra.mxu1 %vm286_vm1, %v18495_v53  ;;  %14615 = vmatprep.mubr.msk.f32.mxu0 %vm286_vm1, %v18232_v40 }
 0x52c   : > { %14665 = vmatprep.mubr.msk.f32.mxu1 %vm286_vm1, %v18501_v18  ;;  %v20263_v18 = vld [vmem:[#allocation81_spill] sm:$0xff] }
 0x52e   : > { %14616 = vmatmul.mubr.msk.f32.gmra.mxu0 %vm286_vm1, %v18241_v24 }
 0x52f   : > { %14666 = vmatmul.mubr.msk.f32.gmra.mxu1 %vm286_vm1, %v18507_v60  ;;  %14618 = vmatprep.mubr.msk.f32.mxu0 %vm286_vm1, %v18250_v47  ;;  %v20264_v60 = vld [vmem:[#allocation17_spill] sm:$0xff] }
 0x530   : > { %14668 = vmatprep.mubr.msk.f32.mxu1 %vm286_vm1, %v18513_v44  ;;  %v20265_v44 = vld [vmem:[#allocation6_spill] sm:$0xff] }
 0x532   : > { %14619 = vmatmul.mubr.msk.f32.gmra.mxu0 %vm286_vm1, %v18259_v25 }
 0x533   : > { %14669 = vmatmul.mubr.msk.f32.gmra.mxu1 %vm286_vm1, %v18519_v14  ;;  %14621 = vmatprep.mubr.msk.f32.mxu0 %vm286_vm1, %v18268_v57  ;;  %v18765_v14 = vld [vmem:[#allocation2 + $0x208] sm:$0xff] }
 0x534   : > { %14671 = vmatprep.mubr.msk.f32.mxu1 %vm286_vm1, %v18525_v19  ;;  %v18767_v19 = vld [vmem:[#allocation2 + $0x209] sm:$0xff] }
 0x536   : > { %14622 = vmatmul.mubr.msk.f32.gmra.mxu0 %vm286_vm1, %v18277_v20 }
 0x537   : > { %14672 = vmatmul.mubr.msk.f32.gmra.mxu1 %vm286_vm1, %v18531_v45  ;;  %14624 = vmatprep.mubr.msk.f32.mxu0 %vm286_vm1, %v18286_v36  ;;  %v18773_v45 = vld [vmem:[#allocation2 + $0x210] sm:$0xff] }
 0x538   : > { %14674 = vmatprep.mubr.msk.f32.mxu1 %vm286_vm1, %v18537_v52  ;;  %v18775_v52 = vld [vmem:[#allocation2 + $0x211] sm:$0xff] }
 0x53a   : > { %14625 = vmatmul.mubr.msk.f32.gmra.mxu0 %vm286_vm1, %v18295_v58 }
 0x53b   : > { %14675 = vmatmul.mubr.msk.f32.gmra.mxu1 %vm286_vm1, %v18543_v6  ;;  %14627 = vmatprep.mubr.msk.f32.mxu0 %vm286_vm1, %v18304_v17  ;;  %v18789_v6 = vpop.f32.mrf.mxu1 }
 0x53c   : > { %14677 = vmatprep.mubr.msk.f32.mxu1 %vm286_vm1, %v18549_v22  ;;  %v18794_v22 = vpop.f32.mrf.mxu0 }
 0x53e   : > { %14628 = vmatmul.mubr.msk.f32.gmra.mxu0 %vm286_vm1, %v18313_v34 }
 0x53f   : > { %14678 = vmatmul.mubr.msk.f32.gmra.mxu1 %vm286_vm1, %v18555_v41  ;;  %14630 = vmatprep.mubr.msk.f32.mxu0 %vm286_vm1, %v18322_v63  ;;  %v20267_v41 = vld [vmem:[#allocation33_spill] sm:$0xff] }
 0x540   : > { %14680 = vmatprep.mubr.msk.f32.mxu1 %vm286_vm1, %v18561_v51 }
 0x542   : > { %14631 = vmatmul.mubr.msk.f32.gmra.mxu0 %vm286_vm1, %v18331_v16 }
 0x543   : > { %14681 = vmatmul.mubr.msk.f32.gmra.mxu1 %vm286_vm1, %v18567_v11  ;;  %14633 = vmatprep.mubr.msk.f32.mxu0 %vm286_vm1, %v18340_v55 }
 0x544   : > { %14683 = vmatprep.mubr.msk.f32.mxu1 %vm286_vm1, %v18573_v42 }
 0x546   : > { %14634 = vmatmul.mubr.msk.f32.gmra.mxu0 %vm286_vm1, %v18349_v4 }
 0x547   : > { %14684 = vmatmul.mubr.msk.f32.gmra.mxu1 %vm286_vm1, %v18579_v31  ;;  %14636 = vmatprep.mubr.msk.f32.mxu0 %vm286_vm1, %v18358_v10 }
 0x548   : > { %14686 = vmatprep.mubr.msk.f32.mxu1 %vm286_vm1, %v18585_v23 }
 0x54a   : > { %14637 = vmatmul.mubr.msk.f32.gmra.mxu0 %vm286_vm1, %v18367_v48 }
 0x54b   : > { %14687 = vmatmul.mubr.msk.f32.gmra.mxu1 %vm286_vm1, %v18591_v33  ;;  %14639 = vmatprep.mubr.msk.f32.mxu0 %vm286_vm1, %v18376_v29  ;;  %v20269_v33 = vld [vmem:[#allocation55_spill] sm:$0xff] }
 0x54c   : > { %14689 = vmatprep.mubr.msk.f32.mxu1 %vm286_vm1, %v18597_v54 }
 0x54e   : > { %14640 = vmatmul.mubr.msk.f32.gmra.mxu0 %vm286_vm1, %v20261_v30 }
 0x54f   : > { %14690 = vmatmul.mubr.msk.f32.gmra.mxu1 %vm286_vm1, %v18603_v37  ;;  %14642 = vmatprep.mubr.msk.f32.mxu0 %vm286_vm1, %v20262_v12 }
 0x550   : > { %14692 = vmatprep.mubr.msk.f32.mxu1 %vm286_vm1, %v18609_v5 }
 0x552   : > { %14643 = vmatmul.mubr.msk.f32.gmra.mxu0 %vm286_vm1, %v20263_v18 }
 0x553   : > { %14693 = vmatmul.mubr.msk.f32.gmra.mxu1 %vm286_vm1, %v18615_v1  ;;  %14645 = vmatprep.mubr.msk.f32.mxu0 %vm286_vm1, %v20264_v60 }
 0x554   : > { %14695 = vmatprep.mubr.msk.f32.mxu1 %vm286_vm1, %v18621_v50 }
 0x556   : > { %14646 = vmatmul.mubr.msk.f32.gmra.mxu0 %vm286_vm1, %v20265_v44 }
 0x557   : > { %14696 = vmatmul.mubr.msk.f32.gmra.mxu1 %vm286_vm1, %v18629_v9  ;;  %14648 = vmatprep.mubr.msk.f32.mxu0 %vm286_vm1, %v18765_v14  ;;  %v20270_v9 = vld [vmem:[#allocation54_spill] sm:$0xff] }
 0x558   : > { %14698 = vmatprep.mubr.msk.f32.mxu1 %vm286_vm1, %v18767_v19 }
 0x55a   : > { %14649 = vmatmul.mubr.msk.f32.gmra.mxu0 %vm286_vm1, %v18773_v45 }
 0x55b   : > { %14699 = vmatmul.mubr.msk.f32.gmra.mxu1 %vm286_vm1, %v18775_v52  ;;  %14703 = vmatprep.mubr.msk.f32.mxu0 %vm286_vm1, %v18176_v15 }
 0x55c   : > { %14753 = vmatprep.mubr.msk.f32.mxu1 %vm286_vm1, %v18178_v32 }
 0x55e   : > { %14704 = vmatmul.mubr.msk.f32.vlgmr.msra.gmra.mxu0 %vm286_vm1, %v18180_v26  ;;  %v20266_v26 = vld [vmem:[#allocation89_spill] sm:$0xff] }
 0x55f   : > { %14754 = vmatmul.mubr.msk.f32.vlgmr.msra.gmra.mxu1 %vm286_vm1, %v18187_v21  ;;  %14802 = vmatpush3.msra.mxu0 %v18648_v62 }
 0x560   : > { %14706 = vmatprep.mubr.msk.f32.mxu0 %vm286_vm1, %v18194_v7  ;;  %14756 = vmatprep.mubr.msk.f32.mxu1 %vm286_vm1, %v18196_v28 }
 0x561   : > { %v14408_v15 = vpop.f32.mrf.mxu0 }
 0x562   : > { %v14458_v32 = vpop.f32.mrf.mxu1  ;;  %14707 = vmatmul.mubr.msk.f32.gmra.mxu0 %vm286_vm1, %v18198_v3  ;;  %v8313_v21 = vadd.f32 %v14408_v15, %v20266_v26  ;;  %v20268_v3 = vld [vmem:[#allocation31_spill] sm:$0xff] }
 0x563   : > { %14757 = vmatmul.mubr.msk.f32.gmra.mxu1 %vm286_vm1, %v18205_v43  ;;  %14709 = vmatprep.mubr.msk.f32.mxu0 %vm286_vm1, %v20267_v41  ;;  %v8161_v7 = vpop.f32.mrf.mxu0 }
 0x564   : > { %14759 = vmatprep.mubr.msk.f32.mxu1 %vm286_vm1, %v18214_v0  ;;  %v8548_v51 = vpop.f32.mrf.mxu1  ;;  %v18807_v11 = vadd.f32 %v14458_v32, %v8313_v21  ;;  %v8312_v28 = vadd.f32 %v20266_v26, %v8161_v7  ;;  %v20273_v32 = vld [vmem:[#allocation13_spill] sm:$0xff] }
 0x565   : > { %v14411_v42 = vpop.f32.mrf.mxu0 }
 0x566   : > { %v14461_v31 = vpop.f32.mrf.mxu1  ;;  %14710 = vmatmul.mubr.msk.f32.gmra.mxu0 %vm286_vm1, %v20268_v3  ;;  %v18814_v43 = vadd.f32 %v8548_v51, %v8312_v28  ;;  %v8315_v23 = vadd.f32 %v14411_v42, %v20266_v26  ;;  %v20274_v42 = vld [vmem:[#allocation22_spill] sm:$0xff]  ;;  %v20275_v3 = vld [vmem:[#allocation37_spill] sm:$0xff] }
 0x567   : > { %14760 = vmatmul.mubr.msk.f32.gmra.mxu1 %vm286_vm1, %v18223_v46  ;;  %14712 = vmatprep.mubr.msk.f32.mxu0 %vm286_vm1, %v20269_v33  ;;  %v8171_v0 = vpop.f32.mrf.mxu0 }
 0x568   : > { %14762 = vmatprep.mubr.msk.f32.mxu1 %vm286_vm1, %v18232_v40  ;;  %v8558_v54 = vpop.f32.mrf.mxu1  ;;  %v18821_v37 = vadd.f32 %v14461_v31, %v8315_v23  ;;  %v8314_v5 = vadd.f32 %v20266_v26, %v8171_v0 }
 0x569   : > { %v14414_v1 = vpop.f32.mrf.mxu0 }
 0x56a   : > { %v14464_v50 = vpop.f32.mrf.mxu1  ;;  %14713 = vmatmul.mubr.msk.f32.gmra.mxu0 %vm286_vm1, %v20270_v9  ;;  %v18828_v46 = vadd.f32 %v8558_v54, %v8314_v5  ;;  %v8317_v62 = vadd.f32 %v14414_v1, %v20266_v26  ;;  %v20276_v1 = vld [vmem:[#allocation56_spill] sm:$0xff] }
 0x56b   : > { %14763 = vmatmul.mubr.msk.f32.gmra.mxu1 %vm286_vm1, %v18241_v24  ;;  %14715 = vmatprep.mubr.msk.f32.mxu0 %vm286_vm1, %v20271_v38  ;;  %v8181_v40 = vpop.f32.mrf.mxu0  ;;  %v20277_v9 = vld [vmem:[#allocation64_spill] sm:$0xff] }
 0x56c   : > { %14765 = vmatprep.mubr.msk.f32.mxu1 %vm286_vm1, %v18250_v47  ;;  %v8568_v59 = vpop.f32.mrf.mxu1  ;;  %v18835_v27 = vadd.f32 %v14464_v50, %v8317_v62  ;;  %v8316_v53 = vadd.f32 %v20266_v26, %v8181_v40 }
 0x56d   : > { %v14417_v13 = vpop.f32.mrf.mxu0 }
 0x56e   : > { %v14467_v2 = vpop.f32.mrf.mxu1  ;;  %14716 = vmatmul.mubr.msk.f32.gmra.mxu0 %vm286_vm1, %v20272_v39  ;;  %v18842_v24 = vadd.f32 %v8568_v59, %v8316_v53  ;;  %v8319_v15 = vadd.f32 %v14417_v13, %v20266_v26  ;;  %v20278_v13 = vld [vmem:[#allocation57_spill] sm:$0xff]  ;;  %v20279_v39 = vld [vmem:[#allocation43_spill] sm:$0xff] }
 0x56f   : > { %14766 = vmatmul.mubr.msk.f32.gmra.mxu1 %vm286_vm1, %v18259_v25  ;;  %14718 = vmatprep.mubr.msk.f32.mxu0 %vm286_vm1, %v20273_v32  ;;  %v8191_v47 = vpop.f32.mrf.mxu0 }
 0x570   : > { %14768 = vmatprep.mubr.msk.f32.mxu1 %vm286_vm1, %v18268_v57  ;;  %v8578_v21 = vpop.f32.mrf.mxu1  ;;  %v18849_v41 = vadd.f32 %v14467_v2, %v8319_v15  ;;  %v8318_v7 = vadd.f32 %v20266_v26, %v8191_v47 }
 0x571   : > { %v14420_v51 = vpop.f32.mrf.mxu0 }
 0x572   : > { %v14470_v28 = vpop.f32.mrf.mxu1  ;;  %14719 = vmatmul.mubr.msk.f32.gmra.mxu0 %vm286_vm1, %v20274_v42  ;;  %v18856_v25 = vadd.f32 %v8578_v21, %v8318_v7  ;;  %v8321_v31 = vadd.f32 %v14420_v51, %v20266_v26  ;;  %v20280_v51 = vld [vmem:[#allocation62_spill] sm:$0xff]  ;;  %v20281_v42 = vld [vmem:[#allocation63_spill] sm:$0xff] }
 0x573   : > { %14769 = vmatmul.mubr.msk.f32.gmra.mxu1 %vm286_vm1, %v18277_v20  ;;  %14721 = vmatprep.mubr.msk.f32.mxu0 %vm286_vm1, %v20275_v3  ;;  %v8201_v57 = vpop.f32.mrf.mxu0 }
 0x574   : > { %14771 = vmatprep.mubr.msk.f32.mxu1 %vm286_vm1, %v18286_v36  ;;  %v8588_v23 = vpop.f32.mrf.mxu1  ;;  %v18863_v33 = vadd.f32 %v14470_v28, %v8321_v31  ;;  %v8320_v0 = vadd.f32 %v20266_v26, %v8201_v57 }
 0x576   : > { %v14423_v54 = vpop.f32.mrf.mxu0  ;;  %14722 = vmatmul.mubr.msk.f32.gmra.mxu0 %vm286_vm1, %v20276_v1  ;;  %v18870_v20 = vadd.f32 %v8588_v23, %v8320_v0  ;;  %v20283_v1 = vld [vmem:[#allocation21_spill] sm:$0xff] }
 0x577   : > { %v14473_v5 = vpop.f32.mrf.mxu1  ;;  %14772 = vmatmul.mubr.msk.f32.gmra.mxu1 %vm286_vm1, %v18295_v58  ;;  %v8323_v50 = vadd.f32 %v14423_v54, %v20266_v26  ;;  %14724 = vmatprep.mubr.msk.f32.mxu0 %vm286_vm1, %v20277_v9  ;;  %v20282_v54 = vld [vmem:[#allocation79_spill] sm:$0xff] }
 0x578   : > { %14774 = vmatprep.mubr.msk.f32.mxu1 %vm286_vm1, %v18304_v17  ;;  %v8211_v36 = vpop.f32.mrf.mxu0 }
 0x579   : > { %v8598_v62 = vpop.f32.mrf.mxu1  ;;  %v18877_v38 = vadd.f32 %v14473_v5, %v8323_v50  ;;  %v8322_v40 = vadd.f32 %v20266_v26, %v8211_v36 }
 0x57a   : > { %v14426_v59 = vpop.f32.mrf.mxu0  ;;  %14725 = vmatmul.mubr.msk.f32.gmra.mxu0 %vm286_vm1, %v20278_v13  ;;  %v20285_v13 = vld [vmem:[#allocation42_spill] sm:$0xff] }
 0x57b   : > { %v14476_v53 = vpop.f32.mrf.mxu1  ;;  %14775 = vmatmul.mubr.msk.f32.gmra.mxu1 %vm286_vm1, %v18313_v34  ;;  %v18884_v58 = vadd.f32 %v8598_v62, %v8322_v40  ;;  %v8325_v2 = vadd.f32 %v14426_v59, %v20266_v26  ;;  %14727 = vmatprep.mubr.msk.f32.mxu0 %vm286_vm1, %v20279_v39  ;;  %v20284_v59 = vld [vmem:[#allocation65_spill] sm:$0xff] }
 0x57c   : > { %14777 = vmatprep.mubr.msk.f32.mxu1 %vm286_vm1, %v18322_v63  ;;  %v8221_v17 = vpop.f32.mrf.mxu0 }
 0x57d   : > { %v8608_v15 = vpop.f32.mrf.mxu1  ;;  %v18891_v32 = vadd.f32 %v14476_v53, %v8325_v2  ;;  %v8324_v47 = vadd.f32 %v20266_v26, %v8221_v17 }
 0x57e   : > { %v14429_v21 = vpop.f32.mrf.mxu0  ;;  %14728 = vmatmul.mubr.msk.f32.gmra.mxu0 %vm286_vm1, %v20280_v51  ;;  %v20287_v51 = vld [vmem:[#allocation66_spill] sm:$0xff] }
 0x57f   : > { %v14479_v7 = vpop.f32.mrf.mxu1  ;;  %14778 = vmatmul.mubr.msk.f32.gmra.mxu1 %vm286_vm1, %v18331_v16  ;;  %v18898_v34 = vadd.f32 %v8608_v15, %v8324_v47  ;;  %v8327_v28 = vadd.f32 %v14429_v21, %v20266_v26  ;;  %14730 = vmatprep.mubr.msk.f32.mxu0 %vm286_vm1, %v20281_v42  ;;  %v20286_v21 = vld [vmem:[#allocation83_spill] sm:$0xff] }
 0x580   : > { %14780 = vmatprep.mubr.msk.f32.mxu1 %vm286_vm1, %v18340_v55  ;;  %v8231_v63 = vpop.f32.mrf.mxu0 }
 0x581   : > { %v8618_v31 = vpop.f32.mrf.mxu1  ;;  %v18905_v3 = vadd.f32 %v14479_v7, %v8327_v28  ;;  %v8326_v57 = vadd.f32 %v20266_v26, %v8231_v63 }
 0x582   : > { %v14432_v23 = vpop.f32.mrf.mxu0  ;;  %14731 = vmatmul.mubr.msk.f32.gmra.mxu0 %vm286_vm1, %v20282_v54  ;;  %v20289_v54 = vld [vmem:[#allocation35_spill] sm:$0xff] }
 0x583   : > { %v14482_v0 = vpop.f32.mrf.mxu1  ;;  %14781 = vmatmul.mubr.msk.f32.gmra.mxu1 %vm286_vm1, %v18349_v4  ;;  %v18912_v16 = vadd.f32 %v8618_v31, %v8326_v57  ;;  %v8329_v5 = vadd.f32 %v14432_v23, %v20266_v26  ;;  %14733 = vmatprep.mubr.msk.f32.mxu0 %vm286_vm1, %v20283_v1  ;;  %v20288_v23 = vld [vmem:[#allocation86_spill] sm:$0xff] }
 0x584   : > { %14783 = vmatprep.mubr.msk.f32.mxu1 %vm286_vm1, %v18358_v10  ;;  %v8241_v55 = vpop.f32.mrf.mxu0 }
 0x585   : > { %v8628_v50 = vpop.f32.mrf.mxu1  ;;  %v18919_v9 = vadd.f32 %v14482_v0, %v8329_v5  ;;  %v8328_v36 = vadd.f32 %v20266_v26, %v8241_v55 }
 0x586   : > { %v14435_v62 = vpop.f32.mrf.mxu0  ;;  %14734 = vmatmul.mubr.msk.f32.gmra.mxu0 %vm286_vm1, %v20284_v59 }
 0x587   : > { %v14485_v40 = vpop.f32.mrf.mxu1  ;;  %14784 = vmatmul.mubr.msk.f32.gmra.mxu1 %vm286_vm1, %v18367_v48  ;;  %v18926_v4 = vadd.f32 %v8628_v50, %v8328_v36  ;;  %v8331_v53 = vadd.f32 %v14435_v62, %v20266_v26  ;;  %14736 = vmatprep.mubr.msk.f32.mxu0 %vm286_vm1, %v20285_v13  ;;  %v10694_v13 = vld [vmem:[#allocation2 + $0x228] sm:$0xff] }
 0x588   : > { %14786 = vmatprep.mubr.msk.f32.mxu1 %vm286_vm1, %v18376_v29  ;;  %v8251_v10 = vpop.f32.mrf.mxu0 }
 0x589   : > { %v8638_v2 = vpop.f32.mrf.mxu1  ;;  %v18933_v39 = vadd.f32 %v14485_v40, %v8331_v53  ;;  %v8330_v17 = vadd.f32 %v20266_v26, %v8251_v10  ;;  %v20290_v40 = vld [vmem:[#allocation51_spill] sm:$0xff] }
 0x58a   : > { %v14438_v15 = vpop.f32.mrf.mxu0  ;;  %14737 = vmatmul.mubr.msk.f32.gmra.mxu0 %vm286_vm1, %v20286_v21  ;;  %v10307_v53 = vld [vmem:[#allocation2 + $0x227] sm:$0xff] }
 0x58b   : > { %v14488_v47 = vpop.f32.mrf.mxu1  ;;  %14787 = vmatmul.mubr.msk.f32.gmra.mxu1 %vm286_vm1, %v20261_v30  ;;  %v18940_v48 = vadd.f32 %v8638_v2, %v8330_v17  ;;  %v8333_v7 = vadd.f32 %v14438_v15, %v20266_v26  ;;  %14739 = vmatprep.mubr.msk.f32.mxu0 %vm286_vm1, %v20287_v51  ;;  %v10308_v15 = vld [vmem:[#allocation2 + $0x22f] sm:$0xff] }
 0x58c   : > { %14789 = vmatprep.mubr.msk.f32.mxu1 %vm286_vm1, %v20262_v12  ;;  %v8261_v29 = vpop.f32.mrf.mxu0 }
 0x58d   : > { %v8648_v28 = vpop.f32.mrf.mxu1  ;;  %v18947_v42 = vadd.f32 %v14488_v47, %v8333_v7  ;;  %v8332_v63 = vadd.f32 %v20266_v26, %v8261_v29  ;;  %v10695_v47 = vld [vmem:[#allocation2 + $0x230] sm:$0xff] }
 0x58e   : > { %v14441_v31 = vpop.f32.mrf.mxu0  ;;  %14740 = vmatmul.mubr.msk.f32.gmra.mxu0 %vm286_vm1, %v20288_v23 }
 0x58f   : > { %v14491_v57 = vpop.f32.mrf.mxu1  ;;  %14790 = vmatmul.mubr.msk.f32.gmra.mxu1 %vm286_vm1, %v20263_v18  ;;  %v18954_v30 = vadd.f32 %v8648_v28, %v8332_v63  ;;  %v8335_v0 = vadd.f32 %v14441_v31, %v20266_v26  ;;  %14742 = vmatprep.mubr.msk.f32.mxu0 %vm286_vm1, %v20289_v54 }
 0x590   : > { %14792 = vmatprep.mubr.msk.f32.mxu1 %vm286_vm1, %v20264_v60  ;;  %v8271_v12 = vpop.f32.mrf.mxu0 }
 0x591   : > { %v8658_v5 = vpop.f32.mrf.mxu1  ;;  %v18961_v1 = vadd.f32 %v14491_v57, %v8335_v0  ;;  %v8334_v55 = vadd.f32 %v20266_v26, %v8271_v12 }
 0x592   : > { %v14444_v50 = vpop.f32.mrf.mxu0  ;;  %14743 = vmatmul.mubr.msk.f32.gmra.mxu0 %vm286_vm1, %v18413_v8 }
 0x593   : > { %v14494_v36 = vpop.f32.mrf.mxu1  ;;  %14793 = vmatmul.mubr.msk.f32.gmra.mxu1 %vm286_vm1, %v20265_v44  ;;  %v18968_v18 = vadd.f32 %v8658_v5, %v8334_v55  ;;  %v8337_v62 = vadd.f32 %v14444_v50, %v20266_v26  ;;  %14745 = vmatprep.mubr.msk.f32.mxu0 %vm286_vm1, %v20290_v40  ;;  %v20291_v50 = vld [vmem:[#allocation82_spill] sm:$0xff] }
 0x594   : > { %14795 = vmatprep.mubr.msk.f32.mxu1 %vm286_vm1, %v18765_v14  ;;  %v8281_v60 = vpop.f32.mrf.mxu0 }
 0x595   : > { %v8668_v59 = vpop.f32.mrf.mxu1  ;;  %v18975_v10 = vadd.f32 %v14494_v36, %v8337_v62  ;;  %v8336_v8 = vadd.f32 %v20266_v26, %v8281_v60 }
 0x596   : > { %v14447_v2 = vpop.f32.mrf.mxu0  ;;  %14746 = vmatmul.mubr.msk.f32.gmra.mxu0 %vm286_vm1, %v18631_v61 }
 0x597   : > { %v14497_v44 = vpop.f32.mrf.mxu1  ;;  %14796 = vmatmul.mubr.msk.f32.gmra.mxu1 %vm286_vm1, %v18773_v45  ;;  %v18982_v17 = vadd.f32 %v8668_v59, %v8336_v8  ;;  %v8339_v14 = vadd.f32 %v14447_v2, %v20266_v26  ;;  %14748 = vmatprep.mubr.msk.f32.mxu0 %vm286_vm1, %v10307_v53  ;;  %v8310_v45 = vadd.f32 %v20266_v26, %v18794_v22 }
 0x598   : > { %14798 = vmatprep.mubr.msk.f32.mxu1 %vm286_vm1, %v10694_v13  ;;  %v8291_v21 = vpop.f32.mrf.mxu0 }
 0x599   : > { %v8678_v7 = vpop.f32.mrf.mxu1  ;;  %v18987_v51 = vadd.f32 %v14497_v44, %v8339_v14  ;;  %v8338_v29 = vadd.f32 %v20266_v26, %v8291_v21  ;;  %v8697_v22 = vadd.f32 %v18789_v6, %v8310_v45  ;;  %v11056_v14 = vld [vmem:[#allocation2 + $0x91] sm:$0xff]  ;;  %v11057_v21 = vld [vmem:[#allocation2 + $0xa9] sm:$0xff] }
 0x59a   : > { %v14450_v61 = vpop.f32.mrf.mxu0  ;;  %14749 = vmatmul.mubr.msk.f32.gmra.mxu0 %vm286_vm1, %v10308_v15 }
 0x59b   : > { %v14500_v28 = vpop.f32.mrf.mxu1  ;;  %14799 = vmatmul.mubr.msk.f32.gmra.mxu1 %vm286_vm1, %v10695_v47  ;;  %v18994_v63 = vadd.f32 %v8678_v7, %v8338_v29  ;;  %v8341_v31 = vadd.f32 %v14450_v61, %v20266_v26  ;;  %14803 = vmatprep.mubr.msk.f32.mxu0 %vm286_vm1, %v18465_v49 }
 0x59c   : > { %v8301_v57 = vpop.f32.mrf.mxu0 }
 0x59d   : > { %v8688_v23 = vpop.f32.mrf.mxu1  ;;  %v18999_v0 = vadd.f32 %v14500_v28, %v8341_v31  ;;  %v8340_v54 = vadd.f32 %v20266_v26, %v8301_v57  ;;  %v11054_v26 = vld [vmem:[#allocation2 + $0x71] sm:$0xff] }
 0x59e   : > { %v14505_v12 = vpop.f32.mrf.mxu0  ;;  %14804 = vmatmul.mubr.msk.f32.vlgmr.msra.gmra.mxu0 %vm286_vm1, %v18471_v56  ;;  %v11055_v56 = vld [vmem:[#allocation2 + $0x89] sm:$0xff]  ;;  %v11058_v31 = vld [vmem:[#allocation2 + $0xb1] sm:$0xff] }
 0x59f   : > { %v14555_v5 = vpop.f32.mrf.mxu1  ;;  %v19005_v55 = vadd.f32 %v8688_v23, %v8340_v54  ;;  %v9085_v36 = vadd.f32 %v14505_v12, %v20291_v50  ;;  %14806 = vmatprep.mubr.msk.f32.mxu0 %vm286_vm1, %v18477_v35  ;;  %v11059_v23 = vld [vmem:[#allocation2 + $0xc9] sm:$0xff] }
 0x5a0   : > { %v8925_v49 = vpop.f32.mrf.mxu0 }
 0x5a1   : > { %v9312_v62 = vpop.f32.mrf.mxu1  ;;  %v19010_v40 = vadd.f32 %v14555_v5, %v9085_v36  ;;  %v9084_v60 = vadd.f32 %v8925_v49, %v8697_v22  ;;  %v11060_v36 = vld [vmem:[#allocation2 + $0xd1] sm:$0xff] }
 0x5a2   : > { %v14508_v59 = vpop.f32.mrf.mxu0  ;;  %14807 = vmatmul.mubr.msk.f32.gmra.mxu0 %vm286_vm1, %v11054_v26 }
 0x5a3   : > { %v14558_v53 = vpop.f32.mrf.mxu1  ;;  %v19013_v13 = vadd.f32 %v9312_v62, %v9084_v60  ;;  %v9087_v6 = vadd.f32 %v14508_v59, %v18807_v11  ;;  %14809 = vmatprep.mubr.msk.f32.mxu0 %vm286_vm1, %v11055_v56  ;;  %v11061_v62 = vld [vmem:[#allocation2 + $0xe9] sm:$0xff] }
 0x5a4   : > { %v8935_v8 = vpop.f32.mrf.mxu0 }
 0x5a5   : > { %v9322_v2 = vpop.f32.mrf.mxu1  ;;  %v19017_v35 = vadd.f32 %v14558_v53, %v9087_v6  ;;  %v9086_v44 = vadd.f32 %v8935_v8, %v18814_v43  ;;  %v11062_v6 = vld [vmem:[#allocation2 + $0xf1] sm:$0xff] }
 0x5a6   : > { %v14511_v15 = vpop.f32.mrf.mxu0  ;;  %14810 = vmatmul.mubr.msk.f32.gmra.mxu0 %vm286_vm1, %v11056_v14 }
 0x5a7   : > { %v14561_v47 = vpop.f32.mrf.mxu1  ;;  %v19021_v7 = vadd.f32 %v9322_v2, %v9086_v44  ;;  %v9089_v29 = vadd.f32 %v14511_v15, %v18821_v37  ;;  %14812 = vmatprep.mubr.msk.f32.mxu0 %vm286_vm1, %v11057_v21  ;;  %v11063_v2 = vld [vmem:[#allocation2 + $0x109] sm:$0xff] }
 0x5a8   : > { %v8945_v11 = vpop.f32.mrf.mxu0 }
 0x5a9   : > { %v9332_v61 = vpop.f32.mrf.mxu1  ;;  %v19025_v28 = vadd.f32 %v14561_v47, %v9089_v29  ;;  %v9088_v45 = vadd.f32 %v8945_v11, %v18828_v46  ;;  %v11064_v29 = vld [vmem:[#allocation2 + $0x111] sm:$0xff] }
 0x5aa   : > { %v14514_v43 = vpop.f32.mrf.mxu0  ;;  %14813 = vmatmul.mubr.msk.f32.gmra.mxu0 %vm286_vm1, %v11058_v31 }
 0x5ab   : > { %v14564_v57 = vpop.f32.mrf.mxu1  ;;  %v19029_v54 = vadd.f32 %v9332_v61, %v9088_v45  ;;  %v9091_v12 = vadd.f32 %v14514_v43, %v18835_v27  ;;  %14815 = vmatprep.mubr.msk.f32.mxu0 %vm286_vm1, %v11059_v23  ;;  %v11065_v61 = vld [vmem:[#allocation2 + $0x129] sm:$0xff] }
 0x5ac   : > { %v8955_v37 = vpop.f32.mrf.mxu0 }
 0x5ad   : > { %v9342_v5 = vpop.f32.mrf.mxu1  ;;  %v19033_v22 = vadd.f32 %v14564_v57, %v9091_v12  ;;  %v9090_v50 = vadd.f32 %v8955_v37, %v18842_v24  ;;  %v11066_v12 = vld [vmem:[#allocation2 + $0x131] sm:$0xff] }
 0x5ae   : > { %v14517_v46 = vpop.f32.mrf.mxu0  ;;  %14816 = vmatmul.mubr.msk.f32.gmra.mxu0 %vm286_vm1, %v11060_v36 }
 0x5af   : > { %v14567_v49 = vpop.f32.mrf.mxu1  ;;  %v19037_v60 = vadd.f32 %v9342_v5, %v9090_v50  ;;  %v9093_v26 = vadd.f32 %v14517_v46, %v18849_v41  ;;  %14818 = vmatprep.mubr.msk.f32.mxu0 %vm286_vm1, %v11061_v62  ;;  %v11067_v5 = vld [vmem:[#allocation2 + $0x149] sm:$0xff] }
 0x5b0   : > { %v8965_v27 = vpop.f32.mrf.mxu0 }
 0x5b1   : > { %v9352_v59 = vpop.f32.mrf.mxu1  ;;  %v19041_v53 = vadd.f32 %v14567_v49, %v9093_v26  ;;  %v9092_v56 = vadd.f32 %v8965_v27, %v18856_v25  ;;  %v11068_v26 = vld [vmem:[#allocation2 + $0x151] sm:$0xff] }
 0x5b2   : > { %v14520_v24 = vpop.f32.mrf.mxu0  ;;  %14819 = vmatmul.mubr.msk.f32.gmra.mxu0 %vm286_vm1, %v11062_v6 }
 0x5b3   : > { %v14570_v8 = vpop.f32.mrf.mxu1  ;;  %v19045_v44 = vadd.f32 %v9352_v59, %v9092_v56  ;;  %v9095_v14 = vadd.f32 %v14520_v24, %v18863_v33  ;;  %14821 = vmatprep.mubr.msk.f32.mxu0 %vm286_vm1, %v11063_v2  ;;  %v11069_v59 = vld [vmem:[#allocation2 + $0x169] sm:$0xff] }
 0x5b4   : > { %v8975_v41 = vpop.f32.mrf.mxu0 }
 0x5b5   : > { %v9362_v15 = vpop.f32.mrf.mxu1  ;;  %v19049_v47 = vadd.f32 %v14570_v8, %v9095_v14  ;;  %v9094_v21 = vadd.f32 %v8975_v41, %v18870_v20  ;;  %v11070_v14 = vld [vmem:[#allocation2 + $0x171] sm:$0xff] }
 0x5b6   : > { %v14523_v25 = vpop.f32.mrf.mxu0  ;;  %14822 = vmatmul.mubr.msk.f32.gmra.mxu0 %vm286_vm1, %v11064_v29 }
 0x5b7   : > { %v14573_v11 = vpop.f32.mrf.mxu1  ;;  %v19053_v45 = vadd.f32 %v9362_v15, %v9094_v21  ;;  %v9097_v31 = vadd.f32 %v14523_v25, %v18877_v38  ;;  %14824 = vmatprep.mubr.msk.f32.mxu0 %vm286_vm1, %v11065_v61  ;;  %v11071_v15 = vld [vmem:[#allocation2 + $0x189] sm:$0xff] }
 0x5b8   : > { %v8985_v33 = vpop.f32.mrf.mxu0 }
 0x5b9   : > { %v9372_v43 = vpop.f32.mrf.mxu1  ;;  %v19057_v57 = vadd.f32 %v14573_v11, %v9097_v31  ;;  %v9096_v23 = vadd.f32 %v8985_v33, %v18884_v58  ;;  %v11072_v31 = vld [vmem:[#allocation2 + $0x191] sm:$0xff] }
 0x5ba   : > { %v14526_v20 = vpop.f32.mrf.mxu0  ;;  %14825 = vmatmul.mubr.msk.f32.gmra.mxu0 %vm286_vm1, %v11066_v12 }
 0x5bb   : > { %v14576_v37 = vpop.f32.mrf.mxu1  ;;  %v19061_v50 = vadd.f32 %v9372_v43, %v9096_v23  ;;  %v9099_v36 = vadd.f32 %v14526_v20, %v18891_v32  ;;  %14827 = vmatprep.mubr.msk.f32.mxu0 %vm286_vm1, %v11067_v5  ;;  %v11073_v43 = vld [vmem:[#allocation2 + $0x1a9] sm:$0xff] }
 0x5bc   : > { %v8995_v38 = vpop.f32.mrf.mxu0 }
 0x5bd   : > { %v9382_v46 = vpop.f32.mrf.mxu1  ;;  %v19065_v49 = vadd.f32 %v14576_v37, %v9099_v36  ;;  %v9098_v62 = vadd.f32 %v8995_v38, %v18898_v34  ;;  %v11074_v36 = vld [vmem:[#allocation2 + $0x1b1] sm:$0xff] }
 0x5be   : > { %v14529_v58 = vpop.f32.mrf.mxu0  ;;  %14828 = vmatmul.mubr.msk.f32.gmra.mxu0 %vm286_vm1, %v11068_v26 }
 0x5bf   : > { %v14579_v27 = vpop.f32.mrf.mxu1  ;;  %v19069_v56 = vadd.f32 %v9382_v46, %v9098_v62  ;;  %v9101_v6 = vadd.f32 %v14529_v58, %v18905_v3  ;;  %14830 = vmatprep.mubr.msk.f32.mxu0 %vm286_vm1, %v11069_v59  ;;  %v11075_v46 = vld [vmem:[#allocation2 + $0x1c9] sm:$0xff] }
 0x5c0   : > { %v9005_v32 = vpop.f32.mrf.mxu0 }
 0x5c1   : > { %v9392_v24 = vpop.f32.mrf.mxu1  ;;  %v19073_v8 = vadd.f32 %v14579_v27, %v9101_v6  ;;  %v9100_v2 = vadd.f32 %v9005_v32, %v18912_v16  ;;  %v11076_v6 = vld [vmem:[#allocation2 + $0x1d1] sm:$0xff] }
 0x5c2   : > { %v14532_v34 = vpop.f32.mrf.mxu0  ;;  %14831 = vmatmul.mubr.msk.f32.gmra.mxu0 %vm286_vm1, %v11070_v14 }
 0x5c3   : > { %v14582_v41 = vpop.f32.mrf.mxu1  ;;  %v19077_v21 = vadd.f32 %v9392_v24, %v9100_v2  ;;  %v9103_v29 = vadd.f32 %v14532_v34, %v18919_v9  ;;  %14833 = vmatprep.mubr.msk.f32.mxu0 %vm286_vm1, %v11071_v15  ;;  %v11077_v24 = vld [vmem:[#allocation2 + $0x1e9] sm:$0xff] }
 0x5c4   : > { %v9015_v3 = vpop.f32.mrf.mxu0 }
 0x5c5   : > { %v9402_v25 = vpop.f32.mrf.mxu1  ;;  %v19081_v11 = vadd.f32 %v14582_v41, %v9103_v29  ;;  %v9102_v61 = vadd.f32 %v9015_v3, %v18926_v4  ;;  %v11078_v29 = vld [vmem:[#allocation2 + $0x1f1] sm:$0xff] }
 0x5c6   : > { %v14535_v16 = vpop.f32.mrf.mxu0  ;;  %14834 = vmatmul.mubr.msk.f32.gmra.mxu0 %vm286_vm1, %v11072_v31 }
 0x5c7   : > { %v14585_v33 = vpop.f32.mrf.mxu1  ;;  %v19085_v23 = vadd.f32 %v9402_v25, %v9102_v61  ;;  %v9105_v12 = vadd.f32 %v14535_v16, %v18933_v39  ;;  %14836 = vmatprep.mubr.msk.f32.mxu0 %vm286_vm1, %v11073_v43  ;;  %v11081_v16 = vld [vmem:[#allocation2 + $0x229] sm:$0xff] }
 0x5c8   : > { %v9025_v9 = vpop.f32.mrf.mxu0 }
 0x5c9   : > { %v9412_v20 = vpop.f32.mrf.mxu1  ;;  %v19089_v37 = vadd.f32 %v14585_v33, %v9105_v12  ;;  %v9104_v5 = vadd.f32 %v9025_v9, %v18940_v48 }
 0x5ca   : > { %v14538_v4 = vpop.f32.mrf.mxu0  ;;  %14837 = vmatmul.mubr.msk.f32.gmra.mxu0 %vm286_vm1, %v11074_v36 }
 0x5cb   : > { %v14588_v38 = vpop.f32.mrf.mxu1  ;;  %v19093_v62 = vadd.f32 %v9412_v20, %v9104_v5  ;;  %v9107_v26 = vadd.f32 %v14538_v4, %v18947_v42  ;;  %14839 = vmatprep.mubr.msk.f32.mxu0 %vm286_vm1, %v11075_v46 }
 0x5cc   : > { %v9035_v39 = vpop.f32.mrf.mxu0 }
 0x5cd   : > { %v9422_v58 = vpop.f32.mrf.mxu1  ;;  %v19097_v27 = vadd.f32 %v14588_v38, %v9107_v26  ;;  %v9106_v59 = vadd.f32 %v9035_v39, %v18954_v30 }
 0x5ce   : > { %v14541_v48 = vpop.f32.mrf.mxu0  ;;  %14840 = vmatmul.mubr.msk.f32.gmra.mxu0 %vm286_vm1, %v11076_v6 }
 0x5cf   : > { %v14591_v32 = vpop.f32.mrf.mxu1  ;;  %v19101_v2 = vadd.f32 %v9422_v58, %v9106_v59  ;;  %v9109_v14 = vadd.f32 %v14541_v48, %v18961_v1  ;;  %14842 = vmatprep.mubr.msk.f32.mxu0 %vm286_vm1, %v11077_v24 }
 0x5d0   : > { %v9045_v42 = vpop.f32.mrf.mxu0 }
 0x5d1   : > { %v9432_v34 = vpop.f32.mrf.mxu1  ;;  %v19105_v41 = vadd.f32 %v14591_v32, %v9109_v14  ;;  %v9108_v15 = vadd.f32 %v9045_v42, %v18968_v18 }
 0x5d2   : > { %v14544_v30 = vpop.f32.mrf.mxu0  ;;  %14843 = vmatmul.mubr.msk.f32.gmra.mxu0 %vm286_vm1, %v11078_v29 }
 0x5d3   : > { %v14594_v3 = vpop.f32.mrf.mxu1  ;;  %v19109_v25 = vadd.f32 %v9432_v34, %v9108_v15  ;;  %v9111_v61 = vadd.f32 %v14544_v30, %v18975_v10  ;;  %14845 = vmatprep.mubr.msk.f32.mxu0 %vm286_vm1, %v18767_v19  ;;  %v11082_v10 = vld [vmem:[#allocation2 + $0x231] sm:$0xff] }
 0x5d4   : > { %v9055_v1 = vpop.f32.mrf.mxu0 }
 0x5d5   : > { %v9442_v31 = vpop.f32.mrf.mxu1  ;;  %v19114_v33 = vadd.f32 %v14594_v3, %v9111_v61  ;;  %v9110_v43 = vadd.f32 %v9055_v1, %v18982_v17 }
 0x5d6   : > { %v14547_v18 = vpop.f32.mrf.mxu0  ;;  %14846 = vmatmul.mubr.msk.f32.gmra.mxu0 %vm286_vm1, %v18775_v52 }
 0x5d7   : > { %v14597_v12 = vpop.f32.mrf.mxu1  ;;  %v19119_v9 = vadd.f32 %v9442_v31, %v9110_v43  ;;  %v9113_v20 = vadd.f32 %v14547_v18, %v18987_v51  ;;  %14848 = vmatprep.mubr.msk.f32.mxu0 %vm286_vm1, %v11081_v16 }
 0x5d8   : > { %v9065_v19 = vpop.f32.mrf.mxu0 }
 0x5d9   : > { %v9452_v5 = vpop.f32.mrf.mxu1  ;;  %v19123_v36 = vadd.f32 %v14597_v12, %v9113_v20  ;;  %v9112_v4 = vadd.f32 %v9065_v19, %v18994_v63 }
 0x5da   : > { %v14550_v38 = vpop.f32.mrf.mxu0  ;;  %14849 = vmatmul.mubr.msk.f32.gmra.mxu0 %vm286_vm1, %v11082_v10 }
 0x5db   : > { %v14600_v17 = vpop.f32.mrf.mxu1  ;;  %v19127_v46 = vadd.f32 %v9452_v5, %v9112_v4  ;;  %v9115_v52 = vadd.f32 %v14550_v38, %v18999_v0 }
 0x5dc   : > { %v9075_v26 = vpop.f32.mrf.mxu0 }
 0x5dd   : > { %v9462_v39 = vpop.f32.mrf.mxu1  ;;  %v19130_v51 = vadd.f32 %v14600_v17, %v9115_v52  ;;  %v9114_v58 = vadd.f32 %v9075_v26, %v19005_v55 }
 0x5de   : > { %v14605_v59 = vpop.f32.mrf.mxu0 }
 0x5df   : > { %v19133_v6 = vpop.f32.mrf.mxu1  ;;  %v19135_v48 = vadd.f32 %v9462_v39, %v9114_v58  ;;  %v19138_v63 = vadd.f32 %v14605_v59, %v19010_v40 }
 0x5e0   : > { %v9699_v32 = vpop.f32.mrf.mxu0 }
 0x5e1   : > { %v19140_v24 = vpop.f32.mrf.mxu1  ;;  %v19143_v14 = vadd.f32 %v9699_v32, %v19013_v13 }
 0x5e2   : > { %v14608_v0 = vpop.f32.mrf.mxu0 }
 0x5e3   : > { %v19145_v42 = vpop.f32.mrf.mxu1  ;;  %v19148_v34 = vadd.f32 %v14608_v0, %v19017_v35 }
 0x5e4   : > { %v9709_v55 = vpop.f32.mrf.mxu0 }
 0x5e5   : > { %v19150_v15 = vpop.f32.mrf.mxu1  ;;  %v19153_v29 = vadd.f32 %v9709_v55, %v19021_v7 }
 0x5e6   : > { %v14611_v40 = vpop.f32.mrf.mxu0 }
 0x5e7   : > { %v19155_v30 = vpop.f32.mrf.mxu1  ;;  %v19158_v3 = vadd.f32 %v14611_v40, %v19025_v28 }
 0x5e8   : > { %v9719_v13 = vpop.f32.mrf.mxu0 }
 0x5e9   : > { %v19160_v61 = vpop.f32.mrf.mxu1  ;;  %v19163_v1 = vadd.f32 %v9719_v13, %v19029_v54 }
 0x5ea   : > { %v14614_v35 = vpop.f32.mrf.mxu0 }
 0x5eb   : > { %v19165_v31 = vpop.f32.mrf.mxu1  ;;  %v19168_v16 = vadd.f32 %v14614_v35, %v19033_v22 }
 0x5ec   : > { %v9729_v7 = vpop.f32.mrf.mxu0 }
 0x5ed   : > { %v19170_v43 = vpop.f32.mrf.mxu1  ;;  %v19173_v18 = vadd.f32 %v9729_v7, %v19037_v60 }
 0x5ee   : > { %v14617_v28 = vpop.f32.mrf.mxu0 }
 0x5ef   : > { %v19175_v12 = vpop.f32.mrf.mxu1  ;;  %v19178_v20 = vadd.f32 %v14617_v28, %v19041_v53 }
 0x5f0   : > { %v9739_v54 = vpop.f32.mrf.mxu0 }
 0x5f1   : > { %v19180_v10 = vpop.f32.mrf.mxu1  ;;  %v19183_v19 = vadd.f32 %v9739_v54, %v19045_v44 }
 0x5f2   : > { %v14620_v22 = vpop.f32.mrf.mxu0 }
 0x5f3   : > { %v19185_v5 = vpop.f32.mrf.mxu1  ;;  %v19188_v4 = vadd.f32 %v14620_v22, %v19049_v47 }
 0x5f4   : > { %v9749_v60 = vpop.f32.mrf.mxu0 }
 0x5f5   : > { %v19190_v38 = vpop.f32.mrf.mxu1  ;;  %v19193_v17 = vadd.f32 %v9749_v60, %v19053_v45 }
 0x5f6   : > { %v14623_v53 = vpop.f32.mrf.mxu0 }
 0x5f7   : > { %v19195_v52 = vpop.f32.mrf.mxu1  ;;  %v19198_v26 = vadd.f32 %v14623_v53, %v19057_v57 }
 0x5f8   : > { %v9759_v44 = vpop.f32.mrf.mxu0 }
 0x5f9   : > { %v19200_v39 = vpop.f32.mrf.mxu1  ;;  %v19203_v58 = vadd.f32 %v9759_v44, %v19061_v50 }
 0x5fa   : > { %v14626_v47 = vpop.f32.mrf.mxu0 }
 0x5fb   : > { %v19205_v59 = vpop.f32.mrf.mxu1  ;;  %v19208_v32 = vadd.f32 %v14626_v47, %v19065_v49 }
 0x5fc   : > { %20292 = vst [vmem:[#allocation52_spill] sm:$0xff] %v19205_v59  ;;  %v9769_v45 = vpop.f32.mrf.mxu0 }
 0x5fd   : > { %v19210_v0 = vpop.f32.mrf.mxu1  ;;  %v19213_v55 = vadd.f32 %v9769_v45, %v19069_v56 }
 0x5fe   : > { %20293 = vst [vmem:[#allocation92_spill] sm:$0xff] %v19210_v0  ;;  %v14629_v57 = vpop.f32.mrf.mxu0 }
 0x5ff   : > { %20294 = vst [vmem:[#allocation84_spill] sm:$0xff] %v19213_v55  ;;  %v19215_v40 = vpop.f32.mrf.mxu1  ;;  %v19218_v13 = vadd.f32 %v14629_v57, %v19073_v8 }
 0x600   : > { %20295 = vst [vmem:[#allocation36_spill] sm:$0xff] %v19215_v40  ;;  %v9779_v50 = vpop.f32.mrf.mxu0 }
 0x601   : > { %20296 = vst [vmem:[#allocation34_spill] sm:$0xff] %v19218_v13  ;;  %v19220_v35 = vpop.f32.mrf.mxu1  ;;  %v19223_v7 = vadd.f32 %v9779_v50, %v19077_v21 }
 0x602   : > { %20297 = vst [vmem:[#allocation32_spill] sm:$0xff] %v19220_v35  ;;  %v14632_v49 = vpop.f32.mrf.mxu0 }
 0x603   : > { %20298 = vst [vmem:[#allocation95_spill] sm:$0xff] %v19223_v7  ;;  %v19225_v28 = vpop.f32.mrf.mxu1  ;;  %v19228_v54 = vadd.f32 %v14632_v49, %v19081_v11 }
 0x604   : > { %20299 = vst [vmem:[#allocation85_spill] sm:$0xff] %v19225_v28  ;;  %v9789_v56 = vpop.f32.mrf.mxu0 }
 0x605   : > { %20300 = vst [vmem:[#allocation7_spill] sm:$0xff] %v19228_v54  ;;  %v19230_v22 = vpop.f32.mrf.mxu1  ;;  %v19233_v60 = vadd.f32 %v9789_v56, %v19085_v23 }
 0x606   : > { %20301 = vst [vmem:[#allocation10_spill] sm:$0xff] %v19230_v22  ;;  %v14635_v8 = vpop.f32.mrf.mxu0 }
 0x607   : > { %20302 = vst [vmem:[#allocation98_spill] sm:$0xff] %v19233_v60  ;;  %v19235_v53 = vpop.f32.mrf.mxu1  ;;  %v19238_v44 = vadd.f32 %v14635_v8, %v19089_v37 }
 0x608   : > { %20303 = vst [vmem:[#allocation87_spill] sm:$0xff] %v19235_v53  ;;  %v9799_v21 = vpop.f32.mrf.mxu0 }
 0x609   : > { %20304 = vst [vmem:[#allocation58_spill] sm:$0xff] %v19238_v44  ;;  %v19240_v47 = vpop.f32.mrf.mxu1  ;;  %v19243_v45 = vadd.f32 %v9799_v21, %v19093_v62 }
 0x60a   : > { %20305 = vst [vmem:[#allocation9_spill] sm:$0xff] %v19240_v47  ;;  %v14638_v11 = vpop.f32.mrf.mxu0 }
 0x60b   : > { %20306 = vst [vmem:[#allocation8_spill] sm:$0xff] %v19243_v45  ;;  %v19245_v57 = vpop.f32.mrf.mxu1  ;;  %v19248_v50 = vadd.f32 %v14638_v11, %v19097_v27 }
 0x60c   : > { %20307 = vst [vmem:[#allocation88_spill] sm:$0xff] %v19245_v57  ;;  %v9809_v23 = vpop.f32.mrf.mxu0 }
 0x60d   : > { %20308 = vst [vmem:[#allocation11_spill] sm:$0xff] %v19248_v50  ;;  %v19250_v49 = vpop.f32.mrf.mxu1  ;;  %v19253_v56 = vadd.f32 %v9809_v23, %v19101_v2 }
 0x60e   : > { %20309 = vst [vmem:[#allocation44_spill] sm:$0xff] %v19250_v49  ;;  %v14641_v37 = vpop.f32.mrf.mxu0 }
 0x60f   : > { %20310 = vst [vmem:[#allocation103_spill] sm:$0xff] %v19253_v56  ;;  %v19255_v8 = vpop.f32.mrf.mxu1  ;;  %v19258_v47 = vadd.f32 %v14641_v37, %v19105_v41 }
 0x610   : > { %20311 = vst [vmem:[#allocation90_spill] sm:$0xff] %v19255_v8  ;;  %v9819_v62 = vpop.f32.mrf.mxu0 }
 0x611   : > { %20312 = vst [vmem:[#allocation59_spill] sm:$0xff] %v19258_v47  ;;  %v19260_v21 = vpop.f32.mrf.mxu1  ;;  %v19263_v57 = vadd.f32 %v9819_v62, %v19109_v25 }
 0x612   : > { %20313 = vst [vmem:[#allocation14_spill] sm:$0xff] %v19260_v21  ;;  %v14644_v27 = vpop.f32.mrf.mxu0 }
 0x613   : > { %20314 = vst [vmem:[#allocation12_spill] sm:$0xff] %v19263_v57  ;;  %v19265_v11 = vpop.f32.mrf.mxu1  ;;  %v19268_v49 = vadd.f32 %v14644_v27, %v19114_v33 }
 0x614   : > { %20315 = vst [vmem:[#allocation91_spill] sm:$0xff] %v19265_v11  ;;  %v9829_v2 = vpop.f32.mrf.mxu0 }
 0x615   : > { %20316 = vst [vmem:[#allocation45_spill] sm:$0xff] %v19268_v49  ;;  %v19270_v23 = vpop.f32.mrf.mxu1  ;;  %v19273_v8 = vadd.f32 %v9829_v2, %v19119_v9 }
 0x616   : > { %20317 = vst [vmem:[#allocation26_spill] sm:$0xff] %v19270_v23  ;;  %v14647_v41 = vpop.f32.mrf.mxu0 }
 0x617   : > { %20318 = vst [vmem:[#allocation93_spill] sm:$0xff] %v19273_v8  ;;  %v19275_v37 = vpop.f32.mrf.mxu1  ;;  %v19278_v21 = vadd.f32 %v14647_v41, %v19123_v36 }
 0x618   : > { %20319 = vst [vmem:[#allocation24_spill] sm:$0xff] %v19275_v37  ;;  %v9839_v25 = vpop.f32.mrf.mxu0 }
 0x619   : > { %20320 = vst [vmem:[#allocation25_spill] sm:$0xff] %v19278_v21  ;;  %v19280_v62 = vpop.f32.mrf.mxu1  ;;  %v19283_v11 = vadd.f32 %v9839_v25, %v19127_v46 }
 0x61a   : > { %20321 = vst [vmem:[#allocation16_spill] sm:$0xff] %v19280_v62  ;;  %v14650_v33 = vpop.f32.mrf.mxu0 }
 0x61b   : > { %20322 = vst [vmem:[#allocation94_spill] sm:$0xff] %v19283_v11  ;;  %v19285_v27 = vpop.f32.mrf.mxu1  ;;  %v19288_v23 = vadd.f32 %v14650_v33, %v19130_v51 }
 0x61c   : > { %20323 = vst [vmem:[#allocation46_spill] sm:$0xff] %v19285_v27  ;;  %v9849_v9 = vpop.f32.mrf.mxu0 }
 0x61d   : > { %20324 = vst [vmem:[#allocation15_spill] sm:$0xff] %v19288_v23  ;;  %v19290_v2 = vpop.f32.mrf.mxu1  ;;  %v19293_v37 = vadd.f32 %v9849_v9, %v19135_v48 }
 0x61e   : > { %20325 = vst [vmem:[#allocation96_spill] sm:$0xff] %v19290_v2  ;;  %v14705_v36 = vpop.f32.mrf.mxu0 }
 0x61f   : > { %20326 = vst [vmem:[#allocation39_spill] sm:$0xff] %v19293_v37  ;;  %v14755_v41 = vpop.f32.mrf.mxu1 }
 0x620   : > { %v10473_v21 = vpop.f32.mrf.mxu0 }
 0x621   : > { %v10860_v8 = vpop.f32.mrf.mxu1 }
 0x622   : > { %v14708_v62 = vpop.f32.mrf.mxu0 }
 0x623   : > { %v14758_v46 = vpop.f32.mrf.mxu1 }
 0x624   : > { %v10483_v49 = vpop.f32.mrf.mxu0 }
 0x625   : > { %v19297_v27 = vpop.f32.mrf.mxu1 }
 0x626   : > { %v14711_v25 = vpop.f32.mrf.mxu0 }
 0x627   : > { %v19303_v2 = vpop.f32.mrf.mxu1 }
 0x628   : > { %v19295_v11 = vpop.f32.mrf.mxu0 }
 0x629   : > { %v19309_v37 = vpop.f32.mrf.mxu1 }
 0x62a   : > { %v19299_v51 = vpop.f32.mrf.mxu0 }
 0x62b   : > { %v19315_v47 = vpop.f32.mrf.mxu1 }
 0x62c   : > { %v19301_v33 = vpop.f32.mrf.mxu0 }
 0x62d   : > { %v19321_v45 = vpop.f32.mrf.mxu1 }
 0x62e   : > { %v19305_v48 = vpop.f32.mrf.mxu0 }
 0x62f   : > { %v19327_v22 = vpop.f32.mrf.mxu1 }
 0x630   : > { %v19307_v9 = vpop.f32.mrf.mxu0 }
 0x631   : > { %v19333_v54 = vpop.f32.mrf.mxu1 }
 0x632   : > { %v19311_v23 = vpop.f32.mrf.mxu0 }
 0x633   : > { %v19339_v40 = vpop.f32.mrf.mxu1 }
 0x634   : > { %v19313_v57 = vpop.f32.mrf.mxu0 }
 0x636   : > { %v19317_v56 = vpop.f32.mrf.mxu0 }
 0x638   : > { %v19319_v50 = vpop.f32.mrf.mxu0 }
 0x639   : > { %20327 = vst [vmem:[#allocation18_spill] sm:$0xff] %v19319_v50 }
 0x63a   : > { %v19323_v53 = vpop.f32.mrf.mxu0 }
 0x63b   : > { %20328 = vst [vmem:[#allocation47_spill] sm:$0xff] %v19323_v53  ;;  %v19345_v53 = vpop.f32.mrf.mxu1 }
 0x63c   : > { %v19325_v44 = vpop.f32.mrf.mxu0 }
 0x63d   : > { %20329 = vst [vmem:[#allocation97_spill] sm:$0xff] %v19325_v44 }
 0x63e   : > { %v19329_v60 = vpop.f32.mrf.mxu0 }
 0x63f   : > { %20330 = vst [vmem:[#allocation28_spill] sm:$0xff] %v19329_v60  ;;  %v19351_v60 = vpop.f32.mrf.mxu1 }
 0x640   : > { %v19331_v28 = vpop.f32.mrf.mxu0  ;;  %20338 = vst [vmem:[#allocation19_spill] sm:$0xff] %v19351_v60 }
 0x641   : > { %20331 = vst [vmem:[#allocation49_spill] sm:$0xff] %v19331_v28 }
 0x642   : > { %v19335_v35 = vpop.f32.mrf.mxu0 }
 0x643   : > { %20332 = vst [vmem:[#allocation99_spill] sm:$0xff] %v19335_v35  ;;  %v19357_v35 = vpop.f32.mrf.mxu1 }
 0x644   : > { %v19337_v7 = vpop.f32.mrf.mxu0  ;;  %20341 = vst [vmem:[#allocation20_spill] sm:$0xff] %v19357_v35 }
 0x645   : > { %20333 = vst [vmem:[#allocation41_spill] sm:$0xff] %v19337_v7 }
 0x646   : > { %v19341_v13 = vpop.f32.mrf.mxu0 }
 0x647   : > { %20334 = vst [vmem:[#allocation48_spill] sm:$0xff] %v19341_v13  ;;  %v19363_v13 = vpop.f32.mrf.mxu1 }
 0x648   : > { %v19343_v0 = vpop.f32.mrf.mxu0  ;;  %20344 = vst [vmem:[#allocation53_spill] sm:$0xff] %v19363_v13 }
 0x649   : > { %20335 = vst [vmem:[#allocation30_spill] sm:$0xff] %v19343_v0  ;;  %v19373_v60 = vpop.f32.mrf.mxu1 }
 0x64a   : > { %v19347_v44 = vpop.f32.mrf.mxu0 }
 0x64b   : > { %20336 = vst [vmem:[#allocation100_spill] sm:$0xff] %v19347_v44 }
 0x64c   : > { %v19349_v55 = vpop.f32.mrf.mxu0 }
 0x64d   : > { %20337 = vst [vmem:[#allocation27_spill] sm:$0xff] %v19349_v55  ;;  %v10246_v55 = vadd.f32 %v19133_v6, %v19138_v63 }
 0x64e   : > { %v19353_v28 = vpop.f32.mrf.mxu0 }
 0x64f   : > { %20339 = vst [vmem:[#allocation101_spill] sm:$0xff] %v19353_v28  ;;  %v10245_v28 = vadd.f32 %v19140_v24, %v19143_v14  ;;  %v10250_v24 = vadd.f32 %v19155_v30, %v19158_v3  ;;  %v11536_v30 = vld [vmem:[%s15023_s21 + $0x8] sm:$0xff] }
 0x650   : > { %v19355_v50 = vpop.f32.mrf.mxu0 }
 0x651   : > { %20340 = vst [vmem:[#allocation60_spill] sm:$0xff] %v19355_v50  ;;  %v10633_v50 = vadd.f32 %v14705_v36, %v10246_v55  ;;  %v19387_v36 = vstv %s12308_s25 }
 0x652   : > { %v19359_v7 = vpop.f32.mrf.mxu0 }
 0x653   : > { %20342 = vst [vmem:[#allocation50_spill] sm:$0xff] %v19359_v7  ;;  %v10632_v7 = vadd.f32 %v10473_v21, %v10245_v28  ;;  %v11020_v6 = vadd.f32 %v14755_v41, %v10633_v50 }
 0x654   : > { %v19361_v59 = vpop.f32.mrf.mxu0 }
 0x655   : > { %20343 = vst [vmem:[#allocation102_spill] sm:$0xff] %v19361_v59  ;;  %v10248_v59 = vadd.f32 %v19145_v42, %v19148_v34  ;;  %v11019_v42 = vadd.f32 %v10860_v8, %v10632_v7 }
 0x656   : > { %v19365_v0 = vpop.f32.mrf.mxu0 }
 0x657   : > { %20345 = vst [vmem:[#allocation69_spill] sm:$0xff] %v19365_v0  ;;  %v10247_v0 = vadd.f32 %v19150_v15, %v19153_v29  ;;  %v10635_v63 = vadd.f32 %v14708_v62, %v10248_v59  ;;  %v10249_v15 = vadd.f32 %v19160_v61, %v19163_v1  ;;  %v10637_v29 = vadd.f32 %v14711_v25, %v10250_v24  ;;  %v11535_v62 = vld [vmem:[%s15023_s21] sm:$0xff]  ;;  %v11538_v24 = vld [vmem:[%s15023_s21 + $0x18] sm:$0xff] }
 0x658   : > { %v19369_v44 = vpop.f32.mrf.mxu0 }
 0x659   : > { %20346 = vst [vmem:[#allocation104_spill] sm:$0xff] %v19369_v44  ;;  %v19383_v44 = vpop.f32.mrf.mxu1  ;;  %v10634_v14 = vadd.f32 %v10483_v49, %v10247_v0  ;;  %v11022_v50 = vadd.f32 %v14758_v46, %v10635_v63  ;;  %v10252_v0 = vadd.f32 %v19165_v31, %v19168_v16  ;;  %v10636_v49 = vadd.f32 %v19295_v11, %v10249_v15  ;;  %v11537_v15 = vld [vmem:[%s15023_s21 + $0x10] sm:$0xff] }
 0x65a   : > { %v19375_v35 = vpop.f32.mrf.mxu0  ;;  %v10251_v31 = vadd.f32 %v19170_v43, %v19173_v18  ;;  %v11024_v16 = vadd.f32 %v19303_v2, %v10637_v29 }
 0x65b   : > { %v19391_v59 = vpop.f32.mrf.mxu1  ;;  %v11021_v7 = vadd.f32 %v19297_v27, %v10634_v14  ;;  %v10639_v11 = vadd.f32 %v19299_v51, %v10252_v0  ;;  %v11023_v43 = vadd.f32 %v19309_v37, %v10636_v49 }
 0x65c   : > { %v19381_v13 = vpop.f32.mrf.mxu0  ;;  %v10638_v18 = vadd.f32 %v19301_v33, %v10251_v31 }
 0x65d   : > { %v19412_v25 = vpop.f32.mrf.mxu1 }
 0x65e   : > { %v14805_v55 = vpop.f32.mrf.mxu0 }
 0x65f   : > { %v11407_v34 = vadd.f32 %v14805_v55, %v11020_v6  ;;  %v10254_v55 = vadd.f32 %v19175_v12, %v19178_v20  ;;  %v11026_v12 = vadd.f32 %v19315_v47, %v10639_v11  ;;  %v11542_v11 = vld [vmem:[%s15023_s21 + $0x38] sm:$0xff] }
 0x660   : > { %v11247_v28 = vpop.f32.mrf.mxu0 }
 0x661   : > { %vm11439_vm1 = vcmp.gt.f32.partialorder %v11407_v34, 0.0  ;;  %v11472_v21 = vmul.f32 %v19387_v36, %v11407_v34  ;;  %v11406_v3 = vadd.f32 %v11247_v28, %v11019_v42  ;;  %v10253_v28 = vadd.f32 %v19180_v10, %v19183_v19 }
 0x662   : > { %v14808_v8 = vpop.f32.mrf.mxu0  ;;  %v10641_v20 = vadd.f32 %v19305_v48, %v10254_v55  ;;  %v10256_v10 = vadd.f32 %v19185_v5, %v19188_v4  ;;  %v11025_v19 = vadd.f32 %v19321_v45, %v10638_v18  ;;  %v10257_v55 = vadd.f32 %v19200_v39, %v19203_v58  ;;  %v20347_v39 = vld [vmem:[#allocation52_spill] sm:$0xff] }
 0x663   : > { %v11504_v61 = vsel %vm11439_vm1, %v11407_v34, %v11472_v21  ;;  %vm11438_vm7 = vcmp.gt.f32.partialorder %v11406_v3, 0.0  ;;  %v11471_v1 = vmul.f32 %v19387_v36, %v11406_v3  ;;  %v11409_v41 = vadd.f32 %v14808_v8, %v11022_v50  ;;  %v19430_v50 = vpop.f32.mrf.mxu1 }
 0x664   : > { %v11568_v27 = vadd.f32 %v11536_v30, %v11504_v61  ;;  %v11257_v46 = vpop.f32.mrf.mxu0  ;;  %v10640_v47 = vadd.f32 %v19307_v9, %v10253_v28  ;;  %v11539_v61 = vld [vmem:[%s15023_s21 + $0x20] sm:$0xff]  ;;  %v11028_v5 = vadd.f32 %v19327_v22, %v10641_v20  ;;  %v10643_v4 = vadd.f32 %v19311_v23, %v10256_v10 }
 0x665   : > { %v11503_v6 = vsel %vm11438_vm7, %v11406_v3, %v11471_v1  ;;  %vm11441_vm8 = vcmp.gt.f32.partialorder %v11409_v41, 0.0  ;;  %v11474_v63 = vmul.f32 %v19387_v36, %v11409_v41  ;;  %v11408_v14 = vadd.f32 %v11257_v46, %v11021_v7  ;;  %v11540_v3 = vld [vmem:[%s15023_s21 + $0x28] sm:$0xff]  ;;  %v11543_v20 = vld [vmem:[%s15023_s21 + $0x40] sm:$0xff] }
 0x666   : > { %11600 = vst.msk [vmem:[%s19404_s28 + $0x8] sm:$0xff] %vm361_vm4, %v11568_v27  ;;  %v11567_v2 = vadd.f32 %v11535_v62, %v11503_v6  ;;  %v14811_v51 = vpop.f32.mrf.mxu0  ;;  %v10255_v62 = vadd.f32 %v19190_v38, %v19193_v17  ;;  %v10258_v38 = vadd.f32 %v19195_v52, %v19198_v26  ;;  %v11027_v17 = vadd.f32 %v19333_v54, %v10640_v47 }
 0x667   : > { %v11506_v42 = vsel %vm11441_vm8, %v11409_v41, %v11474_v63  ;;  %vm11440_vm9 = vcmp.gt.f32.partialorder %v11408_v14, 0.0  ;;  %v11473_v34 = vmul.f32 %v19387_v36, %v11408_v14  ;;  %v11411_v29 = vadd.f32 %v14811_v51, %v11024_v16  ;;  %v19448_v41 = vpop.f32.mrf.mxu1  ;;  %v11544_v51 = vld [vmem:[%s15023_s21 + $0x48] sm:$0xff] }
 0x668   : > { %11599 = vst.msk [vmem:[%s19404_s28] sm:$0xff] %vm361_vm4, %v11567_v2  ;;  %v11570_v37 = vadd.f32 %v11538_v24, %v11506_v42  ;;  %v11267_v33 = vpop.f32.mrf.mxu0  ;;  %v10642_v22 = vadd.f32 %v19313_v57, %v10255_v62  ;;  %v11541_v24 = vld [vmem:[%s15023_s21 + $0x30] sm:$0xff]  ;;  %v11030_v52 = vadd.f32 %v19339_v40, %v10643_v4  ;;  %v10645_v26 = vadd.f32 %v19317_v56, %v10258_v38  ;;  %v20348_v56 = vld [vmem:[#allocation18_spill] sm:$0xff] }
 0x669   : > { %v11505_v21 = vsel %vm11440_vm9, %v11408_v14, %v11473_v34  ;;  %vm11443_vm10 = vcmp.gt.f32.partialorder %v11411_v29, 0.0  ;;  %v11476_v30 = vmul.f32 %v19387_v36, %v11411_v29  ;;  %v11410_v0 = vadd.f32 %v11267_v33, %v11023_v43  ;;  %v19466_v43 = vpop.f32.mrf.mxu1  ;;  %v20349_v33 = vld [vmem:[#allocation84_spill] sm:$0xff] }
 0x66a   : > { %11602 = vst.msk [vmem:[%s19404_s28 + $0x18] sm:$0xff] %vm361_vm4, %v11570_v37  ;;  %v11569_v48 = vadd.f32 %v11537_v15, %v11505_v21  ;;  %v14814_v7 = vpop.f32.mrf.mxu0  ;;  %v10260_v58 = vadd.f32 %v20347_v39, %v19208_v32  ;;  %v11029_v40 = vadd.f32 %v19345_v53, %v10642_v22  ;;  %v10644_v34 = vadd.f32 %v20348_v56, %v10257_v55  ;;  %v20350_v21 = vld [vmem:[#allocation92_spill] sm:$0xff]  ;;  %v20351_v32 = vld [vmem:[#allocation19_spill] sm:$0xff] }
 0x66b   : > { %v11508_v49 = vsel %vm11443_vm10, %v11411_v29, %v11476_v30  ;;  %vm11442_vm11 = vcmp.gt.f32.partialorder %v11410_v0, 0.0  ;;  %v11475_v8 = vmul.f32 %v19387_v36, %v11410_v0  ;;  %v11413_v1 = vadd.f32 %v14814_v7, %v11026_v12  ;;  %v20352_v53 = vld [vmem:[#allocation47_spill] sm:$0xff]  ;;  %v19484_v47 = vpop.f32.mrf.mxu1  ;;  %v11545_v38 = vld [vmem:[%s15023_s21 + $0x50] sm:$0xff] }
 0x66c   : > { %11601 = vst.msk [vmem:[%s19404_s28 + $0x10] sm:$0xff] %vm361_vm4, %v11569_v48  ;;  %v11572_v45 = vadd.f32 %v11540_v3, %v11508_v49  ;;  %v11277_v9 = vpop.f32.mrf.mxu0  ;;  %v10259_v30 = vadd.f32 %v20350_v21, %v20349_v33  ;;  %v11032_v3 = vadd.f32 %v20351_v32, %v10645_v26  ;;  %v11546_v49 = vld [vmem:[%s15023_s21 + $0x58] sm:$0xff]  ;;  %v20357_v22 = vld [vmem:[#allocation95_spill] sm:$0xff]  ;;  %v20365_v33 = vld [vmem:[#allocation10_spill] sm:$0xff] }
 0x66d   : > { %v11507_v31 = vsel %vm11442_vm11, %v11410_v0, %v11475_v8  ;;  %vm11445_vm12 = vcmp.gt.f32.partialorder %v11413_v1, 0.0  ;;  %v11478_v16 = vmul.f32 %v19387_v36, %v11413_v1  ;;  %v11412_v27 = vadd.f32 %v11277_v9, %v11025_v19  ;;  %v19502_v26 = vpop.f32.mrf.mxu1 }
 0x66e   : > { %11604 = vst.msk [vmem:[%s19404_s28 + $0x28] sm:$0xff] %vm361_vm4, %v11572_v45  ;;  %v11571_v23 = vadd.f32 %v11539_v61, %v11507_v31  ;;  %v14817_v46 = vpop.f32.mrf.mxu0  ;;  %v10647_v0 = vadd.f32 %v20352_v53, %v10260_v58  ;;  %v20353_v61 = vld [vmem:[#allocation34_spill] sm:$0xff]  ;;  %v20356_v45 = vld [vmem:[#allocation97_spill] sm:$0xff] }
 0x66f   : > { %v11510_v6 = vsel %vm11445_vm12, %v11413_v1, %v11478_v16  ;;  %vm11444_vm13 = vcmp.gt.f32.partialorder %v11412_v27, 0.0  ;;  %v11477_v63 = vmul.f32 %v19387_v36, %v11412_v27  ;;  %v11415_v14 = vadd.f32 %v14817_v46, %v11028_v5  ;;  %v20354_v1 = vld [vmem:[#allocation36_spill] sm:$0xff] }
 0x670   : > { %11603 = vst.msk [vmem:[%s19404_s28 + $0x20] sm:$0xff] %vm361_vm4, %v11571_v23  ;;  %v11574_v54 = vadd.f32 %v11542_v11, %v11510_v6  ;;  %v11287_v57 = vpop.f32.mrf.mxu0  ;;  %v10262_v62 = vadd.f32 %v20354_v1, %v20353_v61  ;;  %v20355_v5 = vld [vmem:[#allocation20_spill] sm:$0xff]  ;;  %v10646_v9 = vadd.f32 %v20356_v45, %v10259_v30  ;;  %v20359_v6 = vld [vmem:[#allocation53_spill] sm:$0xff] }
 0x671   : > { %v11509_v18 = vsel %vm11444_vm13, %v11412_v27, %v11477_v63  ;;  %vm11447_vm14 = vcmp.gt.f32.partialorder %v11415_v14, 0.0  ;;  %v11480_v2 = vmul.f32 %v19387_v36, %v11415_v14  ;;  %v11414_v42 = vadd.f32 %v11287_v57, %v11027_v17  ;;  %v20358_v23 = vld [vmem:[#allocation32_spill] sm:$0xff]  ;;  %v20369_v1 = vld [vmem:[#allocation41_spill] sm:$0xff] }
 0x672   : > { %11606 = vst.msk [vmem:[%s19404_s28 + $0x38] sm:$0xff] %vm361_vm4, %v11574_v54  ;;  %v11573_v15 = vadd.f32 %v11541_v24, %v11509_v18  ;;  %v14820_v29 = vpop.f32.mrf.mxu0  ;;  %v11031_v4 = vadd.f32 %v20355_v5, %v10644_v34  ;;  %v10261_v46 = vadd.f32 %v20358_v23, %v20357_v22  ;;  %v11034_v63 = vadd.f32 %v20359_v6, %v10647_v0  ;;  %v20360_v24 = vld [vmem:[#allocation28_spill] sm:$0xff]  ;;  %v11548_v18 = vld [vmem:[%s15023_s21 + $0x68] sm:$0xff]  ;;  %v19520_v0 = vpop.f32.mrf.mxu1 }
 0x673   : > { %v11512_v28 = vsel %vm11447_vm14, %v11415_v14, %v11480_v2  ;;  %vm11446_vm15 = vcmp.gt.f32.partialorder %v11414_v42, 0.0  ;;  %v11479_v12 = vmul.f32 %v19387_v36, %v11414_v42  ;;  %v11417_v37 = vadd.f32 %v14820_v29, %v11030_v52 }
 0x674   : > { %11605 = vst.msk [vmem:[%s19404_s28 + $0x30] sm:$0xff] %vm361_vm4, %v11573_v15  ;;  %v11576_v10 = vadd.f32 %v11544_v51, %v11512_v28  ;;  %v11297_v19 = vpop.f32.mrf.mxu0  ;;  %v10649_v14 = vadd.f32 %v20360_v24, %v10262_v62  ;;  %v20361_v51 = vld [vmem:[#allocation7_spill] sm:$0xff]  ;;  %v11033_v58 = vadd.f32 %v19373_v60, %v10646_v9  ;;  %v19538_v6 = vpop.f32.mrf.mxu1 }
 0x675   : > { %v11511_v48 = vsel %vm11446_vm15, %v11414_v42, %v11479_v12  ;;  %vm11449_vm5 = vcmp.gt.f32.partialorder %v11417_v37, 0.0  ;;  %v11482_v7 = vmul.f32 %v19387_v36, %v11417_v37  ;;  %v11416_v8 = vadd.f32 %v11297_v19, %v11029_v40  ;;  %v20362_v42 = vld [vmem:[#allocation85_spill] sm:$0xff]  ;;  %v11547_v12 = vld [vmem:[%s15023_s21 + $0x60] sm:$0xff]  ;;  %v20366_v60 = vld [vmem:[#allocation99_spill] sm:$0xff] }
 0x676   : > { %11608 = vst.msk [vmem:[%s19404_s28 + $0x48] sm:$0xff] %vm361_vm4, %v11576_v10  ;;  %v11575_v31 = vadd.f32 %v11543_v20, %v11511_v48  ;;  %v14823_v16 = vpop.f32.mrf.mxu0  ;;  %v10264_v39 = vadd.f32 %v20362_v42, %v20361_v51  ;;  %v20363_v40 = vld [vmem:[#allocation49_spill] sm:$0xff]  ;;  %v11036_v30 = vadd.f32 %v19383_v44, %v10649_v14  ;;  %v11552_v14 = vld [vmem:[%s15023_s21 + $0x88] sm:$0xff] }
 0x677   : > { %v11514_v11 = vsel %vm11449_vm5, %v11417_v37, %v11482_v7  ;;  %vm11448_vm6 = vcmp.gt.f32.partialorder %v11416_v8, 0.0  ;;  %v11481_v27 = vmul.f32 %v19387_v36, %v11416_v8  ;;  %v11419_v17 = vadd.f32 %v14823_v16, %v11032_v3  ;;  %v20364_v37 = vld [vmem:[#allocation98_spill] sm:$0xff]  ;;  %v11550_v48 = vld [vmem:[%s15023_s21 + $0x78] sm:$0xff] }
 0x678   : > { %11607 = vst.msk [vmem:[%s19404_s28 + $0x40] sm:$0xff] %vm361_vm4, %v11575_v31  ;;  %v11578_v55 = vadd.f32 %v11546_v49, %v11514_v11  ;;  %v11307_v52 = vpop.f32.mrf.mxu0  ;;  %v10648_v56 = vadd.f32 %v20363_v40, %v10261_v46  ;;  %v10263_v21 = vadd.f32 %v20365_v33, %v20364_v37  ;;  %v10651_v32 = vadd.f32 %v20366_v60, %v10264_v39  ;;  %v20367_v49 = vld [vmem:[#allocation58_spill] sm:$0xff]  ;;  %v11549_v31 = vld [vmem:[%s15023_s21 + $0x70] sm:$0xff]  ;;  %v19556_v33 = vpop.f32.mrf.mxu1  ;;  %v11554_v60 = vld [vmem:[%s15023_s21 + $0x98] sm:$0xff] }
 0x679   : > { %v11513_v54 = vsel %vm11448_vm6, %v11416_v8, %v11481_v27  ;;  %vm11451_vm0 = vcmp.gt.f32.partialorder %v11419_v17, 0.0  ;;  %v11484_v57 = vmul.f32 %v19387_v36, %v11419_v17  ;;  %v11418_v2 = vadd.f32 %v11307_v52, %v11031_v4  ;;  %v20368_v8 = vld [vmem:[#allocation87_spill] sm:$0xff]  ;;  %v20370_v11 = vld [vmem:[#allocation8_spill] sm:$0xff]  ;;  %v20371_v27 = vld [vmem:[#allocation9_spill] sm:$0xff] }
 0x67a   : > { %11610 = vst.msk [vmem:[%s19404_s28 + $0x58] sm:$0xff] %vm361_vm4, %v11578_v55  ;;  %v11577_v34 = vadd.f32 %v11545_v38, %v11513_v54  ;;  %v14826_v15 = vpop.f32.mrf.mxu0  ;;  %v10266_v61 = vadd.f32 %v20368_v8, %v20367_v49  ;;  %v11035_v44 = vadd.f32 %v19391_v59, %v10648_v56  ;;  %v10650_v62 = vadd.f32 %v20369_v1, %v10263_v21  ;;  %v20372_v59 = vld [vmem:[#allocation48_spill] sm:$0xff]  ;;  %v20373_v52 = vld [vmem:[#allocation11_spill] sm:$0xff]  ;;  %v11551_v40 = vld [vmem:[%s15023_s21 + $0x80] sm:$0xff] }
 0x67b   : > { %v11516_v29 = vsel %vm11451_vm0, %v11419_v17, %v11484_v57  ;;  %vm11450_vm2 = vcmp.gt.f32.partialorder %v11418_v2, 0.0  ;;  %v11483_v28 = vmul.f32 %v19387_v36, %v11418_v2  ;;  %v11421_v20 = vadd.f32 %v14826_v15, %v11034_v63  ;;  %v20374_v54 = vld [vmem:[#allocation88_spill] sm:$0xff] }
 0x67c   : > { %11609 = vst.msk [vmem:[%s19404_s28 + $0x50] sm:$0xff] %vm361_vm4, %v11577_v34  ;;  %v11580_v3 = vadd.f32 %v11548_v18, %v11516_v29  ;;  %v11317_v53 = vpop.f32.mrf.mxu0  ;;  %v10265_v38 = vadd.f32 %v20371_v27, %v20370_v11  ;;  %v11038_v17 = vadd.f32 %v19412_v25, %v10651_v32  ;;  %v10653_v22 = vadd.f32 %v20372_v59, %v10266_v61  ;;  %v20375_v18 = vld [vmem:[#allocation30_spill] sm:$0xff]  ;;  %v20376_v34 = vld [vmem:[#allocation103_spill] sm:$0xff]  ;;  %v20377_v15 = vld [vmem:[#allocation44_spill] sm:$0xff]  ;;  %v10990_v11 = vpop.f32.mrf.mxu1 }
 0x67d   : > { %v11515_v10 = vsel %vm11450_vm2, %v11418_v2, %v11483_v28  ;;  %vm11453_vm3 = vcmp.gt.f32.partialorder %v11421_v20, 0.0  ;;  %v11486_v19 = vmul.f32 %v19387_v36, %v11421_v20  ;;  %v11420_v7 = vadd.f32 %v11317_v53, %v11033_v58  ;;  %v20380_v53 = vld [vmem:[#allocation90_spill] sm:$0xff] }
 0x67e   : > { %11612 = vst.msk [vmem:[%s19404_s28 + $0x68] sm:$0xff] %vm361_vm4, %v11580_v3  ;;  %v11579_v5 = vadd.f32 %v11547_v12, %v11515_v10  ;;  %v14829_v4 = vpop.f32.mrf.mxu0  ;;  %v10268_v57 = vadd.f32 %v20374_v54, %v20373_v52  ;;  %v11037_v25 = vadd.f32 %v19430_v50, %v10650_v62  ;;  %v10652_v2 = vadd.f32 %v20375_v18, %v10265_v38  ;;  %v20378_v50 = vld [vmem:[#allocation100_spill] sm:$0xff]  ;;  %v20379_v3 = vld [vmem:[#allocation59_spill] sm:$0xff]  ;;  %v20388_v18 = vld [vmem:[#allocation93_spill] sm:$0xff] }
 0x67f   : > { %v11518_v45 = vsel %vm11453_vm3, %v11421_v20, %v11486_v19  ;;  %vm11452_vm1 = vcmp.gt.f32.partialorder %v11420_v7, 0.0  ;;  %v11485_v9 = vmul.f32 %v19387_v36, %v11420_v7  ;;  %v11423_v16 = vadd.f32 %v14829_v4, %v11036_v30  ;;  %v20381_v19 = vld [vmem:[#allocation27_spill] sm:$0xff]  ;;  %v20382_v62 = vld [vmem:[#allocation12_spill] sm:$0xff] }
 0x680   : > { %11611 = vst.msk [vmem:[%s19404_s28 + $0x60] sm:$0xff] %vm361_vm4, %v11579_v5  ;;  %v11582_v23 = vadd.f32 %v11550_v48, %v11518_v45  ;;  %v11327_v46 = vpop.f32.mrf.mxu0  ;;  %v10267_v29 = vadd.f32 %v20377_v15, %v20376_v34  ;;  %v11040_v28 = vadd.f32 %v19448_v41, %v10653_v22  ;;  %v10655_v12 = vadd.f32 %v20378_v50, %v10268_v57  ;;  %v20383_v5 = vld [vmem:[#allocation14_spill] sm:$0xff]  ;;  %v20385_v22 = vld [vmem:[#allocation45_spill] sm:$0xff] }
 0x681   : > { %v11517_v63 = vsel %vm11452_vm1, %v11420_v7, %v11485_v9  ;;  %vm11455_vm7 = vcmp.gt.f32.partialorder %v11423_v16, 0.0  ;;  %v11488_v24 = vmul.f32 %v19387_v36, %v11423_v16  ;;  %v11422_v55 = vadd.f32 %v11327_v46, %v11035_v44  ;;  %v11553_v44 = vld [vmem:[%s15023_s21 + $0x90] sm:$0xff]  ;;  %v11555_v57 = vld [vmem:[%s15023_s21 + $0xa0] sm:$0xff]  ;;  %v20391_v50 = vld [vmem:[#allocation25_spill] sm:$0xff] }
 0x682   : > { %11614 = vst.msk [vmem:[%s19404_s28 + $0x78] sm:$0xff] %vm361_vm4, %v11582_v23  ;;  %v11581_v51 = vadd.f32 %v11549_v31, %v11517_v63  ;;  %v14832_v42 = vpop.f32.mrf.mxu0  ;;  %v10270_v10 = vadd.f32 %v20380_v53, %v20379_v3  ;;  %v11039_v41 = vadd.f32 %v19466_v43, %v10652_v2  ;;  %v10654_v48 = vadd.f32 %v20381_v19, %v10267_v29  ;;  %v20384_v43 = vld [vmem:[#allocation101_spill] sm:$0xff]  ;;  %v20386_v23 = vld [vmem:[#allocation91_spill] sm:$0xff]  ;;  %v20387_v63 = vld [vmem:[#allocation60_spill] sm:$0xff] }
 0x683   : > { %v11520_v39 = vsel %vm11455_vm7, %v11423_v16, %v11488_v24  ;;  %vm11454_vm8 = vcmp.gt.f32.partialorder %v11422_v55, 0.0  ;;  %v11487_v58 = vmul.f32 %v19387_v36, %v11422_v55  ;;  %v11425_v56 = vadd.f32 %v14832_v42, %v11038_v17  ;;  %v11556_v17 = vld [vmem:[%s15023_s21 + $0xa8] sm:$0xff]  ;;  %v20389_v2 = vld [vmem:[#allocation26_spill] sm:$0xff]  ;;  %v11558_v29 = vld [vmem:[%s15023_s21 + $0xb8] sm:$0xff] }
 0x684   : > { %11613 = vst.msk [vmem:[%s19404_s28 + $0x70] sm:$0xff] %vm361_vm4, %v11581_v51  ;;  %v11584_v20 = vadd.f32 %v11552_v14, %v11520_v39  ;;  %v11337_v37 = vpop.f32.mrf.mxu0  ;;  %v10269_v4 = vadd.f32 %v20383_v5, %v20382_v62  ;;  %v11042_v45 = vadd.f32 %v19484_v47, %v10655_v12  ;;  %v10657_v9 = vadd.f32 %v20384_v43, %v10270_v10  ;;  %v20392_v12 = vld [vmem:[#allocation24_spill] sm:$0xff]  ;;  %v11560_v5 = vld [vmem:[%s15023_s21 + $0xc8] sm:$0xff]  ;;  %v20398_v43 = vld [vmem:[#allocation46_spill] sm:$0xff] }
 0x685   : > { %v11519_v21 = vsel %vm11454_vm8, %v11422_v55, %v11487_v58  ;;  %vm11457_vm9 = vcmp.gt.f32.partialorder %v11425_v56, 0.0  ;;  %v11490_v30 = vmul.f32 %v19387_v36, %v11425_v56  ;;  %v11424_v32 = vadd.f32 %v11337_v37, %v11037_v25  ;;  %v20393_v37 = vld [vmem:[#allocation102_spill] sm:$0xff]  ;;  %v11557_v53 = vld [vmem:[%s15023_s21 + $0xb0] sm:$0xff] }
 0x686   : > { %11616 = vst.msk [vmem:[%s19404_s28 + $0x88] sm:$0xff] %vm361_vm4, %v11584_v20  ;;  %v11583_v7 = vadd.f32 %v11551_v40, %v11519_v21  ;;  %v14835_v49 = vpop.f32.mrf.mxu0  ;;  %v10272_v46 = vadd.f32 %v20386_v23, %v20385_v22  ;;  %v11041_v47 = vadd.f32 %v19502_v26, %v10654_v48  ;;  %v10656_v24 = vadd.f32 %v20387_v63, %v10269_v4  ;;  %v20390_v26 = vld [vmem:[#allocation50_spill] sm:$0xff]  ;;  %v20395_v19 = vld [vmem:[#allocation16_spill] sm:$0xff] }
 0x687   : > { %v11522_v8 = vsel %vm11457_vm9, %v11425_v56, %v11490_v30  ;;  %vm11456_vm10 = vcmp.gt.f32.partialorder %v11424_v32, 0.0  ;;  %v11489_v61 = vmul.f32 %v19387_v36, %v11424_v32  ;;  %v11427_v1 = vadd.f32 %v14835_v49, %v11040_v28  ;;  %v14797_v56 = vpop.f32.mrf.mxu1  ;;  %v11559_v23 = vld [vmem:[%s15023_s21 + $0xc0] sm:$0xff]  ;;  %v20401_v63 = vld [vmem:[#allocation96_spill] sm:$0xff] }
 0x688   : > { %11615 = vst.msk [vmem:[%s19404_s28 + $0x80] sm:$0xff] %vm361_vm4, %v11583_v7  ;;  %v11586_v31 = vadd.f32 %v11554_v60, %v11522_v8  ;;  %v11347_v16 = vpop.f32.mrf.mxu0  ;;  %v10271_v51 = vadd.f32 %v20389_v2, %v20388_v18  ;;  %v11044_v42 = vadd.f32 %v19520_v0, %v10657_v9  ;;  %v10659_v39 = vadd.f32 %v20390_v26, %v10272_v46 }
 0x689   : > { %v11521_v27 = vsel %vm11456_vm10, %v11424_v32, %v11489_v61  ;;  %vm11459_vm11 = vcmp.gt.f32.partialorder %v11427_v1, 0.0  ;;  %v11492_v38 = vmul.f32 %v19387_v36, %v11427_v1  ;;  %v11426_v59 = vadd.f32 %v11347_v16, %v11039_v41  ;;  %v20394_v41 = vld [vmem:[#allocation94_spill] sm:$0xff] }
 0x68a   : > { %11618 = vst.msk [vmem:[%s19404_s28 + $0x98] sm:$0xff] %vm361_vm4, %v11586_v31  ;;  %v11585_v14 = vadd.f32 %v11553_v44, %v11521_v27  ;;  %v14838_v55 = vpop.f32.mrf.mxu0  ;;  %v10274_v20 = vadd.f32 %v20392_v12, %v20391_v50  ;;  %v11043_v0 = vadd.f32 %v19538_v6, %v10656_v24  ;;  %v10658_v21 = vadd.f32 %v20393_v37, %v10271_v51  ;;  %v20396_v6 = vld [vmem:[#allocation69_spill] sm:$0xff]  ;;  %v11000_v44 = vpop.f32.mrf.mxu1  ;;  %v11564_v50 = vld [vmem:[%s15023_s21 + $0xe8] sm:$0xff] }
 0x68b   : > { %v11524_v52 = vsel %vm11459_vm11, %v11427_v1, %v11492_v38  ;;  %vm11458_vm12 = vcmp.gt.f32.partialorder %v11426_v59, 0.0  ;;  %v11491_v54 = vmul.f32 %v19387_v36, %v11426_v59  ;;  %v11429_v25 = vadd.f32 %v14838_v55, %v11042_v45  ;;  %v20397_v45 = vld [vmem:[#allocation15_spill] sm:$0xff] }
 0x68c   : > { %11617 = vst.msk [vmem:[%s19404_s28 + $0x90] sm:$0xff] %vm361_vm4, %v11585_v14  ;;  %v11588_v58 = vadd.f32 %v11556_v17, %v11524_v52  ;;  %v11357_v40 = vpop.f32.mrf.mxu0  ;;  %v10273_v48 = vadd.f32 %v20395_v19, %v20394_v41  ;;  %v11046_v7 = vadd.f32 %v19556_v33, %v10659_v39  ;;  %v10661_v49 = vadd.f32 %v20396_v6, %v10274_v20  ;;  %v20399_v33 = vld [vmem:[#allocation104_spill] sm:$0xff]  ;;  %v14800_v17 = vpop.f32.mrf.mxu1  ;;  %v11566_v19 = vld [vmem:[%s15023_s21 + $0xf8] sm:$0xff] }
 0x68d   : > { %v11523_v34 = vsel %vm11458_vm12, %v11426_v59, %v11491_v54  ;;  %vm11461_vm13 = vcmp.gt.f32.partialorder %v11429_v25, 0.0  ;;  %v11494_v15 = vmul.f32 %v19387_v36, %v11429_v25  ;;  %v11428_v28 = vadd.f32 %v11357_v40, %v11041_v47  ;;  %v20400_v47 = vld [vmem:[#allocation39_spill] sm:$0xff]  ;;  %v11561_v40 = vld [vmem:[%s15023_s21 + $0xd0] sm:$0xff] }
 0x68e   : > { %11620 = vst.msk [vmem:[%s19404_s28 + $0xa8] sm:$0xff] %vm361_vm4, %v11588_v58  ;;  %v11587_v30 = vadd.f32 %v11555_v57, %v11523_v34  ;;  %v14841_v60 = vpop.f32.mrf.mxu0  ;;  %v10276_v9 = vadd.f32 %v20398_v43, %v20397_v45  ;;  %v11045_v31 = vadd.f32 %v10990_v11, %v10658_v21  ;;  %v10660_v16 = vadd.f32 %v20399_v33, %v10273_v48  ;;  %v11010_v26 = vpop.f32.mrf.mxu1 }
 0x68f   : > { %v11526_v32 = vsel %vm11461_vm13, %v11429_v25, %v11494_v15  ;;  %vm11460_vm14 = vcmp.gt.f32.partialorder %v11428_v28, 0.0  ;;  %v11493_v3 = vmul.f32 %v19387_v36, %v11428_v28  ;;  %v11431_v10 = vadd.f32 %v14841_v60, %v11044_v42  ;;  %v11562_v25 = vld [vmem:[%s15023_s21 + $0xd8] sm:$0xff]  ;;  %v11563_v60 = vld [vmem:[%s15023_s21 + $0xe0] sm:$0xff] }
 0x690   : > { %11619 = vst.msk [vmem:[%s19404_s28 + $0xa0] sm:$0xff] %vm361_vm4, %v11587_v30  ;;  %v11590_v8 = vadd.f32 %v11558_v29, %v11526_v32  ;;  %v11367_v61 = vpop.f32.mrf.mxu0  ;;  %v10275_v24 = vadd.f32 %v20401_v63, %v20400_v47  ;;  %v11048_v14 = vadd.f32 %v14797_v56, %v10661_v49  ;;  %v10663_v11 = vadd.f32 %v19375_v35, %v10276_v9 }
 0x691   : > { %v11525_v1 = vsel %vm11460_vm14, %v11428_v28, %v11493_v3  ;;  %vm11463_vm15 = vcmp.gt.f32.partialorder %v11431_v10, 0.0  ;;  %v11496_v62 = vmul.f32 %v19387_v36, %v11431_v10  ;;  %v11430_v4 = vadd.f32 %v11367_v61, %v11043_v0 }
 0x692   : > { %11622 = vst.msk [vmem:[%s19404_s28 + $0xb8] sm:$0xff] %vm361_vm4, %v11590_v8  ;;  %v11589_v27 = vadd.f32 %v11557_v53, %v11525_v1  ;;  %v14844_v38 = vpop.f32.mrf.mxu0  ;;  %v11047_v2 = vadd.f32 %v11000_v44, %v10660_v16  ;;  %v10662_v51 = vadd.f32 %v19381_v13, %v10275_v24  ;;  %v11050_v34 = vadd.f32 %v14800_v17, %v10663_v11  ;;  %v11565_v8 = vld [vmem:[%s15023_s21 + $0xf0] sm:$0xff] }
 0x693   : > { %v11528_v59 = vsel %vm11463_vm15, %v11431_v10, %v11496_v62  ;;  %vm11462_vm5 = vcmp.gt.f32.partialorder %v11430_v4, 0.0  ;;  %v11495_v22 = vmul.f32 %v19387_v36, %v11430_v4  ;;  %v11433_v46 = vadd.f32 %v14844_v38, %v11046_v7 }
 0x694   : > { %11621 = vst.msk [vmem:[%s19404_s28 + $0xb0] sm:$0xff] %vm361_vm4, %v11589_v27  ;;  %v11592_v55 = vadd.f32 %v11560_v5, %v11528_v59  ;;  %v11377_v52 = vpop.f32.mrf.mxu0  ;;  %v11049_v20 = vadd.f32 %v11010_v26, %v10662_v51 }
 0x695   : > { %v11527_v54 = vsel %vm11462_vm5, %v11430_v4, %v11495_v22  ;;  %vm11465_vm6 = vcmp.gt.f32.partialorder %v11433_v46, 0.0  ;;  %v11498_v57 = vmul.f32 %v19387_v36, %v11433_v46  ;;  %v11432_v18 = vadd.f32 %v11377_v52, %v11045_v31 }
 0x696   : > { %11624 = vst.msk [vmem:[%s19404_s28 + $0xc8] sm:$0xff] %vm361_vm4, %v11592_v55  ;;  %v11591_v42 = vadd.f32 %v11559_v23, %v11527_v54  ;;  %v14847_v35 = vpop.f32.mrf.mxu0 }
 0x697   : > { %v11530_v39 = vsel %vm11465_vm6, %v11433_v46, %v11498_v57  ;;  %vm11464_vm0 = vcmp.gt.f32.partialorder %v11432_v18, 0.0  ;;  %v11497_v58 = vmul.f32 %v19387_v36, %v11432_v18  ;;  %v11435_v56 = vadd.f32 %v14847_v35, %v11048_v14 }
 0x698   : > { %11623 = vst.msk [vmem:[%s19404_s28 + $0xc0] sm:$0xff] %vm361_vm4, %v11591_v42  ;;  %v11594_v15 = vadd.f32 %v11562_v25, %v11530_v39  ;;  %v11387_v13 = vpop.f32.mrf.mxu0 }
 0x699   : > { %v11529_v29 = vsel %vm11464_vm0, %v11432_v18, %v11497_v58  ;;  %vm11467_vm2 = vcmp.gt.f32.partialorder %v11435_v56, 0.0  ;;  %v11500_v28 = vmul.f32 %v19387_v36, %v11435_v56  ;;  %v11434_v12 = vadd.f32 %v11387_v13, %v11047_v2 }
 0x69a   : > { %11626 = vst.msk [vmem:[%s19404_s28 + $0xd8] sm:$0xff] %vm361_vm4, %v11594_v15  ;;  %v11593_v0 = vadd.f32 %v11561_v40, %v11529_v29  ;;  %v14850_v37 = vpop.f32.mrf.mxu0 }
 0x69b   : > { %v11532_v21 = vsel %vm11467_vm2, %v11435_v56, %v11500_v28  ;;  %vm11466_vm3 = vcmp.gt.f32.partialorder %v11434_v12, 0.0  ;;  %v11499_v30 = vmul.f32 %v19387_v36, %v11434_v12  ;;  %v11437_v32 = vadd.f32 %v14850_v37, %v11050_v34 }
 0x69c   : > { %11625 = vst.msk [vmem:[%s19404_s28 + $0xd0] sm:$0xff] %vm361_vm4, %v11593_v0  ;;  %v11596_v3 = vadd.f32 %v11564_v50, %v11532_v21  ;;  %v11397_v53 = vpop.f32.mrf.mxu0 }
 0x69d   : > { %v11531_v10 = vsel %vm11466_vm3, %v11434_v12, %v11499_v30  ;;  %vm11469_vm1 = vcmp.gt.f32.partialorder %v11437_v32, 0.0  ;;  %v11502_v41 = vmul.f32 %v19387_v36, %v11437_v32  ;;  %v11436_v48 = vadd.f32 %v11397_v53, %v11049_v20 }
 0x69e   : > { %11628 = vst.msk [vmem:[%s19404_s28 + $0xe8] sm:$0xff] %vm361_vm4, %v11596_v3  ;;  %v11595_v7 = vadd.f32 %v11563_v60, %v11531_v10 }
 0x69f   : > { %v11534_v6 = vsel %vm11469_vm1, %v11437_v32, %v11502_v41  ;;  %vm11468_vm7 = vcmp.gt.f32.partialorder %v11436_v48, 0.0  ;;  %v11501_v49 = vmul.f32 %v19387_v36, %v11436_v48 }
 0x6a0   : > { %11627 = vst.msk [vmem:[%s19404_s28 + $0xe0] sm:$0xff] %vm361_vm4, %v11595_v7  ;;  %v11598_v61 = vadd.f32 %v11566_v19, %v11534_v6 }
 0x6a1   : > { %v11533_v44 = vsel %vm11468_vm7, %v11436_v48, %v11501_v49 }
 0x6a2   : > { %11630 = vst.msk [vmem:[%s19404_s28 + $0xf8] sm:$0xff] %vm361_vm4, %v11598_v61  ;;  %v11597_v1 = vadd.f32 %v11565_v8, %v11533_v44 }
 0x6a4   : > { %11629 = vst.msk [vmem:[%s19404_s28 + $0xf0] sm:$0xff] %vm361_vm4, %v11597_v1 }
 0x6a5 PF: > { %s24_s10 = sadd.s32 1, %s14886_s10  }
 0x6a6   : > { %p21_p9 = scmp.ge.s32.totalorder %s24_s10, 4  }
 0x6a8   :  { %23 = sbr.rel (!%p21_p9) target bundleno = 16 (0x10), region = 105 }

</bundles_post_ra>
